<compile_context>
chip_gen: v7x
topology: tpu7x:2x2x1
jax: 0.10.0
libtpu: 0.0.40
codegen_flags: <defaults>
</compile_context>

<pallas_src>
import numpy as np

import jax
import jax.numpy as jnp
from jax.experimental import pallas as pl
from jax.experimental.pallas import tpu as pltpu


# Fixed LeNet geometry (3x32x32 input).
_H1_IN, _W1_IN, _C1_IN = 32, 32, 3
_K = 5
_H1, _W1, _C1 = 28, 28, 16          # conv1 output
_HP1, _WP1 = 14, 14                 # pool1 output
_H2, _W2, _C2 = 10, 10, 32          # conv2 output
_HP2, _WP2 = 5, 5                   # pool2 output
_F1, _F2, _F3 = 120, 84, 10
_FPAD = 128                         # lane-dense padding for the fc stages / output
_B_TILE = 16                        # images per grid step; multiple of 16 keeps all
                                    # in-kernel bf16 row slices sublane-aligned


# ----------------------------------------------------------------------------
# Fused Pallas kernel: B_TILE images per grid step, everything stays in VMEM.
# ----------------------------------------------------------------------------
def _lenet_kernel(x_ref, w1_ref, b1_ref, se1_ref, so1_ref, ce1_ref, co1_ref,
                  e2_ref, w2_ref, b2_ref, se2_ref, so2_ref, ce2_ref, co2_ref,
                  wf1_ref, bf1_ref, wf2_ref, bf2_ref, wf3_ref, bf3_ref, o_ref):
    f32, bf16 = jnp.float32, jnp.bfloat16
    bt = o_ref.shape[0]                                    # images in this tile

    def dot(a, b):
        return jnp.dot(a, b, preferred_element_type=f32)

    # conv1 + bias + ReLU: ONE matmul (bt*32, 480) @ (480, 448) on the di-expanded
    # input.  Rows b*32+28..31 are junk (consumed per-image zero padding) and are
    # never referenced by the pool1 row selectors below.
    y1 = jnp.maximum(dot(x_ref[...], w1_ref[...]) + b1_ref[...], 0.0).astype(bf16)

    # pool1 (2x2 stride 2): block-diagonal even/odd row selectors, then column
    # selectors (the MXU does the strided compaction; no strided slices).
    v1 = jnp.maximum(dot(se1_ref[...], y1), dot(so1_ref[...], y1)).astype(bf16)
    p1 = jnp.maximum(dot(v1, ce1_ref[...]), dot(v1, co1_ref[...])).astype(bf16)

    # conv2 row shifts: one selector matmul gathers the 5 di-shifted row sets,
    # grouped by di, so the per-di operands below are ALIGNED row slices.
    # (0/1 selector @ bf16 -> values copied exactly; the re-cast is lossless.)
    p1x = dot(e2_ref[...], p1).astype(bf16)                # (5*bt*10, 224)

    rows2 = bt * _H2
    acc = dot(p1x[0:rows2, :], w2_ref[0])
    for di in range(1, _K):
        acc = acc + dot(p1x[di * rows2:(di + 1) * rows2, :], w2_ref[di])
    y2 = jnp.maximum(acc + b2_ref[...], 0.0).astype(bf16)  # (bt*10, 320)

    # pool2; output rows grouped h-major (row = h*bt + b) so fc1 slices are aligned.
    v2 = jnp.maximum(dot(se2_ref[...], y2), dot(so2_ref[...], y2)).astype(bf16)
    p2 = jnp.maximum(dot(v2, ce2_ref[...]), dot(v2, co2_ref[...])).astype(bf16)

    # fc1 + ReLU: 5 aligned (bt, 160) @ (160, 128) matmuls; PyTorch's NCHW
    # .view(-1, 800) flatten is folded into wf1's row order at prep time.
    acc = dot(p2[0:bt, :], wf1_ref[0])
    for h in range(1, _HP2):
        acc = acc + dot(p2[h * bt:(h + 1) * bt, :], wf1_ref[h])
    a1 = jnp.maximum(acc + bf1_ref[...], 0.0).astype(bf16)

    # fc2 + ReLU, fc3 (all widths padded to 128 lanes -> lane-dense output store).
    a2 = jnp.maximum(dot(a1, wf2_ref[...]) + bf2_ref[...], 0.0).astype(bf16)
    o_ref[...] = (dot(a2, wf3_ref[...]) + bf3_ref[...]).astype(o_ref.dtype)


# ----------------------------------------------------------------------------
# One-time parameter / selector preparation (hoisted off the hot path)
# ----------------------------------------------------------------------------
def _conv_band_weights(w_oihw, w_in, w_out):
    """Torch conv weight (Co,Ci,K,K) -> (K, w_in*Ci, w_out*Co) band matrices.

    band[di, w*Ci+ci, ox*Co+co] = w[co, ci, di, w-ox] if 0 <= w-ox < K else 0, so that
    conv_nhwc[oy, ox, co] = sum_di  x2d[oy+di, :] @ band[di]
    with x2d[h, w*Ci+ci] = x_nhwc[h, w, ci].
    """
    co_n, ci_n, k, _ = w_oihw.shape
    wt = jnp.transpose(w_oihw, (2, 3, 1, 0))                    # (di, dj, ci, co)
    dj = np.arange(w_in)[:, None] - np.arange(w_out)[None, :]   # (w_in, w_out)
    valid = jnp.asarray((dj >= 0) & (dj < k))
    g = wt[:, np.clip(dj, 0, k - 1)]                            # (di, w_in, w_out, ci, co)
    g = jnp.where(valid[None, :, :, None, None], g, 0.0)
    g = jnp.transpose(g, (0, 1, 3, 2, 4))                       # (di, w_in, ci, w_out, co)
    return g.reshape(k, w_in * ci_n, w_out * co_n)


def _pool_row_selectors(b_tile, rows_in, h_out, group_by_h):
    """Block-diagonal even/odd row selectors for 2x2/stride-2 vertical pooling on a
    batch-stacked tile.  Output row ordering: b*h_out+p (b-major) or p*b_tile+b
    (h-major, used before fc1 so its row slices are aligned)."""
    se = np.zeros((b_tile * h_out, b_tile * rows_in), np.float32)
    so = np.zeros_like(se)
    for b in range(b_tile):
        for p in range(h_out):
            r = p * b_tile + b if group_by_h else b * h_out + p
            se[r, b * rows_in + 2 * p] = 1.0
            so[r, b * rows_in + 2 * p + 1] = 1.0
    return se, so


def _pool_col_selectors(w_in, c):
    """0/1 matrices implementing 2x2 / stride-2 max-pool selection on (rows, W*C)."""
    w_out = w_in // 2
    ce = np.zeros((w_in * c, w_out * c), np.float32)
    co = np.zeros_like(ce)
    j = np.arange(w_out * c)
    px, ch = j // c, j % c
    ce[(2 * px) * c + ch, j] = 1.0
    co[(2 * px + 1) * c + ch, j] = 1.0
    return ce, co


def _conv2_row_expander(b_tile):
    """Selector gathering the 5 di-shifted row sets of pool1's output, grouped by di:
    out[di*bt*10 + b*10 + oy, :] = p1[b*14 + oy + di, :]."""
    e = np.zeros((_K * b_tile * _H2, b_tile * _HP1), np.float32)
    for di in range(_K):
        for b in range(b_tile):
            for oy in range(_H2):
                e[di * b_tile * _H2 + b * _H2 + oy, b * _HP1 + oy + di] = 1.0
    return e


def prepare_lenet_params(params, b_tile=_B_TILE):
    """Convert PyTorch-layout params to the fused kernel's layout (call once)."""
    bf16, f32 = jnp.bfloat16, jnp.float32

    w1 = _conv_band_weights(params["conv1_w"], _W1_IN, _W1)        # (5, 96, 448)
    w1cat = w1.reshape(_K * _W1_IN * _C1_IN, _W1 * _C1)            # (480, 448)
    w2 = _conv_band_weights(params["conv2_w"], _WP1, _W2)          # (5, 224, 320)

    se1, so1 = _pool_row_selectors(b_tile, _H1_IN, _HP1, group_by_h=False)
    ce1, co1 = _pool_col_selectors(_W1, _C1)
    se2, so2 = _pool_row_selectors(b_tile, _H2, _HP2, group_by_h=True)
    ce2, co2 = _pool_col_selectors(_W2, _C2)
    e2 = _conv2_row_expander(b_tile)

    # fc1 rows reordered to consume the (h-grouped, w*32+c) pooled layout directly
    # (folds PyTorch's NCHW .view(-1, 800) flatten); output widths padded to 128.
    wf1 = params["fc1_w"].reshape(_F1, _C2, _HP2, _WP2)
    wf1 = jnp.transpose(wf1, (2, 3, 1, 0)).reshape(_HP2, _WP2 * _C2, _F1)
    wf1 = jnp.pad(wf1, ((0, 0), (0, 0), (0, _FPAD - _F1)))
    wf2 = jnp.pad(params["fc2_w"].T, ((0, _FPAD - _F1), (0, _FPAD - _F2)))
    wf3 = jnp.pad(params["fc3_w"].T, ((0, _FPAD - _F2), (0, _FPAD - _F3)))

    return {
        "w1": w1cat.astype(bf16),
        "b1": jnp.tile(params["conv1_b"], _W1).reshape(1, _W1 * _C1).astype(f32),
        "se1": jnp.asarray(se1, bf16), "so1": jnp.asarray(so1, bf16),
        "ce1": jnp.asarray(ce1, bf16), "co1": jnp.asarray(co1, bf16),
        "e2": jnp.asarray(e2, bf16),
        "w2": w2.astype(bf16),
        "b2": jnp.tile(params["conv2_b"], _W2).reshape(1, _W2 * _C2).astype(f32),
        "se2": jnp.asarray(se2, bf16), "so2": jnp.asarray(so2, bf16),
        "ce2": jnp.asarray(ce2, bf16), "co2": jnp.asarray(co2, bf16),
        "wf1": wf1.astype(bf16),
        "bf1": jnp.pad(params["fc1_b"], (0, _FPAD - _F1)).reshape(1, _FPAD).astype(f32),
        "wf2": wf2.astype(bf16),
        "bf2": jnp.pad(params["fc2_b"], (0, _FPAD - _F2)).reshape(1, _FPAD).astype(f32),
        "wf3": wf3.astype(bf16),
        "bf3": jnp.pad(params["fc3_b"], (0, _FPAD - _F3)).reshape(1, _FPAD).astype(f32),
    }


# ----------------------------------------------------------------------------
# Forward pass: one pallas_call, grid over batch tiles of B_TILE images.
# ----------------------------------------------------------------------------
def _expand_conv1_input(x_nchw, b_pad):
    """NCHW float -> row-stacked, di-expanded bf16 tile (b_pad*32, 5*96).

    lanes: di*96 + w*3 + c;  rows: b*32 + h;  value = x[b, c, h+di, w]
    (zero-padded past each image's bottom).  Pure XLA layout plumbing: bf16 DMA,
    and conv1 becomes a single in-kernel matmul."""
    B = x_nchw.shape[0]
    x = jnp.transpose(x_nchw, (0, 2, 3, 1)).astype(jnp.bfloat16)     # NHWC
    x = x.reshape(B, _H1_IN, _W1_IN * _C1_IN)
    if b_pad != B:
        x = jnp.pad(x, ((0, b_pad - B), (0, 0), (0, 0)))
    xp = jnp.pad(x, ((0, 0), (0, _K - 1), (0, 0)))                   # (b_pad, 36, 96)
    xcat = jnp.concatenate([xp[:, di:di + _H1_IN, :] for di in range(_K)], axis=-1)
    return xcat.reshape(b_pad * _H1_IN, _K * _W1_IN * _C1_IN)


def lenet_forward(prepared, x_nchw, b_tile=_B_TILE):
    """x_nchw: (B, 3, 32, 32) float -> logits (B, 10) float32."""
    B = x_nchw.shape[0]
    b_pad = -(-B // b_tile) * b_tile
    x_cat = _expand_conv1_input(x_nchw, b_pad)            # (b_pad*32, 480) bf16

    p = prepared
    weights = (p["w1"], p["b1"], p["se1"], p["so1"], p["ce1"], p["co1"],
               p["e2"], p["w2"], p["b2"], p["se2"], p["so2"], p["ce2"], p["co2"],
               p["wf1"], p["bf1"], p["wf2"], p["bf2"], p["wf3"], p["bf3"])

    def _const_spec(arr):
        shape = tuple(int(d) for d in arr.shape)
        r = len(shape)
        return pl.BlockSpec(shape, lambda i: (0,) * r)    # weights stay VMEM-resident

    rows = b_tile * _H1_IN
    in_specs = [pl.BlockSpec((rows, _K * _W1_IN * _C1_IN), lambda i: (i, 0))]
    in_specs += [_const_spec(w) for w in weights]

    # TODO(synk): on v7x, verify the batch-tile axis shards across both TensorCores
    # with plain "parallel"; switch to pltpu.CORE_PARALLEL if it does not.
    out = pl.pallas_call(
        _lenet_kernel,
        out_shape=jax.ShapeDtypeStruct((b_pad, _FPAD), jnp.float32),
        grid=(b_pad // b_tile,),
        in_specs=in_specs,
        out_specs=pl.BlockSpec((b_tile, _FPAD), lambda i: (i, 0)),
        compiler_params=pltpu.CompilerParams(
            dimension_semantics=("parallel",),
            vmem_limit_bytes=32 * 1024 * 1024),
    )(x_cat, *weights)
    return out[:B, :_F3]


# ----------------------------------------------------------------------------
# Parameter init (PyTorch layout) and pure-JAX f32 reference for verification
# ----------------------------------------------------------------------------
def init_lenet_params(key):
    ks = jax.random.split(key, 10)
    s = 0.05
    return {
        "conv1_w": s * jax.random.normal(ks[0], (16, 3, 5, 5), jnp.float32),
        "conv1_b": s * jax.random.normal(ks[1], (16,), jnp.float32),
        "conv2_w": s * jax.random.normal(ks[2], (32, 16, 5, 5), jnp.float32),
        "conv2_b": s * jax.random.normal(ks[3], (32,), jnp.float32),
        "fc1_w": s * jax.random.normal(ks[4], (120, 32 * 5 * 5), jnp.float32),
        "fc1_b": s * jax.random.normal(ks[5], (120,), jnp.float32),
        "fc2_w": s * jax.random.normal(ks[6], (84, 120), jnp.float32),
        "fc2_b": s * jax.random.normal(ks[7], (84,), jnp.float32),
        "fc3_w": s * jax.random.normal(ks[8], (10, 84), jnp.float32),
        "fc3_b": s * jax.random.normal(ks[9], (10,), jnp.float32),
    }


def lenet_reference(params, x_nchw):
    """Pure-JAX f32 reference matching the PyTorch module."""
    dn = ("NCHW", "OIHW", "NCHW")
    y = jax.lax.conv_general_dilated(x_nchw, params["conv1_w"], (1, 1), "VALID",
                                     dimension_numbers=dn)
    y = jax.nn.relu(y + params["conv1_b"][None, :, None, None])
    y = jax.lax.reduce_window(y, -jnp.inf, jax.lax.max, (1, 1, 2, 2), (1, 1, 2, 2), "VALID")
    y = jax.lax.conv_general_dilated(y, params["conv2_w"], (1, 1), "VALID",
                                     dimension_numbers=dn)
    y = jax.nn.relu(y + params["conv2_b"][None, :, None, None])
    y = jax.lax.reduce_window(y, -jnp.inf, jax.lax.max, (1, 1, 2, 2), (1, 1, 2, 2), "VALID")
    y = y.reshape(y.shape[0], -1)
    y = jax.nn.relu(y @ params["fc1_w"].T + params["fc1_b"])
    y = jax.nn.relu(y @ params["fc2_w"].T + params["fc2_b"])
    return y @ params["fc3_w"].T + params["fc3_b"]


if __name__ == "__main__":
    key = jax.random.PRNGKey(0)
    pkey, xkey = jax.random.split(key)
    params = init_lenet_params(pkey)
    prepared = prepare_lenet_params(params)       # one-time weight/selector repacking

    # LeNet as defined requires 3x32x32 inputs (so that flatten is 32*5*5). Batch = 2
    # (padded internally to one B_TILE=16 grid step).
    x = jax.random.normal(xkey, (2, 3, 32, 32), jnp.float32)

    fwd = jax.jit(lenet_forward)
    out = jax.block_until_ready(fwd(prepared, x))

    assert out.shape == (2, 10), out.shape
    assert out.dtype == jnp.float32
    assert bool(jnp.all(jnp.isfinite(out)))

    # Numerical check vs the pure-JAX f32 reference (kernel uses bf16 MXU operands).
    ref = lenet_reference(params, x)
    assert bool(jnp.allclose(out, ref, atol=2e-2, rtol=2e-2)), (
        float(jnp.max(jnp.abs(out - ref))))

    print("KERNEL_OK")
</pallas_src>

<mosaic_0001>
module attributes {stable_mosaic.version = 11 : i64} {
  func.func @_lenet_kernel(%arg0: i32, %arg1: memref<512x480xbf16, #tpu.memory_space<vmem>>, %arg2: memref<480x448xbf16, #tpu.memory_space<vmem>>, %arg3: memref<1x448xf32, #tpu.memory_space<vmem>>, %arg4: memref<224x512xbf16, #tpu.memory_space<vmem>>, %arg5: memref<224x512xbf16, #tpu.memory_space<vmem>>, %arg6: memref<448x224xbf16, #tpu.memory_space<vmem>>, %arg7: memref<448x224xbf16, #tpu.memory_space<vmem>>, %arg8: memref<800x224xbf16, #tpu.memory_space<vmem>>, %arg9: memref<5x224x320xbf16, #tpu.memory_space<vmem>>, %arg10: memref<1x320xf32, #tpu.memory_space<vmem>>, %arg11: memref<80x160xbf16, #tpu.memory_space<vmem>>, %arg12: memref<80x160xbf16, #tpu.memory_space<vmem>>, %arg13: memref<320x160xbf16, #tpu.memory_space<vmem>>, %arg14: memref<320x160xbf16, #tpu.memory_space<vmem>>, %arg15: memref<5x160x128xbf16, #tpu.memory_space<vmem>>, %arg16: memref<1x128xf32, #tpu.memory_space<vmem>>, %arg17: memref<128x128xbf16, #tpu.memory_space<vmem>>, %arg18: memref<1x128xf32, #tpu.memory_space<vmem>>, %arg19: memref<128x128xbf16, #tpu.memory_space<vmem>>, %arg20: memref<1x128xf32, #tpu.memory_space<vmem>>, %arg21: memref<16x128xf32, #tpu.memory_space<vmem>>) attributes {dimension_semantics = [#tpu.dimension_semantics<parallel>], iteration_bounds = array<i64: 1>, scalar_prefetch = 0 : i64, scratch_operands = 0 : i64, tpu.core_type = #tpu.core_type<tc>, window_params = [{transform_indices = @transform_0, window_bounds = array<i64: 512, 480>}, {pipeline_mode = #tpu.pipeline_mode<synchronous>, transform_indices = @transform_1, window_bounds = array<i64: 480, 448>}, {pipeline_mode = #tpu.pipeline_mode<synchronous>, transform_indices = @transform_2, window_bounds = array<i64: 1, 448>}, {pipeline_mode = #tpu.pipeline_mode<synchronous>, transform_indices = @transform_3, window_bounds = array<i64: 224, 512>}, {pipeline_mode = #tpu.pipeline_mode<synchronous>, transform_indices = @transform_4, window_bounds = array<i64: 224, 512>}, {pipeline_mode = #tpu.pipeline_mode<synchronous>, transform_indices = @transform_5, window_bounds = array<i64: 448, 224>}, {pipeline_mode = #tpu.pipeline_mode<synchronous>, transform_indices = @transform_6, window_bounds = array<i64: 448, 224>}, {pipeline_mode = #tpu.pipeline_mode<synchronous>, transform_indices = @transform_7, window_bounds = array<i64: 800, 224>}, {pipeline_mode = #tpu.pipeline_mode<synchronous>, transform_indices = @transform_8, window_bounds = array<i64: 5, 224, 320>}, {pipeline_mode = #tpu.pipeline_mode<synchronous>, transform_indices = @transform_9, window_bounds = array<i64: 1, 320>}, {pipeline_mode = #tpu.pipeline_mode<synchronous>, transform_indices = @transform_10, window_bounds = array<i64: 80, 160>}, {pipeline_mode = #tpu.pipeline_mode<synchronous>, transform_indices = @transform_11, window_bounds = array<i64: 80, 160>}, {pipeline_mode = #tpu.pipeline_mode<synchronous>, transform_indices = @transform_12, window_bounds = array<i64: 320, 160>}, {pipeline_mode = #tpu.pipeline_mode<synchronous>, transform_indices = @transform_13, window_bounds = array<i64: 320, 160>}, {pipeline_mode = #tpu.pipeline_mode<synchronous>, transform_indices = @transform_14, window_bounds = array<i64: 5, 160, 128>}, {pipeline_mode = #tpu.pipeline_mode<synchronous>, transform_indices = @transform_15, window_bounds = array<i64: 1, 128>}, {pipeline_mode = #tpu.pipeline_mode<synchronous>, transform_indices = @transform_16, window_bounds = array<i64: 128, 128>}, {pipeline_mode = #tpu.pipeline_mode<synchronous>, transform_indices = @transform_17, window_bounds = array<i64: 1, 128>}, {pipeline_mode = #tpu.pipeline_mode<synchronous>, transform_indices = @transform_18, window_bounds = array<i64: 128, 128>}, {pipeline_mode = #tpu.pipeline_mode<synchronous>, transform_indices = @transform_19, window_bounds = array<i64: 1, 128>}, {transform_indices = @transform_20, window_bounds = array<i64: 16, 128>}]} {
    %c0 = arith.constant 0 : index
    %c0_0 = arith.constant 0 : index
    %0 = vector.load %arg1[%c0, %c0_0] : memref<512x480xbf16, #tpu.memory_space<vmem>>, vector<512x480xbf16>
    %c0_1 = arith.constant 0 : index
    %c0_2 = arith.constant 0 : index
    %1 = vector.load %arg2[%c0_1, %c0_2] : memref<480x448xbf16, #tpu.memory_space<vmem>>, vector<480x448xbf16>
    %cst = arith.constant dense<0.000000e+00> : vector<512x448xf32>
    %2 = tpu.matmul %0, %1, %cst {dimension_numbers = #tpu.dot_dimension_numbers<[1], [0], [0], [1], [0, 0, 1, 1], [], []>} : vector<512x480xbf16>, vector<480x448xbf16>, vector<512x448xf32> -> vector<512x448xf32>
    %c0_3 = arith.constant 0 : index
    %c0_4 = arith.constant 0 : index
    %3 = vector.load %arg3[%c0_3, %c0_4] : memref<1x448xf32, #tpu.memory_space<vmem>>, vector<1x448xf32>
    %4 = vector.broadcast %3 : vector<1x448xf32> to vector<512x448xf32>
    %5 = arith.addf %2, %4 : vector<512x448xf32>
    %cst_5 = arith.constant 0.000000e+00 : f32
    %6 = vector.broadcast %cst_5 : f32 to vector<512x448xf32>
    %7 = arith.maximumf %5, %6 : vector<512x448xf32>
    %8 = arith.truncf %7 : vector<512x448xf32> to vector<512x448xbf16>
    %c0_6 = arith.constant 0 : index
    %c0_7 = arith.constant 0 : index
    %9 = vector.load %arg4[%c0_6, %c0_7] : memref<224x512xbf16, #tpu.memory_space<vmem>>, vector<224x512xbf16>
    %cst_8 = arith.constant dense<0.000000e+00> : vector<224x448xf32>
    %10 = tpu.matmul %9, %8, %cst_8 {dimension_numbers = #tpu.dot_dimension_numbers<[1], [0], [0], [1], [0, 0, 1, 1], [], []>} : vector<224x512xbf16>, vector<512x448xbf16>, vector<224x448xf32> -> vector<224x448xf32>
    %c0_9 = arith.constant 0 : index
    %c0_10 = arith.constant 0 : index
    %11 = vector.load %arg5[%c0_9, %c0_10] : memref<224x512xbf16, #tpu.memory_space<vmem>>, vector<224x512xbf16>
    %cst_11 = arith.constant dense<0.000000e+00> : vector<224x448xf32>
    %12 = tpu.matmul %11, %8, %cst_11 {dimension_numbers = #tpu.dot_dimension_numbers<[1], [0], [0], [1], [0, 0, 1, 1], [], []>} : vector<224x512xbf16>, vector<512x448xbf16>, vector<224x448xf32> -> vector<224x448xf32>
    %13 = arith.maximumf %10, %12 : vector<224x448xf32>
    %14 = arith.truncf %13 : vector<224x448xf32> to vector<224x448xbf16>
    %c0_12 = arith.constant 0 : index
    %c0_13 = arith.constant 0 : index
    %15 = vector.load %arg6[%c0_12, %c0_13] : memref<448x224xbf16, #tpu.memory_space<vmem>>, vector<448x224xbf16>
    %cst_14 = arith.constant dense<0.000000e+00> : vector<224x224xf32>
    %16 = tpu.matmul %14, %15, %cst_14 {dimension_numbers = #tpu.dot_dimension_numbers<[1], [0], [0], [1], [0, 0, 1, 1], [], []>} : vector<224x448xbf16>, vector<448x224xbf16>, vector<224x224xf32> -> vector<224x224xf32>
    %c0_15 = arith.constant 0 : index
    %c0_16 = arith.constant 0 : index
    %17 = vector.load %arg7[%c0_15, %c0_16] : memref<448x224xbf16, #tpu.memory_space<vmem>>, vector<448x224xbf16>
    %cst_17 = arith.constant dense<0.000000e+00> : vector<224x224xf32>
    %18 = tpu.matmul %14, %17, %cst_17 {dimension_numbers = #tpu.dot_dimension_numbers<[1], [0], [0], [1], [0, 0, 1, 1], [], []>} : vector<224x448xbf16>, vector<448x224xbf16>, vector<224x224xf32> -> vector<224x224xf32>
    %19 = arith.maximumf %16, %18 : vector<224x224xf32>
    %20 = arith.truncf %19 : vector<224x224xf32> to vector<224x224xbf16>
    %c0_18 = arith.constant 0 : index
    %c0_19 = arith.constant 0 : index
    %21 = vector.load %arg8[%c0_18, %c0_19] : memref<800x224xbf16, #tpu.memory_space<vmem>>, vector<800x224xbf16>
    %cst_20 = arith.constant dense<0.000000e+00> : vector<800x224xf32>
    %22 = tpu.matmul %21, %20, %cst_20 {dimension_numbers = #tpu.dot_dimension_numbers<[1], [0], [0], [1], [0, 0, 1, 1], [], []>} : vector<800x224xbf16>, vector<224x224xbf16>, vector<800x224xf32> -> vector<800x224xf32>
    %23 = arith.truncf %22 : vector<800x224xf32> to vector<800x224xbf16>
    %24 = vector.extract_strided_slice %23 {offsets = [0, 0], sizes = [160, 224], strides = [1, 1]} : vector<800x224xbf16> to vector<160x224xbf16>
    %c0_21 = arith.constant 0 : index
    %c0_22 = arith.constant 0 : index
    %c0_23 = arith.constant 0 : index
    %25 = vector.load %arg9[%c0_21, %c0_22, %c0_23] : memref<5x224x320xbf16, #tpu.memory_space<vmem>>, vector<1x224x320xbf16>
    %26 = vector.shape_cast %25 : vector<1x224x320xbf16> to vector<224x320xbf16>
    %cst_24 = arith.constant dense<0.000000e+00> : vector<160x320xf32>
    %27 = tpu.matmul %24, %26, %cst_24 {dimension_numbers = #tpu.dot_dimension_numbers<[1], [0], [0], [1], [0, 0, 1, 1], [], []>} : vector<160x224xbf16>, vector<224x320xbf16>, vector<160x320xf32> -> vector<160x320xf32>
    %28 = vector.extract_strided_slice %23 {offsets = [160, 0], sizes = [160, 224], strides = [1, 1]} : vector<800x224xbf16> to vector<160x224xbf16>
    %c1 = arith.constant 1 : index
    %c0_25 = arith.constant 0 : index
    %c0_26 = arith.constant 0 : index
    %29 = vector.load %arg9[%c1, %c0_25, %c0_26] : memref<5x224x320xbf16, #tpu.memory_space<vmem>>, vector<1x224x320xbf16>
    %30 = vector.shape_cast %29 : vector<1x224x320xbf16> to vector<224x320xbf16>
    %cst_27 = arith.constant dense<0.000000e+00> : vector<160x320xf32>
    %31 = tpu.matmul %28, %30, %cst_27 {dimension_numbers = #tpu.dot_dimension_numbers<[1], [0], [0], [1], [0, 0, 1, 1], [], []>} : vector<160x224xbf16>, vector<224x320xbf16>, vector<160x320xf32> -> vector<160x320xf32>
    %32 = arith.addf %27, %31 : vector<160x320xf32>
    %33 = vector.extract_strided_slice %23 {offsets = [320, 0], sizes = [160, 224], strides = [1, 1]} : vector<800x224xbf16> to vector<160x224xbf16>
    %c2 = arith.constant 2 : index
    %c0_28 = arith.constant 0 : index
    %c0_29 = arith.constant 0 : index
    %34 = vector.load %arg9[%c2, %c0_28, %c0_29] : memref<5x224x320xbf16, #tpu.memory_space<vmem>>, vector<1x224x320xbf16>
    %35 = vector.shape_cast %34 : vector<1x224x320xbf16> to vector<224x320xbf16>
    %cst_30 = arith.constant dense<0.000000e+00> : vector<160x320xf32>
    %36 = tpu.matmul %33, %35, %cst_30 {dimension_numbers = #tpu.dot_dimension_numbers<[1], [0], [0], [1], [0, 0, 1, 1], [], []>} : vector<160x224xbf16>, vector<224x320xbf16>, vector<160x320xf32> -> vector<160x320xf32>
    %37 = arith.addf %32, %36 : vector<160x320xf32>
    %38 = vector.extract_strided_slice %23 {offsets = [480, 0], sizes = [160, 224], strides = [1, 1]} : vector<800x224xbf16> to vector<160x224xbf16>
    %c3 = arith.constant 3 : index
    %c0_31 = arith.constant 0 : index
    %c0_32 = arith.constant 0 : index
    %39 = vector.load %arg9[%c3, %c0_31, %c0_32] : memref<5x224x320xbf16, #tpu.memory_space<vmem>>, vector<1x224x320xbf16>
    %40 = vector.shape_cast %39 : vector<1x224x320xbf16> to vector<224x320xbf16>
    %cst_33 = arith.constant dense<0.000000e+00> : vector<160x320xf32>
    %41 = tpu.matmul %38, %40, %cst_33 {dimension_numbers = #tpu.dot_dimension_numbers<[1], [0], [0], [1], [0, 0, 1, 1], [], []>} : vector<160x224xbf16>, vector<224x320xbf16>, vector<160x320xf32> -> vector<160x320xf32>
    %42 = arith.addf %37, %41 : vector<160x320xf32>
    %43 = vector.extract_strided_slice %23 {offsets = [640, 0], sizes = [160, 224], strides = [1, 1]} : vector<800x224xbf16> to vector<160x224xbf16>
    %c4 = arith.constant 4 : index
    %c0_34 = arith.constant 0 : index
    %c0_35 = arith.constant 0 : index
    %44 = vector.load %arg9[%c4, %c0_34, %c0_35] : memref<5x224x320xbf16, #tpu.memory_space<vmem>>, vector<1x224x320xbf16>
    %45 = vector.shape_cast %44 : vector<1x224x320xbf16> to vector<224x320xbf16>
    %cst_36 = arith.constant dense<0.000000e+00> : vector<160x320xf32>
    %46 = tpu.matmul %43, %45, %cst_36 {dimension_numbers = #tpu.dot_dimension_numbers<[1], [0], [0], [1], [0, 0, 1, 1], [], []>} : vector<160x224xbf16>, vector<224x320xbf16>, vector<160x320xf32> -> vector<160x320xf32>
    %47 = arith.addf %42, %46 : vector<160x320xf32>
    %c0_37 = arith.constant 0 : index
    %c0_38 = arith.constant 0 : index
    %48 = vector.load %arg10[%c0_37, %c0_38] : memref<1x320xf32, #tpu.memory_space<vmem>>, vector<1x320xf32>
    %49 = vector.broadcast %48 : vector<1x320xf32> to vector<160x320xf32>
    %50 = arith.addf %47, %49 : vector<160x320xf32>
    %cst_39 = arith.constant 0.000000e+00 : f32
    %51 = vector.broadcast %cst_39 : f32 to vector<160x320xf32>
    %52 = arith.maximumf %50, %51 : vector<160x320xf32>
    %53 = arith.truncf %52 : vector<160x320xf32> to vector<160x320xbf16>
    %c0_40 = arith.constant 0 : index
    %c0_41 = arith.constant 0 : index
    %54 = vector.load %arg11[%c0_40, %c0_41] : memref<80x160xbf16, #tpu.memory_space<vmem>>, vector<80x160xbf16>
    %cst_42 = arith.constant dense<0.000000e+00> : vector<80x320xf32>
    %55 = tpu.matmul %54, %53, %cst_42 {dimension_numbers = #tpu.dot_dimension_numbers<[1], [0], [0], [1], [0, 0, 1, 1], [], []>} : vector<80x160xbf16>, vector<160x320xbf16>, vector<80x320xf32> -> vector<80x320xf32>
    %c0_43 = arith.constant 0 : index
    %c0_44 = arith.constant 0 : index
    %56 = vector.load %arg12[%c0_43, %c0_44] : memref<80x160xbf16, #tpu.memory_space<vmem>>, vector<80x160xbf16>
    %cst_45 = arith.constant dense<0.000000e+00> : vector<80x320xf32>
    %57 = tpu.matmul %56, %53, %cst_45 {dimension_numbers = #tpu.dot_dimension_numbers<[1], [0], [0], [1], [0, 0, 1, 1], [], []>} : vector<80x160xbf16>, vector<160x320xbf16>, vector<80x320xf32> -> vector<80x320xf32>
    %58 = arith.maximumf %55, %57 : vector<80x320xf32>
    %59 = arith.truncf %58 : vector<80x320xf32> to vector<80x320xbf16>
    %c0_46 = arith.constant 0 : index
    %c0_47 = arith.constant 0 : index
    %60 = vector.load %arg13[%c0_46, %c0_47] : memref<320x160xbf16, #tpu.memory_space<vmem>>, vector<320x160xbf16>
    %cst_48 = arith.constant dense<0.000000e+00> : vector<80x160xf32>
    %61 = tpu.matmul %59, %60, %cst_48 {dimension_numbers = #tpu.dot_dimension_numbers<[1], [0], [0], [1], [0, 0, 1, 1], [], []>} : vector<80x320xbf16>, vector<320x160xbf16>, vector<80x160xf32> -> vector<80x160xf32>
    %c0_49 = arith.constant 0 : index
    %c0_50 = arith.constant 0 : index
    %62 = vector.load %arg14[%c0_49, %c0_50] : memref<320x160xbf16, #tpu.memory_space<vmem>>, vector<320x160xbf16>
    %cst_51 = arith.constant dense<0.000000e+00> : vector<80x160xf32>
    %63 = tpu.matmul %59, %62, %cst_51 {dimension_numbers = #tpu.dot_dimension_numbers<[1], [0], [0], [1], [0, 0, 1, 1], [], []>} : vector<80x320xbf16>, vector<320x160xbf16>, vector<80x160xf32> -> vector<80x160xf32>
    %64 = arith.maximumf %61, %63 : vector<80x160xf32>
    %65 = arith.truncf %64 : vector<80x160xf32> to vector<80x160xbf16>
    %66 = vector.extract_strided_slice %65 {offsets = [0, 0], sizes = [16, 160], strides = [1, 1]} : vector<80x160xbf16> to vector<16x160xbf16>
    %c0_52 = arith.constant 0 : index
    %c0_53 = arith.constant 0 : index
    %c0_54 = arith.constant 0 : index
    %67 = vector.load %arg15[%c0_52, %c0_53, %c0_54] : memref<5x160x128xbf16, #tpu.memory_space<vmem>>, vector<1x160x128xbf16>
    %68 = vector.shape_cast %67 : vector<1x160x128xbf16> to vector<160x128xbf16>
    %cst_55 = arith.constant dense<0.000000e+00> : vector<16x128xf32>
    %69 = tpu.matmul %66, %68, %cst_55 {dimension_numbers = #tpu.dot_dimension_numbers<[1], [0], [0], [1], [0, 0, 1, 1], [], []>} : vector<16x160xbf16>, vector<160x128xbf16>, vector<16x128xf32> -> vector<16x128xf32>
    %70 = vector.extract_strided_slice %65 {offsets = [16, 0], sizes = [16, 160], strides = [1, 1]} : vector<80x160xbf16> to vector<16x160xbf16>
    %c1_56 = arith.constant 1 : index
    %c0_57 = arith.constant 0 : index
    %c0_58 = arith.constant 0 : index
    %71 = vector.load %arg15[%c1_56, %c0_57, %c0_58] : memref<5x160x128xbf16, #tpu.memory_space<vmem>>, vector<1x160x128xbf16>
    %72 = vector.shape_cast %71 : vector<1x160x128xbf16> to vector<160x128xbf16>
    %cst_59 = arith.constant dense<0.000000e+00> : vector<16x128xf32>
    %73 = tpu.matmul %70, %72, %cst_59 {dimension_numbers = #tpu.dot_dimension_numbers<[1], [0], [0], [1], [0, 0, 1, 1], [], []>} : vector<16x160xbf16>, vector<160x128xbf16>, vector<16x128xf32> -> vector<16x128xf32>
    %74 = arith.addf %69, %73 : vector<16x128xf32>
    %75 = vector.extract_strided_slice %65 {offsets = [32, 0], sizes = [16, 160], strides = [1, 1]} : vector<80x160xbf16> to vector<16x160xbf16>
    %c2_60 = arith.constant 2 : index
    %c0_61 = arith.constant 0 : index
    %c0_62 = arith.constant 0 : index
    %76 = vector.load %arg15[%c2_60, %c0_61, %c0_62] : memref<5x160x128xbf16, #tpu.memory_space<vmem>>, vector<1x160x128xbf16>
    %77 = vector.shape_cast %76 : vector<1x160x128xbf16> to vector<160x128xbf16>
    %cst_63 = arith.constant dense<0.000000e+00> : vector<16x128xf32>
    %78 = tpu.matmul %75, %77, %cst_63 {dimension_numbers = #tpu.dot_dimension_numbers<[1], [0], [0], [1], [0, 0, 1, 1], [], []>} : vector<16x160xbf16>, vector<160x128xbf16>, vector<16x128xf32> -> vector<16x128xf32>
    %79 = arith.addf %74, %78 : vector<16x128xf32>
    %80 = vector.extract_strided_slice %65 {offsets = [48, 0], sizes = [16, 160], strides = [1, 1]} : vector<80x160xbf16> to vector<16x160xbf16>
    %c3_64 = arith.constant 3 : index
    %c0_65 = arith.constant 0 : index
    %c0_66 = arith.constant 0 : index
    %81 = vector.load %arg15[%c3_64, %c0_65, %c0_66] : memref<5x160x128xbf16, #tpu.memory_space<vmem>>, vector<1x160x128xbf16>
    %82 = vector.shape_cast %81 : vector<1x160x128xbf16> to vector<160x128xbf16>
    %cst_67 = arith.constant dense<0.000000e+00> : vector<16x128xf32>
    %83 = tpu.matmul %80, %82, %cst_67 {dimension_numbers = #tpu.dot_dimension_numbers<[1], [0], [0], [1], [0, 0, 1, 1], [], []>} : vector<16x160xbf16>, vector<160x128xbf16>, vector<16x128xf32> -> vector<16x128xf32>
    %84 = arith.addf %79, %83 : vector<16x128xf32>
    %85 = vector.extract_strided_slice %65 {offsets = [64, 0], sizes = [16, 160], strides = [1, 1]} : vector<80x160xbf16> to vector<16x160xbf16>
    %c4_68 = arith.constant 4 : index
    %c0_69 = arith.constant 0 : index
    %c0_70 = arith.constant 0 : index
    %86 = vector.load %arg15[%c4_68, %c0_69, %c0_70] : memref<5x160x128xbf16, #tpu.memory_space<vmem>>, vector<1x160x128xbf16>
    %87 = vector.shape_cast %86 : vector<1x160x128xbf16> to vector<160x128xbf16>
    %cst_71 = arith.constant dense<0.000000e+00> : vector<16x128xf32>
    %88 = tpu.matmul %85, %87, %cst_71 {dimension_numbers = #tpu.dot_dimension_numbers<[1], [0], [0], [1], [0, 0, 1, 1], [], []>} : vector<16x160xbf16>, vector<160x128xbf16>, vector<16x128xf32> -> vector<16x128xf32>
    %89 = arith.addf %84, %88 : vector<16x128xf32>
    %c0_72 = arith.constant 0 : index
    %c0_73 = arith.constant 0 : index
    %90 = vector.load %arg16[%c0_72, %c0_73] : memref<1x128xf32, #tpu.memory_space<vmem>>, vector<1x128xf32>
    %91 = vector.broadcast %90 : vector<1x128xf32> to vector<16x128xf32>
    %92 = arith.addf %89, %91 : vector<16x128xf32>
    %cst_74 = arith.constant 0.000000e+00 : f32
    %93 = vector.broadcast %cst_74 : f32 to vector<16x128xf32>
    %94 = arith.maximumf %92, %93 : vector<16x128xf32>
    %95 = arith.truncf %94 : vector<16x128xf32> to vector<16x128xbf16>
    %c0_75 = arith.constant 0 : index
    %c0_76 = arith.constant 0 : index
    %96 = vector.load %arg17[%c0_75, %c0_76] : memref<128x128xbf16, #tpu.memory_space<vmem>>, vector<128x128xbf16>
    %cst_77 = arith.constant dense<0.000000e+00> : vector<16x128xf32>
    %97 = tpu.matmul %95, %96, %cst_77 {dimension_numbers = #tpu.dot_dimension_numbers<[1], [0], [0], [1], [0, 0, 1, 1], [], []>} : vector<16x128xbf16>, vector<128x128xbf16>, vector<16x128xf32> -> vector<16x128xf32>
    %c0_78 = arith.constant 0 : index
    %c0_79 = arith.constant 0 : index
    %98 = vector.load %arg18[%c0_78, %c0_79] : memref<1x128xf32, #tpu.memory_space<vmem>>, vector<1x128xf32>
    %99 = vector.broadcast %98 : vector<1x128xf32> to vector<16x128xf32>
    %100 = arith.addf %97, %99 : vector<16x128xf32>
    %cst_80 = arith.constant 0.000000e+00 : f32
    %101 = vector.broadcast %cst_80 : f32 to vector<16x128xf32>
    %102 = arith.maximumf %100, %101 : vector<16x128xf32>
    %103 = arith.truncf %102 : vector<16x128xf32> to vector<16x128xbf16>
    %c0_81 = arith.constant 0 : index
    %c0_82 = arith.constant 0 : index
    %104 = vector.load %arg19[%c0_81, %c0_82] : memref<128x128xbf16, #tpu.memory_space<vmem>>, vector<128x128xbf16>
    %cst_83 = arith.constant dense<0.000000e+00> : vector<16x128xf32>
    %105 = tpu.matmul %103, %104, %cst_83 {dimension_numbers = #tpu.dot_dimension_numbers<[1], [0], [0], [1], [0, 0, 1, 1], [], []>} : vector<16x128xbf16>, vector<128x128xbf16>, vector<16x128xf32> -> vector<16x128xf32>
    %c0_84 = arith.constant 0 : index
    %c0_85 = arith.constant 0 : index
    %106 = vector.load %arg20[%c0_84, %c0_85] : memref<1x128xf32, #tpu.memory_space<vmem>>, vector<1x128xf32>
    %107 = vector.broadcast %106 : vector<1x128xf32> to vector<16x128xf32>
    %108 = arith.addf %105, %107 : vector<16x128xf32>
    %c0_86 = arith.constant 0 : index
    %c0_87 = arith.constant 0 : index
    %109 = vector.load %arg21[%c0_86, %c0_87] : memref<16x128xf32, #tpu.memory_space<vmem>>, vector<16x128xf32>
    tpu.vector_store %arg21[%c0_86, %c0_87], %108 {strides = array<i32>} : memref<16x128xf32, #tpu.memory_space<vmem>>, vector<16x128xf32>,
    return
  }
  func.func @transform_0(%arg0: i32) -> (i32, i32) {
    %c0_i32 = arith.constant 0 : i32
    %c0_i32_0 = arith.constant 0 : i32
    return %arg0, %c0_i32 : i32, i32
  }
  func.func @transform_1(%arg0: i32) -> (i32, i32) {
    %c0_i32 = arith.constant 0 : i32
    %c0_i32_0 = arith.constant 0 : i32
    %c0_i32_1 = arith.constant 0 : i32
    return %c0_i32, %c0_i32_0 : i32, i32
  }
  func.func @transform_2(%arg0: i32) -> (i32, i32) {
    %c0_i32 = arith.constant 0 : i32
    %c0_i32_0 = arith.constant 0 : i32
    %c0_i32_1 = arith.constant 0 : i32
    return %c0_i32, %c0_i32_0 : i32, i32
  }
  func.func @transform_3(%arg0: i32) -> (i32, i32) {
    %c0_i32 = arith.constant 0 : i32
    %c0_i32_0 = arith.constant 0 : i32
    %c0_i32_1 = arith.constant 0 : i32
    return %c0_i32, %c0_i32_0 : i32, i32
  }
  func.func @transform_4(%arg0: i32) -> (i32, i32) {
    %c0_i32 = arith.constant 0 : i32
    %c0_i32_0 = arith.constant 0 : i32
    %c0_i32_1 = arith.constant 0 : i32
    return %c0_i32, %c0_i32_0 : i32, i32
  }
  func.func @transform_5(%arg0: i32) -> (i32, i32) {
    %c0_i32 = arith.constant 0 : i32
    %c0_i32_0 = arith.constant 0 : i32
    %c0_i32_1 = arith.constant 0 : i32
    return %c0_i32, %c0_i32_0 : i32, i32
  }
  func.func @transform_6(%arg0: i32) -> (i32, i32) {
    %c0_i32 = arith.constant 0 : i32
    %c0_i32_0 = arith.constant 0 : i32
    %c0_i32_1 = arith.constant 0 : i32
    return %c0_i32, %c0_i32_0 : i32, i32
  }
  func.func @transform_7(%arg0: i32) -> (i32, i32) {
    %c0_i32 = arith.constant 0 : i32
    %c0_i32_0 = arith.constant 0 : i32
    %c0_i32_1 = arith.constant 0 : i32
    return %c0_i32, %c0_i32_0 : i32, i32
  }
  func.func @transform_8(%arg0: i32) -> (i32, i32, i32) {
    %c0_i32 = arith.constant 0 : i32
    %c0_i32_0 = arith.constant 0 : i32
    %c0_i32_1 = arith.constant 0 : i32
    %c0_i32_2 = arith.constant 0 : i32
    return %c0_i32, %c0_i32_0, %c0_i32_1 : i32, i32, i32
  }
  func.func @transform_9(%arg0: i32) -> (i32, i32) {
    %c0_i32 = arith.constant 0 : i32
    %c0_i32_0 = arith.constant 0 : i32
    %c0_i32_1 = arith.constant 0 : i32
    return %c0_i32, %c0_i32_0 : i32, i32
  }
  func.func @transform_10(%arg0: i32) -> (i32, i32) {
    %c0_i32 = arith.constant 0 : i32
    %c0_i32_0 = arith.constant 0 : i32
    %c0_i32_1 = arith.constant 0 : i32
    return %c0_i32, %c0_i32_0 : i32, i32
  }
  func.func @transform_11(%arg0: i32) -> (i32, i32) {
    %c0_i32 = arith.constant 0 : i32
    %c0_i32_0 = arith.constant 0 : i32
    %c0_i32_1 = arith.constant 0 : i32
    return %c0_i32, %c0_i32_0 : i32, i32
  }
  func.func @transform_12(%arg0: i32) -> (i32, i32) {
    %c0_i32 = arith.constant 0 : i32
    %c0_i32_0 = arith.constant 0 : i32
    %c0_i32_1 = arith.constant 0 : i32
    return %c0_i32, %c0_i32_0 : i32, i32
  }
  func.func @transform_13(%arg0: i32) -> (i32, i32) {
    %c0_i32 = arith.constant 0 : i32
    %c0_i32_0 = arith.constant 0 : i32
    %c0_i32_1 = arith.constant 0 : i32
    return %c0_i32, %c0_i32_0 : i32, i32
  }
  func.func @transform_14(%arg0: i32) -> (i32, i32, i32) {
    %c0_i32 = arith.constant 0 : i32
    %c0_i32_0 = arith.constant 0 : i32
    %c0_i32_1 = arith.constant 0 : i32
    %c0_i32_2 = arith.constant 0 : i32
    return %c0_i32, %c0_i32_0, %c0_i32_1 : i32, i32, i32
  }
  func.func @transform_15(%arg0: i32) -> (i32, i32) {
    %c0_i32 = arith.constant 0 : i32
    %c0_i32_0 = arith.constant 0 : i32
    %c0_i32_1 = arith.constant 0 : i32
    return %c0_i32, %c0_i32_0 : i32, i32
  }
  func.func @transform_16(%arg0: i32) -> (i32, i32) {
    %c0_i32 = arith.constant 0 : i32
    %c0_i32_0 = arith.constant 0 : i32
    %c0_i32_1 = arith.constant 0 : i32
    return %c0_i32, %c0_i32_0 : i32, i32
  }
  func.func @transform_17(%arg0: i32) -> (i32, i32) {
    %c0_i32 = arith.constant 0 : i32
    %c0_i32_0 = arith.constant 0 : i32
    %c0_i32_1 = arith.constant 0 : i32
    return %c0_i32, %c0_i32_0 : i32, i32
  }
  func.func @transform_18(%arg0: i32) -> (i32, i32) {
    %c0_i32 = arith.constant 0 : i32
    %c0_i32_0 = arith.constant 0 : i32
    %c0_i32_1 = arith.constant 0 : i32
    return %c0_i32, %c0_i32_0 : i32, i32
  }
  func.func @transform_19(%arg0: i32) -> (i32, i32) {
    %c0_i32 = arith.constant 0 : i32
    %c0_i32_0 = arith.constant 0 : i32
    %c0_i32_1 = arith.constant 0 : i32
    return %c0_i32, %c0_i32_0 : i32, i32
  }
  func.func @transform_20(%arg0: i32) -> (i32, i32) {
    %c0_i32 = arith.constant 0 : i32
    %c0_i32_0 = arith.constant 0 : i32
    return %arg0, %c0_i32 : i32, i32
  }
}

</mosaic_0001>

<bundles_post_ra>
// kernel: lenet_forward.1
= control target key start
LH: loop header
LB: loop body
LE: loop exit
PB: predicated region body
PF: predicated region fallthrough
CT: control target
= control target key end

     0   :  { %vm1544_vm0 = vcmask 785408   ;;  %vm5997_vm1 = vcmask 523264   ;;  %vm11671_vm2 = vcmask 261120   ;;  %vm17843_vm3 = vmmov 0   ;;  %s23281_s1 = inlined_call_operand.vmem [shape: bf16[480,448], index: 1, kind: input, shape index: {}]   ;;  %s23282_s0 = inlined_call_operand.vmem [shape: bf16[512,480], index: 0, kind: input, shape index: {}]   ;;  %s23283_s2 = inlined_call_operand.vmem [shape: f32[1,448], index: 2, kind: input, shape index: {}]   ;;  %s23284_s3 = inlined_call_operand.vmem [shape: bf16[224,512], index: 3, kind: input, shape index: {}]   ;;  %s23285_s4 = inlined_call_operand.vmem [shape: bf16[224,512], index: 4, kind: input, shape index: {}]   ;;  %s23286_s5 = inlined_call_operand.vmem [shape: bf16[448,224], index: 5, kind: input, shape index: {}]   ;;  %s23287_s6 = inlined_call_operand.vmem [shape: bf16[448,224], index: 6, kind: input, shape index: {}]   ;;  %s23288_s7 = inlined_call_operand.vmem [shape: bf16[800,224], index: 7, kind: input, shape index: {}]   ;;  %s23289_s8 = inlined_call_operand.vmem [shape: bf16[5,224,320], index: 8, kind: input, shape index: {}]   ;;  %s23290_s9 = inlined_call_operand.vmem [shape: f32[1,320], index: 9, kind: input, shape index: {}]   ;;  %s23291_s10 = inlined_call_operand.vmem [shape: bf16[80,160], index: 10, kind: input, shape index: {}]   ;;  %s23292_s11 = inlined_call_operand.vmem [shape: bf16[80,160], index: 11, kind: input, shape index: {}]   ;;  %s23293_s12 = inlined_call_operand.vmem [shape: bf16[320,160], index: 12, kind: input, shape index: {}]   ;;  %s23294_s13 = inlined_call_operand.vmem [shape: bf16[320,160], index: 13, kind: input, shape index: {}]   ;;  %s23295_s14 = inlined_call_operand.vmem [shape: bf16[5,160,128], index: 14, kind: input, shape index: {}]   ;;  %s23296_s16 = inlined_call_operand.vmem [shape: bf16[128,128], index: 16, kind: input, shape index: {}]   ;;  %s23297_s18 = inlined_call_operand.vmem [shape: bf16[128,128], index: 18, kind: input, shape index: {}]   ;;  %s23298_s15 = inlined_call_operand.vmem [shape: f32[1,128], index: 15, kind: input, shape index: {}]   ;;  %s23299_s17 = inlined_call_operand.vmem [shape: f32[1,128], index: 17, kind: input, shape index: {}]   ;;  %s23300_s19 = inlined_call_operand.vmem [shape: f32[1,128], index: 19, kind: input, shape index: {}]   ;;  %s23301_s20 = inlined_call_operand.vmem [shape: f32[16,128], index: 20, kind: output, shape index: {}]  }
   0x1   :  { %23416 = sst [smem:[#allocation87_spill]] %s23281_s1 }
   0x2   :  { %23417 = sst [smem:[#allocation88_spill]] %s23282_s0  ;;  %s23421_s23 = sld [smem:[#allocation87_spill]] }
   0x3   :  { %23418 = sst [smem:[#allocation89_spill]] %s23283_s2  ;;  %s23422_s0 = sld [smem:[#allocation88_spill]] }
   0x4   :  { %23419 = sst [smem:[#allocation90_spill]] %s23284_s3  ;;  %s23424_s3 = sld [smem:[#allocation89_spill]] }
   0x5   :  { %23420 = sst [smem:[#allocation91_spill]] %s23285_s4  ;;  %s23425_s21 = sld [smem:[#allocation90_spill]] }
   0x8   :  { %v16487_v0 = vld [vmem:[%s23421_s23 + $0x4] ss:$16 sps:$4 sm:$0xff]   ;;  %v16489_v1 = vld [vmem:[%s23421_s23 + $0xc] ss:$16 sps:$4 sm:$0xff]   ;;  %v16491_v2 = vld [vmem:[%s23421_s23] ss:$16 sps:$4 sm:$0xff]  }
   0x9   :  { %1641 = vmatprep.subr.bf16.mxu0 %v16487_v0  ;;  %v16492_v3 = vld [vmem:[%s23421_s23 + $0x8] ss:$16 sps:$4 sm:$0xff]   ;;  %2347 = vmatprep.subr.bf16.mxu1 %v16489_v1  ;;  %v16493_v4 = vld [vmem:[%s23421_s23 + $0x24] ss:$16 sps:$4 sm:$0xff]   ;;  %v16495_v5 = vld [vmem:[%s23421_s23 + $0x2c] ss:$16 sps:$4 sm:$0xff]  }
   0xa   :  { %1642 = vmatpush1.bf16.msra.mxu0 %v16491_v2  ;;  %2348 = vmatpush1.bf16.msra.mxu1 %v16492_v3  ;;  %v16497_v6 = vld [vmem:[%s23421_s23 + $0x20] ss:$16 sps:$4 sm:$0xff]   ;;  %v16498_v7 = vld [vmem:[%s23421_s23 + $0x28] ss:$16 sps:$4 sm:$0xff]   ;;  %v16499_v8 = vld [vmem:[%s23421_s23 + $0x44] ss:$16 sps:$4 sm:$0xff]  }
   0xb   :  { %1643 = vmatprep.subr.bf16.mxu0 %v16493_v4  ;;  %2349 = vmatprep.subr.bf16.mxu1 %v16495_v5  ;;  %v16501_v9 = vld [vmem:[%s23421_s23 + $0x4c] ss:$16 sps:$4 sm:$0xff]   ;;  %v16503_v10 = vld [vmem:[%s23421_s23 + $0x40] ss:$16 sps:$4 sm:$0xff]   ;;  %v16504_v11 = vld [vmem:[%s23421_s23 + $0x48] ss:$16 sps:$4 sm:$0xff]  }
   0xc   :  { %v16505_v12 = vld [vmem:[%s23421_s23 + $0x64] ss:$16 sps:$4 sm:$0xff]   ;;  %v16507_v13 = vld [vmem:[%s23421_s23 + $0x6c] ss:$16 sps:$4 sm:$0xff]   ;;  %v16509_v14 = vld [vmem:[%s23421_s23 + $0x60] ss:$16 sps:$4 sm:$0xff]  }
   0xd   :  { %v16510_v15 = vld [vmem:[%s23421_s23 + $0x68] ss:$16 sps:$4 sm:$0xff]   ;;  %v16511_v16 = vld [vmem:[%s23421_s23 + $0x84] ss:$16 sps:$4 sm:$0xff]   ;;  %v16513_v17 = vld [vmem:[%s23421_s23 + $0x8c] ss:$16 sps:$4 sm:$0xff]  }
   0xe   :  { %1644 = vmatpush1.bf16.msra.mxu0 %v16497_v6  ;;  %2350 = vmatpush1.bf16.msra.mxu1 %v16498_v7  ;;  %v16515_v18 = vld [vmem:[%s23421_s23 + $0x80] ss:$16 sps:$4 sm:$0xff]   ;;  %v16516_v19 = vld [vmem:[%s23421_s23 + $0x88] ss:$16 sps:$4 sm:$0xff]   ;;  %v16517_v20 = vld [vmem:[%s23421_s23 + $0xa4] ss:$16 sps:$4 sm:$0xff]  }
   0xf   :  { %1645 = vmatprep.subr.bf16.mxu0 %v16499_v8  ;;  %2351 = vmatprep.subr.bf16.mxu1 %v16501_v9  ;;  %v16519_v21 = vld [vmem:[%s23421_s23 + $0xac] ss:$16 sps:$4 sm:$0xff]   ;;  %v16521_v22 = vld [vmem:[%s23421_s23 + $0xa0] ss:$16 sps:$4 sm:$0xff]   ;;  %v16522_v23 = vld [vmem:[%s23421_s23 + $0xa8] ss:$16 sps:$4 sm:$0xff]  }
  0x10   :  { %v16523_v24 = vld [vmem:[%s23421_s23 + $0xc4] ss:$16 sps:$4 sm:$0xff]   ;;  %v16525_v25 = vld [vmem:[%s23421_s23 + $0xcc] ss:$16 sps:$4 sm:$0xff]   ;;  %v16527_v26 = vld [vmem:[%s23421_s23 + $0xc0] ss:$16 sps:$4 sm:$0xff]  }
  0x11   :  { %v16528_v27 = vld [vmem:[%s23421_s23 + $0xc8] ss:$16 sps:$4 sm:$0xff]   ;;  %v16529_v28 = vld [vmem:[%s23421_s23 + $0xe4] ss:$16 sps:$4 sm:$0xff]   ;;  %v16531_v29 = vld [vmem:[%s23421_s23 + $0xec] ss:$16 sps:$4 sm:$0xff]  }
  0x12   :  { %1646 = vmatpush1.bf16.msra.mxu0 %v16503_v10  ;;  %2352 = vmatpush1.bf16.msra.mxu1 %v16504_v11  ;;  %v16533_v30 = vld [vmem:[%s23421_s23 + $0xe0] ss:$16 sps:$4 sm:$0xff]   ;;  %v16534_v31 = vld [vmem:[%s23421_s23 + $0xe8] ss:$16 sps:$4 sm:$0xff]   ;;  %v16535_v32 = vld [vmem:[%s23421_s23 + $0x104] ss:$16 sps:$4 sm:$0xff]  }
  0x13   :  { %1647 = vmatprep.subr.bf16.mxu0 %v16505_v12  ;;  %2353 = vmatprep.subr.bf16.mxu1 %v16507_v13  ;;  %v16537_v33 = vld [vmem:[%s23421_s23 + $0x10c] ss:$16 sps:$4 sm:$0xff]   ;;  %v16539_v34 = vld [vmem:[%s23421_s23 + $0x100] ss:$16 sps:$4 sm:$0xff]   ;;  %v16540_v35 = vld [vmem:[%s23421_s23 + $0x108] ss:$16 sps:$4 sm:$0xff]  }
  0x14   :  { %v16541_v36 = vld [vmem:[%s23421_s23 + $0x124] ss:$16 sps:$4 sm:$0xff]   ;;  %v16543_v37 = vld [vmem:[%s23421_s23 + $0x12c] ss:$16 sps:$4 sm:$0xff]   ;;  %v16545_v38 = vld [vmem:[%s23421_s23 + $0x120] ss:$16 sps:$4 sm:$0xff]  }
  0x15   :  { %v16546_v39 = vld [vmem:[%s23421_s23 + $0x128] ss:$16 sps:$4 sm:$0xff]   ;;  %v16547_v40 = vld [vmem:[%s23421_s23 + $0x144] ss:$16 sps:$4 sm:$0xff]   ;;  %v16549_v41 = vld [vmem:[%s23421_s23 + $0x14c] ss:$16 sps:$4 sm:$0xff]  }
  0x16   :  { %1648 = vmatpush1.bf16.msra.mxu0 %v16509_v14  ;;  %2354 = vmatpush1.bf16.msra.mxu1 %v16510_v15  ;;  %v16551_v42 = vld [vmem:[%s23421_s23 + $0x140] ss:$16 sps:$4 sm:$0xff]   ;;  %v16552_v43 = vld [vmem:[%s23421_s23 + $0x148] ss:$16 sps:$4 sm:$0xff]   ;;  %v16553_v44 = vld [vmem:[%s23421_s23 + $0x164] ss:$16 sps:$4 sm:$0xff]  }
  0x17   :  { %1649 = vmatprep.subr.bf16.mxu0 %v16511_v16  ;;  %2355 = vmatprep.subr.bf16.mxu1 %v16513_v17  ;;  %v16555_v45 = vld [vmem:[%s23421_s23 + $0x16c] ss:$16 sps:$4 sm:$0xff]   ;;  %v16557_v46 = vld [vmem:[%s23421_s23 + $0x160] ss:$16 sps:$4 sm:$0xff]   ;;  %v16558_v47 = vld [vmem:[%s23421_s23 + $0x168] ss:$16 sps:$4 sm:$0xff]  }
  0x18   :  { %v16585_v48 = vld [vmem:[%s23422_s0 + $0x4] ss:$16 sps:$4 sm:$0xff]   ;;  %v16561_v50 = vld [vmem:[%s23421_s23 + $0x18c] ss:$16 sps:$4 sm:$0xff]   ;;  %v16563_v51 = vld [vmem:[%s23421_s23 + $0x180] ss:$16 sps:$4 sm:$0xff]  }
  0x19   :  { %v16559_v49 = vld [vmem:[%s23421_s23 + $0x184] ss:$16 sps:$4 sm:$0xff]   ;;  %1673 = vmatprep.mubr.bf16.mxu0 %v16585_v48  ;;  %2379 = vmatprep.mubr.bf16.mxu1 %v16585_v48  ;;  %v16564_v52 = vld [vmem:[%s23421_s23 + $0x188] ss:$16 sps:$4 sm:$0xff]   ;;  %v16567_v54 = vld [vmem:[%s23421_s23 + $0x1ac] ss:$16 sps:$4 sm:$0xff]  }
  0x1a   :  { %1650 = vmatpush1.bf16.msra.mxu0 %v16515_v18  ;;  %2356 = vmatpush1.bf16.msra.mxu1 %v16516_v19  ;;  %v16565_v53 = vld [vmem:[%s23421_s23 + $0x1a4] ss:$16 sps:$4 sm:$0xff]   ;;  %v16569_v55 = vld [vmem:[%s23421_s23 + $0x1a0] ss:$16 sps:$4 sm:$0xff]   ;;  %v16570_v56 = vld [vmem:[%s23421_s23 + $0x1a8] ss:$16 sps:$4 sm:$0xff]  }
  0x1b   :  { %1651 = vmatprep.subr.bf16.mxu0 %v16517_v20  ;;  %2357 = vmatprep.subr.bf16.mxu1 %v16519_v21  ;;  %v16571_v57 = vld [vmem:[%s23421_s23 + $0x1c4] ss:$16 sps:$4 sm:$0xff]   ;;  %v16573_v58 = vld [vmem:[%s23421_s23 + $0x1cc] ss:$16 sps:$4 sm:$0xff]   ;;  %v16575_v59 = vld [vmem:[%s23421_s23 + $0x1c0] ss:$16 sps:$4 sm:$0xff]  }
  0x1c   :  { %v16576_v60 = vld [vmem:[%s23421_s23 + $0x1c8] ss:$16 sps:$4 sm:$0xff]   ;;  %v16577_v61 = vld [vmem:[%s23421_s23 + $0x1e4] ss:$16 sps:$4 sm:$0xff]   ;;  %v16579_v62 = vld [vmem:[%s23421_s23 + $0x1ec] ss:$16 sps:$4 sm:$0xff]  }
  0x1d   :  { %v16581_v63 = vld [vmem:[%s23421_s23 + $0x1e0] ss:$16 sps:$4 sm:$0xff]   ;;  %v16582_v0 = vld [vmem:[%s23421_s23 + $0x1e8] ss:$16 sps:$4 sm:$0xff]   ;;  %v16630_v2 = vld [vmem:[%s23421_s23 + $0x204] ss:$16 sps:$4 sm:$0xff]  }
  0x1e   :  { %1652 = vmatpush1.bf16.msra.mxu0 %v16521_v22  ;;  %2358 = vmatpush1.bf16.msra.mxu1 %v16522_v23  ;;  %v16583_v1 = vld [vmem:[%s23422_s0] ss:$16 sps:$4 sm:$0xff]   ;;  %v16586_v3 = vld [vmem:[%s23422_s0 + $0x24] ss:$16 sps:$4 sm:$0xff]   ;;  %v16700_v48 = vld [vmem:[%s23421_s23 + $0x2a8] ss:$16 sps:$4 sm:$0xff]  }
  0x1f   :  { %1653 = vmatprep.subr.bf16.mxu0 %v16523_v24  ;;  %2359 = vmatprep.subr.bf16.mxu1 %v16525_v25  ;;  %v16628_v4 = vld [vmem:[%s23421_s23 + $0x200] ss:$16 sps:$4 sm:$0xff]   ;;  %v16641_v5 = vld [vmem:[%s23421_s23 + $0x224] ss:$16 sps:$4 sm:$0xff]  }
  0x20   :  { %v16588_v6 = vld [vmem:[%s23422_s0 + $0x20] ss:$16 sps:$4 sm:$0xff]   ;;  %v16589_v8 = vld [vmem:[%s23422_s0 + $0x44] ss:$16 sps:$4 sm:$0xff]  }
  0x21   :  { %v16639_v7 = vld [vmem:[%s23421_s23 + $0x220] ss:$16 sps:$4 sm:$0xff]   ;;  %v16592_v10 = vld [vmem:[%s23422_s0 + $0x64] ss:$16 sps:$4 sm:$0xff]  }
  0x22   :  { %1654 = vmatpush1.bf16.msra.mxu0 %v16527_v26  ;;  %2360 = vmatpush1.bf16.msra.mxu1 %v16528_v27  ;;  %v16591_v9 = vld [vmem:[%s23422_s0 + $0x40] ss:$16 sps:$4 sm:$0xff]   ;;  %v16595_v12 = vld [vmem:[%s23422_s0 + $0x84] ss:$16 sps:$4 sm:$0xff]  }
  0x23   :  { %1655 = vmatprep.subr.bf16.mxu0 %v16529_v28  ;;  %2361 = vmatprep.subr.bf16.mxu1 %v16531_v29  ;;  %v16594_v11 = vld [vmem:[%s23422_s0 + $0x60] ss:$16 sps:$4 sm:$0xff]   ;;  %v16651_v14 = vld [vmem:[%s23421_s23 + $0x244] ss:$16 sps:$4 sm:$0xff]  }
  0x24   :  { %v16649_v13 = vld [vmem:[%s23421_s23 + $0x240] ss:$16 sps:$4 sm:$0xff]   ;;  %v16598_v16 = vld [vmem:[%s23422_s0 + $0xa4] ss:$16 sps:$4 sm:$0xff]  }
  0x25   :  { %v16597_v15 = vld [vmem:[%s23422_s0 + $0x80] ss:$16 sps:$4 sm:$0xff]   ;;  %v16601_v18 = vld [vmem:[%s23422_s0 + $0xc4] ss:$16 sps:$4 sm:$0xff]  }
  0x26   :  { %1656 = vmatpush1.bf16.msra.mxu0 %v16533_v30  ;;  %2362 = vmatpush1.bf16.msra.mxu1 %v16534_v31  ;;  %v16600_v17 = vld [vmem:[%s23422_s0 + $0xa0] ss:$16 sps:$4 sm:$0xff]   ;;  %v16660_v20 = vld [vmem:[%s23421_s23 + $0x264] ss:$16 sps:$4 sm:$0xff]   ;;  %v16678_v31 = vld [vmem:[%s23421_s23 + $0x20c] ss:$16 sps:$4 sm:$0xff]  }
  0x27   :  { %1657 = vmatprep.subr.bf16.mxu0 %v16535_v32  ;;  %2363 = vmatprep.subr.bf16.mxu1 %v16537_v33  ;;  %v16658_v19 = vld [vmem:[%s23421_s23 + $0x260] ss:$16 sps:$4 sm:$0xff]   ;;  %v16604_v22 = vld [vmem:[%s23422_s0 + $0xe4] ss:$16 sps:$4 sm:$0xff]   ;;  %v16676_v32 = vld [vmem:[%s23421_s23 + $0x208] ss:$16 sps:$4 sm:$0xff]  }
  0x28   :  { %v16603_v21 = vld [vmem:[%s23422_s0 + $0xc0] ss:$16 sps:$4 sm:$0xff]   ;;  %v16607_v24 = vld [vmem:[%s23422_s0 + $0x104] ss:$16 sps:$4 sm:$0xff]   ;;  %v16681_v33 = vld [vmem:[%s23421_s23 + $0x22c] ss:$16 sps:$4 sm:$0xff]  }
  0x29   :  { %v16606_v23 = vld [vmem:[%s23422_s0 + $0xe0] ss:$16 sps:$4 sm:$0xff]   ;;  %v16669_v26 = vld [vmem:[%s23421_s23 + $0x284] ss:$16 sps:$4 sm:$0xff]  }
  0x2a   :  { %1658 = vmatpush1.bf16.msra.mxu0 %v16539_v34  ;;  %2364 = vmatpush1.bf16.msra.mxu1 %v16540_v35  ;;  %v16667_v25 = vld [vmem:[%s23421_s23 + $0x280] ss:$16 sps:$4 sm:$0xff]   ;;  %v16610_v28 = vld [vmem:[%s23422_s0 + $0x124] ss:$16 sps:$4 sm:$0xff]   ;;  %v16679_v34 = vld [vmem:[%s23421_s23 + $0x228] ss:$16 sps:$4 sm:$0xff]  }
  0x2b   :  { %1659 = vmatprep.subr.bf16.mxu0 %v16541_v36  ;;  %2365 = vmatprep.subr.bf16.mxu1 %v16543_v37  ;;  %v16609_v27 = vld [vmem:[%s23422_s0 + $0x100] ss:$16 sps:$4 sm:$0xff]   ;;  %v16613_v30 = vld [vmem:[%s23422_s0 + $0x144] ss:$16 sps:$4 sm:$0xff]   ;;  %v16690_v37 = vld [vmem:[%s23421_s23 + $0x24c] ss:$16 sps:$4 sm:$0xff]  }
  0x2c   :  { %v16612_v29 = vld [vmem:[%s23422_s0 + $0x120] ss:$16 sps:$4 sm:$0xff]   ;;  %v16616_v36 = vld [vmem:[%s23422_s0 + $0x164] ss:$16 sps:$4 sm:$0xff]  }
  0x2d   :  { %v16615_v35 = vld [vmem:[%s23422_s0 + $0x140] ss:$16 sps:$4 sm:$0xff]  }
  0x2e   :  { %1660 = vmatpush1.bf16.msra.mxu0 %v16545_v38  ;;  %2366 = vmatpush1.bf16.msra.mxu1 %v16546_v39  ;;  %v16688_v38 = vld [vmem:[%s23421_s23 + $0x248] ss:$16 sps:$4 sm:$0xff]   ;;  %v16685_v39 = vld [vmem:[%s23421_s23 + $0x2a0] ss:$16 sps:$4 sm:$0xff]  }
  0x2f   :  { %1661 = vmatprep.subr.bf16.mxu0 %v16547_v40  ;;  %2367 = vmatprep.subr.bf16.mxu1 %v16549_v41  ;;  %v16687_v40 = vld [vmem:[%s23421_s23 + $0x2a4] ss:$16 sps:$4 sm:$0xff]   ;;  %v16693_v41 = vld [vmem:[%s23421_s23 + $0x26c] ss:$16 sps:$4 sm:$0xff]  }
  0x32   :  { %1662 = vmatpush1.bf16.msra.mxu0 %v16551_v42  ;;  %2368 = vmatpush1.bf16.msra.mxu1 %v16552_v43  ;;  %v16691_v42 = vld [vmem:[%s23421_s23 + $0x268] ss:$16 sps:$4 sm:$0xff]   ;;  %v16618_v43 = vld [vmem:[%s23422_s0 + $0x160] ss:$16 sps:$4 sm:$0xff]  }
  0x33   :  { %1663 = vmatprep.subr.bf16.mxu0 %v16553_v44  ;;  %2369 = vmatprep.subr.bf16.mxu1 %v16555_v45  ;;  %v16619_v44 = vld [vmem:[%s23422_s0 + $0x184] ss:$16 sps:$4 sm:$0xff]   ;;  %v16699_v45 = vld [vmem:[%s23421_s23 + $0x28c] ss:$16 sps:$4 sm:$0xff]  }
  0x36   :  { %1664 = vmatpush1.bf16.msra.mxu0 %v16557_v46  ;;  %2370 = vmatpush1.bf16.msra.mxu1 %v16558_v47  ;;  %v16697_v46 = vld [vmem:[%s23421_s23 + $0x288] ss:$16 sps:$4 sm:$0xff]   ;;  %v16702_v47 = vld [vmem:[%s23421_s23 + $0x2ac] ss:$16 sps:$4 sm:$0xff]  }
  0x37   :  { %1665 = vmatprep.subr.bf16.mxu0 %v16559_v49  ;;  %2371 = vmatprep.subr.bf16.mxu1 %v16561_v50  ;;  %v16621_v49 = vld [vmem:[%s23422_s0 + $0x180] ss:$16 sps:$4 sm:$0xff]   ;;  %v16622_v50 = vld [vmem:[%s23422_s0 + $0x1a4] ss:$16 sps:$4 sm:$0xff]  }
  0x3a   :  { %1666 = vmatpush1.bf16.msra.mxu0 %v16563_v51  ;;  %2372 = vmatpush1.bf16.msra.mxu1 %v16564_v52  ;;  %v16708_v51 = vld [vmem:[%s23421_s23 + $0x2c4] ss:$16 sps:$4 sm:$0xff]   ;;  %v16711_v52 = vld [vmem:[%s23421_s23 + $0x2cc] ss:$16 sps:$4 sm:$0xff]  }
  0x3b   :  { %1667 = vmatprep.subr.bf16.mxu0 %v16565_v53  ;;  %2373 = vmatprep.subr.bf16.mxu1 %v16567_v54  ;;  %v16706_v53 = vld [vmem:[%s23421_s23 + $0x2c0] ss:$16 sps:$4 sm:$0xff]   ;;  %v16709_v54 = vld [vmem:[%s23421_s23 + $0x2c8] ss:$16 sps:$4 sm:$0xff]  }
  0x3e   :  { %1668 = vmatpush1.bf16.msra.mxu0 %v16569_v55  ;;  %2374 = vmatpush1.bf16.msra.mxu1 %v16570_v56  ;;  %v16714_v55 = vld [vmem:[%s23421_s23 + $0x2e4] ss:$16 sps:$4 sm:$0xff]   ;;  %v16717_v56 = vld [vmem:[%s23421_s23 + $0x2ec] ss:$16 sps:$4 sm:$0xff]  }
  0x3f   :  { %1669 = vmatprep.subr.bf16.mxu0 %v16571_v57  ;;  %2375 = vmatprep.subr.bf16.mxu1 %v16573_v58  ;;  %v16712_v57 = vld [vmem:[%s23421_s23 + $0x2e0] ss:$16 sps:$4 sm:$0xff]   ;;  %v16715_v58 = vld [vmem:[%s23421_s23 + $0x2e8] ss:$16 sps:$4 sm:$0xff]  }
  0x42   :  { %1670 = vmatpush1.bf16.msra.mxu0 %v16575_v59  ;;  %2376 = vmatpush1.bf16.msra.mxu1 %v16576_v60  ;;  %v16624_v59 = vld [vmem:[%s23422_s0 + $0x1a0] ss:$16 sps:$4 sm:$0xff]   ;;  %v16625_v60 = vld [vmem:[%s23422_s0 + $0x1c4] ss:$16 sps:$4 sm:$0xff]  }
  0x43   :  { %1671 = vmatprep.subr.bf16.mxu0 %v16577_v61  ;;  %2377 = vmatprep.subr.bf16.mxu1 %v16579_v62  ;;  %v16723_v61 = vld [vmem:[%s23421_s23 + $0x304] ss:$16 sps:$4 sm:$0xff]   ;;  %v16726_v62 = vld [vmem:[%s23421_s23 + $0x30c] ss:$16 sps:$4 sm:$0xff]  }
  0x46   :  { %1672 = vmatpush1.bf16.msra.mxu0 %v16581_v63  ;;  %2378 = vmatpush1.bf16.msra.mxu1 %v16582_v0  ;;  %v16721_v63 = vld [vmem:[%s23421_s23 + $0x300] ss:$16 sps:$4 sm:$0xff]   ;;  %v16724_v0 = vld [vmem:[%s23421_s23 + $0x308] ss:$16 sps:$4 sm:$0xff]  }
  0x47   :  { %1994 = vmatprep.subr.bf16.mxu0 %v16630_v2  ;;  %2700 = vmatprep.subr.bf16.mxu1 %v16678_v31  ;;  %v16732_v2 = vld [vmem:[%s23421_s23 + $0x32c] ss:$16 sps:$4 sm:$0xff]   ;;  %v16648_v31 = vld [vmem:[%s23422_s0 + $0x260] ss:$16 sps:$4 sm:$0xff]  }
  0x49   :  { %1674 = vmatmul.mubr.bf16.vlgmr.msra.gmra.mrb[0].mxu0 %v16583_v1  ;;  %2380 = vmatmul.mubr.bf16.vlgmr.msra.gmra.mrb[0].mxu1 %v16583_v1  ;;  %v16729_v1 = vld [vmem:[%s23421_s23 + $0x324] ss:$16 sps:$4 sm:$0xff]  }
  0x4a   :  { %1683 = vmatprep.mubr.bf16.mxu0 %v16586_v3  ;;  %2389 = vmatprep.mubr.bf16.mxu1 %v16586_v3  ;;  %v16727_v3 = vld [vmem:[%s23421_s23 + $0x320] ss:$16 sps:$4 sm:$0xff]  }
  0x4b   :  { %1995 = vmatpush1.bf16.msra.mxu0 %v16628_v4  ;;  %2701 = vmatpush1.bf16.msra.mxu1 %v16676_v32  ;;  %v16730_v4 = vld [vmem:[%s23421_s23 + $0x328] ss:$16 sps:$4 sm:$0xff]   ;;  %v16652_v32 = vld [vmem:[%s23422_s0 + $0x284] ss:$16 sps:$4 sm:$0xff]  }
  0x4c   :  { %1996 = vmatprep.subr.bf16.mxu0 %v16641_v5  ;;  %2702 = vmatprep.subr.bf16.mxu1 %v16681_v33  ;;  %v16627_v5 = vld [vmem:[%s23422_s0 + $0x1c0] ss:$16 sps:$4 sm:$0xff]  }
  0x4d   :  { %v16654_v33 = vld [vmem:[%s23422_s0 + $0x280] ss:$16 sps:$4 sm:$0xff]  }
  0x4f   :  { %1997 = vmatpush1.bf16.msra.mxu0 %v16639_v7  ;;  %2703 = vmatpush1.bf16.msra.mxu1 %v16679_v34  ;;  %v16738_v7 = vld [vmem:[%s23421_s23 + $0x344] ss:$16 sps:$4 sm:$0xff]  }
  0x50   :  { %1998 = vmatprep.subr.bf16.mxu0 %v16651_v14  ;;  %2704 = vmatprep.subr.bf16.mxu1 %v16690_v37  ;;  %v16745_v14 = vld [vmem:[%s23421_s23 + $0x368] ss:$16 sps:$4 sm:$0xff]   ;;  %v16655_v34 = vld [vmem:[%s23422_s0 + $0x2a4] ss:$16 sps:$4 sm:$0xff]   ;;  %v16663_v37 = vld [vmem:[%s23422_s0 + $0x2c0] ss:$16 sps:$4 sm:$0xff]  }
  0x51   :  { %1684 = vmatmul.mubr.bf16.gmra.mrb[4].mxu0 %v16588_v6  ;;  %2390 = vmatmul.mubr.bf16.gmra.mrb[4].mxu1 %v16588_v6  ;;  %v16631_v6 = vld [vmem:[%s23422_s0 + $0x1e4] ss:$16 sps:$4 sm:$0xff]  }
  0x52   :  { %1693 = vmatprep.mubr.bf16.mxu0 %v16589_v8  ;;  %2399 = vmatprep.mubr.bf16.mxu1 %v16589_v8  ;;  %v16741_v8 = vld [vmem:[%s23421_s23 + $0x34c] ss:$16 sps:$4 sm:$0xff]  }
  0x53   :  { %1999 = vmatpush1.bf16.msra.mxu0 %v16649_v13  ;;  %2705 = vmatpush1.bf16.msra.mxu1 %v16688_v38  ;;  %v16742_v13 = vld [vmem:[%s23421_s23 + $0x360] ss:$16 sps:$4 sm:$0xff]   ;;  %v16664_v38 = vld [vmem:[%s23422_s0 + $0x2e4] ss:$16 sps:$4 sm:$0xff]  }
  0x54   :  { %2000 = vmatprep.subr.bf16.mxu0 %v16660_v20  ;;  %2706 = vmatprep.subr.bf16.mxu1 %v16693_v41  ;;  %v16754_v20 = vld [vmem:[%s23421_s23 + $0x388] ss:$16 sps:$4 sm:$0xff]   ;;  %v16672_v41 = vld [vmem:[%s23422_s0 + $0x300] ss:$16 sps:$4 sm:$0xff]  }
  0x57   :  { %2001 = vmatpush1.bf16.msra.mxu0 %v16658_v19  ;;  %2707 = vmatpush1.bf16.msra.mxu1 %v16691_v42  ;;  %v16751_v19 = vld [vmem:[%s23421_s23 + $0x380] ss:$16 sps:$4 sm:$0xff]   ;;  %v16673_v42 = vld [vmem:[%s23422_s0 + $0x324] ss:$16 sps:$4 sm:$0xff]  }
  0x58   :  { %2002 = vmatprep.subr.bf16.mxu0 %v16669_v26  ;;  %2708 = vmatprep.subr.bf16.mxu1 %v16699_v45  ;;  %v16637_v26 = vld [vmem:[%s23422_s0 + $0x224] ss:$16 sps:$4 sm:$0xff]   ;;  %v16684_v45 = vld [vmem:[%s23422_s0 + $0x340] ss:$16 sps:$4 sm:$0xff]  }
  0x59   :  { %1694 = vmatmul.mubr.bf16.gmra.mrb[8].mxu0 %v16591_v9  ;;  %2400 = vmatmul.mubr.bf16.gmra.mrb[8].mxu1 %v16591_v9  ;;  %v16736_v9 = vld [vmem:[%s23421_s23 + $0x340] ss:$16 sps:$4 sm:$0xff]  }
  0x5a   :  { %1703 = vmatprep.mubr.bf16.mxu0 %v16592_v10  ;;  %2409 = vmatprep.mubr.bf16.mxu1 %v16592_v10  ;;  %v16739_v10 = vld [vmem:[%s23421_s23 + $0x348] ss:$16 sps:$4 sm:$0xff]  }
  0x5b   :  { %2003 = vmatpush1.bf16.msra.mxu0 %v16667_v25  ;;  %2709 = vmatpush1.bf16.msra.mxu1 %v16697_v46  ;;  %v16636_v25 = vld [vmem:[%s23422_s0 + $0x200] ss:$16 sps:$4 sm:$0xff]   ;;  %v16694_v46 = vld [vmem:[%s23422_s0 + $0x364] ss:$16 sps:$4 sm:$0xff]  }
  0x5c   :  { %2004 = vmatprep.subr.bf16.mxu0 %v16687_v40  ;;  %2710 = vmatprep.subr.bf16.mxu1 %v16702_v47  ;;  %v16670_v40 = vld [vmem:[%s23422_s0 + $0x304] ss:$16 sps:$4 sm:$0xff]   ;;  %v16696_v47 = vld [vmem:[%s23422_s0 + $0x360] ss:$16 sps:$4 sm:$0xff]  }
  0x5f   :  { %2005 = vmatpush1.bf16.msra.mxu0 %v16685_v39  ;;  %2711 = vmatpush1.bf16.msra.mxu1 %v16700_v48  ;;  %v16666_v39 = vld [vmem:[%s23422_s0 + $0x2e0] ss:$16 sps:$4 sm:$0xff]   ;;  %v16703_v48 = vld [vmem:[%s23422_s0 + $0x384] ss:$16 sps:$4 sm:$0xff]  }
  0x60   :  { %2006 = vmatprep.subr.bf16.mxu0 %v16708_v51  ;;  %2712 = vmatprep.subr.bf16.mxu1 %v16711_v52  ;;  %v16720_v51 = vld [vmem:[%s23422_s0 + $0x3a0] ss:$16 sps:$4 sm:$0xff]   ;;  %v16733_v52 = vld [vmem:[%s23422_s0 + $0x3c4] ss:$16 sps:$4 sm:$0xff]  }
  0x61   :  { %1704 = vmatmul.mubr.bf16.gmra.mrb[12].mxu0 %v16594_v11  ;;  %2410 = vmatmul.mubr.bf16.gmra.mrb[12].mxu1 %v16594_v11  ;;  %v16744_v11 = vld [vmem:[%s23421_s23 + $0x364] ss:$16 sps:$4 sm:$0xff]  }
  0x62   :  { %1713 = vmatprep.mubr.bf16.mxu0 %v16595_v12  ;;  %2419 = vmatprep.mubr.bf16.mxu1 %v16595_v12  ;;  %v16747_v12 = vld [vmem:[%s23421_s23 + $0x36c] ss:$16 sps:$4 sm:$0xff]  }
  0x63   :  { %2007 = vmatpush1.bf16.msra.mxu0 %v16706_v53  ;;  %2713 = vmatpush1.bf16.msra.mxu1 %v16709_v54  ;;  %v16735_v53 = vld [vmem:[%s23422_s0 + $0x3c0] ss:$16 sps:$4 sm:$0xff]   ;;  %v16748_v54 = vld [vmem:[%s23422_s0 + $0x3e4] ss:$16 sps:$4 sm:$0xff]  }
  0x64   :  { %2008 = vmatprep.subr.bf16.mxu0 %v16714_v55  ;;  %2714 = vmatprep.subr.bf16.mxu1 %v16717_v56  ;;  %v16750_v55 = vld [vmem:[%s23422_s0 + $0x3e0] ss:$16 sps:$4 sm:$0xff]   ;;  %v16765_v56 = vld [vmem:[%s23422_s0 + $0xc] ss:$16 sps:$4 sm:$0xff]  }
  0x67   :  { %2009 = vmatpush1.bf16.msra.mxu0 %v16712_v57  ;;  %2715 = vmatpush1.bf16.msra.mxu1 %v16715_v58  ;;  %v16763_v57 = vld [vmem:[%s23422_s0 + $0x8] ss:$16 sps:$4 sm:$0xff]   ;;  %v16766_v58 = vld [vmem:[%s23422_s0 + $0x2c] ss:$16 sps:$4 sm:$0xff]  }
  0x68   :  { %2010 = vmatprep.subr.bf16.mxu0 %v16723_v61  ;;  %2716 = vmatprep.subr.bf16.mxu1 %v16726_v62  ;;  %v16771_v61 = vld [vmem:[%s23422_s0 + $0x48] ss:$16 sps:$4 sm:$0xff]   ;;  %v16772_v62 = vld [vmem:[%s23422_s0 + $0x6c] ss:$16 sps:$4 sm:$0xff]  }
  0x69   :  { %1714 = vmatmul.mubr.bf16.gmra.mrb[16].mxu0 %v16597_v15  ;;  %2420 = vmatmul.mubr.bf16.gmra.mrb[16].mxu1 %v16597_v15  ;;  %v16633_v15 = vld [vmem:[%s23422_s0 + $0x1e0] ss:$16 sps:$4 sm:$0xff]  }
  0x6a   :  { %1723 = vmatprep.mubr.bf16.mxu0 %v16598_v16  ;;  %2429 = vmatprep.mubr.bf16.mxu1 %v16598_v16  ;;  %v16634_v16 = vld [vmem:[%s23422_s0 + $0x204] ss:$16 sps:$4 sm:$0xff]  }
  0x6b   :  { %2011 = vmatpush1.bf16.msra.mxu0 %v16721_v63  ;;  %2717 = vmatpush1.bf16.msra.mxu1 %v16724_v0  ;;  %v16774_v63 = vld [vmem:[%s23422_s0 + $0x68] ss:$16 sps:$4 sm:$0xff]   ;;  %v16775_v0 = vld [vmem:[%s23422_s0 + $0x8c] ss:$16 sps:$4 sm:$0xff]  }
  0x6c   :  { %2012 = vmatprep.subr.bf16.mxu0 %v16729_v1  ;;  %2718 = vmatprep.subr.bf16.mxu1 %v16732_v2  ;;  %v16777_v1 = vld [vmem:[%s23422_s0 + $0x88] ss:$16 sps:$4 sm:$0xff]   ;;  %v16778_v2 = vld [vmem:[%s23422_s0 + $0xac] ss:$16 sps:$4 sm:$0xff]  }
  0x6f   :  { %2013 = vmatpush1.bf16.msra.mxu0 %v16727_v3  ;;  %2719 = vmatpush1.bf16.msra.mxu1 %v16730_v4  ;;  %v16780_v3 = vld [vmem:[%s23422_s0 + $0xa8] ss:$16 sps:$4 sm:$0xff]   ;;  %v16781_v4 = vld [vmem:[%s23422_s0 + $0xcc] ss:$16 sps:$4 sm:$0xff]  }
  0x70   :  { %2014 = vmatprep.subr.bf16.mxu0 %v16738_v7  ;;  %2720 = vmatprep.subr.bf16.mxu1 %v16741_v8  ;;  %v16786_v7 = vld [vmem:[%s23422_s0 + $0xe8] ss:$16 sps:$4 sm:$0xff]   ;;  %v16787_v8 = vld [vmem:[%s23422_s0 + $0x10c] ss:$16 sps:$4 sm:$0xff]  }
  0x71   :  { %1724 = vmatmul.mubr.bf16.gmra.mrb[20].mxu0 %v16600_v17  ;;  %2430 = vmatmul.mubr.bf16.gmra.mrb[20].mxu1 %v16600_v17  ;;  %v16753_v17 = vld [vmem:[%s23421_s23 + $0x384] ss:$16 sps:$4 sm:$0xff]  }
  0x72   :  { %1733 = vmatprep.mubr.bf16.mxu0 %v16601_v18  ;;  %2439 = vmatprep.mubr.bf16.mxu1 %v16601_v18  ;;  %v16756_v18 = vld [vmem:[%s23421_s23 + $0x38c] ss:$16 sps:$4 sm:$0xff]  }
  0x73   :  { %2015 = vmatpush1.bf16.msra.mxu0 %v16736_v9  ;;  %2721 = vmatpush1.bf16.msra.mxu1 %v16739_v10  ;;  %v16789_v9 = vld [vmem:[%s23422_s0 + $0x108] ss:$16 sps:$4 sm:$0xff]   ;;  %v16790_v10 = vld [vmem:[%s23422_s0 + $0x12c] ss:$16 sps:$4 sm:$0xff]  }
  0x74   :  { %2016 = vmatprep.subr.bf16.mxu0 %v16744_v11  ;;  %2722 = vmatprep.subr.bf16.mxu1 %v16747_v12  ;;  %v16792_v11 = vld [vmem:[%s23422_s0 + $0x128] ss:$16 sps:$4 sm:$0xff]   ;;  %v16793_v12 = vld [vmem:[%s23422_s0 + $0x14c] ss:$16 sps:$4 sm:$0xff]  }
  0x77   :  { %2017 = vmatpush1.bf16.msra.mxu0 %v16742_v13  ;;  %2723 = vmatpush1.bf16.msra.mxu1 %v16745_v14  ;;  %v16795_v13 = vld [vmem:[%s23422_s0 + $0x148] ss:$16 sps:$4 sm:$0xff]   ;;  %v16796_v14 = vld [vmem:[%s23422_s0 + $0x16c] ss:$16 sps:$4 sm:$0xff]  }
  0x78   :  { %2018 = vmatprep.subr.bf16.mxu0 %v16753_v17  ;;  %2724 = vmatprep.subr.bf16.mxu1 %v16756_v18  ;;  %v16801_v17 = vld [vmem:[%s23422_s0 + $0x188] ss:$16 sps:$4 sm:$0xff]   ;;  %v16802_v18 = vld [vmem:[%s23422_s0 + $0x1ac] ss:$16 sps:$4 sm:$0xff]  }
  0x79   :  { %1734 = vmatmul.mubr.bf16.gmra.mrb[24].mxu0 %v16603_v21  ;;  %2440 = vmatmul.mubr.bf16.gmra.mrb[24].mxu1 %v16603_v21  ;;  %v16759_v21 = vld [vmem:[%s23421_s23 + $0x3a4] ss:$16 sps:$4 sm:$0xff]  }
  0x7a   :  { %1743 = vmatprep.mubr.bf16.mxu0 %v16604_v22  ;;  %2449 = vmatprep.mubr.bf16.mxu1 %v16604_v22  ;;  %v16762_v22 = vld [vmem:[%s23421_s23 + $0x3ac] ss:$16 sps:$4 sm:$0xff]  }
  0x7b   :  { %2019 = vmatpush1.bf16.msra.mxu0 %v16751_v19  ;;  %2725 = vmatpush1.bf16.msra.mxu1 %v16754_v20  ;;  %v16804_v19 = vld [vmem:[%s23422_s0 + $0x1a8] ss:$16 sps:$4 sm:$0xff]   ;;  %v16805_v20 = vld [vmem:[%s23422_s0 + $0x1cc] ss:$16 sps:$4 sm:$0xff]  }
  0x7c   :  { %2020 = vmatprep.subr.bf16.mxu0 %v16759_v21  ;;  %2726 = vmatprep.subr.bf16.mxu1 %v16762_v22  ;;  %v16807_v21 = vld [vmem:[%s23422_s0 + $0x1c8] ss:$16 sps:$4 sm:$0xff]   ;;  %v16808_v22 = vld [vmem:[%s23422_s0 + $0x1ec] ss:$16 sps:$4 sm:$0xff]  }
  0x81   :  { %1744 = vmatmul.mubr.bf16.gmra.mrb[28].mxu0 %v16606_v23  ;;  %2450 = vmatmul.mubr.bf16.gmra.mrb[28].mxu1 %v16606_v23  ;;  %v16757_v23 = vld [vmem:[%s23421_s23 + $0x3a0] ss:$16 sps:$4 sm:$0xff]  }
  0x82   :  { %1753 = vmatprep.mubr.bf16.mxu0 %v16607_v24  ;;  %2459 = vmatprep.mubr.bf16.mxu1 %v16607_v24  ;;  %v16760_v24 = vld [vmem:[%s23421_s23 + $0x3a8] ss:$16 sps:$4 sm:$0xff]  }
  0x83   :  { %2021 = vmatpush1.bf16.msra.mxu0 %v16757_v23  ;;  %2727 = vmatpush1.bf16.msra.mxu1 %v16760_v24  ;;  %v16810_v23 = vld [vmem:[%s23422_s0 + $0x1e8] ss:$16 sps:$4 sm:$0xff]   ;;  %v16811_v24 = vld [vmem:[%s23422_s0 + $0x20c] ss:$16 sps:$4 sm:$0xff]  }
  0x89   :  { %1754 = vmatmul.mubr.bf16.gmra.mrb[32].mxu0 %v16609_v27  ;;  %2460 = vmatmul.mubr.bf16.gmra.mrb[32].mxu1 %v16609_v27  ;;  %v16642_v27 = vld [vmem:[%s23422_s0 + $0x220] ss:$16 sps:$4 sm:$0xff]  }
  0x8a   :  { %1763 = vmatprep.mubr.bf16.mxu0 %v16610_v28  ;;  %2469 = vmatprep.mubr.bf16.mxu1 %v16610_v28  ;;  %v16643_v28 = vld [vmem:[%s23422_s0 + $0x244] ss:$16 sps:$4 sm:$0xff]  }
  0x91   :  { %1764 = vmatmul.mubr.bf16.gmra.mrb[36].mxu0 %v16612_v29  ;;  %2470 = vmatmul.mubr.bf16.gmra.mrb[36].mxu1 %v16612_v29  ;;  %v16645_v29 = vld [vmem:[%s23422_s0 + $0x240] ss:$16 sps:$4 sm:$0xff]  }
  0x92   :  { %1773 = vmatprep.mubr.bf16.mxu0 %v16613_v30  ;;  %2479 = vmatprep.mubr.bf16.mxu1 %v16613_v30  ;;  %v16646_v30 = vld [vmem:[%s23422_s0 + $0x264] ss:$16 sps:$4 sm:$0xff]  }
  0x99   :  { %1774 = vmatmul.mubr.bf16.gmra.mrb[40].mxu0 %v16615_v35  ;;  %2480 = vmatmul.mubr.bf16.gmra.mrb[40].mxu1 %v16615_v35  ;;  %v16657_v35 = vld [vmem:[%s23422_s0 + $0x2a0] ss:$16 sps:$4 sm:$0xff]  }
  0x9a   :  { %1783 = vmatprep.mubr.bf16.mxu0 %v16616_v36  ;;  %2489 = vmatprep.mubr.bf16.mxu1 %v16616_v36  ;;  %v16661_v36 = vld [vmem:[%s23422_s0 + $0x2c4] ss:$16 sps:$4 sm:$0xff]  }
  0xa1   :  { %1784 = vmatmul.mubr.bf16.gmra.mrb[44].mxu0 %v16618_v43  ;;  %2490 = vmatmul.mubr.bf16.gmra.mrb[44].mxu1 %v16618_v43  ;;  %v16675_v43 = vld [vmem:[%s23422_s0 + $0x320] ss:$16 sps:$4 sm:$0xff]  }
  0xa2   :  { %1793 = vmatprep.mubr.bf16.mxu0 %v16619_v44  ;;  %2499 = vmatprep.mubr.bf16.mxu1 %v16619_v44  ;;  %v16682_v44 = vld [vmem:[%s23422_s0 + $0x344] ss:$16 sps:$4 sm:$0xff]  }
  0xa9   :  { %1794 = vmatmul.mubr.bf16.gmra.mrb[48].mxu0 %v16621_v49  ;;  %2500 = vmatmul.mubr.bf16.gmra.mrb[48].mxu1 %v16621_v49  ;;  %v16705_v49 = vld [vmem:[%s23422_s0 + $0x380] ss:$16 sps:$4 sm:$0xff]  }
  0xaa   :  { %1803 = vmatprep.mubr.bf16.mxu0 %v16622_v50  ;;  %2509 = vmatprep.mubr.bf16.mxu1 %v16622_v50  ;;  %v16718_v50 = vld [vmem:[%s23422_s0 + $0x3a4] ss:$16 sps:$4 sm:$0xff]  }
  0xb1   :  { %1804 = vmatmul.mubr.bf16.gmra.mrb[52].mxu0 %v16624_v59  ;;  %2510 = vmatmul.mubr.bf16.gmra.mrb[52].mxu1 %v16624_v59  ;;  %v16768_v59 = vld [vmem:[%s23422_s0 + $0x28] ss:$16 sps:$4 sm:$0xff]  }
  0xb2   :  { %1813 = vmatprep.mubr.bf16.mxu0 %v16625_v60  ;;  %2519 = vmatprep.mubr.bf16.mxu1 %v16625_v60  ;;  %v16769_v60 = vld [vmem:[%s23422_s0 + $0x4c] ss:$16 sps:$4 sm:$0xff]  }
  0xb9   :  { %1814 = vmatmul.mubr.bf16.gmra.mrb[56].mxu0 %v16627_v5  ;;  %2520 = vmatmul.mubr.bf16.gmra.mrb[56].mxu1 %v16627_v5  ;;  %v16783_v5 = vld [vmem:[%s23422_s0 + $0xc8] ss:$16 sps:$4 sm:$0xff]  }
  0xba   :  { %1823 = vmatprep.mubr.bf16.mxu0 %v16631_v6  ;;  %2529 = vmatprep.mubr.bf16.mxu1 %v16631_v6  ;;  %v16784_v6 = vld [vmem:[%s23422_s0 + $0xec] ss:$16 sps:$4 sm:$0xff]  }
  0xc1   :  { %1824 = vmatmul.mubr.bf16.gmra.mrb[60].mxu0 %v16633_v15  ;;  %2530 = vmatmul.mubr.bf16.gmra.mrb[60].mxu1 %v16633_v15  ;;  %v16798_v15 = vld [vmem:[%s23422_s0 + $0x168] ss:$16 sps:$4 sm:$0xff]  }
  0xc2   :  { %1833 = vmatprep.mubr.bf16.mxu0 %v16634_v16  ;;  %2539 = vmatprep.mubr.bf16.mxu1 %v16634_v16  ;;  %v16799_v16 = vld [vmem:[%s23422_s0 + $0x18c] ss:$16 sps:$4 sm:$0xff]  }
  0xc9   :  { %1834 = vmatmul.mubr.bf16.gmra.mrb[64].mxu0 %v16636_v25  ;;  %2540 = vmatmul.mubr.bf16.gmra.mrb[64].mxu1 %v16636_v25  ;;  %v16813_v25 = vld [vmem:[%s23422_s0 + $0x208] ss:$16 sps:$4 sm:$0xff]  }
  0xca   :  { %1843 = vmatprep.mubr.bf16.mxu0 %v16637_v26  ;;  %2549 = vmatprep.mubr.bf16.mxu1 %v16637_v26  ;;  %v16814_v26 = vld [vmem:[%s23422_s0 + $0x22c] ss:$16 sps:$4 sm:$0xff]  }
  0xd1   :  { %1844 = vmatmul.mubr.bf16.gmra.mrb[68].mxu0 %v16642_v27  ;;  %2550 = vmatmul.mubr.bf16.gmra.mrb[68].mxu1 %v16642_v27  ;;  %v16816_v27 = vld [vmem:[%s23422_s0 + $0x228] ss:$16 sps:$4 sm:$0xff]  }
  0xd2   :  { %1853 = vmatprep.mubr.bf16.mxu0 %v16643_v28  ;;  %2559 = vmatprep.mubr.bf16.mxu1 %v16643_v28  ;;  %v16817_v28 = vld [vmem:[%s23422_s0 + $0x24c] ss:$16 sps:$4 sm:$0xff]  }
  0xd9   :  { %1854 = vmatmul.mubr.bf16.gmra.mrb[72].mxu0 %v16645_v29  ;;  %2560 = vmatmul.mubr.bf16.gmra.mrb[72].mxu1 %v16645_v29  ;;  %v16819_v29 = vld [vmem:[%s23422_s0 + $0x248] ss:$16 sps:$4 sm:$0xff]  }
  0xda   :  { %1863 = vmatprep.mubr.bf16.mxu0 %v16646_v30  ;;  %2569 = vmatprep.mubr.bf16.mxu1 %v16646_v30  ;;  %v16820_v30 = vld [vmem:[%s23422_s0 + $0x26c] ss:$16 sps:$4 sm:$0xff]  }
  0xe1   :  { %1864 = vmatmul.mubr.bf16.gmra.mrb[76].mxu0 %v16648_v31  ;;  %2570 = vmatmul.mubr.bf16.gmra.mrb[76].mxu1 %v16648_v31  ;;  %v16822_v31 = vld [vmem:[%s23422_s0 + $0x268] ss:$16 sps:$4 sm:$0xff]  }
  0xe2   :  { %1873 = vmatprep.mubr.bf16.mxu0 %v16652_v32  ;;  %2579 = vmatprep.mubr.bf16.mxu1 %v16652_v32  ;;  %v16823_v32 = vld [vmem:[%s23422_s0 + $0x28c] ss:$16 sps:$4 sm:$0xff]  }
  0xe9   :  { %1874 = vmatmul.mubr.bf16.gmra.mrb[80].mxu0 %v16654_v33  ;;  %2580 = vmatmul.mubr.bf16.gmra.mrb[80].mxu1 %v16654_v33  ;;  %v16825_v33 = vld [vmem:[%s23422_s0 + $0x288] ss:$16 sps:$4 sm:$0xff]  }
  0xea   :  { %1883 = vmatprep.mubr.bf16.mxu0 %v16655_v34  ;;  %2589 = vmatprep.mubr.bf16.mxu1 %v16655_v34  ;;  %v16826_v34 = vld [vmem:[%s23422_s0 + $0x2ac] ss:$16 sps:$4 sm:$0xff]  }
  0xf1   :  { %1884 = vmatmul.mubr.bf16.gmra.mrb[84].mxu0 %v16657_v35  ;;  %2590 = vmatmul.mubr.bf16.gmra.mrb[84].mxu1 %v16657_v35  ;;  %v16828_v35 = vld [vmem:[%s23422_s0 + $0x2a8] ss:$16 sps:$4 sm:$0xff]  }
  0xf2   :  { %1893 = vmatprep.mubr.bf16.mxu0 %v16661_v36  ;;  %2599 = vmatprep.mubr.bf16.mxu1 %v16661_v36  ;;  %v16829_v36 = vld [vmem:[%s23422_s0 + $0x2cc] ss:$16 sps:$4 sm:$0xff]  }
  0xf9   :  { %1894 = vmatmul.mubr.bf16.gmra.mrb[88].mxu0 %v16663_v37  ;;  %2600 = vmatmul.mubr.bf16.gmra.mrb[88].mxu1 %v16663_v37  ;;  %v16831_v37 = vld [vmem:[%s23422_s0 + $0x2c8] ss:$16 sps:$4 sm:$0xff]  }
  0xfa   :  { %1903 = vmatprep.mubr.bf16.mxu0 %v16664_v38  ;;  %2609 = vmatprep.mubr.bf16.mxu1 %v16664_v38  ;;  %v16832_v38 = vld [vmem:[%s23422_s0 + $0x2ec] ss:$16 sps:$4 sm:$0xff]  }
 0x101   :  { %1904 = vmatmul.mubr.bf16.gmra.mrb[92].mxu0 %v16666_v39  ;;  %2610 = vmatmul.mubr.bf16.gmra.mrb[92].mxu1 %v16666_v39  ;;  %v16834_v39 = vld [vmem:[%s23422_s0 + $0x2e8] ss:$16 sps:$4 sm:$0xff]  }
 0x102   :  { %1913 = vmatprep.mubr.bf16.mxu0 %v16670_v40  ;;  %2619 = vmatprep.mubr.bf16.mxu1 %v16670_v40  ;;  %v16835_v40 = vld [vmem:[%s23422_s0 + $0x30c] ss:$16 sps:$4 sm:$0xff]  }
 0x109   :  { %1914 = vmatmul.mubr.bf16.gmra.mrb[96].mxu0 %v16672_v41  ;;  %2620 = vmatmul.mubr.bf16.gmra.mrb[96].mxu1 %v16672_v41  ;;  %v16837_v41 = vld [vmem:[%s23422_s0 + $0x308] ss:$16 sps:$4 sm:$0xff]  }
 0x10a   :  { %1923 = vmatprep.mubr.bf16.mxu0 %v16673_v42  ;;  %2629 = vmatprep.mubr.bf16.mxu1 %v16673_v42  ;;  %v16838_v42 = vld [vmem:[%s23422_s0 + $0x32c] ss:$16 sps:$4 sm:$0xff]  }
 0x111   :  { %1924 = vmatmul.mubr.bf16.gmra.mrb[100].mxu0 %v16675_v43  ;;  %2630 = vmatmul.mubr.bf16.gmra.mrb[100].mxu1 %v16675_v43  ;;  %v16840_v43 = vld [vmem:[%s23422_s0 + $0x328] ss:$16 sps:$4 sm:$0xff]  }
 0x112   :  { %1933 = vmatprep.mubr.bf16.mxu0 %v16682_v44  ;;  %2639 = vmatprep.mubr.bf16.mxu1 %v16682_v44  ;;  %v316_v44 = vlaneseq }
 0x119   :  { %1934 = vmatmul.mubr.bf16.gmra.mrb[104].mxu0 %v16684_v45  ;;  %2640 = vmatmul.mubr.bf16.gmra.mrb[104].mxu1 %v16684_v45  ;;  %v16841_v45 = vld [vmem:[%s23422_s0 + $0x34c] ss:$16 sps:$4 sm:$0xff]  }
 0x11a   :  { %1943 = vmatprep.mubr.bf16.mxu0 %v16694_v46  ;;  %2649 = vmatprep.mubr.bf16.mxu1 %v16694_v46  ;;  %v18712_v46 = vshrl.u32 %v316_v44, 7 }
 0x11c   :  { %23423 = vst [vmem:[#allocation2_spill] sm:$0xff] %v18712_v46 }
 0x121   :  { %1944 = vmatmul.mubr.bf16.gmra.mrb[108].mxu0 %v16696_v47  ;;  %2650 = vmatmul.mubr.bf16.gmra.mrb[108].mxu1 %v16696_v47  ;;  %v16843_v47 = vld [vmem:[%s23422_s0 + $0x348] ss:$16 sps:$4 sm:$0xff]  }
 0x122   :  { %1953 = vmatprep.mubr.bf16.mxu0 %v16703_v48  ;;  %2659 = vmatprep.mubr.bf16.mxu1 %v16703_v48  ;;  %v23307_v48 = vsub.s32 0, %v18712_v46 }
 0x129   :  { %1954 = vmatmul.mubr.bf16.gmra.mrb[112].mxu0 %v16705_v49  ;;  %2660 = vmatmul.mubr.bf16.gmra.mrb[112].mxu1 %v16705_v49  ;;  %v23308_v49 = vsub.s32 2, %v18712_v46 }
 0x12a   :  { %1963 = vmatprep.mubr.bf16.mxu0 %v16718_v50  ;;  %2669 = vmatprep.mubr.bf16.mxu1 %v16718_v50  ;;  %v314_v50 = vld [vmem:[%s23424_s3] sm:$0xf] }
 0x131   :  { %1964 = vmatmul.mubr.bf16.gmra.mrb[116].mxu0 %v16720_v51  ;;  %2670 = vmatmul.mubr.bf16.gmra.mrb[116].mxu1 %v16720_v51  ;;  %v23306_v51 = vsub.s32 1, %v18712_v46 }
 0x132   :  { %1973 = vmatprep.mubr.bf16.mxu0 %v16733_v52  ;;  %2679 = vmatprep.mubr.bf16.mxu1 %v16733_v52  ;;  %v330_v52 = vsub.s32 3, %v18712_v46 }
 0x139   :  { %1974 = vmatmul.mubr.bf16.gmra.mrb[120].mxu0 %v16735_v53  ;;  %2680 = vmatmul.mubr.bf16.gmra.mrb[120].mxu1 %v16735_v53  ;;  %v16844_v53 = vld [vmem:[%s23422_s0 + $0x36c] ss:$16 sps:$4 sm:$0xff]  }
 0x13a   :  { %1983 = vmatprep.mubr.bf16.mxu0 %v16748_v54  ;;  %2689 = vmatprep.mubr.bf16.mxu1 %v16748_v54  ;;  %v18731_v54 = vrot.slane %v314_v50, %v23307_v48 }
 0x141   :  { %1984 = vmatmul.mubr.bf16.gmra.mrb[124].mxu0 %v16750_v55  ;;  %2690 = vmatmul.mubr.bf16.gmra.mrb[124].mxu1 %v16750_v55  ;;  %v18735_v55 = vrot.slane %v314_v50, %v23308_v49 }
 0x142   :  { %14094 = vmatprep.mubr.msk.bf16.mxu0 %vm1544_vm0, %v16765_v56  ;;  %14126 = vmatprep.mubr.msk.bf16.mxu1 %vm1544_vm0, %v16765_v56  ;;  %v18739_v56 = vrot.slane %v314_v50, %v23306_v51 }
 0x149   :  { %2027 = vmatmul.mubr.bf16.vlgmr.msra.gmra.mrb[0].mxu0 %v16763_v57  ;;  %2733 = vmatmul.mubr.bf16.vlgmr.msra.gmra.mrb[0].mxu1 %v16763_v57  ;;  %v18741_v57 = vrot.slane %v314_v50, %v330_v52 }
 0x14a   :  { %14095 = vmatprep.mubr.msk.bf16.mxu0 %vm1544_vm0, %v16766_v58  ;;  %14127 = vmatprep.mubr.msk.bf16.mxu1 %vm1544_vm0, %v16766_v58 }
 0x151   :  { %2037 = vmatmul.mubr.bf16.gmra.mrb[4].mxu0 %v16768_v59  ;;  %2743 = vmatmul.mubr.bf16.gmra.mrb[4].mxu1 %v16768_v59 }
 0x152   :  { %14096 = vmatprep.mubr.msk.bf16.mxu0 %vm1544_vm0, %v16769_v60  ;;  %14128 = vmatprep.mubr.msk.bf16.mxu1 %vm1544_vm0, %v16769_v60 }
 0x159   :  { %2047 = vmatmul.mubr.bf16.gmra.mrb[8].mxu0 %v16771_v61  ;;  %2753 = vmatmul.mubr.bf16.gmra.mrb[8].mxu1 %v16771_v61 }
 0x15a   :  { %14097 = vmatprep.mubr.msk.bf16.mxu0 %vm1544_vm0, %v16772_v62  ;;  %14129 = vmatprep.mubr.msk.bf16.mxu1 %vm1544_vm0, %v16772_v62 }
 0x161   :  { %2057 = vmatmul.mubr.bf16.gmra.mrb[12].mxu0 %v16774_v63  ;;  %2763 = vmatmul.mubr.bf16.gmra.mrb[12].mxu1 %v16774_v63 }
 0x162   :  { %14098 = vmatprep.mubr.msk.bf16.mxu0 %vm1544_vm0, %v16775_v0  ;;  %14130 = vmatprep.mubr.msk.bf16.mxu1 %vm1544_vm0, %v16775_v0  ;;  %v16846_v0 = vld [vmem:[%s23422_s0 + $0x368] ss:$16 sps:$4 sm:$0xff]  }
 0x169   :  { %2067 = vmatmul.mubr.bf16.gmra.mrb[16].mxu0 %v16777_v1  ;;  %2773 = vmatmul.mubr.bf16.gmra.mrb[16].mxu1 %v16777_v1 }
 0x16a   :  { %14099 = vmatprep.mubr.msk.bf16.mxu0 %vm1544_vm0, %v16778_v2  ;;  %14131 = vmatprep.mubr.msk.bf16.mxu1 %vm1544_vm0, %v16778_v2 }
 0x171   :  { %2077 = vmatmul.mubr.bf16.gmra.mrb[20].mxu0 %v16780_v3  ;;  %2783 = vmatmul.mubr.bf16.gmra.mrb[20].mxu1 %v16780_v3 }
 0x172   :  { %14100 = vmatprep.mubr.msk.bf16.mxu0 %vm1544_vm0, %v16781_v4  ;;  %14132 = vmatprep.mubr.msk.bf16.mxu1 %vm1544_vm0, %v16781_v4 }
 0x179   :  { %2087 = vmatmul.mubr.bf16.gmra.mrb[24].mxu0 %v16783_v5  ;;  %2793 = vmatmul.mubr.bf16.gmra.mrb[24].mxu1 %v16783_v5  ;;  %v16847_v5 = vld [vmem:[%s23422_s0 + $0x38c] ss:$16 sps:$4 sm:$0xff]  }
 0x17a   :  { %14101 = vmatprep.mubr.msk.bf16.mxu0 %vm1544_vm0, %v16784_v6  ;;  %14133 = vmatprep.mubr.msk.bf16.mxu1 %vm1544_vm0, %v16784_v6 }
 0x181   :  { %2097 = vmatmul.mubr.bf16.gmra.mrb[28].mxu0 %v16786_v7  ;;  %2803 = vmatmul.mubr.bf16.gmra.mrb[28].mxu1 %v16786_v7 }
 0x182   :  { %14102 = vmatprep.mubr.msk.bf16.mxu0 %vm1544_vm0, %v16787_v8  ;;  %14134 = vmatprep.mubr.msk.bf16.mxu1 %vm1544_vm0, %v16787_v8 }
 0x189   :  { %2107 = vmatmul.mubr.bf16.gmra.mrb[32].mxu0 %v16789_v9  ;;  %2813 = vmatmul.mubr.bf16.gmra.mrb[32].mxu1 %v16789_v9 }
 0x18a   :  { %14103 = vmatprep.mubr.msk.bf16.mxu0 %vm1544_vm0, %v16790_v10  ;;  %14135 = vmatprep.mubr.msk.bf16.mxu1 %vm1544_vm0, %v16790_v10 }
 0x191   :  { %2117 = vmatmul.mubr.bf16.gmra.mrb[36].mxu0 %v16792_v11  ;;  %2823 = vmatmul.mubr.bf16.gmra.mrb[36].mxu1 %v16792_v11 }
 0x192   :  { %14104 = vmatprep.mubr.msk.bf16.mxu0 %vm1544_vm0, %v16793_v12  ;;  %14136 = vmatprep.mubr.msk.bf16.mxu1 %vm1544_vm0, %v16793_v12 }
 0x199   :  { %2127 = vmatmul.mubr.bf16.gmra.mrb[40].mxu0 %v16795_v13  ;;  %2833 = vmatmul.mubr.bf16.gmra.mrb[40].mxu1 %v16795_v13 }
 0x19a   :  { %14105 = vmatprep.mubr.msk.bf16.mxu0 %vm1544_vm0, %v16796_v14  ;;  %14137 = vmatprep.mubr.msk.bf16.mxu1 %vm1544_vm0, %v16796_v14 }
 0x1a1   :  { %2137 = vmatmul.mubr.bf16.gmra.mrb[44].mxu0 %v16798_v15  ;;  %2843 = vmatmul.mubr.bf16.gmra.mrb[44].mxu1 %v16798_v15 }
 0x1a2   :  { %14106 = vmatprep.mubr.msk.bf16.mxu0 %vm1544_vm0, %v16799_v16  ;;  %14138 = vmatprep.mubr.msk.bf16.mxu1 %vm1544_vm0, %v16799_v16 }
 0x1a9   :  { %2147 = vmatmul.mubr.bf16.gmra.mrb[48].mxu0 %v16801_v17  ;;  %2853 = vmatmul.mubr.bf16.gmra.mrb[48].mxu1 %v16801_v17 }
 0x1aa   :  { %14107 = vmatprep.mubr.msk.bf16.mxu0 %vm1544_vm0, %v16802_v18  ;;  %14139 = vmatprep.mubr.msk.bf16.mxu1 %vm1544_vm0, %v16802_v18 }
 0x1b1   :  { %2157 = vmatmul.mubr.bf16.gmra.mrb[52].mxu0 %v16804_v19  ;;  %2863 = vmatmul.mubr.bf16.gmra.mrb[52].mxu1 %v16804_v19 }
 0x1b2   :  { %14108 = vmatprep.mubr.msk.bf16.mxu0 %vm1544_vm0, %v16805_v20  ;;  %14140 = vmatprep.mubr.msk.bf16.mxu1 %vm1544_vm0, %v16805_v20 }
 0x1b9   :  { %2167 = vmatmul.mubr.bf16.gmra.mrb[56].mxu0 %v16807_v21  ;;  %2873 = vmatmul.mubr.bf16.gmra.mrb[56].mxu1 %v16807_v21 }
 0x1ba   :  { %14109 = vmatprep.mubr.msk.bf16.mxu0 %vm1544_vm0, %v16808_v22  ;;  %14141 = vmatprep.mubr.msk.bf16.mxu1 %vm1544_vm0, %v16808_v22 }
 0x1c1   :  { %2177 = vmatmul.mubr.bf16.gmra.mrb[60].mxu0 %v16810_v23  ;;  %2883 = vmatmul.mubr.bf16.gmra.mrb[60].mxu1 %v16810_v23 }
 0x1c2   :  { %14110 = vmatprep.mubr.msk.bf16.mxu0 %vm1544_vm0, %v16811_v24  ;;  %14142 = vmatprep.mubr.msk.bf16.mxu1 %vm1544_vm0, %v16811_v24 }
 0x1c9   :  { %2187 = vmatmul.mubr.bf16.gmra.mrb[64].mxu0 %v16813_v25  ;;  %2893 = vmatmul.mubr.bf16.gmra.mrb[64].mxu1 %v16813_v25 }
 0x1ca   :  { %14111 = vmatprep.mubr.msk.bf16.mxu0 %vm1544_vm0, %v16814_v26  ;;  %14143 = vmatprep.mubr.msk.bf16.mxu1 %vm1544_vm0, %v16814_v26  ;;  %v16849_v26 = vld [vmem:[%s23422_s0 + $0x388] ss:$16 sps:$4 sm:$0xff]  }
 0x1d1   :  { %2197 = vmatmul.mubr.bf16.gmra.mrb[68].mxu0 %v16816_v27  ;;  %2903 = vmatmul.mubr.bf16.gmra.mrb[68].mxu1 %v16816_v27 }
 0x1d2   :  { %14112 = vmatprep.mubr.msk.bf16.mxu0 %vm1544_vm0, %v16817_v28  ;;  %14144 = vmatprep.mubr.msk.bf16.mxu1 %vm1544_vm0, %v16817_v28 }
 0x1d9   :  { %2207 = vmatmul.mubr.bf16.gmra.mrb[72].mxu0 %v16819_v29  ;;  %2913 = vmatmul.mubr.bf16.gmra.mrb[72].mxu1 %v16819_v29 }
 0x1da   :  { %14113 = vmatprep.mubr.msk.bf16.mxu0 %vm1544_vm0, %v16820_v30  ;;  %14145 = vmatprep.mubr.msk.bf16.mxu1 %vm1544_vm0, %v16820_v30 }
 0x1e1   :  { %2217 = vmatmul.mubr.bf16.gmra.mrb[76].mxu0 %v16822_v31  ;;  %2923 = vmatmul.mubr.bf16.gmra.mrb[76].mxu1 %v16822_v31  ;;  %v16850_v31 = vld [vmem:[%s23422_s0 + $0x3ac] ss:$16 sps:$4 sm:$0xff]  }
 0x1e2   :  { %14114 = vmatprep.mubr.msk.bf16.mxu0 %vm1544_vm0, %v16823_v32  ;;  %14146 = vmatprep.mubr.msk.bf16.mxu1 %vm1544_vm0, %v16823_v32 }
 0x1e9   :  { %2227 = vmatmul.mubr.bf16.gmra.mrb[80].mxu0 %v16825_v33  ;;  %2933 = vmatmul.mubr.bf16.gmra.mrb[80].mxu1 %v16825_v33 }
 0x1ea   :  { %14115 = vmatprep.mubr.msk.bf16.mxu0 %vm1544_vm0, %v16826_v34  ;;  %14147 = vmatprep.mubr.msk.bf16.mxu1 %vm1544_vm0, %v16826_v34 }
 0x1f1   :  { %2237 = vmatmul.mubr.bf16.gmra.mrb[84].mxu0 %v16828_v35  ;;  %2943 = vmatmul.mubr.bf16.gmra.mrb[84].mxu1 %v16828_v35 }
 0x1f2   :  { %14116 = vmatprep.mubr.msk.bf16.mxu0 %vm1544_vm0, %v16829_v36  ;;  %14148 = vmatprep.mubr.msk.bf16.mxu1 %vm1544_vm0, %v16829_v36 }
 0x1f9   :  { %2247 = vmatmul.mubr.bf16.gmra.mrb[88].mxu0 %v16831_v37  ;;  %2953 = vmatmul.mubr.bf16.gmra.mrb[88].mxu1 %v16831_v37 }
 0x1fa   :  { %14117 = vmatprep.mubr.msk.bf16.mxu0 %vm1544_vm0, %v16832_v38  ;;  %14149 = vmatprep.mubr.msk.bf16.mxu1 %vm1544_vm0, %v16832_v38 }
 0x201   :  { %2257 = vmatmul.mubr.bf16.gmra.mrb[92].mxu0 %v16834_v39  ;;  %2963 = vmatmul.mubr.bf16.gmra.mrb[92].mxu1 %v16834_v39 }
 0x202   :  { %14118 = vmatprep.mubr.msk.bf16.mxu0 %vm1544_vm0, %v16835_v40  ;;  %14150 = vmatprep.mubr.msk.bf16.mxu1 %vm1544_vm0, %v16835_v40 }
 0x209   :  { %2267 = vmatmul.mubr.bf16.gmra.mrb[96].mxu0 %v16837_v41  ;;  %2973 = vmatmul.mubr.bf16.gmra.mrb[96].mxu1 %v16837_v41 }
 0x20a   :  { %14119 = vmatprep.mubr.msk.bf16.mxu0 %vm1544_vm0, %v16838_v42  ;;  %14151 = vmatprep.mubr.msk.bf16.mxu1 %vm1544_vm0, %v16838_v42 }
 0x211   :  { %2277 = vmatmul.mubr.bf16.gmra.mrb[100].mxu0 %v16840_v43  ;;  %2983 = vmatmul.mubr.bf16.gmra.mrb[100].mxu1 %v16840_v43 }
 0x212   :  { %14120 = vmatprep.mubr.msk.bf16.mxu0 %vm1544_vm0, %v16841_v45  ;;  %14152 = vmatprep.mubr.msk.bf16.mxu1 %vm1544_vm0, %v16841_v45 }
 0x219   :  { %2287 = vmatmul.mubr.bf16.gmra.mrb[104].mxu0 %v16843_v47  ;;  %2993 = vmatmul.mubr.bf16.gmra.mrb[104].mxu1 %v16843_v47 }
 0x21a   :  { %14121 = vmatprep.mubr.msk.bf16.mxu0 %vm1544_vm0, %v16844_v53  ;;  %14153 = vmatprep.mubr.msk.bf16.mxu1 %vm1544_vm0, %v16844_v53 }
 0x21c   :  { %v2028_v58 = vpop.f32.mrb[0].mxu0  ;;  %v2734_v59 = vpop.f32.mrb[0].mxu1 }
 0x21d   :  { %v15436_v60 = vadd.f32 %v2028_v58, %v18731_v54  ;;  %v15564_v61 = vadd.f32 %v2734_v59, %v18735_v55  ;;  %v2030_v62 = vpop.f32.mrb[1].mxu0  ;;  %v2736_v63 = vpop.f32.mrb[1].mxu1 }
 0x21e   :  { %v15437_v1 = vadd.f32 %v2030_v62, %v18739_v56  ;;  %v15565_v2 = vadd.f32 %v2736_v63, %v18741_v57  ;;  %v2032_v3 = vpop.f32.mrb[2].mxu0  ;;  %v2738_v4 = vpop.f32.mrb[2].mxu1 }
 0x21f   :  { %v15438_v6 = vadd.f32 %v2032_v3, %v18731_v54  ;;  %v15566_v7 = vadd.f32 %v2738_v4, %v18735_v55  ;;  %v2034_v8 = vpop.f32.mrb[3].mxu0  ;;  %v2740_v9 = vpop.f32.mrb[3].mxu1  ;;  %v3053_v12 = vmax.f32 %v15436_v60, 0.0  ;;  %v3055_v13 = vmax.f32 %v15564_v61, 0.0  ;;  %v16852_v60 = vld [vmem:[%s23422_s0 + $0x3a8] ss:$16 sps:$4 sm:$0xff]  }
 0x220   :  { %v15439_v10 = vadd.f32 %v2034_v8, %v18739_v56  ;;  %v15567_v11 = vadd.f32 %v2740_v9, %v18741_v57  ;;  %v3054_v16 = vmax.f32 %v15437_v1, 0.0  ;;  %v3056_v18 = vmax.f32 %v15565_v2, 0.0  ;;  %v16853_v1 = vld [vmem:[%s23422_s0 + $0x3cc] ss:$16 sps:$4 sm:$0xff]  }
 0x221   :  { %v3057_v14 = vmax.f32 %v15438_v6, 0.0  ;;  %v3059_v15 = vmax.f32 %v15566_v7, 0.0  ;;  %2297 = vmatmul.mubr.bf16.gmra.mrb[108].mxu0 %v16846_v0  ;;  %3003 = vmatmul.mubr.bf16.gmra.mrb[108].mxu1 %v16846_v0 }
 0x222   :  { %v3058_v17 = vmax.f32 %v15439_v10, 0.0  ;;  %v3060_v19 = vmax.f32 %v15567_v11, 0.0  ;;  %14122 = vmatprep.mubr.msk.bf16.mxu0 %vm1544_vm0, %v16847_v5  ;;  %14154 = vmatprep.mubr.msk.bf16.mxu1 %vm1544_vm0, %v16847_v5 }
 0x223   :  { %v18761_v20 = vpack.c.bf16 %v3057_v14, %v3053_v12  ;;  %v18763_v21 = vpack.c.bf16 %v3059_v15, %v3055_v13 }
 0x224   :  { %v2038_v22 = vpop.f32.mrb[4].mxu0  ;;  %v2744_v23 = vpop.f32.mrb[4].mxu1  ;;  %v18765_v24 = vpack.c.bf16 %v3058_v17, %v3054_v16  ;;  %v18767_v25 = vpack.c.bf16 %v3060_v19, %v3056_v18 }
 0x225   :  { %v15440_v27 = vadd.f32 %v2038_v22, %v18731_v54  ;;  %v15568_v28 = vadd.f32 %v2744_v23, %v18735_v55  ;;  %v2040_v29 = vpop.f32.mrb[5].mxu0  ;;  %v2746_v30 = vpop.f32.mrb[5].mxu1 }
 0x226   :  { %v15441_v32 = vadd.f32 %v2040_v29, %v18739_v56  ;;  %v15569_v33 = vadd.f32 %v2746_v30, %v18741_v57  ;;  %v2042_v34 = vpop.f32.mrb[6].mxu0  ;;  %v2748_v35 = vpop.f32.mrb[6].mxu1  ;;  %3773 = vmatprep.subr.bf16.mxu0 %v18765_v24  ;;  %4119 = vmatprep.subr.bf16.mxu1 %v18767_v25  ;;  %v16855_v30 = vld [vmem:[%s23422_s0 + $0x3c8] ss:$16 sps:$4 sm:$0xff]  }
 0x227   :  { %v15442_v36 = vadd.f32 %v2042_v34, %v18731_v54  ;;  %v15570_v37 = vadd.f32 %v2748_v35, %v18735_v55  ;;  %v2044_v38 = vpop.f32.mrb[7].mxu0  ;;  %v2750_v39 = vpop.f32.mrb[7].mxu1  ;;  %3774 = vmatpush1.bf16.msra.mxu0 %v18761_v20  ;;  %4120 = vmatpush1.bf16.msra.mxu1 %v18763_v21  ;;  %v3061_v40 = vmax.f32 %v15440_v27, 0.0  ;;  %v3063_v41 = vmax.f32 %v15568_v28, 0.0  ;;  %v16856_v35 = vld [vmem:[%s23422_s0 + $0x3ec] ss:$16 sps:$4 sm:$0xff]  }
 0x228   :  { %v15443_v42 = vadd.f32 %v2044_v38, %v18739_v56  ;;  %v15571_v43 = vadd.f32 %v2750_v39, %v18741_v57  ;;  %v3062_v47 = vmax.f32 %v15441_v32, 0.0  ;;  %v3064_v52 = vmax.f32 %v15569_v33, 0.0 }
 0x229   :  { %v3065_v44 = vmax.f32 %v15442_v36, 0.0  ;;  %v3067_v45 = vmax.f32 %v15570_v37, 0.0  ;;  %2307 = vmatmul.mubr.bf16.gmra.mrb[112].mxu0 %v16849_v26  ;;  %3013 = vmatmul.mubr.bf16.gmra.mrb[112].mxu1 %v16849_v26 }
 0x22a   :  { %v3066_v50 = vmax.f32 %v15443_v42, 0.0  ;;  %v3068_v53 = vmax.f32 %v15571_v43, 0.0  ;;  %14123 = vmatprep.mubr.msk.bf16.mxu0 %vm1544_vm0, %v16850_v31  ;;  %14155 = vmatprep.mubr.msk.bf16.mxu1 %vm1544_vm0, %v16850_v31 }
 0x22b   :  { %v18789_v58 = vpack.c.bf16 %v3065_v44, %v3061_v40  ;;  %v18791_v59 = vpack.c.bf16 %v3067_v45, %v3063_v41 }
 0x22c   :  { %v2048_v61 = vpop.f32.mrb[8].mxu0  ;;  %v2754_v62 = vpop.f32.mrb[8].mxu1  ;;  %v18796_v63 = vpack.c.bf16 %v3066_v50, %v3062_v47  ;;  %v18798_v0 = vpack.c.bf16 %v3068_v53, %v3064_v52 }
 0x22d   :  { %v15444_v2 = vadd.f32 %v2048_v61, %v18731_v54  ;;  %v15572_v3 = vadd.f32 %v2754_v62, %v18735_v55  ;;  %v2050_v4 = vpop.f32.mrb[9].mxu0  ;;  %v2756_v5 = vpop.f32.mrb[9].mxu1 }
 0x22e   :  { %v15445_v6 = vadd.f32 %v2050_v4, %v18739_v56  ;;  %v15573_v7 = vadd.f32 %v2756_v5, %v18741_v57  ;;  %v2052_v8 = vpop.f32.mrb[10].mxu0  ;;  %v2758_v9 = vpop.f32.mrb[10].mxu1  ;;  %3775 = vmatprep.subr.bf16.mxu0 %v18796_v63  ;;  %4121 = vmatprep.subr.bf16.mxu1 %v18798_v0 }
 0x22f   :  { %v15446_v10 = vadd.f32 %v2052_v8, %v18731_v54  ;;  %v15574_v11 = vadd.f32 %v2758_v9, %v18735_v55  ;;  %v2054_v12 = vpop.f32.mrb[11].mxu0  ;;  %v2760_v13 = vpop.f32.mrb[11].mxu1  ;;  %3776 = vmatpush1.bf16.msra.mxu0 %v18789_v58  ;;  %4122 = vmatpush1.bf16.msra.mxu1 %v18791_v59  ;;  %v3069_v14 = vmax.f32 %v15444_v2, 0.0  ;;  %v3071_v15 = vmax.f32 %v15572_v3, 0.0 }
 0x230   :  { %v15447_v16 = vadd.f32 %v2054_v12, %v18739_v56  ;;  %v15575_v17 = vadd.f32 %v2760_v13, %v18741_v57  ;;  %v3070_v22 = vmax.f32 %v15445_v6, 0.0  ;;  %v3072_v26 = vmax.f32 %v15573_v7, 0.0 }
 0x231   :  { %v3073_v18 = vmax.f32 %v15446_v10, 0.0  ;;  %v3075_v19 = vmax.f32 %v15574_v11, 0.0  ;;  %2317 = vmatmul.mubr.bf16.gmra.mrb[116].mxu0 %v16852_v60  ;;  %3023 = vmatmul.mubr.bf16.gmra.mrb[116].mxu1 %v16852_v60 }
 0x232   :  { %v3074_v23 = vmax.f32 %v15447_v16, 0.0  ;;  %v3076_v27 = vmax.f32 %v15575_v17, 0.0  ;;  %14124 = vmatprep.mubr.msk.bf16.mxu0 %vm1544_vm0, %v16853_v1  ;;  %14156 = vmatprep.mubr.msk.bf16.mxu1 %vm1544_vm0, %v16853_v1  ;;  %v16858_v16 = vld [vmem:[%s23422_s0 + $0x3e8] ss:$16 sps:$4 sm:$0xff]   ;;  %s23540_s0 = sld [smem:[#allocation91_spill]] }
 0x233   :  { %v18817_v28 = vpack.c.bf16 %v3073_v18, %v3069_v14  ;;  %v18819_v29 = vpack.c.bf16 %v3075_v19, %v3071_v15 }
 0x234   :  { %v2058_v31 = vpop.f32.mrb[12].mxu0  ;;  %v2764_v32 = vpop.f32.mrb[12].mxu1  ;;  %v18824_v33 = vpack.c.bf16 %v3074_v23, %v3070_v22  ;;  %v18826_v34 = vpack.c.bf16 %v3076_v27, %v3072_v26  ;;  %v16861_v23 = vld [vmem:[%s23425_s21 + $0x4] ss:$16 sps:$4 sm:$0xff]  }
 0x235   :  { %v15448_v36 = vadd.f32 %v2058_v31, %v18731_v54  ;;  %v15576_v37 = vadd.f32 %v2764_v32, %v18735_v55  ;;  %v2060_v38 = vpop.f32.mrb[13].mxu0  ;;  %v2766_v39 = vpop.f32.mrb[13].mxu1 }
 0x236   :  { %v15449_v40 = vadd.f32 %v2060_v38, %v18739_v56  ;;  %v15577_v41 = vadd.f32 %v2766_v39, %v18741_v57  ;;  %v2062_v42 = vpop.f32.mrb[14].mxu0  ;;  %v2768_v43 = vpop.f32.mrb[14].mxu1  ;;  %3777 = vmatprep.subr.bf16.mxu0 %v18824_v33  ;;  %4123 = vmatprep.subr.bf16.mxu1 %v18826_v34 }
 0x237   :  { %v15450_v44 = vadd.f32 %v2062_v42, %v18731_v54  ;;  %v15578_v45 = vadd.f32 %v2768_v43, %v18735_v55  ;;  %v2064_v47 = vpop.f32.mrb[15].mxu0  ;;  %v2770_v50 = vpop.f32.mrb[15].mxu1  ;;  %3778 = vmatpush1.bf16.msra.mxu0 %v18817_v28  ;;  %4124 = vmatpush1.bf16.msra.mxu1 %v18819_v29  ;;  %v3077_v60 = vmax.f32 %v15448_v36, 0.0  ;;  %v3079_v61 = vmax.f32 %v15576_v37, 0.0 }
 0x238   :  { %v15451_v52 = vadd.f32 %v2064_v47, %v18739_v56  ;;  %v15579_v53 = vadd.f32 %v2770_v50, %v18741_v57  ;;  %v3078_v2 = vmax.f32 %v15449_v40, 0.0  ;;  %v3080_v4 = vmax.f32 %v15577_v41, 0.0 }
 0x239   :  { %v3081_v62 = vmax.f32 %v15450_v44, 0.0  ;;  %v3083_v1 = vmax.f32 %v15578_v45, 0.0  ;;  %2327 = vmatmul.mubr.bf16.gmra.mrb[120].mxu0 %v16855_v30  ;;  %3033 = vmatmul.mubr.bf16.gmra.mrb[120].mxu1 %v16855_v30 }
 0x23a   :  { %v3082_v3 = vmax.f32 %v15451_v52, 0.0  ;;  %v3084_v5 = vmax.f32 %v15579_v53, 0.0  ;;  %14125 = vmatprep.mubr.msk.bf16.mxu0 %vm1544_vm0, %v16856_v35  ;;  %14157 = vmatprep.mubr.msk.bf16.mxu1 %vm1544_vm0, %v16856_v35 }
 0x23b   :  { %v18845_v6 = vpack.c.bf16 %v3081_v62, %v3077_v60  ;;  %v18847_v7 = vpack.c.bf16 %v3083_v1, %v3079_v61 }
 0x23c   :  { %v2068_v8 = vpop.f32.mrb[16].mxu0  ;;  %v2774_v9 = vpop.f32.mrb[16].mxu1  ;;  %v18849_v10 = vpack.c.bf16 %v3082_v3, %v3078_v2  ;;  %v18851_v11 = vpack.c.bf16 %v3084_v5, %v3080_v4 }
 0x23d   :  { %v15452_v12 = vadd.f32 %v2068_v8, %v18731_v54  ;;  %v15580_v13 = vadd.f32 %v2774_v9, %v18735_v55  ;;  %v2070_v14 = vpop.f32.mrb[17].mxu0  ;;  %v2776_v15 = vpop.f32.mrb[17].mxu1 }
 0x23e   :  { %v15453_v17 = vadd.f32 %v2070_v14, %v18739_v56  ;;  %v15581_v18 = vadd.f32 %v2776_v15, %v18741_v57  ;;  %v2072_v19 = vpop.f32.mrb[18].mxu0  ;;  %v2778_v22 = vpop.f32.mrb[18].mxu1  ;;  %3779 = vmatprep.subr.bf16.mxu0 %v18849_v10  ;;  %4125 = vmatprep.subr.bf16.mxu1 %v18851_v11 }
 0x23f   :  { %v15454_v26 = vadd.f32 %v2072_v19, %v18731_v54  ;;  %v15582_v27 = vadd.f32 %v2778_v22, %v18735_v55  ;;  %v2074_v30 = vpop.f32.mrb[19].mxu0  ;;  %v2780_v31 = vpop.f32.mrb[19].mxu1  ;;  %3780 = vmatpush1.bf16.msra.mxu0 %v18845_v6  ;;  %4126 = vmatpush1.bf16.msra.mxu1 %v18847_v7  ;;  %v3085_v36 = vmax.f32 %v15452_v12, 0.0  ;;  %v3087_v37 = vmax.f32 %v15580_v13, 0.0 }
 0x240   :  { %v15455_v32 = vadd.f32 %v2074_v30, %v18739_v56  ;;  %v15583_v35 = vadd.f32 %v2780_v31, %v18741_v57  ;;  %v3086_v40 = vmax.f32 %v15453_v17, 0.0  ;;  %v3088_v42 = vmax.f32 %v15581_v18, 0.0 }
 0x241   :  { %v3089_v38 = vmax.f32 %v15454_v26, 0.0  ;;  %v3091_v39 = vmax.f32 %v15582_v27, 0.0  ;;  %2337 = vmatmul.mubr.bf16.gmra.mrb[124].mxu0 %v16858_v16  ;;  %3043 = vmatmul.mubr.bf16.gmra.mrb[124].mxu1 %v16858_v16 }
 0x242   :  { %v3090_v41 = vmax.f32 %v15455_v32, 0.0  ;;  %v3092_v43 = vmax.f32 %v15583_v35, 0.0  ;;  %3805 = vmatprep.mubr.bf16.mxu0 %v16861_v23  ;;  %4151 = vmatprep.mubr.bf16.mxu1 %v16861_v23 }
 0x243   :  { %v18871_v44 = vpack.c.bf16 %v3089_v38, %v3085_v36  ;;  %v18873_v45 = vpack.c.bf16 %v3091_v39, %v3087_v37 }
 0x244   :  { %v2078_v47 = vpop.f32.mrb[20].mxu0  ;;  %v2784_v50 = vpop.f32.mrb[20].mxu1  ;;  %v18875_v52 = vpack.c.bf16 %v3090_v41, %v3086_v40  ;;  %v18877_v53 = vpack.c.bf16 %v3092_v43, %v3088_v42 }
 0x245   :  { %v15456_v60 = vadd.f32 %v2078_v47, %v18731_v54  ;;  %v15584_v61 = vadd.f32 %v2784_v50, %v18735_v55  ;;  %v2080_v62 = vpop.f32.mrb[21].mxu0  ;;  %v2786_v1 = vpop.f32.mrb[21].mxu1 }
 0x246   :  { %v15457_v2 = vadd.f32 %v2080_v62, %v18739_v56  ;;  %v15585_v3 = vadd.f32 %v2786_v1, %v18741_v57  ;;  %v2082_v4 = vpop.f32.mrb[22].mxu0  ;;  %v2788_v5 = vpop.f32.mrb[22].mxu1  ;;  %3781 = vmatprep.subr.bf16.mxu0 %v18875_v52  ;;  %4127 = vmatprep.subr.bf16.mxu1 %v18877_v53 }
 0x247   :  { %v15458_v8 = vadd.f32 %v2082_v4, %v18731_v54  ;;  %v15586_v9 = vadd.f32 %v2788_v5, %v18735_v55  ;;  %v2084_v12 = vpop.f32.mrb[23].mxu0  ;;  %v2790_v13 = vpop.f32.mrb[23].mxu1  ;;  %3782 = vmatpush1.bf16.msra.mxu0 %v18871_v44  ;;  %4128 = vmatpush1.bf16.msra.mxu1 %v18873_v45  ;;  %v3093_v16 = vmax.f32 %v15456_v60, 0.0  ;;  %v3095_v17 = vmax.f32 %v15584_v61, 0.0 }
 0x248   :  { %v15459_v14 = vadd.f32 %v2084_v12, %v18739_v56  ;;  %v15587_v15 = vadd.f32 %v2790_v13, %v18741_v57  ;;  %v3094_v22 = vmax.f32 %v15457_v2, 0.0  ;;  %v3096_v26 = vmax.f32 %v15585_v3, 0.0 }
 0x249   :  { %v3097_v18 = vmax.f32 %v15458_v8, 0.0  ;;  %v3099_v19 = vmax.f32 %v15586_v9, 0.0 }
 0x24a   :  { %v3098_v23 = vmax.f32 %v15459_v14, 0.0  ;;  %v3100_v27 = vmax.f32 %v15587_v15, 0.0 }
 0x24b   :  { %v18891_v30 = vpack.c.bf16 %v3097_v18, %v3093_v16  ;;  %v18893_v31 = vpack.c.bf16 %v3099_v19, %v3095_v17 }
 0x24c   :  { %v2088_v32 = vpop.f32.mrb[24].mxu0  ;;  %v2794_v35 = vpop.f32.mrb[24].mxu1  ;;  %v18895_v36 = vpack.c.bf16 %v3098_v23, %v3094_v22  ;;  %v18897_v37 = vpack.c.bf16 %v3100_v27, %v3096_v26 }
 0x24d   :  { %v15460_v38 = vadd.f32 %v2088_v32, %v18731_v54  ;;  %v15588_v39 = vadd.f32 %v2794_v35, %v18735_v55  ;;  %v2090_v40 = vpop.f32.mrb[25].mxu0  ;;  %v2796_v41 = vpop.f32.mrb[25].mxu1 }
 0x24e   :  { %v15461_v42 = vadd.f32 %v2090_v40, %v18739_v56  ;;  %v15589_v43 = vadd.f32 %v2796_v41, %v18741_v57  ;;  %v2092_v47 = vpop.f32.mrb[26].mxu0  ;;  %v2798_v50 = vpop.f32.mrb[26].mxu1  ;;  %3783 = vmatprep.subr.bf16.mxu0 %v18895_v36  ;;  %4129 = vmatprep.subr.bf16.mxu1 %v18897_v37 }
 0x24f   :  { %v15462_v60 = vadd.f32 %v2092_v47, %v18731_v54  ;;  %v15590_v61 = vadd.f32 %v2798_v50, %v18735_v55  ;;  %v2094_v62 = vpop.f32.mrb[27].mxu0  ;;  %v2800_v1 = vpop.f32.mrb[27].mxu1  ;;  %3784 = vmatpush1.bf16.msra.mxu0 %v18891_v30  ;;  %4130 = vmatpush1.bf16.msra.mxu1 %v18893_v31  ;;  %v3101_v4 = vmax.f32 %v15460_v38, 0.0  ;;  %v3103_v5 = vmax.f32 %v15588_v39, 0.0 }
 0x250   :  { %v15463_v2 = vadd.f32 %v2094_v62, %v18739_v56  ;;  %v15591_v3 = vadd.f32 %v2800_v1, %v18741_v57  ;;  %v3102_v12 = vmax.f32 %v15461_v42, 0.0  ;;  %v3104_v14 = vmax.f32 %v15589_v43, 0.0 }
 0x251   :  { %v3105_v8 = vmax.f32 %v15462_v60, 0.0  ;;  %v3107_v9 = vmax.f32 %v15590_v61, 0.0 }
 0x252   :  { %v3106_v13 = vmax.f32 %v15463_v2, 0.0  ;;  %v3108_v15 = vmax.f32 %v15591_v3, 0.0 }
 0x253   :  { %v18911_v16 = vpack.c.bf16 %v3105_v8, %v3101_v4  ;;  %v18913_v17 = vpack.c.bf16 %v3107_v9, %v3103_v5 }
 0x254   :  { %v2098_v18 = vpop.f32.mrb[28].mxu0  ;;  %v2804_v19 = vpop.f32.mrb[28].mxu1  ;;  %v18915_v22 = vpack.c.bf16 %v3106_v13, %v3102_v12  ;;  %v18917_v23 = vpack.c.bf16 %v3108_v15, %v3104_v14 }
 0x255   :  { %v15464_v26 = vadd.f32 %v2098_v18, %v18731_v54  ;;  %v15592_v27 = vadd.f32 %v2804_v19, %v18735_v55  ;;  %v2100_v32 = vpop.f32.mrb[29].mxu0  ;;  %v2806_v35 = vpop.f32.mrb[29].mxu1 }
 0x256   :  { %v15465_v38 = vadd.f32 %v2100_v32, %v18739_v56  ;;  %v15593_v39 = vadd.f32 %v2806_v35, %v18741_v57  ;;  %v2102_v40 = vpop.f32.mrb[30].mxu0  ;;  %v2808_v41 = vpop.f32.mrb[30].mxu1  ;;  %3785 = vmatprep.subr.bf16.mxu0 %v18915_v22  ;;  %4131 = vmatprep.subr.bf16.mxu1 %v18917_v23 }
 0x257   :  { %v15466_v42 = vadd.f32 %v2102_v40, %v18731_v54  ;;  %v15594_v43 = vadd.f32 %v2808_v41, %v18735_v55  ;;  %v2104_v47 = vpop.f32.mrb[31].mxu0  ;;  %v2810_v50 = vpop.f32.mrb[31].mxu1  ;;  %3786 = vmatpush1.bf16.msra.mxu0 %v18911_v16  ;;  %4132 = vmatpush1.bf16.msra.mxu1 %v18913_v17  ;;  %v3109_v62 = vmax.f32 %v15464_v26, 0.0  ;;  %v3111_v1 = vmax.f32 %v15592_v27, 0.0 }
 0x258   :  { %v15467_v60 = vadd.f32 %v2104_v47, %v18739_v56  ;;  %v15595_v61 = vadd.f32 %v2810_v50, %v18741_v57  ;;  %v3110_v4 = vmax.f32 %v15465_v38, 0.0  ;;  %v3112_v8 = vmax.f32 %v15593_v39, 0.0 }
 0x259   :  { %v3113_v2 = vmax.f32 %v15466_v42, 0.0  ;;  %v3115_v3 = vmax.f32 %v15594_v43, 0.0 }
 0x25a   :  { %v3114_v5 = vmax.f32 %v15467_v60, 0.0  ;;  %v3116_v9 = vmax.f32 %v15595_v61, 0.0 }
 0x25b   :  { %v18931_v12 = vpack.c.bf16 %v3113_v2, %v3109_v62  ;;  %v18933_v13 = vpack.c.bf16 %v3115_v3, %v3111_v1 }
 0x25c   :  { %v2108_v14 = vpop.f32.mrb[32].mxu0  ;;  %v2814_v15 = vpop.f32.mrb[32].mxu1  ;;  %v18935_v18 = vpack.c.bf16 %v3114_v5, %v3110_v4  ;;  %v18937_v19 = vpack.c.bf16 %v3116_v9, %v3112_v8 }
 0x25d   :  { %v15468_v32 = vadd.f32 %v2108_v14, %v18731_v54  ;;  %v15596_v26 = vadd.f32 %v2814_v15, %v18735_v55  ;;  %v2110_v27 = vpop.f32.mrb[33].mxu0  ;;  %v2816_v35 = vpop.f32.mrb[33].mxu1 }
 0x25e   :  { %v15469_v38 = vadd.f32 %v2110_v27, %v18739_v56  ;;  %v15597_v39 = vadd.f32 %v2816_v35, %v18741_v57  ;;  %v2112_v40 = vpop.f32.mrb[34].mxu0  ;;  %v2818_v41 = vpop.f32.mrb[34].mxu1  ;;  %3787 = vmatprep.subr.bf16.mxu0 %v18935_v18  ;;  %4133 = vmatprep.subr.bf16.mxu1 %v18937_v19 }
 0x25f   :  { %v15470_v42 = vadd.f32 %v2112_v40, %v18731_v54  ;;  %v15598_v43 = vadd.f32 %v2818_v41, %v18735_v55  ;;  %v2114_v47 = vpop.f32.mrb[35].mxu0  ;;  %v2820_v50 = vpop.f32.mrb[35].mxu1  ;;  %3788 = vmatpush1.bf16.msra.mxu0 %v18931_v12  ;;  %4134 = vmatpush1.bf16.msra.mxu1 %v18933_v13  ;;  %v3117_v62 = vmax.f32 %v15468_v32, 0.0  ;;  %v3119_v1 = vmax.f32 %v15596_v26, 0.0 }
 0x260   :  { %v15471_v60 = vadd.f32 %v2114_v47, %v18739_v56  ;;  %v15599_v61 = vadd.f32 %v2820_v50, %v18741_v57  ;;  %v3118_v4 = vmax.f32 %v15469_v38, 0.0  ;;  %v3120_v8 = vmax.f32 %v15597_v39, 0.0 }
 0x261   :  { %v3121_v2 = vmax.f32 %v15470_v42, 0.0  ;;  %v3123_v3 = vmax.f32 %v15598_v43, 0.0 }
 0x262   :  { %v3122_v5 = vmax.f32 %v15471_v60, 0.0  ;;  %v3124_v9 = vmax.f32 %v15599_v61, 0.0 }
 0x263   :  { %v18951_v14 = vpack.c.bf16 %v3121_v2, %v3117_v62  ;;  %v18953_v15 = vpack.c.bf16 %v3123_v3, %v3119_v1 }
 0x264   :  { %v2118_v27 = vpop.f32.mrb[36].mxu0  ;;  %v2824_v35 = vpop.f32.mrb[36].mxu1  ;;  %v18955_v40 = vpack.c.bf16 %v3122_v5, %v3118_v4  ;;  %v18957_v41 = vpack.c.bf16 %v3124_v9, %v3120_v8 }
 0x265   :  { %v15472_v47 = vadd.f32 %v2118_v27, %v18731_v54  ;;  %v15600_v32 = vadd.f32 %v2824_v35, %v18735_v55  ;;  %v2120_v26 = vpop.f32.mrb[37].mxu0  ;;  %v2826_v42 = vpop.f32.mrb[37].mxu1 }
 0x266   :  { %v15473_v38 = vadd.f32 %v2120_v26, %v18739_v56  ;;  %v15601_v39 = vadd.f32 %v2826_v42, %v18741_v57  ;;  %v2122_v43 = vpop.f32.mrb[38].mxu0  ;;  %v2828_v50 = vpop.f32.mrb[38].mxu1  ;;  %3789 = vmatprep.subr.bf16.mxu0 %v18955_v40  ;;  %4135 = vmatprep.subr.bf16.mxu1 %v18957_v41 }
 0x267   :  { %v15474_v60 = vadd.f32 %v2122_v43, %v18731_v54  ;;  %v15602_v61 = vadd.f32 %v2828_v50, %v18735_v55  ;;  %v2124_v62 = vpop.f32.mrb[39].mxu0  ;;  %v2830_v1 = vpop.f32.mrb[39].mxu1  ;;  %3790 = vmatpush1.bf16.msra.mxu0 %v18951_v14  ;;  %4136 = vmatpush1.bf16.msra.mxu1 %v18953_v15  ;;  %v3125_v4 = vmax.f32 %v15472_v47, 0.0  ;;  %v3127_v5 = vmax.f32 %v15600_v32, 0.0 }
 0x268   :  { %v15475_v2 = vadd.f32 %v2124_v62, %v18739_v56  ;;  %v15603_v3 = vadd.f32 %v2830_v1, %v18741_v57  ;;  %v3126_v27 = vmax.f32 %v15473_v38, 0.0  ;;  %v3128_v26 = vmax.f32 %v15601_v39, 0.0 }
 0x269   :  { %v3129_v8 = vmax.f32 %v15474_v60, 0.0  ;;  %v3131_v9 = vmax.f32 %v15602_v61, 0.0 }
 0x26a   :  { %v3130_v35 = vmax.f32 %v15475_v2, 0.0  ;;  %v3132_v42 = vmax.f32 %v15603_v3, 0.0 }
 0x26b   :  { %v18971_v43 = vpack.c.bf16 %v3129_v8, %v3125_v4  ;;  %v18973_v50 = vpack.c.bf16 %v3131_v9, %v3127_v5 }
 0x26c   :  { %v2128_v51 = vpop.f32.mrb[40].mxu0  ;;  %v2834_v48 = vpop.f32.mrb[40].mxu1  ;;  %v18975_v49 = vpack.c.bf16 %v3130_v35, %v3126_v27  ;;  %v18977_v46 = vpack.c.bf16 %v3132_v42, %v3128_v26 }
 0x26d   :  { %23426 = vst [vmem:[#allocation3_spill] sm:$0xff] %v18971_v43  ;;  %23427 = vst [vmem:[#allocation4_spill] sm:$0xff] %v18973_v50  ;;  %v15476_v62 = vadd.f32 %v2128_v51, %v18731_v54  ;;  %v2130_v47 = vpop.f32.mrb[41].mxu0  ;;  %v2836_v32 = vpop.f32.mrb[41].mxu1  ;;  %v15604_v60 = vadd.f32 %v2834_v48, %v18735_v55 }
 0x26e   :  { %23428 = vst [vmem:[#allocation5_spill] sm:$0xff] %v18975_v49  ;;  %23429 = vst [vmem:[#allocation6_spill] sm:$0xff] %v18977_v46  ;;  %v15477_v38 = vadd.f32 %v2130_v47, %v18739_v56  ;;  %v2132_v39 = vpop.f32.mrb[42].mxu0  ;;  %v2838_v61 = vpop.f32.mrb[42].mxu1  ;;  %3791 = vmatprep.subr.bf16.mxu0 %v18975_v49  ;;  %4137 = vmatprep.subr.bf16.mxu1 %v18977_v46  ;;  %v15605_v1 = vadd.f32 %v2836_v32, %v18741_v57 }
 0x26f   :  { %v15478_v2 = vadd.f32 %v2132_v39, %v18731_v54  ;;  %v2134_v3 = vpop.f32.mrb[43].mxu0  ;;  %v2840_v4 = vpop.f32.mrb[43].mxu1  ;;  %3792 = vmatpush1.bf16.msra.mxu0 %v18971_v43  ;;  %4138 = vmatpush1.bf16.msra.mxu1 %v18973_v50  ;;  %v15606_v48 = vadd.f32 %v2838_v61, %v18735_v55  ;;  %v3133_v8 = vmax.f32 %v15476_v62, 0.0  ;;  %v3135_v27 = vmax.f32 %v15604_v60, 0.0 }
 0x270   :  { %v15479_v51 = vadd.f32 %v2134_v3, %v18739_v56  ;;  %v15607_v5 = vadd.f32 %v2840_v4, %v18741_v57  ;;  %v3134_v26 = vmax.f32 %v15477_v38, 0.0  ;;  %v3136_v47 = vmax.f32 %v15605_v1, 0.0 }
 0x271   :  { %v3137_v9 = vmax.f32 %v15478_v2, 0.0  ;;  %v3139_v35 = vmax.f32 %v15606_v48, 0.0 }
 0x272   :  { %v3138_v42 = vmax.f32 %v15479_v51, 0.0  ;;  %v3140_v32 = vmax.f32 %v15607_v5, 0.0 }
 0x273   :  { %v18991_v39 = vpack.c.bf16 %v3137_v9, %v3133_v8  ;;  %v18993_v46 = vpack.c.bf16 %v3139_v35, %v3135_v27 }
 0x274   :  { %v2138_v43 = vpop.f32.mrb[44].mxu0  ;;  %v2844_v50 = vpop.f32.mrb[44].mxu1  ;;  %v18995_v49 = vpack.c.bf16 %v3138_v42, %v3134_v26  ;;  %v18997_v61 = vpack.c.bf16 %v3140_v32, %v3136_v47 }
 0x275   :  { %23430 = vst [vmem:[#allocation7_spill] sm:$0xff] %v18991_v39  ;;  %23431 = vst [vmem:[#allocation8_spill] sm:$0xff] %v18993_v46  ;;  %v15480_v3 = vadd.f32 %v2138_v43, %v18731_v54  ;;  %v2140_v62 = vpop.f32.mrb[45].mxu0  ;;  %v2846_v2 = vpop.f32.mrb[45].mxu1  ;;  %v15608_v60 = vadd.f32 %v2844_v50, %v18735_v55 }
 0x276   :  { %23432 = vst [vmem:[#allocation9_spill] sm:$0xff] %v18995_v49  ;;  %23433 = vst [vmem:[#allocation10_spill] sm:$0xff] %v18997_v61  ;;  %v15481_v38 = vadd.f32 %v2140_v62, %v18739_v56  ;;  %v2142_v1 = vpop.f32.mrb[46].mxu0  ;;  %v2848_v4 = vpop.f32.mrb[46].mxu1  ;;  %3793 = vmatprep.subr.bf16.mxu0 %v18995_v49  ;;  %4139 = vmatprep.subr.bf16.mxu1 %v18997_v61  ;;  %v15609_v48 = vadd.f32 %v2846_v2, %v18741_v57 }
 0x277   :  { %v15482_v51 = vadd.f32 %v2142_v1, %v18731_v54  ;;  %v2144_v5 = vpop.f32.mrb[47].mxu0  ;;  %v2850_v8 = vpop.f32.mrb[47].mxu1  ;;  %3794 = vmatpush1.bf16.msra.mxu0 %v18991_v39  ;;  %4140 = vmatpush1.bf16.msra.mxu1 %v18993_v46  ;;  %v15610_v43 = vadd.f32 %v2848_v4, %v18735_v55  ;;  %v3141_v27 = vmax.f32 %v15480_v3, 0.0  ;;  %v3143_v26 = vmax.f32 %v15608_v60, 0.0 }
 0x278   :  { %v15483_v50 = vadd.f32 %v2144_v5, %v18739_v56  ;;  %v15611_v9 = vadd.f32 %v2850_v8, %v18741_v57  ;;  %v3142_v47 = vmax.f32 %v15481_v38, 0.0  ;;  %v3144_v62 = vmax.f32 %v15609_v48, 0.0 }
 0x279   :  { %v3145_v35 = vmax.f32 %v15482_v51, 0.0  ;;  %v3147_v42 = vmax.f32 %v15610_v43, 0.0 }
 0x27a   :  { %v3146_v32 = vmax.f32 %v15483_v50, 0.0  ;;  %v3148_v2 = vmax.f32 %v15611_v9, 0.0 }
 0x27b   :  { %v19011_v1 = vpack.c.bf16 %v3145_v35, %v3141_v27  ;;  %v19013_v61 = vpack.c.bf16 %v3147_v42, %v3143_v26 }
 0x27c   :  { %v2148_v39 = vpop.f32.mrb[48].mxu0  ;;  %v2854_v46 = vpop.f32.mrb[48].mxu1  ;;  %v19015_v49 = vpack.c.bf16 %v3146_v32, %v3142_v47  ;;  %v19017_v4 = vpack.c.bf16 %v3148_v2, %v3144_v62 }
 0x27d   :  { %23434 = vst [vmem:[#allocation11_spill] sm:$0xff] %v19011_v1  ;;  %23435 = vst [vmem:[#allocation12_spill] sm:$0xff] %v19013_v61  ;;  %v15484_v5 = vadd.f32 %v2148_v39, %v18731_v54  ;;  %v2150_v3 = vpop.f32.mrb[49].mxu0  ;;  %v2856_v51 = vpop.f32.mrb[49].mxu1  ;;  %v15612_v60 = vadd.f32 %v2854_v46, %v18735_v55 }
 0x27e   :  { %23436 = vst [vmem:[#allocation13_spill] sm:$0xff] %v19015_v49  ;;  %23437 = vst [vmem:[#allocation14_spill] sm:$0xff] %v19017_v4  ;;  %v15485_v38 = vadd.f32 %v2150_v3, %v18739_v56  ;;  %v2152_v48 = vpop.f32.mrb[50].mxu0  ;;  %v2858_v8 = vpop.f32.mrb[50].mxu1  ;;  %3795 = vmatprep.subr.bf16.mxu0 %v19015_v49  ;;  %4141 = vmatprep.subr.bf16.mxu1 %v19017_v4  ;;  %v15613_v43 = vadd.f32 %v2856_v51, %v18741_v57 }
 0x27f   :  { %v15486_v50 = vadd.f32 %v2152_v48, %v18731_v54  ;;  %v2154_v9 = vpop.f32.mrb[51].mxu0  ;;  %v2860_v27 = vpop.f32.mrb[51].mxu1  ;;  %3796 = vmatpush1.bf16.msra.mxu0 %v19011_v1  ;;  %4142 = vmatpush1.bf16.msra.mxu1 %v19013_v61  ;;  %v15614_v46 = vadd.f32 %v2858_v8, %v18735_v55  ;;  %v3149_v26 = vmax.f32 %v15484_v5, 0.0  ;;  %v3151_v47 = vmax.f32 %v15612_v60, 0.0 }
 0x280   :  { %v15487_v39 = vadd.f32 %v2154_v9, %v18739_v56  ;;  %v15615_v35 = vadd.f32 %v2860_v27, %v18741_v57  ;;  %v3150_v62 = vmax.f32 %v15485_v38, 0.0  ;;  %v3152_v3 = vmax.f32 %v15613_v43, 0.0 }
 0x281   :  { %v3153_v42 = vmax.f32 %v15486_v50, 0.0  ;;  %v3155_v32 = vmax.f32 %v15614_v46, 0.0 }
 0x282   :  { %v3154_v2 = vmax.f32 %v15487_v39, 0.0  ;;  %v3156_v51 = vmax.f32 %v15615_v35, 0.0 }
 0x283   :  { %v19031_v48 = vpack.c.bf16 %v3153_v42, %v3149_v26  ;;  %v19033_v4 = vpack.c.bf16 %v3155_v32, %v3151_v47 }
 0x284   :  { %v2158_v1 = vpop.f32.mrb[52].mxu0  ;;  %v2864_v61 = vpop.f32.mrb[52].mxu1  ;;  %v19035_v49 = vpack.c.bf16 %v3154_v2, %v3150_v62  ;;  %v19037_v8 = vpack.c.bf16 %v3156_v51, %v3152_v3 }
 0x285   :  { %23438 = vst [vmem:[#allocation15_spill] sm:$0xff] %v19031_v48  ;;  %23439 = vst [vmem:[#allocation16_spill] sm:$0xff] %v19033_v4  ;;  %v15488_v9 = vadd.f32 %v2158_v1, %v18731_v54  ;;  %v2160_v5 = vpop.f32.mrb[53].mxu0  ;;  %v2866_v50 = vpop.f32.mrb[53].mxu1  ;;  %v15616_v60 = vadd.f32 %v2864_v61, %v18735_v55 }
 0x286   :  { %23440 = vst [vmem:[#allocation17_spill] sm:$0xff] %v19035_v49  ;;  %23441 = vst [vmem:[#allocation18_spill] sm:$0xff] %v19037_v8  ;;  %v15489_v38 = vadd.f32 %v2160_v5, %v18739_v56  ;;  %v2162_v43 = vpop.f32.mrb[54].mxu0  ;;  %v2868_v27 = vpop.f32.mrb[54].mxu1  ;;  %3797 = vmatprep.subr.bf16.mxu0 %v19035_v49  ;;  %4143 = vmatprep.subr.bf16.mxu1 %v19037_v8  ;;  %v15617_v46 = vadd.f32 %v2866_v50, %v18741_v57 }
 0x287   :  { %v15490_v39 = vadd.f32 %v2162_v43, %v18731_v54  ;;  %v2164_v35 = vpop.f32.mrb[55].mxu0  ;;  %v2870_v26 = vpop.f32.mrb[55].mxu1  ;;  %3798 = vmatpush1.bf16.msra.mxu0 %v19031_v48  ;;  %4144 = vmatpush1.bf16.msra.mxu1 %v19033_v4  ;;  %v15618_v61 = vadd.f32 %v2868_v27, %v18735_v55  ;;  %v3157_v47 = vmax.f32 %v15488_v9, 0.0  ;;  %v3159_v62 = vmax.f32 %v15616_v60, 0.0 }
 0x288   :  { %v15491_v1 = vadd.f32 %v2164_v35, %v18739_v56  ;;  %v15619_v42 = vadd.f32 %v2870_v26, %v18741_v57  ;;  %v3158_v3 = vmax.f32 %v15489_v38, 0.0  ;;  %v3160_v5 = vmax.f32 %v15617_v46, 0.0 }
 0x289   :  { %v3161_v32 = vmax.f32 %v15490_v39, 0.0  ;;  %v3163_v2 = vmax.f32 %v15618_v61, 0.0 }
 0x28a   :  { %v3162_v51 = vmax.f32 %v15491_v1, 0.0  ;;  %v3164_v50 = vmax.f32 %v15619_v42, 0.0 }
 0x28b   :  { %v19051_v43 = vpack.c.bf16 %v3161_v32, %v3157_v47  ;;  %v19053_v8 = vpack.c.bf16 %v3163_v2, %v3159_v62 }
 0x28c   :  { %v2168_v48 = vpop.f32.mrb[56].mxu0  ;;  %v2874_v4 = vpop.f32.mrb[56].mxu1  ;;  %v19055_v49 = vpack.c.bf16 %v3162_v51, %v3158_v3  ;;  %v19057_v27 = vpack.c.bf16 %v3164_v50, %v3160_v5 }
 0x28d   :  { %23442 = vst [vmem:[#allocation19_spill] sm:$0xff] %v19051_v43  ;;  %23443 = vst [vmem:[#allocation20_spill] sm:$0xff] %v19053_v8  ;;  %v15492_v35 = vadd.f32 %v2168_v48, %v18731_v54  ;;  %v2170_v9 = vpop.f32.mrb[57].mxu0  ;;  %v2876_v39 = vpop.f32.mrb[57].mxu1  ;;  %v15620_v60 = vadd.f32 %v2874_v4, %v18735_v55 }
 0x28e   :  { %23444 = vst [vmem:[#allocation21_spill] sm:$0xff] %v19055_v49  ;;  %23445 = vst [vmem:[#allocation22_spill] sm:$0xff] %v19057_v27  ;;  %v15493_v38 = vadd.f32 %v2170_v9, %v18739_v56  ;;  %v2172_v46 = vpop.f32.mrb[58].mxu0  ;;  %v2878_v26 = vpop.f32.mrb[58].mxu1  ;;  %3799 = vmatprep.subr.bf16.mxu0 %v19055_v49  ;;  %4145 = vmatprep.subr.bf16.mxu1 %v19057_v27  ;;  %v15621_v61 = vadd.f32 %v2876_v39, %v18741_v57 }
 0x28f   :  { %v15494_v1 = vadd.f32 %v2172_v46, %v18731_v54  ;;  %v2174_v42 = vpop.f32.mrb[59].mxu0  ;;  %v2880_v47 = vpop.f32.mrb[59].mxu1  ;;  %3800 = vmatpush1.bf16.msra.mxu0 %v19051_v43  ;;  %4146 = vmatpush1.bf16.msra.mxu1 %v19053_v8  ;;  %v15622_v4 = vadd.f32 %v2878_v26, %v18735_v55  ;;  %v3165_v62 = vmax.f32 %v15492_v35, 0.0  ;;  %v3167_v3 = vmax.f32 %v15620_v60, 0.0 }
 0x290   :  { %v15495_v48 = vadd.f32 %v2174_v42, %v18739_v56  ;;  %v15623_v32 = vadd.f32 %v2880_v47, %v18741_v57  ;;  %v3166_v5 = vmax.f32 %v15493_v38, 0.0  ;;  %v3168_v9 = vmax.f32 %v15621_v61, 0.0 }
 0x291   :  { %v3169_v2 = vmax.f32 %v15494_v1, 0.0  ;;  %v3171_v51 = vmax.f32 %v15622_v4, 0.0 }
 0x292   :  { %v3170_v50 = vmax.f32 %v15495_v48, 0.0  ;;  %v3172_v39 = vmax.f32 %v15623_v32, 0.0 }
 0x293   :  { %v19071_v46 = vpack.c.bf16 %v3169_v2, %v3165_v62  ;;  %v19073_v27 = vpack.c.bf16 %v3171_v51, %v3167_v3 }
 0x294   :  { %v2178_v43 = vpop.f32.mrb[60].mxu0  ;;  %v2884_v8 = vpop.f32.mrb[60].mxu1  ;;  %v19075_v49 = vpack.c.bf16 %v3170_v50, %v3166_v5  ;;  %v19077_v26 = vpack.c.bf16 %v3172_v39, %v3168_v9 }
 0x295   :  { %23446 = vst [vmem:[#allocation23_spill] sm:$0xff] %v19071_v46  ;;  %23447 = vst [vmem:[#allocation24_spill] sm:$0xff] %v19073_v27  ;;  %v15496_v42 = vadd.f32 %v2178_v43, %v18731_v54  ;;  %v2180_v35 = vpop.f32.mrb[61].mxu0  ;;  %v2886_v1 = vpop.f32.mrb[61].mxu1  ;;  %v15624_v60 = vadd.f32 %v2884_v8, %v18735_v55 }
 0x296   :  { %23448 = vst [vmem:[#allocation25_spill] sm:$0xff] %v19075_v49  ;;  %23449 = vst [vmem:[#allocation26_spill] sm:$0xff] %v19077_v26  ;;  %v15497_v38 = vadd.f32 %v2180_v35, %v18739_v56  ;;  %v2182_v61 = vpop.f32.mrb[62].mxu0  ;;  %v2888_v47 = vpop.f32.mrb[62].mxu1  ;;  %3801 = vmatprep.subr.bf16.mxu0 %v19075_v49  ;;  %4147 = vmatprep.subr.bf16.mxu1 %v19077_v26  ;;  %v15625_v4 = vadd.f32 %v2886_v1, %v18741_v57 }
 0x297   :  { %v15498_v48 = vadd.f32 %v2182_v61, %v18731_v54  ;;  %v2184_v32 = vpop.f32.mrb[63].mxu0  ;;  %v2890_v62 = vpop.f32.mrb[63].mxu1  ;;  %3802 = vmatpush1.bf16.msra.mxu0 %v19071_v46  ;;  %4148 = vmatpush1.bf16.msra.mxu1 %v19073_v27  ;;  %v15626_v8 = vadd.f32 %v2888_v47, %v18735_v55  ;;  %v3173_v3 = vmax.f32 %v15496_v42, 0.0  ;;  %v3175_v5 = vmax.f32 %v15624_v60, 0.0 }
 0x298   :  { %v15499_v43 = vadd.f32 %v2184_v32, %v18739_v56  ;;  %v15627_v2 = vadd.f32 %v2890_v62, %v18741_v57  ;;  %v3174_v9 = vmax.f32 %v15497_v38, 0.0  ;;  %v3176_v35 = vmax.f32 %v15625_v4, 0.0 }
 0x299   :  { %v3177_v51 = vmax.f32 %v15498_v48, 0.0  ;;  %v3179_v50 = vmax.f32 %v15626_v8, 0.0  ;;  %v16859_v8 = vld [vmem:[%s23425_s21] ss:$16 sps:$4 sm:$0xff]  }
 0x29a   :  { %v3178_v39 = vmax.f32 %v15499_v43, 0.0  ;;  %v3180_v1 = vmax.f32 %v15627_v2, 0.0 }
 0x29b   :  { %v19091_v61 = vpack.c.bf16 %v3177_v51, %v3173_v3  ;;  %v19093_v26 = vpack.c.bf16 %v3179_v50, %v3175_v5  ;;  %v16862_v51 = vld [vmem:[%s23425_s21 + $0x24] ss:$16 sps:$4 sm:$0xff]  }
 0x29c   :  { %v2188_v46 = vpop.f32.mrb[64].mxu0  ;;  %v2894_v27 = vpop.f32.mrb[64].mxu1  ;;  %v19095_v49 = vpack.c.bf16 %v3178_v39, %v3174_v9  ;;  %v19097_v47 = vpack.c.bf16 %v3180_v1, %v3176_v35 }
 0x29d   :  { %23450 = vst [vmem:[#allocation27_spill] sm:$0xff] %v19091_v61  ;;  %23451 = vst [vmem:[#allocation28_spill] sm:$0xff] %v19093_v26  ;;  %v15500_v32 = vadd.f32 %v2188_v46, %v18731_v54  ;;  %v2190_v42 = vpop.f32.mrb[65].mxu0  ;;  %v2896_v48 = vpop.f32.mrb[65].mxu1  ;;  %v15628_v60 = vadd.f32 %v2894_v27, %v18735_v55 }
 0x29e   :  { %23452 = vst [vmem:[#allocation29_spill] sm:$0xff] %v19095_v49  ;;  %23453 = vst [vmem:[#allocation30_spill] sm:$0xff] %v19097_v47  ;;  %v15501_v38 = vadd.f32 %v2190_v42, %v18739_v56  ;;  %v2192_v4 = vpop.f32.mrb[66].mxu0  ;;  %v2898_v62 = vpop.f32.mrb[66].mxu1  ;;  %3803 = vmatprep.subr.bf16.mxu0 %v19095_v49  ;;  %4149 = vmatprep.subr.bf16.mxu1 %v19097_v47  ;;  %v15629_v43 = vadd.f32 %v2896_v48, %v18741_v57 }
 0x29f   :  { %v15502_v46 = vadd.f32 %v2192_v4, %v18731_v54  ;;  %v2194_v2 = vpop.f32.mrb[67].mxu0  ;;  %v2900_v3 = vpop.f32.mrb[67].mxu1  ;;  %3804 = vmatpush1.bf16.msra.mxu0 %v19091_v61  ;;  %4150 = vmatpush1.bf16.msra.mxu1 %v19093_v26  ;;  %v15630_v27 = vadd.f32 %v2898_v62, %v18735_v55  ;;  %v3181_v9 = vmax.f32 %v15500_v32, 0.0  ;;  %v3183_v35 = vmax.f32 %v15628_v60, 0.0 }
 0x2a0   :  { %v15503_v5 = vadd.f32 %v2194_v2, %v18739_v56  ;;  %v15631_v50 = vadd.f32 %v2900_v3, %v18741_v57  ;;  %v3182_v42 = vmax.f32 %v15501_v38, 0.0  ;;  %v3184_v4 = vmax.f32 %v15629_v43, 0.0 }
 0x2a1   :  { %v3185_v39 = vmax.f32 %v15502_v46, 0.0  ;;  %v3187_v1 = vmax.f32 %v15630_v27, 0.0 }
 0x2a2   :  { %v3186_v48 = vmax.f32 %v15503_v5, 0.0  ;;  %v3188_v61 = vmax.f32 %v15631_v50, 0.0  ;;  %3806 = vmatmul.mubr.bf16.vlgmr.msra.gmra.mrb[128].mxu0 %v16859_v8  ;;  %4152 = vmatmul.mubr.bf16.vlgmr.msra.gmra.mrb[128].mxu1 %v16859_v8 }
 0x2a3   :  { %v19117_v26 = vpack.c.bf16 %v3185_v39, %v3181_v9  ;;  %v19119_v62 = vpack.c.bf16 %v3187_v1, %v3183_v35  ;;  %3815 = vmatprep.mubr.bf16.mxu0 %v16862_v51  ;;  %4161 = vmatprep.mubr.bf16.mxu1 %v16862_v51  ;;  %v16865_v39 = vld [vmem:[%s23425_s21 + $0x44] ss:$16 sps:$4 sm:$0xff]  }
 0x2a4   :  { %v2198_v47 = vpop.f32.mrb[68].mxu0  ;;  %v2904_v2 = vpop.f32.mrb[68].mxu1  ;;  %v19121_v49 = vpack.c.bf16 %v3186_v48, %v3182_v42  ;;  %v19123_v32 = vpack.c.bf16 %v3188_v61, %v3184_v4  ;;  %v16864_v61 = vld [vmem:[%s23425_s21 + $0x20] ss:$16 sps:$4 sm:$0xff]  }
 0x2a5   :  { %23454 = vst [vmem:[#allocation31_spill] sm:$0xff] %v19117_v26  ;;  %23455 = vst [vmem:[#allocation32_spill] sm:$0xff] %v19119_v62  ;;  %v15504_v60 = vadd.f32 %v2198_v47, %v18731_v54  ;;  %v2200_v38 = vpop.f32.mrb[69].mxu0  ;;  %v2906_v46 = vpop.f32.mrb[69].mxu1  ;;  %v15632_v43 = vadd.f32 %v2904_v2, %v18735_v55 }
 0x2a6   :  { %23456 = vst [vmem:[#allocation33_spill] sm:$0xff] %v19121_v49  ;;  %23457 = vst [vmem:[#allocation34_spill] sm:$0xff] %v19123_v32  ;;  %v15505_v8 = vadd.f32 %v2200_v38, %v18739_v56  ;;  %v2202_v3 = vpop.f32.mrb[70].mxu0  ;;  %v2908_v27 = vpop.f32.mrb[70].mxu1  ;;  %3946 = vmatprep.subr.bf16.mxu0 %v19121_v49  ;;  %4292 = vmatprep.subr.bf16.mxu1 %v19123_v32  ;;  %v15633_v51 = vadd.f32 %v2906_v46, %v18741_v57 }
 0x2a7   :  { %v15506_v47 = vadd.f32 %v2202_v3, %v18731_v54  ;;  %v2204_v5 = vpop.f32.mrb[71].mxu0  ;;  %v2910_v50 = vpop.f32.mrb[71].mxu1  ;;  %3947 = vmatpush1.bf16.msra.mxu0 %v19117_v26  ;;  %4293 = vmatpush1.bf16.msra.mxu1 %v19119_v62  ;;  %v15634_v9 = vadd.f32 %v2908_v27, %v18735_v55  ;;  %v3189_v42 = vmax.f32 %v15504_v60, 0.0  ;;  %v3191_v4 = vmax.f32 %v15632_v43, 0.0 }
 0x2a8   :  { %v15507_v35 = vadd.f32 %v2204_v5, %v18739_v56  ;;  %v15635_v1 = vadd.f32 %v2910_v50, %v18741_v57  ;;  %v3190_v38 = vmax.f32 %v15505_v8, 0.0  ;;  %v3192_v3 = vmax.f32 %v15633_v51, 0.0 }
 0x2a9   :  { %v3193_v48 = vmax.f32 %v15506_v47, 0.0  ;;  %v3195_v2 = vmax.f32 %v15634_v9, 0.0 }
 0x2aa   :  { %v3194_v46 = vmax.f32 %v15507_v35, 0.0  ;;  %v3196_v26 = vmax.f32 %v15635_v1, 0.0  ;;  %3816 = vmatmul.mubr.bf16.gmra.mrb[132].mxu0 %v16864_v61  ;;  %4162 = vmatmul.mubr.bf16.gmra.mrb[132].mxu1 %v16864_v61 }
 0x2ab   :  { %v19143_v62 = vpack.c.bf16 %v3193_v48, %v3189_v42  ;;  %v19145_v27 = vpack.c.bf16 %v3195_v2, %v3191_v4  ;;  %3825 = vmatprep.mubr.bf16.mxu0 %v16865_v39  ;;  %4171 = vmatprep.mubr.bf16.mxu1 %v16865_v39  ;;  %v16868_v48 = vld [vmem:[%s23425_s21 + $0x64] ss:$16 sps:$4 sm:$0xff]  }
 0x2ac   :  { %v2208_v32 = vpop.f32.mrb[72].mxu0  ;;  %v2914_v5 = vpop.f32.mrb[72].mxu1  ;;  %v19147_v49 = vpack.c.bf16 %v3194_v46, %v3190_v38  ;;  %v19149_v60 = vpack.c.bf16 %v3196_v26, %v3192_v3  ;;  %v16867_v26 = vld [vmem:[%s23425_s21 + $0x40] ss:$16 sps:$4 sm:$0xff]  }
 0x2ad   :  { %23458 = vst [vmem:[#allocation35_spill] sm:$0xff] %v19143_v62  ;;  %23459 = vst [vmem:[#allocation36_spill] sm:$0xff] %v19145_v27  ;;  %v15508_v43 = vadd.f32 %v2208_v32, %v18731_v54  ;;  %v2210_v8 = vpop.f32.mrb[73].mxu0  ;;  %v2916_v47 = vpop.f32.mrb[73].mxu1  ;;  %v15636_v51 = vadd.f32 %v2914_v5, %v18735_v55 }
 0x2ae   :  { %23460 = vst [vmem:[#allocation37_spill] sm:$0xff] %v19147_v49  ;;  %23461 = vst [vmem:[#allocation38_spill] sm:$0xff] %v19149_v60  ;;  %v15509_v61 = vadd.f32 %v2210_v8, %v18739_v56  ;;  %v2212_v50 = vpop.f32.mrb[74].mxu0  ;;  %v2918_v9 = vpop.f32.mrb[74].mxu1  ;;  %3948 = vmatprep.subr.bf16.mxu0 %v19147_v49  ;;  %4294 = vmatprep.subr.bf16.mxu1 %v19149_v60  ;;  %v15637_v39 = vadd.f32 %v2916_v47, %v18741_v57 }
 0x2af   :  { %v15510_v32 = vadd.f32 %v2212_v50, %v18731_v54  ;;  %v2214_v35 = vpop.f32.mrb[75].mxu0  ;;  %v2920_v1 = vpop.f32.mrb[75].mxu1  ;;  %3949 = vmatpush1.bf16.msra.mxu0 %v19143_v62  ;;  %4295 = vmatpush1.bf16.msra.mxu1 %v19145_v27  ;;  %v15638_v42 = vadd.f32 %v2918_v9, %v18735_v55  ;;  %v3197_v38 = vmax.f32 %v15508_v43, 0.0  ;;  %v3199_v3 = vmax.f32 %v15636_v51, 0.0 }
 0x2b0   :  { %v15511_v4 = vadd.f32 %v2214_v35, %v18739_v56  ;;  %v15639_v2 = vadd.f32 %v2920_v1, %v18741_v57  ;;  %v3198_v8 = vmax.f32 %v15509_v61, 0.0  ;;  %v3200_v50 = vmax.f32 %v15637_v39, 0.0 }
 0x2b1   :  { %v3201_v46 = vmax.f32 %v15510_v32, 0.0  ;;  %v3203_v5 = vmax.f32 %v15638_v42, 0.0 }
 0x2b2   :  { %v3202_v47 = vmax.f32 %v15511_v4, 0.0  ;;  %v3204_v62 = vmax.f32 %v15639_v2, 0.0  ;;  %3826 = vmatmul.mubr.bf16.gmra.mrb[136].mxu0 %v16867_v26  ;;  %4172 = vmatmul.mubr.bf16.gmra.mrb[136].mxu1 %v16867_v26 }
 0x2b3   :  { %v19169_v27 = vpack.c.bf16 %v3201_v46, %v3197_v38  ;;  %v19171_v9 = vpack.c.bf16 %v3203_v5, %v3199_v3  ;;  %3835 = vmatprep.mubr.bf16.mxu0 %v16868_v48  ;;  %4181 = vmatprep.mubr.bf16.mxu1 %v16868_v48  ;;  %v16871_v46 = vld [vmem:[%s23425_s21 + $0x84] ss:$16 sps:$4 sm:$0xff]  }
 0x2b4   :  { %v2218_v60 = vpop.f32.mrb[76].mxu0  ;;  %v2924_v35 = vpop.f32.mrb[76].mxu1  ;;  %v19173_v49 = vpack.c.bf16 %v3202_v47, %v3198_v8  ;;  %v19175_v43 = vpack.c.bf16 %v3204_v62, %v3200_v50  ;;  %v16870_v62 = vld [vmem:[%s23425_s21 + $0x60] ss:$16 sps:$4 sm:$0xff]  }
 0x2b5   :  { %23462 = vst [vmem:[#allocation39_spill] sm:$0xff] %v19169_v27  ;;  %23463 = vst [vmem:[#allocation40_spill] sm:$0xff] %v19171_v9  ;;  %v15512_v51 = vadd.f32 %v2218_v60, %v18731_v54  ;;  %v2220_v61 = vpop.f32.mrb[77].mxu0  ;;  %v2926_v32 = vpop.f32.mrb[77].mxu1  ;;  %v15640_v39 = vadd.f32 %v2924_v35, %v18735_v55 }
 0x2b6   :  { %23464 = vst [vmem:[#allocation41_spill] sm:$0xff] %v19173_v49  ;;  %23465 = vst [vmem:[#allocation42_spill] sm:$0xff] %v19175_v43  ;;  %v15513_v26 = vadd.f32 %v2220_v61, %v18739_v56  ;;  %v2222_v1 = vpop.f32.mrb[78].mxu0  ;;  %v2928_v42 = vpop.f32.mrb[78].mxu1  ;;  %3950 = vmatprep.subr.bf16.mxu0 %v19173_v49  ;;  %4296 = vmatprep.subr.bf16.mxu1 %v19175_v43  ;;  %v15641_v48 = vadd.f32 %v2926_v32, %v18741_v57 }
 0x2b7   :  { %v15514_v60 = vadd.f32 %v2222_v1, %v18731_v54  ;;  %v2224_v4 = vpop.f32.mrb[79].mxu0  ;;  %v2930_v2 = vpop.f32.mrb[79].mxu1  ;;  %3951 = vmatpush1.bf16.msra.mxu0 %v19169_v27  ;;  %4297 = vmatpush1.bf16.msra.mxu1 %v19171_v9  ;;  %v15642_v38 = vadd.f32 %v2928_v42, %v18735_v55  ;;  %v3205_v8 = vmax.f32 %v15512_v51, 0.0  ;;  %v3207_v50 = vmax.f32 %v15640_v39, 0.0 }
 0x2b8   :  { %v15515_v3 = vadd.f32 %v2224_v4, %v18739_v56  ;;  %v15643_v5 = vadd.f32 %v2930_v2, %v18741_v57  ;;  %v3206_v61 = vmax.f32 %v15513_v26, 0.0  ;;  %v3208_v1 = vmax.f32 %v15641_v48, 0.0 }
 0x2b9   :  { %v3209_v47 = vmax.f32 %v15514_v60, 0.0  ;;  %v3211_v35 = vmax.f32 %v15642_v38, 0.0 }
 0x2ba   :  { %v3210_v32 = vmax.f32 %v15515_v3, 0.0  ;;  %v3212_v27 = vmax.f32 %v15643_v5, 0.0  ;;  %3836 = vmatmul.mubr.bf16.gmra.mrb[140].mxu0 %v16870_v62  ;;  %4182 = vmatmul.mubr.bf16.gmra.mrb[140].mxu1 %v16870_v62 }
 0x2bb   :  { %v19195_v9 = vpack.c.bf16 %v3209_v47, %v3205_v8  ;;  %v19197_v42 = vpack.c.bf16 %v3211_v35, %v3207_v50  ;;  %3845 = vmatprep.mubr.bf16.mxu0 %v16871_v46  ;;  %4191 = vmatprep.mubr.bf16.mxu1 %v16871_v46  ;;  %v16874_v47 = vld [vmem:[%s23425_s21 + $0xa4] ss:$16 sps:$4 sm:$0xff]  }
 0x2bc   :  { %v2228_v43 = vpop.f32.mrb[80].mxu0  ;;  %v2934_v4 = vpop.f32.mrb[80].mxu1  ;;  %v19199_v49 = vpack.c.bf16 %v3210_v32, %v3206_v61  ;;  %v19201_v51 = vpack.c.bf16 %v3212_v27, %v3208_v1  ;;  %v16873_v27 = vld [vmem:[%s23425_s21 + $0x80] ss:$16 sps:$4 sm:$0xff]  }
 0x2bd   :  { %23466 = vst [vmem:[#allocation43_spill] sm:$0xff] %v19195_v9  ;;  %23467 = vst [vmem:[#allocation44_spill] sm:$0xff] %v19197_v42  ;;  %v15516_v39 = vadd.f32 %v2228_v43, %v18731_v54  ;;  %v15644_v26 = vadd.f32 %v2934_v4, %v18735_v55  ;;  %v2230_v48 = vpop.f32.mrb[81].mxu0  ;;  %v2936_v60 = vpop.f32.mrb[81].mxu1 }
 0x2be   :  { %23468 = vst [vmem:[#allocation45_spill] sm:$0xff] %v19199_v49  ;;  %23469 = vst [vmem:[#allocation46_spill] sm:$0xff] %v19201_v51  ;;  %v15517_v62 = vadd.f32 %v2230_v48, %v18739_v56  ;;  %v15645_v2 = vadd.f32 %v2936_v60, %v18741_v57  ;;  %v2232_v38 = vpop.f32.mrb[82].mxu0  ;;  %v2938_v3 = vpop.f32.mrb[82].mxu1  ;;  %3952 = vmatprep.subr.bf16.mxu0 %v19199_v49  ;;  %4298 = vmatprep.subr.bf16.mxu1 %v19201_v51 }
 0x2bf   :  { %v15518_v43 = vadd.f32 %v2232_v38, %v18731_v54  ;;  %v15646_v46 = vadd.f32 %v2938_v3, %v18735_v55  ;;  %v2234_v5 = vpop.f32.mrb[83].mxu0  ;;  %v2940_v8 = vpop.f32.mrb[83].mxu1  ;;  %3953 = vmatpush1.bf16.msra.mxu0 %v19195_v9  ;;  %4299 = vmatpush1.bf16.msra.mxu1 %v19197_v42  ;;  %v3213_v61 = vmax.f32 %v15516_v39, 0.0  ;;  %v3215_v32 = vmax.f32 %v15644_v26, 0.0 }
 0x2c0   :  { %v15519_v50 = vadd.f32 %v2234_v5, %v18739_v56  ;;  %v15647_v35 = vadd.f32 %v2940_v8, %v18741_v57  ;;  %v3214_v48 = vmax.f32 %v15517_v62, 0.0  ;;  %v3216_v60 = vmax.f32 %v15645_v2, 0.0 }
 0x2c1   :  { %v3217_v1 = vmax.f32 %v15518_v43, 0.0  ;;  %v3219_v4 = vmax.f32 %v15646_v46, 0.0 }
 0x2c2   :  { %v3218_v38 = vmax.f32 %v15519_v50, 0.0  ;;  %v3220_v3 = vmax.f32 %v15647_v35, 0.0  ;;  %3846 = vmatmul.mubr.bf16.gmra.mrb[144].mxu0 %v16873_v27  ;;  %4192 = vmatmul.mubr.bf16.gmra.mrb[144].mxu1 %v16873_v27 }
 0x2c3   :  { %v19221_v9 = vpack.c.bf16 %v3217_v1, %v3213_v61  ;;  %v19223_v42 = vpack.c.bf16 %v3219_v4, %v3215_v32  ;;  %3855 = vmatprep.mubr.bf16.mxu0 %v16874_v47  ;;  %4201 = vmatprep.mubr.bf16.mxu1 %v16874_v47  ;;  %v16876_v47 = vld [vmem:[%s23425_s21 + $0xa0] ss:$16 sps:$4 sm:$0xff]   ;;  %v16877_v1 = vld [vmem:[%s23425_s21 + $0xc4] ss:$16 sps:$4 sm:$0xff]  }
 0x2c4   :  { %v2238_v51 = vpop.f32.mrb[84].mxu0  ;;  %v2944_v5 = vpop.f32.mrb[84].mxu1  ;;  %v19225_v49 = vpack.c.bf16 %v3218_v38, %v3214_v48  ;;  %v19227_v39 = vpack.c.bf16 %v3220_v3, %v3216_v60 }
 0x2c5   :  { %23470 = vst [vmem:[#allocation47_spill] sm:$0xff] %v19221_v9  ;;  %23471 = vst [vmem:[#allocation48_spill] sm:$0xff] %v19223_v42  ;;  %v15520_v26 = vadd.f32 %v2238_v51, %v18731_v54  ;;  %v15648_v62 = vadd.f32 %v2944_v5, %v18735_v55  ;;  %v2240_v2 = vpop.f32.mrb[85].mxu0  ;;  %v2946_v43 = vpop.f32.mrb[85].mxu1 }
 0x2c6   :  { %23472 = vst [vmem:[#allocation49_spill] sm:$0xff] %v19225_v49  ;;  %23473 = vst [vmem:[#allocation50_spill] sm:$0xff] %v19227_v39  ;;  %v15521_v27 = vadd.f32 %v2240_v2, %v18739_v56  ;;  %v15649_v46 = vadd.f32 %v2946_v43, %v18741_v57  ;;  %v2242_v8 = vpop.f32.mrb[86].mxu0  ;;  %v2948_v50 = vpop.f32.mrb[86].mxu1  ;;  %3954 = vmatprep.subr.bf16.mxu0 %v19225_v49  ;;  %4300 = vmatprep.subr.bf16.mxu1 %v19227_v39 }
 0x2c7   :  { %v15522_v51 = vadd.f32 %v2242_v8, %v18731_v54  ;;  %v15650_v35 = vadd.f32 %v2948_v50, %v18735_v55  ;;  %v2244_v61 = vpop.f32.mrb[87].mxu0  ;;  %v2950_v32 = vpop.f32.mrb[87].mxu1  ;;  %3955 = vmatpush1.bf16.msra.mxu0 %v19221_v9  ;;  %4301 = vmatpush1.bf16.msra.mxu1 %v19223_v42  ;;  %v3221_v60 = vmax.f32 %v15520_v26, 0.0  ;;  %v3223_v38 = vmax.f32 %v15648_v62, 0.0 }
 0x2c8   :  { %v15523_v4 = vadd.f32 %v2244_v61, %v18739_v56  ;;  %v15651_v48 = vadd.f32 %v2950_v32, %v18741_v57  ;;  %v3222_v2 = vmax.f32 %v15521_v27, 0.0  ;;  %v3224_v43 = vmax.f32 %v15649_v46, 0.0 }
 0x2c9   :  { %v3225_v3 = vmax.f32 %v15522_v51, 0.0  ;;  %v3227_v5 = vmax.f32 %v15650_v35, 0.0 }
 0x2ca   :  { %v3226_v8 = vmax.f32 %v15523_v4, 0.0  ;;  %v3228_v50 = vmax.f32 %v15651_v48, 0.0  ;;  %3856 = vmatmul.mubr.bf16.gmra.mrb[148].mxu0 %v16876_v47  ;;  %4202 = vmatmul.mubr.bf16.gmra.mrb[148].mxu1 %v16876_v47 }
 0x2cb   :  { %v19247_v9 = vpack.c.bf16 %v3225_v3, %v3221_v60  ;;  %v19249_v42 = vpack.c.bf16 %v3227_v5, %v3223_v38  ;;  %3865 = vmatprep.mubr.bf16.mxu0 %v16877_v1  ;;  %4211 = vmatprep.mubr.bf16.mxu1 %v16877_v1  ;;  %v16879_v1 = vld [vmem:[%s23425_s21 + $0xc0] ss:$16 sps:$4 sm:$0xff]   ;;  %v16880_v3 = vld [vmem:[%s23425_s21 + $0xe4] ss:$16 sps:$4 sm:$0xff]  }
 0x2cc   :  { %v2248_v39 = vpop.f32.mrb[88].mxu0  ;;  %v2954_v61 = vpop.f32.mrb[88].mxu1  ;;  %v19251_v49 = vpack.c.bf16 %v3226_v8, %v3222_v2  ;;  %v19253_v26 = vpack.c.bf16 %v3228_v50, %v3224_v43 }
 0x2cd   :  { %23474 = vst [vmem:[#allocation51_spill] sm:$0xff] %v19247_v9  ;;  %23475 = vst [vmem:[#allocation52_spill] sm:$0xff] %v19249_v42  ;;  %v15524_v62 = vadd.f32 %v2248_v39, %v18731_v54  ;;  %v15652_v27 = vadd.f32 %v2954_v61, %v18735_v55  ;;  %v2250_v46 = vpop.f32.mrb[89].mxu0  ;;  %v2956_v51 = vpop.f32.mrb[89].mxu1 }
 0x2ce   :  { %23476 = vst [vmem:[#allocation53_spill] sm:$0xff] %v19251_v49  ;;  %23477 = vst [vmem:[#allocation54_spill] sm:$0xff] %v19253_v26  ;;  %v15525_v47 = vadd.f32 %v2250_v46, %v18739_v56  ;;  %v15653_v35 = vadd.f32 %v2956_v51, %v18741_v57  ;;  %v2252_v32 = vpop.f32.mrb[90].mxu0  ;;  %v2958_v4 = vpop.f32.mrb[90].mxu1  ;;  %3956 = vmatprep.subr.bf16.mxu0 %v19251_v49  ;;  %4302 = vmatprep.subr.bf16.mxu1 %v19253_v26 }
 0x2cf   :  { %v15526_v39 = vadd.f32 %v2252_v32, %v18731_v54  ;;  %v15654_v48 = vadd.f32 %v2958_v4, %v18735_v55  ;;  %v2254_v60 = vpop.f32.mrb[91].mxu0  ;;  %v2960_v38 = vpop.f32.mrb[91].mxu1  ;;  %3957 = vmatpush1.bf16.msra.mxu0 %v19247_v9  ;;  %4303 = vmatpush1.bf16.msra.mxu1 %v19249_v42  ;;  %v3229_v43 = vmax.f32 %v15524_v62, 0.0  ;;  %v3231_v8 = vmax.f32 %v15652_v27, 0.0 }
 0x2d0   :  { %v15527_v5 = vadd.f32 %v2254_v60, %v18739_v56  ;;  %v15655_v2 = vadd.f32 %v2960_v38, %v18741_v57  ;;  %v3230_v46 = vmax.f32 %v15525_v47, 0.0  ;;  %v3232_v51 = vmax.f32 %v15653_v35, 0.0 }
 0x2d1   :  { %v3233_v50 = vmax.f32 %v15526_v39, 0.0  ;;  %v3235_v61 = vmax.f32 %v15654_v48, 0.0 }
 0x2d2   :  { %v3234_v32 = vmax.f32 %v15527_v5, 0.0  ;;  %v3236_v4 = vmax.f32 %v15655_v2, 0.0  ;;  %3866 = vmatmul.mubr.bf16.gmra.mrb[152].mxu0 %v16879_v1  ;;  %4212 = vmatmul.mubr.bf16.gmra.mrb[152].mxu1 %v16879_v1 }
 0x2d3   :  { %v19273_v9 = vpack.c.bf16 %v3233_v50, %v3229_v43  ;;  %v19275_v42 = vpack.c.bf16 %v3235_v61, %v3231_v8  ;;  %3875 = vmatprep.mubr.bf16.mxu0 %v16880_v3  ;;  %4221 = vmatprep.mubr.bf16.mxu1 %v16880_v3  ;;  %v16882_v3 = vld [vmem:[%s23425_s21 + $0xe0] ss:$16 sps:$4 sm:$0xff]   ;;  %v16883_v50 = vld [vmem:[%s23425_s21 + $0x104] ss:$16 sps:$4 sm:$0xff]  }
 0x2d4   :  { %v2258_v26 = vpop.f32.mrb[92].mxu0  ;;  %v2964_v60 = vpop.f32.mrb[92].mxu1  ;;  %v19277_v49 = vpack.c.bf16 %v3234_v32, %v3230_v46  ;;  %v19279_v62 = vpack.c.bf16 %v3236_v4, %v3232_v51 }
 0x2d5   :  { %23478 = vst [vmem:[#allocation55_spill] sm:$0xff] %v19273_v9  ;;  %23479 = vst [vmem:[#allocation56_spill] sm:$0xff] %v19275_v42  ;;  %v15528_v27 = vadd.f32 %v2258_v26, %v18731_v54  ;;  %v15656_v47 = vadd.f32 %v2964_v60, %v18735_v55  ;;  %v2260_v35 = vpop.f32.mrb[93].mxu0  ;;  %v2966_v39 = vpop.f32.mrb[93].mxu1 }
 0x2d6   :  { %23480 = vst [vmem:[#allocation57_spill] sm:$0xff] %v19277_v49  ;;  %23481 = vst [vmem:[#allocation58_spill] sm:$0xff] %v19279_v62  ;;  %v15529_v1 = vadd.f32 %v2260_v35, %v18739_v56  ;;  %v15657_v48 = vadd.f32 %v2966_v39, %v18741_v57  ;;  %v2262_v38 = vpop.f32.mrb[94].mxu0  ;;  %v2968_v5 = vpop.f32.mrb[94].mxu1  ;;  %3958 = vmatprep.subr.bf16.mxu0 %v19277_v49  ;;  %4304 = vmatprep.subr.bf16.mxu1 %v19279_v62 }
 0x2d7   :  { %v15530_v26 = vadd.f32 %v2262_v38, %v18731_v54  ;;  %v15658_v2 = vadd.f32 %v2968_v5, %v18735_v55  ;;  %v2264_v43 = vpop.f32.mrb[95].mxu0  ;;  %v2970_v8 = vpop.f32.mrb[95].mxu1  ;;  %3959 = vmatpush1.bf16.msra.mxu0 %v19273_v9  ;;  %4305 = vmatpush1.bf16.msra.mxu1 %v19275_v42  ;;  %v3237_v51 = vmax.f32 %v15528_v27, 0.0  ;;  %v3239_v32 = vmax.f32 %v15656_v47, 0.0 }
 0x2d8   :  { %v15531_v61 = vadd.f32 %v2264_v43, %v18739_v56  ;;  %v15659_v46 = vadd.f32 %v2970_v8, %v18741_v57  ;;  %v3238_v35 = vmax.f32 %v15529_v1, 0.0  ;;  %v3240_v39 = vmax.f32 %v15657_v48, 0.0 }
 0x2d9   :  { %v3241_v4 = vmax.f32 %v15530_v26, 0.0  ;;  %v3243_v60 = vmax.f32 %v15658_v2, 0.0 }
 0x2da   :  { %v3242_v38 = vmax.f32 %v15531_v61, 0.0  ;;  %v3244_v5 = vmax.f32 %v15659_v46, 0.0  ;;  %3876 = vmatmul.mubr.bf16.gmra.mrb[156].mxu0 %v16882_v3  ;;  %4222 = vmatmul.mubr.bf16.gmra.mrb[156].mxu1 %v16882_v3 }
 0x2db   :  { %v19299_v9 = vpack.c.bf16 %v3241_v4, %v3237_v51  ;;  %v19301_v42 = vpack.c.bf16 %v3243_v60, %v3239_v32  ;;  %3885 = vmatprep.mubr.bf16.mxu0 %v16883_v50  ;;  %4231 = vmatprep.mubr.bf16.mxu1 %v16883_v50  ;;  %v16885_v50 = vld [vmem:[%s23425_s21 + $0x100] ss:$16 sps:$4 sm:$0xff]   ;;  %v16886_v4 = vld [vmem:[%s23425_s21 + $0x124] ss:$16 sps:$4 sm:$0xff]  }
 0x2dc   :  { %v2268_v62 = vpop.f32.mrb[96].mxu0  ;;  %v2974_v43 = vpop.f32.mrb[96].mxu1  ;;  %v19303_v49 = vpack.c.bf16 %v3242_v38, %v3238_v35  ;;  %v19305_v27 = vpack.c.bf16 %v3244_v5, %v3240_v39 }
 0x2dd   :  { %23482 = vst [vmem:[#allocation59_spill] sm:$0xff] %v19299_v9  ;;  %23483 = vst [vmem:[#allocation60_spill] sm:$0xff] %v19301_v42  ;;  %v15532_v47 = vadd.f32 %v2268_v62, %v18731_v54  ;;  %v15660_v1 = vadd.f32 %v2974_v43, %v18735_v55  ;;  %v2270_v48 = vpop.f32.mrb[97].mxu0  ;;  %v2976_v26 = vpop.f32.mrb[97].mxu1 }
 0x2de   :  { %23484 = vst [vmem:[#allocation61_spill] sm:$0xff] %v19303_v49  ;;  %23485 = vst [vmem:[#allocation62_spill] sm:$0xff] %v19305_v27  ;;  %v15533_v3 = vadd.f32 %v2270_v48, %v18739_v56  ;;  %v15661_v2 = vadd.f32 %v2976_v26, %v18741_v57  ;;  %v2272_v8 = vpop.f32.mrb[98].mxu0  ;;  %v2978_v61 = vpop.f32.mrb[98].mxu1  ;;  %3960 = vmatprep.subr.bf16.mxu0 %v19303_v49  ;;  %4306 = vmatprep.subr.bf16.mxu1 %v19305_v27 }
 0x2df   :  { %v15534_v62 = vadd.f32 %v2272_v8, %v18731_v54  ;;  %v15662_v46 = vadd.f32 %v2978_v61, %v18735_v55  ;;  %v2274_v51 = vpop.f32.mrb[99].mxu0  ;;  %v2980_v32 = vpop.f32.mrb[99].mxu1  ;;  %3961 = vmatpush1.bf16.msra.mxu0 %v19299_v9  ;;  %4307 = vmatpush1.bf16.msra.mxu1 %v19301_v42  ;;  %v3245_v39 = vmax.f32 %v15532_v47, 0.0  ;;  %v3247_v38 = vmax.f32 %v15660_v1, 0.0 }
 0x2e0   :  { %v15535_v60 = vadd.f32 %v2274_v51, %v18739_v56  ;;  %v15663_v35 = vadd.f32 %v2980_v32, %v18741_v57  ;;  %v3246_v48 = vmax.f32 %v15533_v3, 0.0  ;;  %v3248_v26 = vmax.f32 %v15661_v2, 0.0 }
 0x2e1   :  { %v3249_v5 = vmax.f32 %v15534_v62, 0.0  ;;  %v3251_v43 = vmax.f32 %v15662_v46, 0.0 }
 0x2e2   :  { %v3250_v8 = vmax.f32 %v15535_v60, 0.0  ;;  %v3252_v61 = vmax.f32 %v15663_v35, 0.0  ;;  %3886 = vmatmul.mubr.bf16.gmra.mrb[160].mxu0 %v16885_v50  ;;  %4232 = vmatmul.mubr.bf16.gmra.mrb[160].mxu1 %v16885_v50 }
 0x2e3   :  { %v19325_v9 = vpack.c.bf16 %v3249_v5, %v3245_v39  ;;  %v19327_v42 = vpack.c.bf16 %v3251_v43, %v3247_v38  ;;  %3895 = vmatprep.mubr.bf16.mxu0 %v16886_v4  ;;  %4241 = vmatprep.mubr.bf16.mxu1 %v16886_v4  ;;  %v16888_v4 = vld [vmem:[%s23425_s21 + $0x120] ss:$16 sps:$4 sm:$0xff]   ;;  %v16889_v5 = vld [vmem:[%s23425_s21 + $0x144] ss:$16 sps:$4 sm:$0xff]  }
 0x2e4   :  { %v2278_v27 = vpop.f32.mrb[100].mxu0  ;;  %v2984_v51 = vpop.f32.mrb[100].mxu1  ;;  %v19329_v49 = vpack.c.bf16 %v3250_v8, %v3246_v48  ;;  %v19331_v47 = vpack.c.bf16 %v3252_v61, %v3248_v26 }
 0x2e5   :  { %23486 = vst [vmem:[#allocation63_spill] sm:$0xff] %v19325_v9  ;;  %23487 = vst [vmem:[#allocation64_spill] sm:$0xff] %v19327_v42  ;;  %v15536_v1 = vadd.f32 %v2278_v27, %v18731_v54  ;;  %v15664_v3 = vadd.f32 %v2984_v51, %v18735_v55  ;;  %v2280_v2 = vpop.f32.mrb[101].mxu0  ;;  %v2986_v62 = vpop.f32.mrb[101].mxu1 }
 0x2e6   :  { %23488 = vst [vmem:[#allocation65_spill] sm:$0xff] %v19329_v49  ;;  %23489 = vst [vmem:[#allocation66_spill] sm:$0xff] %v19331_v47  ;;  %v15537_v50 = vadd.f32 %v2280_v2, %v18739_v56  ;;  %v15665_v46 = vadd.f32 %v2986_v62, %v18741_v57  ;;  %v2282_v32 = vpop.f32.mrb[102].mxu0  ;;  %v2988_v60 = vpop.f32.mrb[102].mxu1  ;;  %3962 = vmatprep.subr.bf16.mxu0 %v19329_v49  ;;  %4308 = vmatprep.subr.bf16.mxu1 %v19331_v47 }
 0x2e7   :  { %v15538_v27 = vadd.f32 %v2282_v32, %v18731_v54  ;;  %v15666_v35 = vadd.f32 %v2988_v60, %v18735_v55  ;;  %v2284_v39 = vpop.f32.mrb[103].mxu0  ;;  %v2990_v38 = vpop.f32.mrb[103].mxu1  ;;  %3963 = vmatpush1.bf16.msra.mxu0 %v19325_v9  ;;  %4309 = vmatpush1.bf16.msra.mxu1 %v19327_v42  ;;  %v3253_v26 = vmax.f32 %v15536_v1, 0.0  ;;  %v3255_v8 = vmax.f32 %v15664_v3, 0.0 }
 0x2e8   :  { %v15539_v43 = vadd.f32 %v2284_v39, %v18739_v56  ;;  %v15667_v48 = vadd.f32 %v2990_v38, %v18741_v57  ;;  %v3254_v2 = vmax.f32 %v15537_v50, 0.0  ;;  %v3256_v62 = vmax.f32 %v15665_v46, 0.0 }
 0x2e9   :  { %v3257_v61 = vmax.f32 %v15538_v27, 0.0  ;;  %v3259_v51 = vmax.f32 %v15666_v35, 0.0 }
 0x2ea   :  { %v3258_v32 = vmax.f32 %v15539_v43, 0.0  ;;  %v3260_v60 = vmax.f32 %v15667_v48, 0.0  ;;  %3896 = vmatmul.mubr.bf16.gmra.mrb[164].mxu0 %v16888_v4  ;;  %4242 = vmatmul.mubr.bf16.gmra.mrb[164].mxu1 %v16888_v4 }
 0x2eb   :  { %v19351_v9 = vpack.c.bf16 %v3257_v61, %v3253_v26  ;;  %v19353_v42 = vpack.c.bf16 %v3259_v51, %v3255_v8  ;;  %3905 = vmatprep.mubr.bf16.mxu0 %v16889_v5  ;;  %4251 = vmatprep.mubr.bf16.mxu1 %v16889_v5  ;;  %v16891_v5 = vld [vmem:[%s23425_s21 + $0x140] ss:$16 sps:$4 sm:$0xff]   ;;  %v16892_v61 = vld [vmem:[%s23425_s21 + $0x164] ss:$16 sps:$4 sm:$0xff]  }
 0x2ec   :  { %v2288_v47 = vpop.f32.mrb[104].mxu0  ;;  %v2994_v39 = vpop.f32.mrb[104].mxu1  ;;  %v19355_v49 = vpack.c.bf16 %v3258_v32, %v3254_v2  ;;  %v19357_v1 = vpack.c.bf16 %v3260_v60, %v3256_v62 }
 0x2ed   :  { %23490 = vst [vmem:[#allocation67_spill] sm:$0xff] %v19351_v9  ;;  %23491 = vst [vmem:[#allocation68_spill] sm:$0xff] %v19353_v42  ;;  %v15540_v3 = vadd.f32 %v2288_v47, %v18731_v54  ;;  %v15668_v50 = vadd.f32 %v2994_v39, %v18735_v55  ;;  %v2290_v46 = vpop.f32.mrb[105].mxu0  ;;  %v2996_v27 = vpop.f32.mrb[105].mxu1 }
 0x2ee   :  { %23492 = vst [vmem:[#allocation69_spill] sm:$0xff] %v19355_v49  ;;  %23493 = vst [vmem:[#allocation70_spill] sm:$0xff] %v19357_v1  ;;  %v15541_v4 = vadd.f32 %v2290_v46, %v18739_v56  ;;  %v15669_v35 = vadd.f32 %v2996_v27, %v18741_v57  ;;  %v2292_v38 = vpop.f32.mrb[106].mxu0  ;;  %v2998_v43 = vpop.f32.mrb[106].mxu1  ;;  %3964 = vmatprep.subr.bf16.mxu0 %v19355_v49  ;;  %4310 = vmatprep.subr.bf16.mxu1 %v19357_v1 }
 0x2ef   :  { %v15542_v47 = vadd.f32 %v2292_v38, %v18731_v54  ;;  %v15670_v48 = vadd.f32 %v2998_v43, %v18735_v55  ;;  %v2294_v26 = vpop.f32.mrb[107].mxu0  ;;  %v3000_v8 = vpop.f32.mrb[107].mxu1  ;;  %3965 = vmatpush1.bf16.msra.mxu0 %v19351_v9  ;;  %4311 = vmatpush1.bf16.msra.mxu1 %v19353_v42  ;;  %v3261_v62 = vmax.f32 %v15540_v3, 0.0  ;;  %v3263_v32 = vmax.f32 %v15668_v50, 0.0 }
 0x2f0   :  { %v15543_v51 = vadd.f32 %v2294_v26, %v18739_v56  ;;  %v15671_v2 = vadd.f32 %v3000_v8, %v18741_v57  ;;  %v3262_v46 = vmax.f32 %v15541_v4, 0.0  ;;  %v3264_v27 = vmax.f32 %v15669_v35, 0.0 }
 0x2f1   :  { %v3265_v60 = vmax.f32 %v15542_v47, 0.0  ;;  %v3267_v39 = vmax.f32 %v15670_v48, 0.0 }
 0x2f2   :  { %v3266_v38 = vmax.f32 %v15543_v51, 0.0  ;;  %v3268_v43 = vmax.f32 %v15671_v2, 0.0  ;;  %3906 = vmatmul.mubr.bf16.gmra.mrb[168].mxu0 %v16891_v5  ;;  %4252 = vmatmul.mubr.bf16.gmra.mrb[168].mxu1 %v16891_v5 }
 0x2f3   :  { %v19377_v9 = vpack.c.bf16 %v3265_v60, %v3261_v62  ;;  %v19379_v42 = vpack.c.bf16 %v3267_v39, %v3263_v32  ;;  %3915 = vmatprep.mubr.bf16.mxu0 %v16892_v61  ;;  %4261 = vmatprep.mubr.bf16.mxu1 %v16892_v61  ;;  %v16894_v61 = vld [vmem:[%s23425_s21 + $0x160] ss:$16 sps:$4 sm:$0xff]   ;;  %v16895_v60 = vld [vmem:[%s23425_s21 + $0x184] ss:$16 sps:$4 sm:$0xff]  }
 0x2f4   :  { %v2298_v1 = vpop.f32.mrb[108].mxu0  ;;  %v3004_v26 = vpop.f32.mrb[108].mxu1  ;;  %v19381_v49 = vpack.c.bf16 %v3266_v38, %v3262_v46  ;;  %v19383_v3 = vpack.c.bf16 %v3268_v43, %v3264_v27 }
 0x2f5   :  { %23494 = vst [vmem:[#allocation71_spill] sm:$0xff] %v19377_v9  ;;  %23495 = vst [vmem:[#allocation72_spill] sm:$0xff] %v19379_v42  ;;  %v15544_v50 = vadd.f32 %v2298_v1, %v18731_v54  ;;  %v15672_v4 = vadd.f32 %v3004_v26, %v18735_v55  ;;  %v2300_v35 = vpop.f32.mrb[109].mxu0  ;;  %v3006_v47 = vpop.f32.mrb[109].mxu1 }
 0x2f6   :  { %23496 = vst [vmem:[#allocation73_spill] sm:$0xff] %v19381_v49  ;;  %23497 = vst [vmem:[#allocation74_spill] sm:$0xff] %v19383_v3  ;;  %v15545_v5 = vadd.f32 %v2300_v35, %v18739_v56  ;;  %v15673_v48 = vadd.f32 %v3006_v47, %v18741_v57  ;;  %v2302_v8 = vpop.f32.mrb[110].mxu0  ;;  %v3008_v51 = vpop.f32.mrb[110].mxu1  ;;  %3966 = vmatprep.subr.bf16.mxu0 %v19381_v49  ;;  %4312 = vmatprep.subr.bf16.mxu1 %v19383_v3 }
 0x2f7   :  { %v15546_v1 = vadd.f32 %v2302_v8, %v18731_v54  ;;  %v15674_v2 = vadd.f32 %v3008_v51, %v18735_v55  ;;  %v2304_v62 = vpop.f32.mrb[111].mxu0  ;;  %v3010_v32 = vpop.f32.mrb[111].mxu1  ;;  %3967 = vmatpush1.bf16.msra.mxu0 %v19377_v9  ;;  %4313 = vmatpush1.bf16.msra.mxu1 %v19379_v42  ;;  %v3269_v27 = vmax.f32 %v15544_v50, 0.0  ;;  %v3271_v38 = vmax.f32 %v15672_v4, 0.0 }
 0x2f8   :  { %v15547_v39 = vadd.f32 %v2304_v62, %v18739_v56  ;;  %v15675_v46 = vadd.f32 %v3010_v32, %v18741_v57  ;;  %v3270_v35 = vmax.f32 %v15545_v5, 0.0  ;;  %v3272_v47 = vmax.f32 %v15673_v48, 0.0 }
 0x2f9   :  { %v3273_v43 = vmax.f32 %v15546_v1, 0.0  ;;  %v3275_v26 = vmax.f32 %v15674_v2, 0.0 }
 0x2fa   :  { %v3274_v8 = vmax.f32 %v15547_v39, 0.0  ;;  %v3276_v51 = vmax.f32 %v15675_v46, 0.0  ;;  %3916 = vmatmul.mubr.bf16.gmra.mrb[172].mxu0 %v16894_v61  ;;  %4262 = vmatmul.mubr.bf16.gmra.mrb[172].mxu1 %v16894_v61 }
 0x2fb   :  { %v19403_v9 = vpack.c.bf16 %v3273_v43, %v3269_v27  ;;  %v19405_v42 = vpack.c.bf16 %v3275_v26, %v3271_v38  ;;  %3925 = vmatprep.mubr.bf16.mxu0 %v16895_v60  ;;  %4271 = vmatprep.mubr.bf16.mxu1 %v16895_v60  ;;  %v16897_v60 = vld [vmem:[%s23425_s21 + $0x180] ss:$16 sps:$4 sm:$0xff]   ;;  %v16898_v43 = vld [vmem:[%s23425_s21 + $0x1a4] ss:$16 sps:$4 sm:$0xff]  }
 0x2fc   :  { %v2308_v3 = vpop.f32.mrb[112].mxu0  ;;  %v3014_v62 = vpop.f32.mrb[112].mxu1  ;;  %v19407_v49 = vpack.c.bf16 %v3274_v8, %v3270_v35  ;;  %v19409_v50 = vpack.c.bf16 %v3276_v51, %v3272_v47 }
 0x2fd   :  { %23498 = vst [vmem:[#allocation75_spill] sm:$0xff] %v19403_v9  ;;  %23499 = vst [vmem:[#allocation76_spill] sm:$0xff] %v19405_v42  ;;  %v15548_v4 = vadd.f32 %v2308_v3, %v18731_v54  ;;  %v15676_v5 = vadd.f32 %v3014_v62, %v18735_v55  ;;  %v2310_v48 = vpop.f32.mrb[113].mxu0  ;;  %v3016_v1 = vpop.f32.mrb[113].mxu1 }
 0x2fe   :  { %23500 = vst [vmem:[#allocation77_spill] sm:$0xff] %v19407_v49  ;;  %23501 = vst [vmem:[#allocation78_spill] sm:$0xff] %v19409_v50  ;;  %v15549_v61 = vadd.f32 %v2310_v48, %v18739_v56  ;;  %v15677_v2 = vadd.f32 %v3016_v1, %v18741_v57  ;;  %v2312_v32 = vpop.f32.mrb[114].mxu0  ;;  %v3018_v39 = vpop.f32.mrb[114].mxu1  ;;  %3968 = vmatprep.subr.bf16.mxu0 %v19407_v49  ;;  %4314 = vmatprep.subr.bf16.mxu1 %v19409_v50 }
 0x2ff   :  { %v15550_v3 = vadd.f32 %v2312_v32, %v18731_v54  ;;  %v15678_v46 = vadd.f32 %v3018_v39, %v18735_v55  ;;  %v2314_v27 = vpop.f32.mrb[115].mxu0  ;;  %v3020_v38 = vpop.f32.mrb[115].mxu1  ;;  %3969 = vmatpush1.bf16.msra.mxu0 %v19403_v9  ;;  %4315 = vmatpush1.bf16.msra.mxu1 %v19405_v42  ;;  %v3277_v47 = vmax.f32 %v15548_v4, 0.0  ;;  %v3279_v8 = vmax.f32 %v15676_v5, 0.0 }
 0x300   :  { %v15551_v26 = vadd.f32 %v2314_v27, %v18739_v56  ;;  %v15679_v35 = vadd.f32 %v3020_v38, %v18741_v57  ;;  %v3278_v48 = vmax.f32 %v15549_v61, 0.0  ;;  %v3280_v1 = vmax.f32 %v15677_v2, 0.0 }
 0x301   :  { %v3281_v51 = vmax.f32 %v15550_v3, 0.0  ;;  %v3283_v62 = vmax.f32 %v15678_v46, 0.0 }
 0x302   :  { %v3282_v32 = vmax.f32 %v15551_v26, 0.0  ;;  %v3284_v39 = vmax.f32 %v15679_v35, 0.0  ;;  %3926 = vmatmul.mubr.bf16.gmra.mrb[176].mxu0 %v16897_v60  ;;  %4272 = vmatmul.mubr.bf16.gmra.mrb[176].mxu1 %v16897_v60 }
 0x303   :  { %v19429_v9 = vpack.c.bf16 %v3281_v51, %v3277_v47  ;;  %v19431_v42 = vpack.c.bf16 %v3283_v62, %v3279_v8  ;;  %3935 = vmatprep.mubr.bf16.mxu0 %v16898_v43  ;;  %4281 = vmatprep.mubr.bf16.mxu1 %v16898_v43  ;;  %v16900_v43 = vld [vmem:[%s23425_s21 + $0x1a0] ss:$16 sps:$4 sm:$0xff]   ;;  %v16903_v51 = vld [vmem:[%s23425_s21 + $0xc] ss:$16 sps:$4 sm:$0xff]  }
 0x304   :  { %v2318_v50 = vpop.f32.mrb[116].mxu0  ;;  %v3024_v27 = vpop.f32.mrb[116].mxu1  ;;  %v19433_v49 = vpack.c.bf16 %v3282_v32, %v3278_v48  ;;  %v19435_v4 = vpack.c.bf16 %v3284_v39, %v3280_v1 }
 0x305   :  { %23502 = vst [vmem:[#allocation79_spill] sm:$0xff] %v19429_v9  ;;  %23503 = vst [vmem:[#allocation80_spill] sm:$0xff] %v19431_v42  ;;  %v15552_v5 = vadd.f32 %v2318_v50, %v18731_v54  ;;  %v15680_v61 = vadd.f32 %v3024_v27, %v18735_v55  ;;  %v2320_v2 = vpop.f32.mrb[117].mxu0  ;;  %v3026_v3 = vpop.f32.mrb[117].mxu1 }
 0x306   :  { %23504 = vst [vmem:[#allocation81_spill] sm:$0xff] %v19433_v49  ;;  %23505 = vst [vmem:[#allocation82_spill] sm:$0xff] %v19435_v4  ;;  %v15553_v60 = vadd.f32 %v2320_v2, %v18739_v56  ;;  %v15681_v46 = vadd.f32 %v3026_v3, %v18741_v57  ;;  %v2322_v38 = vpop.f32.mrb[118].mxu0  ;;  %v3028_v26 = vpop.f32.mrb[118].mxu1  ;;  %3970 = vmatprep.subr.bf16.mxu0 %v19433_v49  ;;  %4316 = vmatprep.subr.bf16.mxu1 %v19435_v4 }
 0x307   :  { %v15554_v50 = vadd.f32 %v2322_v38, %v18731_v54  ;;  %v15682_v35 = vadd.f32 %v3028_v26, %v18735_v55  ;;  %v2324_v47 = vpop.f32.mrb[119].mxu0  ;;  %v3030_v8 = vpop.f32.mrb[119].mxu1  ;;  %3971 = vmatpush1.bf16.msra.mxu0 %v19429_v9  ;;  %4317 = vmatpush1.bf16.msra.mxu1 %v19431_v42  ;;  %v3285_v1 = vmax.f32 %v15552_v5, 0.0  ;;  %v3287_v32 = vmax.f32 %v15680_v61, 0.0 }
 0x308   :  { %v15555_v62 = vadd.f32 %v2324_v47, %v18739_v56  ;;  %v15683_v48 = vadd.f32 %v3030_v8, %v18741_v57  ;;  %v3286_v2 = vmax.f32 %v15553_v60, 0.0  ;;  %v3288_v3 = vmax.f32 %v15681_v46, 0.0 }
 0x309   :  { %v3289_v39 = vmax.f32 %v15554_v50, 0.0  ;;  %v3291_v27 = vmax.f32 %v15682_v35, 0.0 }
 0x30a   :  { %v3290_v38 = vmax.f32 %v15555_v62, 0.0  ;;  %v3292_v26 = vmax.f32 %v15683_v48, 0.0  ;;  %3936 = vmatmul.mubr.bf16.gmra.mrb[180].mxu0 %v16900_v43  ;;  %4282 = vmatmul.mubr.bf16.gmra.mrb[180].mxu1 %v16900_v43 }
 0x30b   :  { %v19455_v9 = vpack.c.bf16 %v3289_v39, %v3285_v1  ;;  %v19457_v42 = vpack.c.bf16 %v3291_v27, %v3287_v32  ;;  %3978 = vmatprep.mubr.bf16.mxu0 %v16903_v51  ;;  %4324 = vmatprep.mubr.bf16.mxu1 %v16903_v51 }
 0x30c   :  { %v2328_v4 = vpop.f32.mrb[120].mxu0  ;;  %v3034_v47 = vpop.f32.mrb[120].mxu1  ;;  %v19459_v49 = vpack.c.bf16 %v3290_v38, %v3286_v2  ;;  %v19461_v5 = vpack.c.bf16 %v3292_v26, %v3288_v3 }
 0x30d   :  { %23506 = vst [vmem:[#allocation83_spill] sm:$0xff] %v19455_v9  ;;  %v15556_v61 = vadd.f32 %v2328_v4, %v18731_v54  ;;  %v15684_v60 = vadd.f32 %v3034_v47, %v18735_v55  ;;  %v2330_v46 = vpop.f32.mrb[121].mxu0  ;;  %v3036_v50 = vpop.f32.mrb[121].mxu1 }
 0x30e   :  { %23507 = vst [vmem:[#allocation84_spill] sm:$0xff] %v19459_v49  ;;  %23508 = vst [vmem:[#allocation85_spill] sm:$0xff] %v19461_v5  ;;  %v15557_v43 = vadd.f32 %v2330_v46, %v18739_v56  ;;  %v15685_v35 = vadd.f32 %v3036_v50, %v18741_v57  ;;  %v2332_v8 = vpop.f32.mrb[122].mxu0  ;;  %v3038_v62 = vpop.f32.mrb[122].mxu1  ;;  %3972 = vmatprep.subr.bf16.mxu0 %v19459_v49  ;;  %4318 = vmatprep.subr.bf16.mxu1 %v19461_v5 }
 0x30f   :  { %v15558_v51 = vadd.f32 %v2332_v8, %v18731_v54  ;;  %v15686_v48 = vadd.f32 %v3038_v62, %v18735_v55  ;;  %v2334_v1 = vpop.f32.mrb[123].mxu0  ;;  %v3040_v4 = vpop.f32.mrb[123].mxu1  ;;  %3973 = vmatpush1.bf16.msra.mxu0 %v19455_v9  ;;  %4319 = vmatpush1.bf16.msra.mxu1 %v19457_v42  ;;  %v3293_v32 = vmax.f32 %v15556_v61, 0.0  ;;  %v3295_v39 = vmax.f32 %v15684_v60, 0.0 }
 0x310   :  { %v15559_v27 = vadd.f32 %v2334_v1, %v18739_v56  ;;  %v15687_v2 = vadd.f32 %v3040_v4, %v18741_v57  ;;  %v3294_v3 = vmax.f32 %v15557_v43, 0.0  ;;  %v3296_v47 = vmax.f32 %v15685_v35, 0.0 }
 0x311   :  { %v3297_v38 = vmax.f32 %v15558_v51, 0.0  ;;  %v3299_v26 = vmax.f32 %v15686_v48, 0.0 }
 0x312   :  { %v3298_v46 = vmax.f32 %v15559_v27, 0.0  ;;  %v3300_v50 = vmax.f32 %v15687_v2, 0.0 }
 0x313   :  { %v19475_v8 = vpack.c.bf16 %v3297_v38, %v3293_v32  ;;  %v19477_v62 = vpack.c.bf16 %v3299_v26, %v3295_v39 }
 0x314   :  { %v2338_v5 = vpop.f32.mrb[124].mxu0  ;;  %v3044_v9 = vpop.f32.mrb[124].mxu1  ;;  %v19479_v49 = vpack.c.bf16 %v3298_v46, %v3294_v3  ;;  %v19481_v61 = vpack.c.bf16 %v3300_v50, %v3296_v47 }
 0x315   :  { %23509 = vst [vmem:[#allocation86_spill] sm:$0xff] %v19475_v8  ;;  %v15560_v60 = vadd.f32 %v2338_v5, %v18731_v54  ;;  %v15688_v1 = vadd.f32 %v3044_v9, %v18735_v55  ;;  %v2340_v43 = vpop.f32.mrb[125].mxu0  ;;  %v3046_v51 = vpop.f32.mrb[125].mxu1 }
 0x316   :  { %v15561_v35 = vadd.f32 %v2340_v43, %v18739_v56  ;;  %v15689_v48 = vadd.f32 %v3046_v51, %v18741_v57  ;;  %v2342_v4 = vpop.f32.mrb[126].mxu0  ;;  %v3048_v32 = vpop.f32.mrb[126].mxu1  ;;  %3974 = vmatprep.subr.bf16.mxu0 %v19479_v49  ;;  %4320 = vmatprep.subr.bf16.mxu1 %v19481_v61 }
 0x317   :  { %v15562_v39 = vadd.f32 %v2342_v4, %v18731_v54  ;;  %v15690_v27 = vadd.f32 %v3048_v32, %v18735_v55  ;;  %v2344_v2 = vpop.f32.mrb[127].mxu0  ;;  %v3050_v5 = vpop.f32.mrb[127].mxu1  ;;  %3975 = vmatpush1.bf16.msra.mxu0 %v19475_v8  ;;  %4321 = vmatpush1.bf16.msra.mxu1 %v19477_v62  ;;  %v3301_v9 = vmax.f32 %v15560_v60, 0.0  ;;  %v3303_v3 = vmax.f32 %v15688_v1, 0.0  ;;  %v23532_v60 = vld [vmem:[#allocation23_spill] sm:$0xff]  ;;  %v23533_v1 = vld [vmem:[#allocation24_spill] sm:$0xff] }
 0x318   :  { %v15563_v38 = vadd.f32 %v2344_v2, %v18739_v56  ;;  %v15691_v26 = vadd.f32 %v3050_v5, %v18741_v57  ;;  %v3302_v47 = vmax.f32 %v15561_v35, 0.0  ;;  %v3304_v43 = vmax.f32 %v15689_v48, 0.0  ;;  %v16901_v56 = vld [vmem:[%s23425_s21 + $0x8] ss:$16 sps:$4 sm:$0xff]   ;;  %v16904_v57 = vld [vmem:[%s23425_s21 + $0x2c] ss:$16 sps:$4 sm:$0xff]  }
 0x319   :  { %v3305_v46 = vmax.f32 %v15562_v39, 0.0  ;;  %v3307_v50 = vmax.f32 %v15690_v27, 0.0  ;;  %v23534_v35 = vld [vmem:[#allocation29_spill] sm:$0xff]  ;;  %v23535_v48 = vld [vmem:[#allocation30_spill] sm:$0xff]  ;;  %v23536_v27 = vld [vmem:[#allocation27_spill] sm:$0xff] }
 0x31a   :  { %v3306_v51 = vmax.f32 %v15563_v38, 0.0  ;;  %v3308_v54 = vmax.f32 %v15691_v26, 0.0  ;;  %v16927_v39 = vld [vmem:[%s23425_s21 + $0x108] ss:$16 sps:$4 sm:$0xff]   ;;  %v23537_v2 = vld [vmem:[#allocation28_spill] sm:$0xff] }
 0x31b   :  { %v19495_v4 = vpack.c.bf16 %v3305_v46, %v3301_v9  ;;  %v19497_v55 = vpack.c.bf16 %v3307_v50, %v3303_v3  ;;  %v16928_v5 = vld [vmem:[%s23425_s21 + $0x12c] ss:$16 sps:$4 sm:$0xff]   ;;  %v23539_v3 = vld [vmem:[#allocation34_spill] sm:$0xff]  ;;  %v16930_v38 = vld [vmem:[%s23425_s21 + $0x128] ss:$16 sps:$4 sm:$0xff]  }
 0x31c   :  { %v19499_v32 = vpack.c.bf16 %v3306_v51, %v3302_v47  ;;  %v19501_v8 = vpack.c.bf16 %v3308_v54, %v3304_v43  ;;  %v23538_v9 = vld [vmem:[#allocation33_spill] sm:$0xff] }
 0x31d   :  { %v16931_v26 = vld [vmem:[%s23425_s21 + $0x14c] ss:$16 sps:$4 sm:$0xff]   ;;  %v16933_v47 = vld [vmem:[%s23425_s21 + $0x148] ss:$16 sps:$4 sm:$0xff]  }
 0x31e   :  { %3976 = vmatprep.subr.bf16.mxu0 %v19499_v32  ;;  %4322 = vmatprep.subr.bf16.mxu1 %v19501_v8  ;;  %v16934_v46 = vld [vmem:[%s23425_s21 + $0x16c] ss:$16 sps:$4 sm:$0xff]   ;;  %v16936_v50 = vld [vmem:[%s23425_s21 + $0x168] ss:$16 sps:$4 sm:$0xff]  }
 0x31f   :  { %3977 = vmatpush1.bf16.msra.mxu0 %v19495_v4  ;;  %4323 = vmatpush1.bf16.msra.mxu1 %v19497_v55  ;;  %v16937_v43 = vld [vmem:[%s23425_s21 + $0x18c] ss:$16 sps:$4 sm:$0xff]   ;;  %v16939_v51 = vld [vmem:[%s23425_s21 + $0x188] ss:$16 sps:$4 sm:$0xff]  }
 0x320   :  { %4801 = vmatprep.subr.bf16.mxu0 %v18765_v24  ;;  %5147 = vmatprep.subr.bf16.mxu1 %v18767_v25  ;;  %v16906_v24 = vld [vmem:[%s23425_s21 + $0x28] ss:$16 sps:$4 sm:$0xff]   ;;  %v16910_v25 = vld [vmem:[%s23425_s21 + $0x6c] ss:$16 sps:$4 sm:$0xff]  }
 0x321   :  { %v16940_v54 = vld [vmem:[%s23425_s21 + $0x1ac] ss:$16 sps:$4 sm:$0xff]  }
 0x322   :  { %3979 = vmatmul.mubr.bf16.vlgmr.msra.gmra.mrb[128].mxu0 %v16901_v56  ;;  %4325 = vmatmul.mubr.bf16.vlgmr.msra.gmra.mrb[128].mxu1 %v16901_v56  ;;  %v16942_v56 = vld [vmem:[%s23425_s21 + $0x1a8] ss:$16 sps:$4 sm:$0xff]  }
 0x323   :  { %4802 = vmatpush1.bf16.msra.mxu0 %v18761_v20  ;;  %5148 = vmatpush1.bf16.msra.mxu1 %v18763_v21  ;;  %v16907_v20 = vld [vmem:[%s23425_s21 + $0x4c] ss:$16 sps:$4 sm:$0xff]   ;;  %v16909_v21 = vld [vmem:[%s23425_s21 + $0x48] ss:$16 sps:$4 sm:$0xff]  }
 0x324   :  { %4803 = vmatprep.subr.bf16.mxu0 %v18796_v63  ;;  %5149 = vmatprep.subr.bf16.mxu1 %v18798_v0  ;;  %v16915_v63 = vld [vmem:[%s23425_s21 + $0x88] ss:$16 sps:$4 sm:$0xff]   ;;  %v16916_v0 = vld [vmem:[%s23425_s21 + $0xac] ss:$16 sps:$4 sm:$0xff]  }
 0x325   :  { %3988 = vmatprep.mubr.bf16.mxu0 %v16904_v57  ;;  %4334 = vmatprep.mubr.bf16.mxu1 %v16904_v57  ;;  %v16945_v57 = vld [vmem:[%s23540_s0 + $0x4] ss:$16 sps:$4 sm:$0xff]  }
 0x327   :  { %4804 = vmatpush1.bf16.msra.mxu0 %v18789_v58  ;;  %5150 = vmatpush1.bf16.msra.mxu1 %v18791_v59  ;;  %v16912_v58 = vld [vmem:[%s23425_s21 + $0x68] ss:$16 sps:$4 sm:$0xff]   ;;  %v16913_v59 = vld [vmem:[%s23425_s21 + $0x8c] ss:$16 sps:$4 sm:$0xff]  }
 0x328   :  { %4805 = vmatprep.subr.bf16.mxu0 %v18824_v33  ;;  %5151 = vmatprep.subr.bf16.mxu1 %v18826_v34  ;;  %v16918_v33 = vld [vmem:[%s23425_s21 + $0xa8] ss:$16 sps:$4 sm:$0xff]  }
 0x329   :  { %v23512_v34 = vld [vmem:[#allocation3_spill] sm:$0xff] }
 0x32a   :  { %3989 = vmatmul.mubr.bf16.gmra.mrb[132].mxu0 %v16906_v24  ;;  %4335 = vmatmul.mubr.bf16.gmra.mrb[132].mxu1 %v16906_v24  ;;  %v16943_v24 = vld [vmem:[%s23540_s0] ss:$16 sps:$4 sm:$0xff]  }
 0x32b   :  { %4806 = vmatpush1.bf16.msra.mxu0 %v18817_v28  ;;  %5152 = vmatpush1.bf16.msra.mxu1 %v18819_v29  ;;  %v23510_v28 = vld [vmem:[#allocation5_spill] sm:$0xff]  ;;  %v23511_v29 = vld [vmem:[#allocation6_spill] sm:$0xff] }
 0x32c   :  { %4807 = vmatprep.subr.bf16.mxu0 %v18849_v10  ;;  %5153 = vmatprep.subr.bf16.mxu1 %v18851_v11  ;;  %v23515_v10 = vld [vmem:[#allocation10_spill] sm:$0xff]  ;;  %v16919_v11 = vld [vmem:[%s23425_s21 + $0xcc] ss:$16 sps:$4 sm:$0xff]  }
 0x32d   :  { %3998 = vmatprep.mubr.bf16.mxu0 %v16907_v20  ;;  %4344 = vmatprep.mubr.bf16.mxu1 %v16907_v20  ;;  %v16946_v20 = vld [vmem:[%s23540_s0 + $0x24] ss:$16 sps:$4 sm:$0xff]  }
 0x32f   :  { %4808 = vmatpush1.bf16.msra.mxu0 %v18845_v6  ;;  %5154 = vmatpush1.bf16.msra.mxu1 %v18847_v7  ;;  %v23513_v6 = vld [vmem:[#allocation4_spill] sm:$0xff]  ;;  %v23514_v7 = vld [vmem:[#allocation9_spill] sm:$0xff] }
 0x330   :  { %4809 = vmatprep.subr.bf16.mxu0 %v18875_v52  ;;  %5155 = vmatprep.subr.bf16.mxu1 %v18877_v53  ;;  %v23518_v52 = vld [vmem:[#allocation13_spill] sm:$0xff]  ;;  %v23519_v53 = vld [vmem:[#allocation14_spill] sm:$0xff] }
 0x332   :  { %3999 = vmatmul.mubr.bf16.gmra.mrb[136].mxu0 %v16909_v21  ;;  %4345 = vmatmul.mubr.bf16.gmra.mrb[136].mxu1 %v16909_v21  ;;  %v23541_v21 = vld [vmem:[#allocation31_spill] sm:$0xff] }
 0x333   :  { %4810 = vmatpush1.bf16.msra.mxu0 %v18871_v44  ;;  %5156 = vmatpush1.bf16.msra.mxu1 %v18873_v45  ;;  %v23516_v44 = vld [vmem:[#allocation7_spill] sm:$0xff]  ;;  %v23517_v45 = vld [vmem:[#allocation8_spill] sm:$0xff] }
 0x334   :  { %4811 = vmatprep.subr.bf16.mxu0 %v18895_v36  ;;  %5157 = vmatprep.subr.bf16.mxu1 %v18897_v37  ;;  %v23521_v36 = vld [vmem:[#allocation12_spill] sm:$0xff]  ;;  %v23522_v37 = vld [vmem:[#allocation17_spill] sm:$0xff] }
 0x335   :  { %4008 = vmatprep.mubr.bf16.mxu0 %v16910_v25  ;;  %4354 = vmatprep.mubr.bf16.mxu1 %v16910_v25  ;;  %v23542_v25 = vld [vmem:[#allocation32_spill] sm:$0xff] }
 0x337   :  { %4812 = vmatpush1.bf16.msra.mxu0 %v18891_v30  ;;  %5158 = vmatpush1.bf16.msra.mxu1 %v18893_v31  ;;  %v16921_v30 = vld [vmem:[%s23425_s21 + $0xc8] ss:$16 sps:$4 sm:$0xff]  }
 0x338   :  { %4813 = vmatprep.subr.bf16.mxu0 %v18915_v22  ;;  %5159 = vmatprep.subr.bf16.mxu1 %v18917_v23  ;;  %v23520_v31 = vld [vmem:[#allocation11_spill] sm:$0xff]  ;;  %v23525_v23 = vld [vmem:[#allocation16_spill] sm:$0xff] }
 0x339   :  { %v23524_v22 = vld [vmem:[#allocation15_spill] sm:$0xff] }
 0x33a   :  { %4009 = vmatmul.mubr.bf16.gmra.mrb[140].mxu0 %v16912_v58  ;;  %4355 = vmatmul.mubr.bf16.gmra.mrb[140].mxu1 %v16912_v58  ;;  %v23543_v58 = vld [vmem:[#allocation37_spill] sm:$0xff] }
 0x33b   :  { %4814 = vmatpush1.bf16.msra.mxu0 %v18911_v16  ;;  %5160 = vmatpush1.bf16.msra.mxu1 %v18913_v17  ;;  %v23523_v16 = vld [vmem:[#allocation18_spill] sm:$0xff]  ;;  %v16922_v17 = vld [vmem:[%s23425_s21 + $0xec] ss:$16 sps:$4 sm:$0xff]  }
 0x33c   :  { %4815 = vmatprep.subr.bf16.mxu0 %v18935_v18  ;;  %5161 = vmatprep.subr.bf16.mxu1 %v18937_v19  ;;  %v16924_v18 = vld [vmem:[%s23425_s21 + $0xe8] ss:$16 sps:$4 sm:$0xff]  }
 0x33d   :  { %4018 = vmatprep.mubr.bf16.mxu0 %v16913_v59  ;;  %4364 = vmatprep.mubr.bf16.mxu1 %v16913_v59  ;;  %v23528_v19 = vld [vmem:[#allocation19_spill] sm:$0xff]  ;;  %v23544_v59 = vld [vmem:[#allocation38_spill] sm:$0xff] }
 0x33f   :  { %4816 = vmatpush1.bf16.msra.mxu0 %v18931_v12  ;;  %5162 = vmatpush1.bf16.msra.mxu1 %v18933_v13  ;;  %v23526_v12 = vld [vmem:[#allocation21_spill] sm:$0xff]  ;;  %v23527_v13 = vld [vmem:[#allocation22_spill] sm:$0xff] }
 0x340   :  { %4817 = vmatprep.subr.bf16.mxu0 %v18955_v40  ;;  %5163 = vmatprep.subr.bf16.mxu1 %v18957_v41  ;;  %v23531_v40 = vld [vmem:[#allocation26_spill] sm:$0xff]  ;;  %v16925_v41 = vld [vmem:[%s23425_s21 + $0x10c] ss:$16 sps:$4 sm:$0xff]  }
 0x342   :  { %4019 = vmatmul.mubr.bf16.gmra.mrb[144].mxu0 %v16915_v63  ;;  %4365 = vmatmul.mubr.bf16.gmra.mrb[144].mxu1 %v16915_v63  ;;  %v16948_v63 = vld [vmem:[%s23540_s0 + $0x20] ss:$16 sps:$4 sm:$0xff]  }
 0x343   :  { %4818 = vmatpush1.bf16.msra.mxu0 %v18951_v14  ;;  %5164 = vmatpush1.bf16.msra.mxu1 %v18953_v15  ;;  %v23529_v14 = vld [vmem:[#allocation20_spill] sm:$0xff]  ;;  %v23530_v15 = vld [vmem:[#allocation25_spill] sm:$0xff] }
 0x344   :  { %4819 = vmatprep.subr.bf16.mxu0 %v23510_v28  ;;  %5165 = vmatprep.subr.bf16.mxu1 %v23511_v29  ;;  %v23546_v28 = vld [vmem:[#allocation36_spill] sm:$0xff]  ;;  %v23547_v29 = vld [vmem:[#allocation41_spill] sm:$0xff] }
 0x345   :  { %4028 = vmatprep.mubr.bf16.mxu0 %v16916_v0  ;;  %4374 = vmatprep.mubr.bf16.mxu1 %v16916_v0  ;;  %v23545_v0 = vld [vmem:[#allocation35_spill] sm:$0xff] }
 0x347   :  { %4820 = vmatpush1.bf16.msra.mxu0 %v23512_v34  ;;  %5166 = vmatpush1.bf16.msra.mxu1 %v23513_v6  ;;  %v16949_v34 = vld [vmem:[%s23540_s0 + $0x44] ss:$16 sps:$4 sm:$0xff]   ;;  %v23549_v6 = vld [vmem:[#allocation39_spill] sm:$0xff] }
 0x348   :  { %4821 = vmatprep.subr.bf16.mxu0 %v23514_v7  ;;  %5167 = vmatprep.subr.bf16.mxu1 %v23515_v10  ;;  %v23550_v7 = vld [vmem:[#allocation40_spill] sm:$0xff]  ;;  %v23551_v10 = vld [vmem:[#allocation45_spill] sm:$0xff] }
 0x34a   :  { %4029 = vmatmul.mubr.bf16.gmra.mrb[148].mxu0 %v16918_v33  ;;  %4375 = vmatmul.mubr.bf16.gmra.mrb[148].mxu1 %v16918_v33  ;;  %v23548_v33 = vld [vmem:[#allocation42_spill] sm:$0xff] }
 0x34b   :  { %4822 = vmatpush1.bf16.msra.mxu0 %v23516_v44  ;;  %5168 = vmatpush1.bf16.msra.mxu1 %v23517_v45  ;;  %v16951_v44 = vld [vmem:[%s23540_s0 + $0x40] ss:$16 sps:$4 sm:$0xff]   ;;  %v23553_v45 = vld [vmem:[#allocation43_spill] sm:$0xff] }
 0x34c   :  { %4823 = vmatprep.subr.bf16.mxu0 %v23518_v52  ;;  %5169 = vmatprep.subr.bf16.mxu1 %v23519_v53  ;;  %v23554_v52 = vld [vmem:[#allocation44_spill] sm:$0xff]  ;;  %v23555_v53 = vld [vmem:[#allocation49_spill] sm:$0xff] }
 0x34d   :  { %4038 = vmatprep.mubr.bf16.mxu0 %v16919_v11  ;;  %4384 = vmatprep.mubr.bf16.mxu1 %v16919_v11  ;;  %v23552_v11 = vld [vmem:[#allocation46_spill] sm:$0xff] }
 0x34f   :  { %4824 = vmatpush1.bf16.msra.mxu0 %v23520_v31  ;;  %5170 = vmatpush1.bf16.msra.mxu1 %v23521_v36  ;;  %v16952_v31 = vld [vmem:[%s23540_s0 + $0x64] ss:$16 sps:$4 sm:$0xff]   ;;  %v23557_v36 = vld [vmem:[#allocation47_spill] sm:$0xff] }
 0x350   :  { %4825 = vmatprep.subr.bf16.mxu0 %v23522_v37  ;;  %5171 = vmatprep.subr.bf16.mxu1 %v23523_v16  ;;  %v23558_v37 = vld [vmem:[#allocation48_spill] sm:$0xff]  ;;  %v23559_v16 = vld [vmem:[#allocation53_spill] sm:$0xff] }
 0x352   :  { %4039 = vmatmul.mubr.bf16.gmra.mrb[152].mxu0 %v16921_v30  ;;  %4385 = vmatmul.mubr.bf16.gmra.mrb[152].mxu1 %v16921_v30  ;;  %v23556_v30 = vld [vmem:[#allocation50_spill] sm:$0xff] }
 0x353   :  { %4826 = vmatpush1.bf16.msra.mxu0 %v23524_v22  ;;  %5172 = vmatpush1.bf16.msra.mxu1 %v23525_v23  ;;  %v16954_v22 = vld [vmem:[%s23540_s0 + $0x60] ss:$16 sps:$4 sm:$0xff]   ;;  %v23561_v23 = vld [vmem:[#allocation51_spill] sm:$0xff] }
 0x354   :  { %4827 = vmatprep.subr.bf16.mxu0 %v23526_v12  ;;  %5173 = vmatprep.subr.bf16.mxu1 %v23527_v13  ;;  %v23562_v12 = vld [vmem:[#allocation52_spill] sm:$0xff]  ;;  %v23563_v13 = vld [vmem:[#allocation57_spill] sm:$0xff] }
 0x355   :  { %4048 = vmatprep.mubr.bf16.mxu0 %v16922_v17  ;;  %4394 = vmatprep.mubr.bf16.mxu1 %v16922_v17  ;;  %v23560_v17 = vld [vmem:[#allocation54_spill] sm:$0xff] }
 0x357   :  { %4828 = vmatpush1.bf16.msra.mxu0 %v23528_v19  ;;  %5174 = vmatpush1.bf16.msra.mxu1 %v23529_v14  ;;  %v16955_v19 = vld [vmem:[%s23540_s0 + $0x84] ss:$16 sps:$4 sm:$0xff]   ;;  %v23565_v14 = vld [vmem:[#allocation55_spill] sm:$0xff] }
 0x358   :  { %4829 = vmatprep.subr.bf16.mxu0 %v23530_v15  ;;  %5175 = vmatprep.subr.bf16.mxu1 %v23531_v40  ;;  %v23566_v15 = vld [vmem:[#allocation56_spill] sm:$0xff]  ;;  %v23567_v40 = vld [vmem:[#allocation61_spill] sm:$0xff] }
 0x35a   :  { %4049 = vmatmul.mubr.bf16.gmra.mrb[156].mxu0 %v16924_v18  ;;  %4395 = vmatmul.mubr.bf16.gmra.mrb[156].mxu1 %v16924_v18  ;;  %v23564_v18 = vld [vmem:[#allocation58_spill] sm:$0xff] }
 0x35b   :  { %4830 = vmatpush1.bf16.msra.mxu0 %v23532_v60  ;;  %5176 = vmatpush1.bf16.msra.mxu1 %v23533_v1  ;;  %v16957_v60 = vld [vmem:[%s23540_s0 + $0x80] ss:$16 sps:$4 sm:$0xff]   ;;  %v23569_v1 = vld [vmem:[#allocation59_spill] sm:$0xff] }
 0x35c   :  { %4831 = vmatprep.subr.bf16.mxu0 %v23534_v35  ;;  %5177 = vmatprep.subr.bf16.mxu1 %v23535_v48  ;;  %v23570_v35 = vld [vmem:[#allocation60_spill] sm:$0xff]  ;;  %v23571_v48 = vld [vmem:[#allocation65_spill] sm:$0xff] }
 0x35d   :  { %4058 = vmatprep.mubr.bf16.mxu0 %v16925_v41  ;;  %4404 = vmatprep.mubr.bf16.mxu1 %v16925_v41  ;;  %v23568_v41 = vld [vmem:[#allocation62_spill] sm:$0xff] }
 0x35f   :  { %4832 = vmatpush1.bf16.msra.mxu0 %v23536_v27  ;;  %5178 = vmatpush1.bf16.msra.mxu1 %v23537_v2  ;;  %v16958_v27 = vld [vmem:[%s23540_s0 + $0xa4] ss:$16 sps:$4 sm:$0xff]   ;;  %v23573_v2 = vld [vmem:[#allocation63_spill] sm:$0xff] }
 0x360   :  { %4974 = vmatprep.subr.bf16.mxu0 %v23538_v9  ;;  %5320 = vmatprep.subr.bf16.mxu1 %v23539_v3  ;;  %v23575_v9 = vld [vmem:[#allocation69_spill] sm:$0xff]  ;;  %v23576_v3 = vld [vmem:[#allocation70_spill] sm:$0xff] }
 0x362   :  { %4059 = vmatmul.mubr.bf16.gmra.mrb[160].mxu0 %v16927_v39  ;;  %4405 = vmatmul.mubr.bf16.gmra.mrb[160].mxu1 %v16927_v39  ;;  %v23572_v39 = vld [vmem:[#allocation66_spill] sm:$0xff] }
 0x363   :  { %4068 = vmatprep.mubr.bf16.mxu0 %v16928_v5  ;;  %4414 = vmatprep.mubr.bf16.mxu1 %v16928_v5  ;;  %v23574_v5 = vld [vmem:[#allocation64_spill] sm:$0xff] }
 0x36a   :  { %4069 = vmatmul.mubr.bf16.gmra.mrb[164].mxu0 %v16930_v38  ;;  %4415 = vmatmul.mubr.bf16.gmra.mrb[164].mxu1 %v16930_v38  ;;  %v16960_v38 = vld [vmem:[%s23540_s0 + $0xa0] ss:$16 sps:$4 sm:$0xff]  }
 0x36b   :  { %4078 = vmatprep.mubr.bf16.mxu0 %v16931_v26  ;;  %4424 = vmatprep.mubr.bf16.mxu1 %v16931_v26  ;;  %v23577_v26 = vld [vmem:[#allocation67_spill] sm:$0xff] }
 0x372   :  { %4079 = vmatmul.mubr.bf16.gmra.mrb[168].mxu0 %v16933_v47  ;;  %4425 = vmatmul.mubr.bf16.gmra.mrb[168].mxu1 %v16933_v47  ;;  %v23578_v47 = vld [vmem:[#allocation68_spill] sm:$0xff] }
 0x373   :  { %4088 = vmatprep.mubr.bf16.mxu0 %v16934_v46  ;;  %4434 = vmatprep.mubr.bf16.mxu1 %v16934_v46  ;;  %v23579_v46 = vld [vmem:[#allocation73_spill] sm:$0xff] }
 0x37a   :  { %4089 = vmatmul.mubr.bf16.gmra.mrb[172].mxu0 %v16936_v50  ;;  %4435 = vmatmul.mubr.bf16.gmra.mrb[172].mxu1 %v16936_v50  ;;  %v23580_v50 = vld [vmem:[#allocation74_spill] sm:$0xff] }
 0x37b   :  { %4098 = vmatprep.mubr.bf16.mxu0 %v16937_v43  ;;  %4444 = vmatprep.mubr.bf16.mxu1 %v16937_v43  ;;  %v16961_v43 = vld [vmem:[%s23540_s0 + $0xc4] ss:$16 sps:$4 sm:$0xff]  }
 0x382   :  { %4099 = vmatmul.mubr.bf16.gmra.mrb[176].mxu0 %v16939_v51  ;;  %4445 = vmatmul.mubr.bf16.gmra.mrb[176].mxu1 %v16939_v51  ;;  %v23581_v51 = vld [vmem:[#allocation71_spill] sm:$0xff] }
 0x383   :  { %4108 = vmatprep.mubr.bf16.mxu0 %v16940_v54  ;;  %4454 = vmatprep.mubr.bf16.mxu1 %v16940_v54  ;;  %v23582_v54 = vld [vmem:[#allocation72_spill] sm:$0xff] }
 0x38a   :  { %4109 = vmatmul.mubr.bf16.gmra.mrb[180].mxu0 %v16942_v56  ;;  %4455 = vmatmul.mubr.bf16.gmra.mrb[180].mxu1 %v16942_v56  ;;  %v23583_v56 = vld [vmem:[#allocation77_spill] sm:$0xff] }
 0x38b   :  { %4833 = vmatprep.mubr.bf16.mxu0 %v16945_v57  ;;  %5179 = vmatprep.mubr.bf16.mxu1 %v16945_v57  ;;  %v23584_v57 = vld [vmem:[#allocation78_spill] sm:$0xff] }
 0x392   :  { %4834 = vmatmul.mubr.bf16.vlgmr.msra.gmra.mrb[184].mxu0 %v16943_v24  ;;  %5180 = vmatmul.mubr.bf16.vlgmr.msra.gmra.mrb[184].mxu1 %v16943_v24  ;;  %v16963_v24 = vld [vmem:[%s23540_s0 + $0xc0] ss:$16 sps:$4 sm:$0xff]  }
 0x393   :  { %4975 = vmatpush1.bf16.msra.mxu0 %v23541_v21  ;;  %5321 = vmatpush1.bf16.msra.mxu1 %v23542_v25  ;;  %v23586_v21 = vld [vmem:[#allocation76_spill] sm:$0xff]  ;;  %v23587_v25 = vld [vmem:[#allocation81_spill] sm:$0xff] }
 0x394   :  { %4976 = vmatprep.subr.bf16.mxu0 %v23543_v58  ;;  %5322 = vmatprep.subr.bf16.mxu1 %v23544_v59  ;;  %v23588_v58 = vld [vmem:[#allocation82_spill] sm:$0xff] }
 0x395   :  { %4843 = vmatprep.mubr.bf16.mxu0 %v16946_v20  ;;  %5189 = vmatprep.mubr.bf16.mxu1 %v16946_v20  ;;  %v23585_v20 = vld [vmem:[#allocation75_spill] sm:$0xff]  ;;  %v16964_v59 = vld [vmem:[%s23540_s0 + $0xe4] ss:$16 sps:$4 sm:$0xff]  }
 0x397   :  { %4977 = vmatpush1.bf16.msra.mxu0 %v23545_v0  ;;  %5323 = vmatpush1.bf16.msra.mxu1 %v23546_v28  ;;  %v23590_v0 = vld [vmem:[#allocation80_spill] sm:$0xff] }
 0x398   :  { %4978 = vmatprep.subr.bf16.mxu0 %v23547_v29  ;;  %5324 = vmatprep.subr.bf16.mxu1 %v23548_v33  ;;  %v23591_v28 = vld [vmem:[#allocation84_spill] sm:$0xff]  ;;  %v23592_v29 = vld [vmem:[#allocation85_spill] sm:$0xff] }
 0x399   :  { %v16966_v33 = vld [vmem:[%s23540_s0 + $0xe0] ss:$16 sps:$4 sm:$0xff]  }
 0x39a   :  { %4844 = vmatmul.mubr.bf16.gmra.mrb[188].mxu0 %v16948_v63  ;;  %5190 = vmatmul.mubr.bf16.gmra.mrb[188].mxu1 %v16948_v63  ;;  %v23589_v63 = vld [vmem:[#allocation79_spill] sm:$0xff] }
 0x39b   :  { %4979 = vmatpush1.bf16.msra.mxu0 %v23549_v6  ;;  %5325 = vmatpush1.bf16.msra.mxu1 %v23550_v7  ;;  %v16967_v6 = vld [vmem:[%s23540_s0 + $0x104] ss:$16 sps:$4 sm:$0xff]  }
 0x39c   :  { %4980 = vmatprep.subr.bf16.mxu0 %v23551_v10  ;;  %5326 = vmatprep.subr.bf16.mxu1 %v23552_v11  ;;  %v23594_v7 = vld [vmem:[#allocation86_spill] sm:$0xff] }
 0x39d   :  { %4853 = vmatprep.mubr.bf16.mxu0 %v16949_v34  ;;  %5199 = vmatprep.mubr.bf16.mxu1 %v16949_v34  ;;  %v23593_v34 = vld [vmem:[#allocation83_spill] sm:$0xff] }
 0x39e   :  { %v17029_v10 = vld [vmem:[%s23286_s5 + $0x4] ss:$8 sps:$4 sm:$0xff]  }
 0x39f   :  { %4981 = vmatpush1.bf16.msra.mxu0 %v23553_v45  ;;  %5327 = vmatpush1.bf16.msra.mxu1 %v23554_v52  ;;  %v17032_v11 = vld [vmem:[%s23287_s6 + $0x4] ss:$8 sps:$4 sm:$0xff]  }
 0x3a0   :  { %4982 = vmatprep.subr.bf16.mxu0 %v23555_v53  ;;  %5328 = vmatprep.subr.bf16.mxu1 %v23556_v30  ;;  %v16982_v45 = vld [vmem:[%s23540_s0 + $0x1a4] ss:$16 sps:$4 sm:$0xff]  }
 0x3a2   :  { %4854 = vmatmul.mubr.bf16.gmra.mrb[192].mxu0 %v16951_v44  ;;  %5200 = vmatmul.mubr.bf16.gmra.mrb[192].mxu1 %v16951_v44  ;;  %v16981_v44 = vld [vmem:[%s23540_s0 + $0x180] ss:$16 sps:$4 sm:$0xff]  }
 0x3a3   :  { %4983 = vmatpush1.bf16.msra.mxu0 %v23557_v36  ;;  %5329 = vmatpush1.bf16.msra.mxu1 %v23558_v37 }
 0x3a4   :  { %4984 = vmatprep.subr.bf16.mxu0 %v23559_v16  ;;  %5330 = vmatprep.subr.bf16.mxu1 %v23560_v17  ;;  %v16987_v16 = vld [vmem:[%s23540_s0 + $0xc] ss:$16 sps:$4 sm:$0xff]  }
 0x3a5   :  { %4863 = vmatprep.mubr.bf16.mxu0 %v16952_v31  ;;  %5209 = vmatprep.mubr.bf16.mxu1 %v16952_v31  ;;  %v16984_v31 = vld [vmem:[%s23540_s0 + $0x1a0] ss:$16 sps:$4 sm:$0xff]  }
 0x3a7   :  { %4985 = vmatpush1.bf16.msra.mxu0 %v23561_v23  ;;  %5331 = vmatpush1.bf16.msra.mxu1 %v23562_v12 }
 0x3a8   :  { %4986 = vmatprep.subr.bf16.mxu0 %v23563_v13  ;;  %5332 = vmatprep.subr.bf16.mxu1 %v23564_v18  ;;  %v16985_v13 = vld [vmem:[%s23540_s0 + $0x8] ss:$16 sps:$4 sm:$0xff]  }
 0x3aa   :  { %4864 = vmatmul.mubr.bf16.gmra.mrb[196].mxu0 %v16954_v22  ;;  %5210 = vmatmul.mubr.bf16.gmra.mrb[196].mxu1 %v16954_v22 }
 0x3ab   :  { %4987 = vmatpush1.bf16.msra.mxu0 %v23565_v14  ;;  %5333 = vmatpush1.bf16.msra.mxu1 %v23566_v15  ;;  %v16988_v14 = vld [vmem:[%s23540_s0 + $0x2c] ss:$16 sps:$4 sm:$0xff]  }
 0x3ac   :  { %4988 = vmatprep.subr.bf16.mxu0 %v23567_v40  ;;  %5334 = vmatprep.subr.bf16.mxu1 %v23568_v41 }
 0x3ad   :  { %4873 = vmatprep.mubr.bf16.mxu0 %v16955_v19  ;;  %5219 = vmatprep.mubr.bf16.mxu1 %v16955_v19 }
 0x3af   :  { %4989 = vmatpush1.bf16.msra.mxu0 %v23569_v1  ;;  %5335 = vmatpush1.bf16.msra.mxu1 %v23570_v35  ;;  %v17030_v1 = vld [vmem:[%s23287_s6] ss:$8 sps:$4 sm:$0xff]  }
 0x3b0   :  { %4990 = vmatprep.subr.bf16.mxu0 %v23571_v48  ;;  %5336 = vmatprep.subr.bf16.mxu1 %v23572_v39  ;;  %v17035_v39 = vld [vmem:[%s23286_s5 + $0x14] ss:$8 sps:$4 sm:$0xff]  }
 0x3b2   :  { %4874 = vmatmul.mubr.bf16.gmra.mrb[200].mxu0 %v16957_v60  ;;  %5220 = vmatmul.mubr.bf16.gmra.mrb[200].mxu1 %v16957_v60  ;;  %v17027_v60 = vld [vmem:[%s23286_s5] ss:$8 sps:$4 sm:$0xff]  }
 0x3b3   :  { %4991 = vmatpush1.bf16.msra.mxu0 %v23573_v2  ;;  %5337 = vmatpush1.bf16.msra.mxu1 %v23574_v5  ;;  %v17033_v2 = vld [vmem:[%s23286_s5 + $0x10] ss:$8 sps:$4 sm:$0xff]  }
 0x3b4   :  { %4992 = vmatprep.subr.bf16.mxu0 %v23575_v9  ;;  %5338 = vmatprep.subr.bf16.mxu1 %v23576_v3  ;;  %v17036_v5 = vld [vmem:[%s23287_s6 + $0x10] ss:$8 sps:$4 sm:$0xff]   ;;  %v17041_v9 = vld [vmem:[%s23286_s5 + $0x24] ss:$8 sps:$4 sm:$0xff]  }
 0x3b5   :  { %4883 = vmatprep.mubr.bf16.mxu0 %v16958_v27  ;;  %5229 = vmatprep.mubr.bf16.mxu1 %v16958_v27  ;;  %v17038_v27 = vld [vmem:[%s23287_s6 + $0x14] ss:$8 sps:$4 sm:$0xff]  }
 0x3b7   :  { %4993 = vmatpush1.bf16.msra.mxu0 %v23577_v26  ;;  %5339 = vmatpush1.bf16.msra.mxu1 %v23578_v47  ;;  %v17044_v26 = vld [vmem:[%s23287_s6 + $0x24] ss:$8 sps:$4 sm:$0xff]  }
 0x3b8   :  { %4994 = vmatprep.subr.bf16.mxu0 %v23579_v46  ;;  %5340 = vmatprep.subr.bf16.mxu1 %v23580_v50  ;;  %v16990_v46 = vld [vmem:[%s23540_s0 + $0x28] ss:$16 sps:$4 sm:$0xff]   ;;  %v16991_v50 = vld [vmem:[%s23540_s0 + $0x4c] ss:$16 sps:$4 sm:$0xff]  }
 0x3ba   :  { %4884 = vmatmul.mubr.bf16.gmra.mrb[204].mxu0 %v16960_v38  ;;  %5230 = vmatmul.mubr.bf16.gmra.mrb[204].mxu1 %v16960_v38 }
 0x3bb   :  { %4995 = vmatpush1.bf16.msra.mxu0 %v23581_v51  ;;  %5341 = vmatpush1.bf16.msra.mxu1 %v23582_v54 }
 0x3bc   :  { %4996 = vmatprep.subr.bf16.mxu0 %v23583_v56  ;;  %5342 = vmatprep.subr.bf16.mxu1 %v23584_v57  ;;  %v17039_v56 = vld [vmem:[%s23286_s5 + $0x20] ss:$8 sps:$4 sm:$0xff]  }
 0x3bd   :  { %4893 = vmatprep.mubr.bf16.mxu0 %v16961_v43  ;;  %5239 = vmatprep.mubr.bf16.mxu1 %v16961_v43 }
 0x3bf   :  { %4997 = vmatpush1.bf16.msra.mxu0 %v23585_v20  ;;  %5343 = vmatpush1.bf16.msra.mxu1 %v23586_v21  ;;  %v17042_v20 = vld [vmem:[%s23287_s6 + $0x20] ss:$8 sps:$4 sm:$0xff]   ;;  %v17047_v21 = vld [vmem:[%s23286_s5 + $0x34] ss:$8 sps:$4 sm:$0xff]  }
 0x3c0   :  { %4998 = vmatprep.subr.bf16.mxu0 %v23587_v25  ;;  %5344 = vmatprep.subr.bf16.mxu1 %v23588_v58  ;;  %v17050_v25 = vld [vmem:[%s23287_s6 + $0x34] ss:$8 sps:$4 sm:$0xff]   ;;  %v17045_v58 = vld [vmem:[%s23286_s5 + $0x30] ss:$8 sps:$4 sm:$0xff]  }
 0x3c2   :  { %4894 = vmatmul.mubr.bf16.gmra.mrb[208].mxu0 %v16963_v24  ;;  %5240 = vmatmul.mubr.bf16.gmra.mrb[208].mxu1 %v16963_v24 }
 0x3c3   :  { %4999 = vmatpush1.bf16.msra.mxu0 %v23589_v63  ;;  %5345 = vmatpush1.bf16.msra.mxu1 %v23590_v0  ;;  %v17048_v63 = vld [vmem:[%s23287_s6 + $0x30] ss:$8 sps:$4 sm:$0xff]  }
 0x3c4   :  { %5000 = vmatprep.subr.bf16.mxu0 %v23591_v28  ;;  %5346 = vmatprep.subr.bf16.mxu1 %v23592_v29  ;;  %v17053_v29 = vld [vmem:[%s23286_s5 + $0x44] ss:$8 sps:$4 sm:$0xff]  }
 0x3c5   :  { %4903 = vmatprep.mubr.bf16.mxu0 %v16964_v59  ;;  %5249 = vmatprep.mubr.bf16.mxu1 %v16964_v59  ;;  %v16993_v59 = vld [vmem:[%s23540_s0 + $0x48] ss:$16 sps:$4 sm:$0xff]  }
 0x3c7   :  { %5001 = vmatpush1.bf16.msra.mxu0 %v23593_v34  ;;  %5347 = vmatpush1.bf16.msra.mxu1 %v19457_v42  ;;  %v16970_v42 = vld [vmem:[%s23540_s0 + $0x124] ss:$16 sps:$4 sm:$0xff]  }
 0x3c8   :  { %5002 = vmatprep.subr.bf16.mxu0 %v19479_v49  ;;  %5348 = vmatprep.subr.bf16.mxu1 %v19481_v61  ;;  %v16969_v49 = vld [vmem:[%s23540_s0 + $0x100] ss:$16 sps:$4 sm:$0xff]  }
 0x3c9   :  { %v16975_v61 = vld [vmem:[%s23540_s0 + $0x140] ss:$16 sps:$4 sm:$0xff]  }
 0x3ca   :  { %4904 = vmatmul.mubr.bf16.gmra.mrb[212].mxu0 %v16966_v33  ;;  %5250 = vmatmul.mubr.bf16.gmra.mrb[212].mxu1 %v16966_v33  ;;  %v17056_v33 = vld [vmem:[%s23287_s6 + $0x44] ss:$8 sps:$4 sm:$0xff]  }
 0x3cb   :  { %5003 = vmatpush1.bf16.msra.mxu0 %v23594_v7  ;;  %5349 = vmatpush1.bf16.msra.mxu1 %v19477_v62  ;;  %v16973_v62 = vld [vmem:[%s23540_s0 + $0x144] ss:$16 sps:$4 sm:$0xff]  }
 0x3cc   :  { %5004 = vmatprep.subr.bf16.mxu0 %v19499_v32  ;;  %5350 = vmatprep.subr.bf16.mxu1 %v19501_v8  ;;  %v16972_v8 = vld [vmem:[%s23540_s0 + $0x120] ss:$16 sps:$4 sm:$0xff]   ;;  %v16979_v32 = vld [vmem:[%s23540_s0 + $0x184] ss:$16 sps:$4 sm:$0xff]  }
 0x3cd   :  { %4913 = vmatprep.mubr.bf16.mxu0 %v16967_v6  ;;  %5259 = vmatprep.mubr.bf16.mxu1 %v16967_v6  ;;  %v16994_v6 = vld [vmem:[%s23540_s0 + $0x6c] ss:$16 sps:$4 sm:$0xff]  }
 0x3cf   :  { %5005 = vmatpush1.bf16.msra.mxu0 %v19495_v4  ;;  %5351 = vmatpush1.bf16.msra.mxu1 %v19497_v55  ;;  %v16976_v4 = vld [vmem:[%s23540_s0 + $0x164] ss:$16 sps:$4 sm:$0xff]   ;;  %v16978_v55 = vld [vmem:[%s23540_s0 + $0x160] ss:$16 sps:$4 sm:$0xff]  }
 0x3d0   :  { %6040 = vmatprep.subr.bf16.mxu0 %v17029_v10  ;;  %6722 = vmatprep.subr.bf16.mxu1 %v17032_v11  ;;  %v17057_v10 = vld [vmem:[%s23286_s5 + $0x50] ss:$8 sps:$4 sm:$0xff]  }
 0x3d1   :  { %v17060_v11 = vld [vmem:[%s23287_s6 + $0x50] ss:$8 sps:$4 sm:$0xff]  }
 0x3d2   :  { %4914 = vmatmul.mubr.bf16.gmra.mrb[216].mxu0 %v16969_v49  ;;  %5260 = vmatmul.mubr.bf16.gmra.mrb[216].mxu1 %v16969_v49 }
 0x3d3   :  { %4923 = vmatprep.mubr.bf16.mxu0 %v16970_v42  ;;  %5269 = vmatprep.mubr.bf16.mxu1 %v16970_v42 }
 0x3da   :  { %4924 = vmatmul.mubr.bf16.gmra.mrb[220].mxu0 %v16972_v8  ;;  %5270 = vmatmul.mubr.bf16.gmra.mrb[220].mxu1 %v16972_v8  ;;  %v17051_v8 = vld [vmem:[%s23286_s5 + $0x40] ss:$8 sps:$4 sm:$0xff]  }
 0x3db   :  { %4933 = vmatprep.mubr.bf16.mxu0 %v16973_v62  ;;  %5279 = vmatprep.mubr.bf16.mxu1 %v16973_v62 }
 0x3e2   :  { %4934 = vmatmul.mubr.bf16.gmra.mrb[224].mxu0 %v16975_v61  ;;  %5280 = vmatmul.mubr.bf16.gmra.mrb[224].mxu1 %v16975_v61 }
 0x3e3   :  { %4943 = vmatprep.mubr.bf16.mxu0 %v16976_v4  ;;  %5289 = vmatprep.mubr.bf16.mxu1 %v16976_v4  ;;  %v17054_v4 = vld [vmem:[%s23287_s6 + $0x40] ss:$8 sps:$4 sm:$0xff]  }
 0x3ea   :  { %4944 = vmatmul.mubr.bf16.gmra.mrb[228].mxu0 %v16978_v55  ;;  %5290 = vmatmul.mubr.bf16.gmra.mrb[228].mxu1 %v16978_v55  ;;  %v17059_v55 = vld [vmem:[%s23286_s5 + $0x54] ss:$8 sps:$4 sm:$0xff]  }
 0x3eb   :  { %4953 = vmatprep.mubr.bf16.mxu0 %v16979_v32  ;;  %5299 = vmatprep.mubr.bf16.mxu1 %v16979_v32  ;;  %v17062_v32 = vld [vmem:[%s23287_s6 + $0x54] ss:$8 sps:$4 sm:$0xff]  }
 0x3f2   :  { %4954 = vmatmul.mubr.bf16.gmra.mrb[232].mxu0 %v16981_v44  ;;  %5300 = vmatmul.mubr.bf16.gmra.mrb[232].mxu1 %v16981_v44  ;;  %v17065_v44 = vld [vmem:[%s23286_s5 + $0x64] ss:$8 sps:$4 sm:$0xff]  }
 0x3f3   :  { %4963 = vmatprep.mubr.bf16.mxu0 %v16982_v45  ;;  %5309 = vmatprep.mubr.bf16.mxu1 %v16982_v45  ;;  %v17068_v45 = vld [vmem:[%s23287_s6 + $0x64] ss:$8 sps:$4 sm:$0xff]  }
 0x3f5   :  { %v19803_v52 = vpop.f32.mrb[128].mxu0  ;;  %v19805_v53 = vpop.f32.mrb[128].mxu1 }
 0x3f6   :  { %v19807_v30 = vpop.f32.mrb[129].mxu0  ;;  %v19812_v36 = vpop.f32.mrb[129].mxu1 }
 0x3f7   :  { %v19814_v37 = vpop.f32.mrb[130].mxu0  ;;  %v19819_v17 = vpop.f32.mrb[130].mxu1 }
 0x3f8   :  { %v19821_v22 = vpop.f32.mrb[131].mxu0  ;;  %v19823_v23 = vpop.f32.mrb[131].mxu1 }
 0x3fa   :  { %4964 = vmatmul.mubr.bf16.gmra.mrb[236].mxu0 %v16984_v31  ;;  %5310 = vmatmul.mubr.bf16.gmra.mrb[236].mxu1 %v16984_v31  ;;  %v16996_v31 = vld [vmem:[%s23540_s0 + $0x68] ss:$16 sps:$4 sm:$0xff]  }
 0x3fb   :  { %5006 = vmatprep.mubr.bf16.mxu0 %v16987_v16  ;;  %5352 = vmatprep.mubr.bf16.mxu1 %v16987_v16 }
 0x3fd   :  { %v19825_v12 = vpop.f32.mrb[132].mxu0  ;;  %v19830_v18 = vpop.f32.mrb[132].mxu1 }
 0x3fe   :  { %v19832_v19 = vpop.f32.mrb[133].mxu0  ;;  %v19837_v15 = vpop.f32.mrb[133].mxu1 }
 0x3ff   :  { %v19839_v40 = vpop.f32.mrb[134].mxu0  ;;  %v19841_v41 = vpop.f32.mrb[134].mxu1 }
 0x400   :  { %v19849_v35 = vpop.f32.mrb[135].mxu0  ;;  %v19851_v48 = vpop.f32.mrb[135].mxu1 }
 0x402   :  { %5007 = vmatmul.mubr.bf16.vlgmr.msra.gmra.mrb[184].mxu0 %v16985_v13  ;;  %5353 = vmatmul.mubr.bf16.vlgmr.msra.gmra.mrb[184].mxu1 %v16985_v13  ;;  %v16997_v13 = vld [vmem:[%s23540_s0 + $0x8c] ss:$16 sps:$4 sm:$0xff]  }
 0x403   :  { %5016 = vmatprep.mubr.bf16.mxu0 %v16988_v14  ;;  %5362 = vmatprep.mubr.bf16.mxu1 %v16988_v14 }
 0x404   :  { %6041 = vmatpush1.bf16.msra.mxu0 %v17027_v60  ;;  %6723 = vmatpush1.bf16.msra.mxu1 %v17030_v1 }
 0x405   :  { %v19868_v3 = vpop.f32.mrb[136].mxu0  ;;  %v19870_v38 = vpop.f32.mrb[136].mxu1  ;;  %6042 = vmatprep.subr.bf16.mxu0 %v17035_v39  ;;  %6724 = vmatprep.subr.bf16.mxu1 %v17038_v27  ;;  %v17063_v39 = vld [vmem:[%s23286_s5 + $0x60] ss:$8 sps:$4 sm:$0xff]  }
 0x406   :  { %v19875_v47 = vpop.f32.mrb[137].mxu0  ;;  %v19883_v43 = vpop.f32.mrb[137].mxu1  ;;  %v17066_v27 = vld [vmem:[%s23287_s6 + $0x60] ss:$8 sps:$4 sm:$0xff]  }
 0x407   :  { %v19885_v51 = vpop.f32.mrb[138].mxu0  ;;  %v19887_v54 = vpop.f32.mrb[138].mxu1 }
 0x408   :  { %v19892_v57 = vpop.f32.mrb[139].mxu0  ;;  %v19894_v24 = vpop.f32.mrb[139].mxu1  ;;  %6043 = vmatpush1.bf16.msra.mxu0 %v17033_v2  ;;  %6725 = vmatpush1.bf16.msra.mxu1 %v17036_v5 }
 0x409   :  { %6044 = vmatprep.subr.bf16.mxu0 %v17041_v9  ;;  %6726 = vmatprep.subr.bf16.mxu1 %v17044_v26  ;;  %v17071_v9 = vld [vmem:[%s23286_s5 + $0x74] ss:$8 sps:$4 sm:$0xff]  }
 0x40a   :  { %5017 = vmatmul.mubr.bf16.gmra.mrb[188].mxu0 %v16990_v46  ;;  %5363 = vmatmul.mubr.bf16.gmra.mrb[188].mxu1 %v16990_v46  ;;  %v17074_v26 = vld [vmem:[%s23287_s6 + $0x74] ss:$8 sps:$4 sm:$0xff]  }
 0x40b   :  { %5026 = vmatprep.mubr.bf16.mxu0 %v16991_v50  ;;  %5372 = vmatprep.mubr.bf16.mxu1 %v16991_v50 }
 0x40c   :  { %6045 = vmatpush1.bf16.msra.mxu0 %v17039_v56  ;;  %6727 = vmatpush1.bf16.msra.mxu1 %v17042_v20  ;;  %v17069_v56 = vld [vmem:[%s23286_s5 + $0x70] ss:$8 sps:$4 sm:$0xff]  }
 0x40d   :  { %v19914_v0 = vpop.f32.mrb[140].mxu0  ;;  %v19916_v28 = vpop.f32.mrb[140].mxu1  ;;  %6046 = vmatprep.subr.bf16.mxu0 %v17047_v21  ;;  %6728 = vmatprep.subr.bf16.mxu1 %v17050_v25  ;;  %v17072_v20 = vld [vmem:[%s23287_s6 + $0x70] ss:$8 sps:$4 sm:$0xff]   ;;  %v17077_v21 = vld [vmem:[%s23286_s5 + $0x84] ss:$8 sps:$4 sm:$0xff]  }
 0x40e   :  { %v19924_v34 = vpop.f32.mrb[141].mxu0  ;;  %v19929_v7 = vpop.f32.mrb[141].mxu1  ;;  %v17080_v25 = vld [vmem:[%s23287_s6 + $0x84] ss:$8 sps:$4 sm:$0xff]  }
 0x40f   :  { %v19931_v49 = vpop.f32.mrb[142].mxu0  ;;  %v19933_v42 = vpop.f32.mrb[142].mxu1 }
 0x410   :  { %v19938_v62 = vpop.f32.mrb[143].mxu0  ;;  %v19940_v61 = vpop.f32.mrb[143].mxu1  ;;  %6047 = vmatpush1.bf16.msra.mxu0 %v17045_v58  ;;  %6729 = vmatpush1.bf16.msra.mxu1 %v17048_v63  ;;  %v16999_v58 = vld [vmem:[%s23540_s0 + $0x88] ss:$16 sps:$4 sm:$0xff]   ;;  %v17000_v63 = vld [vmem:[%s23540_s0 + $0xac] ss:$16 sps:$4 sm:$0xff]  }
 0x411   :  { %6048 = vmatprep.subr.bf16.mxu0 %v17053_v29  ;;  %6730 = vmatprep.subr.bf16.mxu1 %v17056_v33 }
 0x412   :  { %5027 = vmatmul.mubr.bf16.gmra.mrb[192].mxu0 %v16993_v59  ;;  %5373 = vmatmul.mubr.bf16.gmra.mrb[192].mxu1 %v16993_v59 }
 0x413   :  { %5036 = vmatprep.mubr.bf16.mxu0 %v16994_v6  ;;  %5382 = vmatprep.mubr.bf16.mxu1 %v16994_v6 }
 0x414   :  { %6049 = vmatpush1.bf16.msra.mxu0 %v17051_v8  ;;  %6731 = vmatpush1.bf16.msra.mxu1 %v17054_v4  ;;  %v17075_v8 = vld [vmem:[%s23286_s5 + $0x80] ss:$8 sps:$4 sm:$0xff]  }
 0x415   :  { %v19966_v16 = vpop.f32.mrb[144].mxu0  ;;  %v19971_v14 = vpop.f32.mrb[144].mxu1  ;;  %6050 = vmatprep.subr.bf16.mxu0 %v17059_v55  ;;  %6732 = vmatprep.subr.bf16.mxu1 %v17062_v32  ;;  %v17078_v4 = vld [vmem:[%s23287_s6 + $0x80] ss:$8 sps:$4 sm:$0xff]  }
 0x416   :  { %v19973_v60 = vpop.f32.mrb[145].mxu0  ;;  %v19975_v1 = vpop.f32.mrb[145].mxu1 }
 0x417   :  { %v19983_v2 = vpop.f32.mrb[146].mxu0  ;;  %v19985_v5 = vpop.f32.mrb[146].mxu1 }
 0x418   :  { %v19993_v46 = vpop.f32.mrb[147].mxu0  ;;  %v19995_v50 = vpop.f32.mrb[147].mxu1  ;;  %6051 = vmatpush1.bf16.msra.mxu0 %v17057_v10  ;;  %6733 = vmatpush1.bf16.msra.mxu1 %v17060_v11  ;;  %v17083_v10 = vld [vmem:[%s23286_s5 + $0x94] ss:$8 sps:$4 sm:$0xff]  }
 0x419   :  { %6052 = vmatprep.subr.bf16.mxu0 %v17065_v44  ;;  %6734 = vmatprep.subr.bf16.mxu1 %v17068_v45  ;;  %v17086_v11 = vld [vmem:[%s23287_s6 + $0x94] ss:$8 sps:$4 sm:$0xff]  }
 0x41a   :  { %5037 = vmatmul.mubr.bf16.gmra.mrb[196].mxu0 %v16996_v31  ;;  %5383 = vmatmul.mubr.bf16.gmra.mrb[196].mxu1 %v16996_v31  ;;  %v17081_v31 = vld [vmem:[%s23286_s5 + $0x90] ss:$8 sps:$4 sm:$0xff]  }
 0x41b   :  { %5046 = vmatprep.mubr.bf16.mxu0 %v16997_v13  ;;  %5392 = vmatprep.mubr.bf16.mxu1 %v16997_v13  ;;  %v17084_v13 = vld [vmem:[%s23287_s6 + $0x90] ss:$8 sps:$4 sm:$0xff]  }
 0x41c   :  { %6053 = vmatpush1.bf16.msra.mxu0 %v17063_v39  ;;  %6735 = vmatpush1.bf16.msra.mxu1 %v17066_v27 }
 0x41d   :  { %v20012_v59 = vpop.f32.mrb[148].mxu0  ;;  %v20017_v29 = vpop.f32.mrb[148].mxu1  ;;  %6054 = vmatprep.subr.bf16.mxu0 %v17071_v9  ;;  %6736 = vmatprep.subr.bf16.mxu1 %v17074_v26  ;;  %v17089_v9 = vld [vmem:[%s23286_s5 + $0xa4] ss:$8 sps:$4 sm:$0xff]  }
 0x41e   :  { %v20019_v33 = vpop.f32.mrb[149].mxu0  ;;  %v20021_v6 = vpop.f32.mrb[149].mxu1  ;;  %v17092_v26 = vld [vmem:[%s23287_s6 + $0xa4] ss:$8 sps:$4 sm:$0xff]  }
 0x41f   :  { %v20029_v55 = vpop.f32.mrb[150].mxu0  ;;  %v20031_v32 = vpop.f32.mrb[150].mxu1 }
 0x420   :  { %v20039_v44 = vpop.f32.mrb[151].mxu0  ;;  %v20041_v45 = vpop.f32.mrb[151].mxu1  ;;  %6055 = vmatpush1.bf16.msra.mxu0 %v17069_v56  ;;  %6737 = vmatpush1.bf16.msra.mxu1 %v17072_v20  ;;  %v17002_v20 = vld [vmem:[%s23540_s0 + $0xa8] ss:$16 sps:$4 sm:$0xff]  }
 0x421   :  { %6056 = vmatprep.subr.bf16.mxu0 %v17077_v21  ;;  %6738 = vmatprep.subr.bf16.mxu1 %v17080_v25 }
 0x422   :  { %5047 = vmatmul.mubr.bf16.gmra.mrb[200].mxu0 %v16999_v58  ;;  %5393 = vmatmul.mubr.bf16.gmra.mrb[200].mxu1 %v16999_v58  ;;  %v17003_v58 = vld [vmem:[%s23540_s0 + $0xcc] ss:$16 sps:$4 sm:$0xff]  }
 0x423   :  { %5056 = vmatprep.mubr.bf16.mxu0 %v17000_v63  ;;  %5402 = vmatprep.mubr.bf16.mxu1 %v17000_v63 }
 0x424   :  { %6057 = vmatpush1.bf16.msra.mxu0 %v17075_v8  ;;  %6739 = vmatpush1.bf16.msra.mxu1 %v17078_v4 }
 0x425   :  { %v20049_v39 = vpop.f32.mrb[152].mxu0  ;;  %v20051_v27 = vpop.f32.mrb[152].mxu1  ;;  %6058 = vmatprep.subr.bf16.mxu0 %v17083_v10  ;;  %6740 = vmatprep.subr.bf16.mxu1 %v17086_v11  ;;  %v17087_v10 = vld [vmem:[%s23286_s5 + $0xa0] ss:$8 sps:$4 sm:$0xff]  }
 0x426   :  { %23595 = vst [vmem:[#allocation5_spill] sm:$0xff] %v20051_v27  ;;  %v20059_v56 = vpop.f32.mrb[153].mxu0  ;;  %v20064_v21 = vpop.f32.mrb[153].mxu1  ;;  %v17090_v11 = vld [vmem:[%s23287_s6 + $0xa0] ss:$8 sps:$4 sm:$0xff]  }
 0x427   :  { %23596 = vst [vmem:[#allocation6_spill] sm:$0xff] %v20059_v56  ;;  %23597 = vst [vmem:[#allocation3_spill] sm:$0xff] %v20064_v21  ;;  %v20066_v25 = vpop.f32.mrb[154].mxu0  ;;  %v20071_v63 = vpop.f32.mrb[154].mxu1 }
 0x428   :  { %23598 = vst [vmem:[#allocation4_spill] sm:$0xff] %v20066_v25  ;;  %23599 = vst [vmem:[#allocation9_spill] sm:$0xff] %v20071_v63  ;;  %v20073_v8 = vpop.f32.mrb[155].mxu0  ;;  %v20075_v4 = vpop.f32.mrb[155].mxu1  ;;  %6059 = vmatpush1.bf16.msra.mxu0 %v17081_v31  ;;  %6741 = vmatpush1.bf16.msra.mxu1 %v17084_v13  ;;  %v17095_v63 = vld [vmem:[%s23286_s5 + $0xb4] ss:$8 sps:$4 sm:$0xff]  }
 0x429   :  { %23600 = vst [vmem:[#allocation10_spill] sm:$0xff] %v20073_v8  ;;  %23601 = vst [vmem:[#allocation7_spill] sm:$0xff] %v20075_v4  ;;  %6060 = vmatprep.subr.bf16.mxu0 %v17089_v9  ;;  %6742 = vmatprep.subr.bf16.mxu1 %v17092_v26  ;;  %v17098_v4 = vld [vmem:[%s23287_s6 + $0xb4] ss:$8 sps:$4 sm:$0xff]   ;;  %v17093_v31 = vld [vmem:[%s23286_s5 + $0xb0] ss:$8 sps:$4 sm:$0xff]  }
 0x42a   :  { %5057 = vmatmul.mubr.bf16.gmra.mrb[204].mxu0 %v17002_v20  ;;  %5403 = vmatmul.mubr.bf16.gmra.mrb[204].mxu1 %v17002_v20  ;;  %v17096_v13 = vld [vmem:[%s23287_s6 + $0xb0] ss:$8 sps:$4 sm:$0xff]   ;;  %v17101_v20 = vld [vmem:[%s23286_s5 + $0xc4] ss:$8 sps:$4 sm:$0xff]  }
 0x42b   :  { %5066 = vmatprep.mubr.bf16.mxu0 %v17003_v58  ;;  %5412 = vmatprep.mubr.bf16.mxu1 %v17003_v58  ;;  %v17104_v58 = vld [vmem:[%s23287_s6 + $0xc4] ss:$8 sps:$4 sm:$0xff]  }
 0x42c   :  { %6061 = vmatpush1.bf16.msra.mxu0 %v17087_v10  ;;  %6743 = vmatpush1.bf16.msra.mxu1 %v17090_v11  ;;  %v17005_v11 = vld [vmem:[%s23540_s0 + $0xc8] ss:$16 sps:$4 sm:$0xff]  }
 0x42d   :  { %v20095_v9 = vpop.f32.mrb[156].mxu0  ;;  %v20097_v26 = vpop.f32.mrb[156].mxu1  ;;  %6062 = vmatprep.subr.bf16.mxu0 %v17095_v63  ;;  %6744 = vmatprep.subr.bf16.mxu1 %v17098_v4  ;;  %v17006_v63 = vld [vmem:[%s23540_s0 + $0xec] ss:$16 sps:$4 sm:$0xff]  }
 0x42e   :  { %23602 = vst [vmem:[#allocation8_spill] sm:$0xff] %v20095_v9  ;;  %23603 = vst [vmem:[#allocation13_spill] sm:$0xff] %v20097_v26  ;;  %v20105_v10 = vpop.f32.mrb[157].mxu0  ;;  %v20110_v8 = vpop.f32.mrb[157].mxu1 }
 0x42f   :  { %23604 = vst [vmem:[#allocation14_spill] sm:$0xff] %v20105_v10  ;;  %23605 = vst [vmem:[#allocation11_spill] sm:$0xff] %v20110_v8  ;;  %v20112_v9 = vpop.f32.mrb[158].mxu0  ;;  %v20117_v4 = vpop.f32.mrb[158].mxu1  ;;  %v17099_v10 = vld [vmem:[%s23286_s5 + $0xc0] ss:$8 sps:$4 sm:$0xff]  }
 0x430   :  { %23606 = vst [vmem:[#allocation12_spill] sm:$0xff] %v20112_v9  ;;  %23607 = vst [vmem:[#allocation17_spill] sm:$0xff] %v20117_v4  ;;  %v20119_v26 = vpop.f32.mrb[159].mxu0  ;;  %v20121_v25 = vpop.f32.mrb[159].mxu1  ;;  %6063 = vmatpush1.bf16.msra.mxu0 %v17093_v31  ;;  %6745 = vmatpush1.bf16.msra.mxu1 %v17096_v13  ;;  %v17102_v9 = vld [vmem:[%s23287_s6 + $0xc0] ss:$8 sps:$4 sm:$0xff]  }
 0x431   :  { %23608 = vst [vmem:[#allocation18_spill] sm:$0xff] %v20119_v26  ;;  %23609 = vst [vmem:[#allocation15_spill] sm:$0xff] %v20121_v25  ;;  %6064 = vmatprep.subr.bf16.mxu0 %v17101_v20  ;;  %6746 = vmatprep.subr.bf16.mxu1 %v17104_v58  ;;  %v17107_v4 = vld [vmem:[%s23286_s5 + $0xd4] ss:$8 sps:$4 sm:$0xff]   ;;  %v17105_v31 = vld [vmem:[%s23286_s5 + $0xd0] ss:$8 sps:$4 sm:$0xff]  }
 0x432   :  { %v17110_v25 = vld [vmem:[%s23287_s6 + $0xd4] ss:$8 sps:$4 sm:$0xff]   ;;  %5067 = vmatmul.mubr.bf16.gmra.mrb[208].mxu0 %v17005_v11  ;;  %5413 = vmatmul.mubr.bf16.gmra.mrb[208].mxu1 %v17005_v11  ;;  %v17108_v13 = vld [vmem:[%s23287_s6 + $0xd0] ss:$8 sps:$4 sm:$0xff]  }
 0x433   :  { %5076 = vmatprep.mubr.bf16.mxu0 %v17006_v63  ;;  %5422 = vmatprep.mubr.bf16.mxu1 %v17006_v63  ;;  %v17009_v63 = vld [vmem:[%s23540_s0 + $0x10c] ss:$16 sps:$4 sm:$0xff]  }
 0x434   :  { %6065 = vmatpush1.bf16.msra.mxu0 %v17099_v10  ;;  %6747 = vmatpush1.bf16.msra.mxu1 %v17102_v9  ;;  %v17008_v9 = vld [vmem:[%s23540_s0 + $0xe8] ss:$16 sps:$4 sm:$0xff]  }
 0x435   :  { %v20141_v20 = vpop.f32.mrb[160].mxu0  ;;  %v20143_v58 = vpop.f32.mrb[160].mxu1  ;;  %6066 = vmatprep.subr.bf16.mxu0 %v17107_v4  ;;  %6748 = vmatprep.subr.bf16.mxu1 %v17110_v25 }
 0x436   :  { %23610 = vst [vmem:[#allocation16_spill] sm:$0xff] %v20141_v20  ;;  %23611 = vst [vmem:[#allocation21_spill] sm:$0xff] %v20143_v58  ;;  %v20145_v26 = vpop.f32.mrb[161].mxu0  ;;  %v20150_v10 = vpop.f32.mrb[161].mxu1 }
 0x437   :  { %23612 = vst [vmem:[#allocation22_spill] sm:$0xff] %v20145_v26  ;;  %23613 = vst [vmem:[#allocation19_spill] sm:$0xff] %v20150_v10  ;;  %v20152_v11 = vpop.f32.mrb[162].mxu0  ;;  %v20157_v8 = vpop.f32.mrb[162].mxu1 }
 0x438   :  { %23614 = vst [vmem:[#allocation20_spill] sm:$0xff] %v20152_v11  ;;  %23615 = vst [vmem:[#allocation25_spill] sm:$0xff] %v20157_v8  ;;  %v20159_v20 = vpop.f32.mrb[163].mxu0  ;;  %v20161_v4 = vpop.f32.mrb[163].mxu1  ;;  %6067 = vmatpush1.bf16.msra.mxu0 %v17105_v31  ;;  %6749 = vmatpush1.bf16.msra.mxu1 %v17108_v13  ;;  %v17011_v8 = vld [vmem:[%s23540_s0 + $0x108] ss:$16 sps:$4 sm:$0xff]  }
 0x439   :  { %23616 = vst [vmem:[#allocation26_spill] sm:$0xff] %v20159_v20  ;;  %23617 = vst [vmem:[#allocation23_spill] sm:$0xff] %v20161_v4  ;;  %v17012_v31 = vld [vmem:[%s23540_s0 + $0x12c] ss:$16 sps:$4 sm:$0xff]  }
 0x43a   :  { %5077 = vmatmul.mubr.bf16.gmra.mrb[212].mxu0 %v17008_v9  ;;  %5423 = vmatmul.mubr.bf16.gmra.mrb[212].mxu1 %v17008_v9  ;;  %v17119_v4 = vld [vmem:[%s23286_s5 + $0xf4] ss:$8 sps:$4 sm:$0xff]  }
 0x43b   :  { %5086 = vmatprep.mubr.bf16.mxu0 %v17009_v63  ;;  %5432 = vmatprep.mubr.bf16.mxu1 %v17009_v63 }
 0x43d   :  { %v20163_v25 = vpop.f32.mrb[164].mxu0  ;;  %v20165_v10 = vpop.f32.mrb[164].mxu1 }
 0x43e   :  { %23618 = vst [vmem:[#allocation24_spill] sm:$0xff] %v20163_v25  ;;  %23619 = vst [vmem:[#allocation29_spill] sm:$0xff] %v20165_v10  ;;  %v20167_v11 = vpop.f32.mrb[165].mxu0  ;;  %v20172_v26 = vpop.f32.mrb[165].mxu1 }
 0x43f   :  { %23620 = vst [vmem:[#allocation30_spill] sm:$0xff] %v20167_v11  ;;  %23621 = vst [vmem:[#allocation27_spill] sm:$0xff] %v20172_v26  ;;  %v20174_v20 = vpop.f32.mrb[166].mxu0  ;;  %v20179_v13 = vpop.f32.mrb[166].mxu1 }
 0x440   :  { %23622 = vst [vmem:[#allocation28_spill] sm:$0xff] %v20174_v20  ;;  %23623 = vst [vmem:[#allocation33_spill] sm:$0xff] %v20179_v13  ;;  %v20181_v9 = vpop.f32.mrb[167].mxu0  ;;  %v20183_v63 = vpop.f32.mrb[167].mxu1  ;;  %v17014_v20 = vld [vmem:[%s23540_s0 + $0x128] ss:$16 sps:$4 sm:$0xff]  }
 0x441   :  { %23624 = vst [vmem:[#allocation34_spill] sm:$0xff] %v20181_v9  ;;  %23625 = vst [vmem:[#allocation31_spill] sm:$0xff] %v20183_v63 }
 0x442   :  { %5087 = vmatmul.mubr.bf16.gmra.mrb[216].mxu0 %v17011_v8  ;;  %5433 = vmatmul.mubr.bf16.gmra.mrb[216].mxu1 %v17011_v8  ;;  %v17015_v8 = vld [vmem:[%s23540_s0 + $0x14c] ss:$16 sps:$4 sm:$0xff]  }
 0x443   :  { %5096 = vmatprep.mubr.bf16.mxu0 %v17012_v31  ;;  %5442 = vmatprep.mubr.bf16.mxu1 %v17012_v31 }
 0x445   :  { %v20185_v11 = vpop.f32.mrb[168].mxu0  ;;  %v20187_v10 = vpop.f32.mrb[168].mxu1 }
 0x446   :  { %23626 = vst [vmem:[#allocation32_spill] sm:$0xff] %v20185_v11  ;;  %23627 = vst [vmem:[#allocation37_spill] sm:$0xff] %v20187_v10  ;;  %v20189_v26 = vpop.f32.mrb[169].mxu0  ;;  %v20194_v25 = vpop.f32.mrb[169].mxu1 }
 0x447   :  { %23628 = vst [vmem:[#allocation38_spill] sm:$0xff] %v20189_v26  ;;  %23629 = vst [vmem:[#allocation35_spill] sm:$0xff] %v20194_v25  ;;  %v20196_v13 = vpop.f32.mrb[170].mxu0  ;;  %v20201_v63 = vpop.f32.mrb[170].mxu1 }
 0x448   :  { %23630 = vst [vmem:[#allocation36_spill] sm:$0xff] %v20196_v13  ;;  %23631 = vst [vmem:[#allocation41_spill] sm:$0xff] %v20201_v63  ;;  %v20203_v31 = vpop.f32.mrb[171].mxu0  ;;  %v20205_v11 = vpop.f32.mrb[171].mxu1  ;;  %v17017_v13 = vld [vmem:[%s23540_s0 + $0x148] ss:$16 sps:$4 sm:$0xff]  }
 0x449   :  { %23632 = vst [vmem:[#allocation42_spill] sm:$0xff] %v20203_v31  ;;  %23633 = vst [vmem:[#allocation39_spill] sm:$0xff] %v20205_v11 }
 0x44a   :  { %5097 = vmatmul.mubr.bf16.gmra.mrb[220].mxu0 %v17014_v20  ;;  %5443 = vmatmul.mubr.bf16.gmra.mrb[220].mxu1 %v17014_v20  ;;  %v17018_v20 = vld [vmem:[%s23540_s0 + $0x16c] ss:$16 sps:$4 sm:$0xff]  }
 0x44b   :  { %5106 = vmatprep.mubr.bf16.mxu0 %v17015_v8  ;;  %5452 = vmatprep.mubr.bf16.mxu1 %v17015_v8 }
 0x44d   :  { %v20207_v26 = vpop.f32.mrb[172].mxu0  ;;  %v20209_v10 = vpop.f32.mrb[172].mxu1 }
 0x44e   :  { %23634 = vst [vmem:[#allocation40_spill] sm:$0xff] %v20207_v26  ;;  %23635 = vst [vmem:[#allocation45_spill] sm:$0xff] %v20209_v10  ;;  %v20211_v25 = vpop.f32.mrb[173].mxu0  ;;  %v20216_v9 = vpop.f32.mrb[173].mxu1  ;;  %v17021_v10 = vld [vmem:[%s23540_s0 + $0x18c] ss:$16 sps:$4 sm:$0xff]  }
 0x44f   :  { %23636 = vst [vmem:[#allocation46_spill] sm:$0xff] %v20211_v25  ;;  %23637 = vst [vmem:[#allocation43_spill] sm:$0xff] %v20216_v9  ;;  %v20218_v63 = vpop.f32.mrb[174].mxu0  ;;  %v20223_v11 = vpop.f32.mrb[174].mxu1  ;;  %v17020_v9 = vld [vmem:[%s23540_s0 + $0x168] ss:$16 sps:$4 sm:$0xff]  }
 0x450   :  { %23638 = vst [vmem:[#allocation44_spill] sm:$0xff] %v20218_v63  ;;  %23639 = vst [vmem:[#allocation49_spill] sm:$0xff] %v20223_v11  ;;  %v20225_v8 = vpop.f32.mrb[175].mxu0  ;;  %v20227_v26 = vpop.f32.mrb[175].mxu1  ;;  %v17113_v11 = vld [vmem:[%s23286_s5 + $0xe4] ss:$8 sps:$4 sm:$0xff]  }
 0x451   :  { %23640 = vst [vmem:[#allocation50_spill] sm:$0xff] %v20225_v8  ;;  %23641 = vst [vmem:[#allocation47_spill] sm:$0xff] %v20227_v26  ;;  %v17116_v26 = vld [vmem:[%s23287_s6 + $0xe4] ss:$8 sps:$4 sm:$0xff]   ;;  %6068 = vmatprep.subr.bf16.mxu0 %v17113_v11  ;;  %v17120_v11 = vld [vmem:[%s23287_s6 + $0xf0] ss:$8 sps:$4 sm:$0xff]  }
 0x452   :  { %5107 = vmatmul.mubr.bf16.gmra.mrb[224].mxu0 %v17017_v13  ;;  %5453 = vmatmul.mubr.bf16.gmra.mrb[224].mxu1 %v17017_v13 }
 0x453   :  { %5116 = vmatprep.mubr.bf16.mxu0 %v17018_v20  ;;  %5462 = vmatprep.mubr.bf16.mxu1 %v17018_v20  ;;  %v17111_v20 = vld [vmem:[%s23286_s5 + $0xe0] ss:$8 sps:$4 sm:$0xff]  }
 0x454   :  { %6750 = vmatprep.subr.bf16.mxu1 %v17116_v26  ;;  %6069 = vmatpush1.bf16.msra.mxu0 %v17111_v20  ;;  %v17117_v26 = vld [vmem:[%s23286_s5 + $0xf0] ss:$8 sps:$4 sm:$0xff]  }
 0x455   :  { %v20232_v25 = vpop.f32.mrb[176].mxu0  ;;  %v20234_v63 = vpop.f32.mrb[176].mxu1  ;;  %6070 = vmatprep.subr.bf16.mxu0 %v17119_v4 }
 0x456   :  { %23642 = vst [vmem:[#allocation48_spill] sm:$0xff] %v20232_v25  ;;  %23643 = vst [vmem:[#allocation53_spill] sm:$0xff] %v20234_v63  ;;  %v20242_v8 = vpop.f32.mrb[177].mxu0  ;;  %v20244_v13 = vpop.f32.mrb[177].mxu1  ;;  %v17114_v63 = vld [vmem:[%s23287_s6 + $0xe0] ss:$8 sps:$4 sm:$0xff]  }
 0x457   :  { %23644 = vst [vmem:[#allocation54_spill] sm:$0xff] %v20242_v8  ;;  %23645 = vst [vmem:[#allocation51_spill] sm:$0xff] %v20244_v13  ;;  %v20252_v25 = vpop.f32.mrb[178].mxu0  ;;  %v20257_v31 = vpop.f32.mrb[178].mxu1  ;;  %6751 = vmatpush1.bf16.msra.mxu1 %v17114_v63 }
 0x458   :  { %23646 = vst [vmem:[#allocation52_spill] sm:$0xff] %v20252_v25  ;;  %23647 = vst [vmem:[#allocation57_spill] sm:$0xff] %v20257_v31  ;;  %v20259_v8 = vpop.f32.mrb[179].mxu0  ;;  %v20261_v13 = vpop.f32.mrb[179].mxu1  ;;  %v17122_v25 = vld [vmem:[%s23287_s6 + $0xf4] ss:$8 sps:$4 sm:$0xff]   ;;  %6071 = vmatpush1.bf16.msra.mxu0 %v17117_v26 }
 0x459   :  { %23648 = vst [vmem:[#allocation58_spill] sm:$0xff] %v20259_v8  ;;  %23649 = vst [vmem:[#allocation55_spill] sm:$0xff] %v20261_v13  ;;  %6752 = vmatprep.subr.bf16.mxu1 %v17122_v25 }
 0x45a   :  { %5117 = vmatmul.mubr.bf16.gmra.mrb[228].mxu0 %v17020_v9  ;;  %5463 = vmatmul.mubr.bf16.gmra.mrb[228].mxu1 %v17020_v9  ;;  %v17023_v9 = vld [vmem:[%s23540_s0 + $0x188] ss:$16 sps:$4 sm:$0xff]  }
 0x45b   :  { %5126 = vmatprep.mubr.bf16.mxu0 %v17021_v10  ;;  %5472 = vmatprep.mubr.bf16.mxu1 %v17021_v10  ;;  %v17024_v10 = vld [vmem:[%s23540_s0 + $0x1ac] ss:$16 sps:$4 sm:$0xff]  }
 0x45c   :  { %6753 = vmatpush1.bf16.msra.mxu1 %v17120_v11  ;;  %v17026_v11 = vld [vmem:[%s23540_s0 + $0x1a8] ss:$16 sps:$4 sm:$0xff]  }
 0x45d   :  { %v20275_v63 = vpop.f32.mrb[180].mxu0  ;;  %v20277_v20 = vpop.f32.mrb[180].mxu1 }
 0x45e   :  { %23650 = vst [vmem:[#allocation56_spill] sm:$0xff] %v20275_v63  ;;  %23651 = vst [vmem:[#allocation61_spill] sm:$0xff] %v20277_v20  ;;  %v20279_v13 = vpop.f32.mrb[181].mxu0  ;;  %v20284_v8 = vpop.f32.mrb[181].mxu1 }
 0x45f   :  { %23652 = vst [vmem:[#allocation62_spill] sm:$0xff] %v20279_v13  ;;  %23653 = vst [vmem:[#allocation59_spill] sm:$0xff] %v20284_v8  ;;  %v20286_v31 = vpop.f32.mrb[182].mxu0  ;;  %v20291_v4 = vpop.f32.mrb[182].mxu1 }
 0x460   :  { %23654 = vst [vmem:[#allocation60_spill] sm:$0xff] %v20286_v31  ;;  %23655 = vst [vmem:[#allocation65_spill] sm:$0xff] %v20291_v4  ;;  %v20293_v25 = vpop.f32.mrb[183].mxu0  ;;  %v20295_v26 = vpop.f32.mrb[183].mxu1  ;;  %v17125_v31 = vld [vmem:[%s23286_s5 + $0x104] ss:$8 sps:$4 sm:$0xff]  }
 0x461   :  { %23656 = vst [vmem:[#allocation66_spill] sm:$0xff] %v20293_v25  ;;  %23657 = vst [vmem:[#allocation63_spill] sm:$0xff] %v20295_v26  ;;  %v17128_v25 = vld [vmem:[%s23287_s6 + $0x104] ss:$8 sps:$4 sm:$0xff]   ;;  %6213 = vmatprep.subr.bf16.mxu0 %v17125_v31 }
 0x462   :  { %5127 = vmatmul.mubr.bf16.gmra.mrb[232].mxu0 %v17023_v9  ;;  %5473 = vmatmul.mubr.bf16.gmra.mrb[232].mxu1 %v17023_v9 }
 0x463   :  { %5136 = vmatprep.mubr.bf16.mxu0 %v17024_v10  ;;  %5482 = vmatprep.mubr.bf16.mxu1 %v17024_v10 }
 0x464   :  { %6895 = vmatprep.subr.bf16.mxu1 %v17128_v25 }
 0x46a   :  { %5137 = vmatmul.mubr.bf16.gmra.mrb[236].mxu0 %v17026_v11  ;;  %5483 = vmatmul.mubr.bf16.gmra.mrb[236].mxu1 %v17026_v11 }
 0x4d5   :  { %v5008_v26 = vpop.f32.mrb[184].mxu0  ;;  %v5354_v9 = vpop.f32.mrb[184].mxu1 }
 0x4d6   :  { %v5493_v10 = vmax.f32 %v19803_v52, %v5008_v26  ;;  %v5495_v4 = vmax.f32 %v19805_v53, %v5354_v9  ;;  %v5010_v8 = vpop.f32.mrb[185].mxu0  ;;  %v5356_v13 = vpop.f32.mrb[185].mxu1 }
 0x4d7   :  { %v5494_v11 = vmax.f32 %v19807_v30, %v5010_v8  ;;  %v5496_v20 = vmax.f32 %v19812_v36, %v5356_v13  ;;  %v5012_v63 = vpop.f32.mrb[186].mxu0  ;;  %v5358_v58 = vpop.f32.mrb[186].mxu1  ;;  %v17123_v36 = vld [vmem:[%s23286_s5 + $0x100] ss:$8 sps:$4 sm:$0xff]  }
 0x4d8   :  { %v5497_v21 = vmax.f32 %v19814_v37, %v5012_v63  ;;  %v5499_v56 = vmax.f32 %v19819_v17, %v5358_v58  ;;  %v5014_v31 = vpop.f32.mrb[187].mxu0  ;;  %v5360_v25 = vpop.f32.mrb[187].mxu1  ;;  %v17126_v37 = vld [vmem:[%s23287_s6 + $0x100] ss:$8 sps:$4 sm:$0xff]   ;;  %v17131_v17 = vld [vmem:[%s23286_s5 + $0x114] ss:$8 sps:$4 sm:$0xff]  }
 0x4d9   :  { %v5498_v27 = vmax.f32 %v19821_v22, %v5014_v31  ;;  %v5500_v52 = vmax.f32 %v19823_v23, %v5360_v25  ;;  %v17134_v22 = vld [vmem:[%s23287_s6 + $0x114] ss:$8 sps:$4 sm:$0xff]   ;;  %v17140_v25 = vld [vmem:[%s23287_s6 + $0x124] ss:$8 sps:$4 sm:$0xff]  }
 0x4da   :  { %v5605_v26 = vpack.c.bf16 %v5497_v21, %v5493_v10  ;;  %v20314_v53 = vpack.c.bf16 %v5499_v56, %v5495_v4  ;;  %v17129_v10 = vld [vmem:[%s23286_s5 + $0x110] ss:$8 sps:$4 sm:$0xff]  }
 0x4db   :  { %v20316_v9 = vpack.c.bf16 %v5500_v52, %v5496_v20  ;;  %v5606_v30 = vpack.c.bf16 %v5498_v27, %v5494_v11 }
 0x4dd   :  { %v5018_v23 = vpop.f32.mrb[188].mxu0  ;;  %v5364_v56 = vpop.f32.mrb[188].mxu1  ;;  %6072 = vmatprep.mubr.bf16.mxu0 %v5606_v30  ;;  %6754 = vmatprep.mubr.bf16.mxu1 %v5606_v30 }
 0x4de   :  { %v5501_v27 = vmax.f32 %v19825_v12, %v5018_v23  ;;  %v5503_v21 = vmax.f32 %v19830_v18, %v5364_v56  ;;  %v5020_v58 = vpop.f32.mrb[189].mxu0  ;;  %v5366_v8 = vpop.f32.mrb[189].mxu1  ;;  %6073 = vmatmul.mubr.bf16.vlgmr.msra.gmra.mrb[240].mxu0 %v5605_v26  ;;  %6755 = vmatmul.mubr.bf16.vlgmr.msra.gmra.mrb[240].mxu1 %v5605_v26  ;;  %v17132_v12 = vld [vmem:[%s23287_s6 + $0x110] ss:$8 sps:$4 sm:$0xff]  }
 0x4df   :  { %v5502_v13 = vmax.f32 %v19832_v19, %v5020_v58  ;;  %v5504_v63 = vmax.f32 %v19837_v15, %v5366_v8  ;;  %v5022_v20 = vpop.f32.mrb[190].mxu0  ;;  %v5368_v4 = vpop.f32.mrb[190].mxu1  ;;  %6214 = vmatpush1.bf16.msra.mxu0 %v17123_v36  ;;  %6896 = vmatpush1.bf16.msra.mxu1 %v17126_v37  ;;  %v17137_v15 = vld [vmem:[%s23286_s5 + $0x124] ss:$8 sps:$4 sm:$0xff]   ;;  %v17135_v37 = vld [vmem:[%s23286_s5 + $0x120] ss:$8 sps:$4 sm:$0xff]  }
 0x4e0   :  { %v5505_v18 = vmax.f32 %v19839_v40, %v5022_v20  ;;  %v5507_v11 = vmax.f32 %v19841_v41, %v5368_v4  ;;  %v5024_v31 = vpop.f32.mrb[191].mxu0  ;;  %v5370_v19 = vpop.f32.mrb[191].mxu1  ;;  %6215 = vmatprep.subr.bf16.mxu0 %v17131_v17  ;;  %6897 = vmatprep.subr.bf16.mxu1 %v17134_v22  ;;  %v17138_v17 = vld [vmem:[%s23287_s6 + $0x120] ss:$8 sps:$4 sm:$0xff]   ;;  %v17141_v4 = vld [vmem:[%s23286_s5 + $0x130] ss:$8 sps:$4 sm:$0xff]  }
 0x4e1   :  { %v5506_v52 = vmax.f32 %v19849_v35, %v5024_v31  ;;  %v5508_v26 = vmax.f32 %v19851_v48, %v5370_v19  ;;  %v17143_v35 = vld [vmem:[%s23286_s5 + $0x134] ss:$8 sps:$4 sm:$0xff]  }
 0x4e2   :  { %v5609_v30 = vpack.c.bf16 %v5505_v18, %v5501_v27  ;;  %v20350_v40 = vpack.c.bf16 %v5507_v11, %v5503_v21  ;;  %v17146_v48 = vld [vmem:[%s23287_s6 + $0x134] ss:$8 sps:$4 sm:$0xff]   ;;  %v17152_v18 = vld [vmem:[%s23287_s6 + $0x144] ss:$8 sps:$4 sm:$0xff]  }
 0x4e3   :  { %v20352_v41 = vpack.c.bf16 %v5508_v26, %v5504_v63  ;;  %v5610_v36 = vpack.c.bf16 %v5506_v52, %v5502_v13  ;;  %6216 = vmatpush1.bf16.msra.mxu0 %v17129_v10  ;;  %6898 = vmatpush1.bf16.msra.mxu1 %v17132_v12  ;;  %v17150_v52 = vld [vmem:[%s23287_s6 + $0x140] ss:$8 sps:$4 sm:$0xff]  }
 0x4e4   :  { %6217 = vmatprep.subr.bf16.mxu0 %v17137_v15  ;;  %6899 = vmatprep.subr.bf16.mxu1 %v17140_v25  ;;  %v17147_v25 = vld [vmem:[%s23286_s5 + $0x140] ss:$8 sps:$4 sm:$0xff]  }
 0x4e5   :  { %v5028_v22 = vpop.f32.mrb[192].mxu0  ;;  %v5374_v23 = vpop.f32.mrb[192].mxu1  ;;  %6082 = vmatprep.mubr.bf16.mxu0 %v5610_v36  ;;  %6764 = vmatprep.mubr.bf16.mxu1 %v5610_v36 }
 0x4e6   :  { %v5509_v56 = vmax.f32 %v19868_v3, %v5028_v22  ;;  %v5511_v27 = vmax.f32 %v19870_v38, %v5374_v23  ;;  %v5030_v21 = vpop.f32.mrb[193].mxu0  ;;  %v5376_v58 = vpop.f32.mrb[193].mxu1  ;;  %6083 = vmatmul.mubr.bf16.gmra.mrb[244].mxu0 %v5609_v30  ;;  %6765 = vmatmul.mubr.bf16.gmra.mrb[244].mxu1 %v5609_v30  ;;  %v17144_v3 = vld [vmem:[%s23287_s6 + $0x130] ss:$8 sps:$4 sm:$0xff]  }
 0x4e7   :  { %v5510_v8 = vmax.f32 %v19875_v47, %v5030_v21  ;;  %v5512_v13 = vmax.f32 %v19883_v43, %v5376_v58  ;;  %v5032_v63 = vpop.f32.mrb[194].mxu0  ;;  %v5378_v20 = vpop.f32.mrb[194].mxu1  ;;  %6218 = vmatpush1.bf16.msra.mxu0 %v17135_v37  ;;  %6900 = vmatpush1.bf16.msra.mxu1 %v17138_v17  ;;  %v17149_v43 = vld [vmem:[%s23286_s5 + $0x144] ss:$8 sps:$4 sm:$0xff]  }
 0x4e8   :  { %v5513_v38 = vmax.f32 %v19885_v51, %v5032_v63  ;;  %v5515_v10 = vmax.f32 %v19887_v54, %v5378_v20  ;;  %v5034_v12 = vpop.f32.mrb[195].mxu0  ;;  %v5380_v47 = vpop.f32.mrb[195].mxu1  ;;  %6219 = vmatprep.subr.bf16.mxu0 %v17143_v35  ;;  %6901 = vmatprep.subr.bf16.mxu1 %v17146_v48 }
 0x4e9   :  { %v5514_v11 = vmax.f32 %v19892_v57, %v5034_v12  ;;  %v5516_v31 = vmax.f32 %v19894_v24, %v5380_v47  ;;  %v17155_v57 = vld [vmem:[%s23286_s5 + $0x154] ss:$8 sps:$4 sm:$0xff]  }
 0x4ea   :  { %v5613_v19 = vpack.c.bf16 %v5513_v38, %v5509_v56  ;;  %v20386_v51 = vpack.c.bf16 %v5515_v10, %v5511_v27  ;;  %v17158_v24 = vld [vmem:[%s23287_s6 + $0x154] ss:$8 sps:$4 sm:$0xff]   ;;  %v17153_v27 = vld [vmem:[%s23286_s5 + $0x150] ss:$8 sps:$4 sm:$0xff]   ;;  %v17162_v38 = vld [vmem:[%s23287_s6 + $0x160] ss:$8 sps:$4 sm:$0xff]  }
 0x4eb   :  { %v20388_v54 = vpack.c.bf16 %v5516_v31, %v5512_v13  ;;  %v5614_v15 = vpack.c.bf16 %v5514_v11, %v5510_v8  ;;  %6220 = vmatpush1.bf16.msra.mxu0 %v17141_v4  ;;  %6902 = vmatpush1.bf16.msra.mxu1 %v17144_v3  ;;  %v17164_v8 = vld [vmem:[%s23287_s6 + $0x164] ss:$8 sps:$4 sm:$0xff]   ;;  %v17159_v3 = vld [vmem:[%s23286_s5 + $0x160] ss:$8 sps:$4 sm:$0xff]  }
 0x4ec   :  { %6221 = vmatprep.subr.bf16.mxu0 %v17149_v43  ;;  %6903 = vmatprep.subr.bf16.mxu1 %v17152_v18 }
 0x4ed   :  { %v5038_v26 = vpop.f32.mrb[196].mxu0  ;;  %v5384_v30 = vpop.f32.mrb[196].mxu1  ;;  %6092 = vmatprep.mubr.bf16.mxu0 %v5614_v15  ;;  %6774 = vmatprep.mubr.bf16.mxu1 %v5614_v15 }
 0x4ee   :  { %v5517_v36 = vmax.f32 %v19914_v0, %v5038_v26  ;;  %v5519_v37 = vmax.f32 %v19916_v28, %v5384_v30  ;;  %v5040_v17 = vpop.f32.mrb[197].mxu0  ;;  %v5386_v35 = vpop.f32.mrb[197].mxu1  ;;  %6093 = vmatmul.mubr.bf16.gmra.mrb[248].mxu0 %v5613_v19  ;;  %6775 = vmatmul.mubr.bf16.gmra.mrb[248].mxu1 %v5613_v19  ;;  %v17156_v0 = vld [vmem:[%s23287_s6 + $0x150] ss:$8 sps:$4 sm:$0xff]   ;;  %v17176_v26 = vld [vmem:[%s23287_s6 + $0x184] ss:$8 sps:$4 sm:$0xff]  }
 0x4ef   :  { %v5518_v48 = vmax.f32 %v19924_v34, %v5040_v17  ;;  %v5520_v22 = vmax.f32 %v19929_v7, %v5386_v35  ;;  %v5042_v23 = vpop.f32.mrb[198].mxu0  ;;  %v5388_v56 = vpop.f32.mrb[198].mxu1  ;;  %6222 = vmatpush1.bf16.msra.mxu0 %v17147_v25  ;;  %6904 = vmatpush1.bf16.msra.mxu1 %v17150_v52  ;;  %v17161_v7 = vld [vmem:[%s23286_s5 + $0x164] ss:$8 sps:$4 sm:$0xff]   ;;  %v17165_v52 = vld [vmem:[%s23286_s5 + $0x170] ss:$8 sps:$4 sm:$0xff]  }
 0x4f0   :  { %v5521_v28 = vmax.f32 %v19931_v49, %v5042_v23  ;;  %v5523_v21 = vmax.f32 %v19933_v42, %v5388_v56  ;;  %v5044_v58 = vpop.f32.mrb[199].mxu0  ;;  %v5390_v34 = vpop.f32.mrb[199].mxu1  ;;  %6223 = vmatprep.subr.bf16.mxu0 %v17155_v57  ;;  %6905 = vmatprep.subr.bf16.mxu1 %v17158_v24  ;;  %v17171_v35 = vld [vmem:[%s23286_s5 + $0x180] ss:$8 sps:$4 sm:$0xff]  }
 0x4f1   :  { %v5522_v13 = vmax.f32 %v19938_v62, %v5044_v58  ;;  %v5524_v63 = vmax.f32 %v19940_v61, %v5390_v34  ;;  %v17167_v62 = vld [vmem:[%s23286_s5 + $0x174] ss:$8 sps:$4 sm:$0xff]  }
 0x4f2   :  { %v5617_v20 = vpack.c.bf16 %v5521_v28, %v5517_v36  ;;  %v20422_v49 = vpack.c.bf16 %v5523_v21, %v5519_v37  ;;  %v17170_v61 = vld [vmem:[%s23287_s6 + $0x174] ss:$8 sps:$4 sm:$0xff]  }
 0x4f3   :  { %v20424_v42 = vpack.c.bf16 %v5524_v63, %v5520_v22  ;;  %v5618_v4 = vpack.c.bf16 %v5522_v13, %v5518_v48  ;;  %6224 = vmatpush1.bf16.msra.mxu0 %v17153_v27  ;;  %6906 = vmatpush1.bf16.msra.mxu1 %v17156_v0  ;;  %v17174_v48 = vld [vmem:[%s23287_s6 + $0x180] ss:$8 sps:$4 sm:$0xff]  }
 0x4f4   :  { %6225 = vmatprep.subr.bf16.mxu0 %v17161_v7  ;;  %6907 = vmatprep.subr.bf16.mxu1 %v17164_v8  ;;  %v17177_v8 = vld [vmem:[%s23286_s5 + $0x190] ss:$8 sps:$4 sm:$0xff]  }
 0x4f5   :  { %v5048_v10 = vpop.f32.mrb[200].mxu0  ;;  %v5394_v12 = vpop.f32.mrb[200].mxu1  ;;  %6102 = vmatprep.mubr.bf16.mxu0 %v5618_v4  ;;  %6784 = vmatprep.mubr.bf16.mxu1 %v5618_v4 }
 0x4f6   :  { %v5525_v47 = vmax.f32 %v19966_v16, %v5048_v10  ;;  %v5527_v43 = vmax.f32 %v19971_v14, %v5394_v12  ;;  %v5050_v18 = vpop.f32.mrb[201].mxu0  ;;  %v5396_v11 = vpop.f32.mrb[201].mxu1  ;;  %6103 = vmatmul.mubr.bf16.gmra.mrb[252].mxu0 %v5617_v20  ;;  %6785 = vmatmul.mubr.bf16.gmra.mrb[252].mxu1 %v5617_v20  ;;  %v17168_v16 = vld [vmem:[%s23287_s6 + $0x170] ss:$8 sps:$4 sm:$0xff]   ;;  %v17188_v20 = vld [vmem:[%s23287_s6 + $0x1a4] ss:$8 sps:$4 sm:$0xff]  }
 0x4f7   :  { %v5526_v31 = vmax.f32 %v19973_v60, %v5050_v18  ;;  %v5528_v19 = vmax.f32 %v19975_v1, %v5396_v11  ;;  %v5052_v15 = vpop.f32.mrb[202].mxu0  ;;  %v5398_v25 = vpop.f32.mrb[202].mxu1  ;;  %6226 = vmatpush1.bf16.msra.mxu0 %v17159_v3  ;;  %6908 = vmatpush1.bf16.msra.mxu1 %v17162_v38  ;;  %v17173_v1 = vld [vmem:[%s23286_s5 + $0x184] ss:$8 sps:$4 sm:$0xff]   ;;  %v17186_v10 = vld [vmem:[%s23287_s6 + $0x1a0] ss:$8 sps:$4 sm:$0xff]  }
 0x4f8   :  { %v5529_v14 = vmax.f32 %v19983_v2, %v5052_v15  ;;  %v5531_v57 = vmax.f32 %v19985_v5, %v5398_v25  ;;  %v5054_v24 = vpop.f32.mrb[203].mxu0  ;;  %v5400_v60 = vpop.f32.mrb[203].mxu1  ;;  %6227 = vmatprep.subr.bf16.mxu0 %v17167_v62  ;;  %6909 = vmatprep.subr.bf16.mxu1 %v17170_v61  ;;  %v17183_v61 = vld [vmem:[%s23286_s5 + $0x1a0] ss:$8 sps:$4 sm:$0xff]   ;;  %v23658_v18 = vld [vmem:[#allocation5_spill] sm:$0xff] }
 0x4f9   :  { %v5530_v30 = vmax.f32 %v19993_v46, %v5054_v24  ;;  %v5532_v36 = vmax.f32 %v19995_v50, %v5400_v60  ;;  %v17179_v46 = vld [vmem:[%s23286_s5 + $0x194] ss:$8 sps:$4 sm:$0xff]   ;;  %v23659_v15 = vld [vmem:[#allocation6_spill] sm:$0xff]  ;;  %v17189_v24 = vld [vmem:[%s23286_s5 + $0x1b0] ss:$8 sps:$4 sm:$0xff]  }
 0x4fa   :  { %v5621_v37 = vpack.c.bf16 %v5529_v14, %v5525_v47  ;;  %v20458_v2 = vpack.c.bf16 %v5531_v57, %v5527_v43  ;;  %v17182_v50 = vld [vmem:[%s23287_s6 + $0x194] ss:$8 sps:$4 sm:$0xff]  }
 0x4fb   :  { %v20460_v5 = vpack.c.bf16 %v5532_v36, %v5528_v19  ;;  %v5622_v17 = vpack.c.bf16 %v5530_v30, %v5526_v31  ;;  %6228 = vmatpush1.bf16.msra.mxu0 %v17165_v52  ;;  %6910 = vmatpush1.bf16.msra.mxu1 %v17168_v16  ;;  %v23660_v52 = vld [vmem:[#allocation3_spill] sm:$0xff]  ;;  %v23661_v60 = vld [vmem:[#allocation4_spill] sm:$0xff] }
 0x4fc   :  { %6229 = vmatprep.subr.bf16.mxu0 %v17173_v1  ;;  %6911 = vmatprep.subr.bf16.mxu1 %v17176_v26  ;;  %v23662_v26 = vld [vmem:[#allocation9_spill] sm:$0xff] }
 0x4fd   :  { %v5058_v22 = vpop.f32.mrb[204].mxu0  ;;  %v5404_v23 = vpop.f32.mrb[204].mxu1  ;;  %6112 = vmatprep.mubr.bf16.mxu0 %v5622_v17  ;;  %6794 = vmatprep.mubr.bf16.mxu1 %v5622_v17  ;;  %v23663_v17 = vld [vmem:[#allocation10_spill] sm:$0xff] }
 0x4fe   :  { %v5533_v56 = vmax.f32 %v20012_v59, %v5058_v22  ;;  %v5535_v27 = vmax.f32 %v20017_v29, %v5404_v23  ;;  %v5060_v0 = vpop.f32.mrb[205].mxu0  ;;  %v5406_v28 = vpop.f32.mrb[205].mxu1  ;;  %6113 = vmatmul.mubr.bf16.gmra.mrb[0].mxu0 %v5621_v37  ;;  %6795 = vmatmul.mubr.bf16.gmra.mrb[0].mxu1 %v5621_v37  ;;  %v17180_v59 = vld [vmem:[%s23287_s6 + $0x190] ss:$8 sps:$4 sm:$0xff]  }
 0x4ff   :  { %v5534_v21 = vmax.f32 %v20019_v33, %v5060_v0  ;;  %v5536_v58 = vmax.f32 %v20021_v6, %v5406_v28  ;;  %v5062_v34 = vpop.f32.mrb[206].mxu0  ;;  %v5408_v7 = vpop.f32.mrb[206].mxu1  ;;  %6230 = vmatpush1.bf16.msra.mxu0 %v17171_v35  ;;  %6912 = vmatpush1.bf16.msra.mxu1 %v17174_v48  ;;  %v17185_v6 = vld [vmem:[%s23286_s5 + $0x1a4] ss:$8 sps:$4 sm:$0xff]   ;;  %v23665_v28 = vld [vmem:[#allocation8_spill] sm:$0xff] }
 0x500   :  { %v5537_v29 = vmax.f32 %v20029_v55, %v5062_v34  ;;  %v5539_v13 = vmax.f32 %v20031_v32, %v5408_v7  ;;  %v5064_v63 = vpop.f32.mrb[207].mxu0  ;;  %v5410_v33 = vpop.f32.mrb[207].mxu1  ;;  %6231 = vmatprep.subr.bf16.mxu0 %v17179_v46  ;;  %6913 = vmatprep.subr.bf16.mxu1 %v17182_v50  ;;  %v23664_v48 = vld [vmem:[#allocation7_spill] sm:$0xff] }
 0x501   :  { %v5538_v4 = vmax.f32 %v20039_v44, %v5064_v63  ;;  %v5540_v3 = vmax.f32 %v20041_v45, %v5410_v33  ;;  %v17191_v44 = vld [vmem:[%s23286_s5 + $0x1b4] ss:$8 sps:$4 sm:$0xff]  }
 0x502   :  { %v5625_v38 = vpack.c.bf16 %v5537_v29, %v5533_v56  ;;  %v20494_v55 = vpack.c.bf16 %v5539_v13, %v5535_v27  ;;  %v17194_v45 = vld [vmem:[%s23287_s6 + $0x1b4] ss:$8 sps:$4 sm:$0xff]   ;;  %v23668_v13 = vld [vmem:[#allocation11_spill] sm:$0xff] }
 0x503   :  { %v20496_v32 = vpack.c.bf16 %v5540_v3, %v5536_v58  ;;  %v5626_v62 = vpack.c.bf16 %v5538_v4, %v5534_v21  ;;  %6232 = vmatpush1.bf16.msra.mxu0 %v17177_v8  ;;  %6914 = vmatpush1.bf16.msra.mxu1 %v17180_v59  ;;  %v23666_v58 = vld [vmem:[#allocation13_spill] sm:$0xff]  ;;  %v23667_v59 = vld [vmem:[#allocation14_spill] sm:$0xff] }
 0x504   :  { %6233 = vmatprep.subr.bf16.mxu0 %v17185_v6  ;;  %6915 = vmatprep.subr.bf16.mxu1 %v17188_v20  ;;  %v23669_v20 = vld [vmem:[#allocation12_spill] sm:$0xff]  ;;  %v23670_v3 = vld [vmem:[#allocation17_spill] sm:$0xff] }
 0x505   :  { %v5068_v12 = vpop.f32.mrb[208].mxu0  ;;  %v5414_v47 = vpop.f32.mrb[208].mxu1  ;;  %6122 = vmatprep.mubr.bf16.mxu0 %v5626_v62  ;;  %6804 = vmatprep.mubr.bf16.mxu1 %v5626_v62 }
 0x506   :  { %v5541_v43 = vmax.f32 %v20049_v39, %v5068_v12  ;;  %v5543_v11 = vmax.f32 %v23658_v18, %v5414_v47  ;;  %v5070_v31 = vpop.f32.mrb[209].mxu0  ;;  %v5416_v19 = vpop.f32.mrb[209].mxu1  ;;  %6123 = vmatmul.mubr.bf16.gmra.mrb[4].mxu0 %v5625_v38  ;;  %6805 = vmatmul.mubr.bf16.gmra.mrb[4].mxu1 %v5625_v38  ;;  %v17192_v39 = vld [vmem:[%s23287_s6 + $0x1b0] ss:$8 sps:$4 sm:$0xff]  }
 0x507   :  { %v5542_v25 = vmax.f32 %v23659_v15, %v5070_v31  ;;  %v5544_v16 = vmax.f32 %v23660_v52, %v5416_v19  ;;  %v5072_v14 = vpop.f32.mrb[210].mxu0  ;;  %v5418_v57 = vpop.f32.mrb[210].mxu1  ;;  %6234 = vmatpush1.bf16.msra.mxu0 %v17183_v61  ;;  %6916 = vmatpush1.bf16.msra.mxu1 %v17186_v10  ;;  %v23671_v10 = vld [vmem:[#allocation18_spill] sm:$0xff]  ;;  %v23673_v15 = vld [vmem:[#allocation16_spill] sm:$0xff]  ;;  %v23674_v52 = vld [vmem:[#allocation21_spill] sm:$0xff] }
 0x508   :  { %v5545_v1 = vmax.f32 %v23661_v60, %v5072_v14  ;;  %v5547_v30 = vmax.f32 %v23662_v26, %v5418_v57  ;;  %v5074_v36 = vpop.f32.mrb[211].mxu0  ;;  %v5420_v37 = vpop.f32.mrb[211].mxu1  ;;  %6235 = vmatprep.subr.bf16.mxu0 %v17191_v44  ;;  %6917 = vmatprep.subr.bf16.mxu1 %v17194_v45  ;;  %v23672_v45 = vld [vmem:[#allocation15_spill] sm:$0xff] }
 0x509   :  { %v5546_v35 = vmax.f32 %v23663_v17, %v5074_v36  ;;  %v5548_v46 = vmax.f32 %v23664_v48, %v5420_v37  ;;  %v23676_v60 = vld [vmem:[#allocation19_spill] sm:$0xff]  ;;  %v23677_v36 = vld [vmem:[#allocation20_spill] sm:$0xff]  ;;  %v23678_v17 = vld [vmem:[#allocation25_spill] sm:$0xff] }
 0x50a   :  { %v5629_v50 = vpack.c.bf16 %v5545_v1, %v5541_v43  ;;  %v20524_v22 = vpack.c.bf16 %v5547_v30, %v5543_v11 }
 0x50b   :  { %v20526_v23 = vpack.c.bf16 %v5548_v46, %v5544_v16  ;;  %v5630_v56 = vpack.c.bf16 %v5546_v35, %v5542_v25  ;;  %6236 = vmatpush1.bf16.msra.mxu0 %v17189_v24  ;;  %6918 = vmatpush1.bf16.msra.mxu1 %v17192_v39  ;;  %v23675_v24 = vld [vmem:[#allocation22_spill] sm:$0xff] }
 0x50d   :  { %v5078_v27 = vpop.f32.mrb[212].mxu0  ;;  %v5424_v0 = vpop.f32.mrb[212].mxu1  ;;  %6132 = vmatprep.mubr.bf16.mxu0 %v5630_v56  ;;  %6814 = vmatprep.mubr.bf16.mxu1 %v5630_v56 }
 0x50e   :  { %v5549_v21 = vmax.f32 %v23665_v28, %v5078_v27  ;;  %v5551_v34 = vmax.f32 %v23666_v58, %v5424_v0  ;;  %v5080_v7 = vpop.f32.mrb[213].mxu0  ;;  %v5426_v8 = vpop.f32.mrb[213].mxu1  ;;  %6133 = vmatmul.mubr.bf16.gmra.mrb[8].mxu0 %v5629_v50  ;;  %6815 = vmatmul.mubr.bf16.gmra.mrb[8].mxu1 %v5629_v50  ;;  %v23679_v50 = vld [vmem:[#allocation26_spill] sm:$0xff]  ;;  %v23680_v27 = vld [vmem:[#allocation23_spill] sm:$0xff] }
 0x50f   :  { %v5550_v29 = vmax.f32 %v23667_v59, %v5080_v7  ;;  %v5552_v63 = vmax.f32 %v23668_v13, %v5426_v8  ;;  %v5082_v33 = vpop.f32.mrb[214].mxu0  ;;  %v5428_v6 = vpop.f32.mrb[214].mxu1  ;;  %v23681_v59 = vld [vmem:[#allocation24_spill] sm:$0xff]  ;;  %v23682_v13 = vld [vmem:[#allocation29_spill] sm:$0xff] }
 0x510   :  { %v5553_v4 = vmax.f32 %v23669_v20, %v5082_v33  ;;  %v5555_v38 = vmax.f32 %v23670_v3, %v5428_v6  ;;  %v5084_v62 = vpop.f32.mrb[215].mxu0  ;;  %v5430_v61 = vpop.f32.mrb[215].mxu1  ;;  %v23683_v20 = vld [vmem:[#allocation30_spill] sm:$0xff]  ;;  %v23684_v3 = vld [vmem:[#allocation27_spill] sm:$0xff] }
 0x511   :  { %v5554_v44 = vmax.f32 %v23671_v10, %v5084_v62  ;;  %v5556_v12 = vmax.f32 %v23672_v45, %v5430_v61  ;;  %v23685_v10 = vld [vmem:[#allocation28_spill] sm:$0xff]  ;;  %v23686_v45 = vld [vmem:[#allocation33_spill] sm:$0xff] }
 0x512   :  { %v5633_v47 = vpack.c.bf16 %v5553_v4, %v5549_v21  ;;  %v20536_v43 = vpack.c.bf16 %v5555_v38, %v5551_v34 }
 0x513   :  { %v20538_v18 = vpack.c.bf16 %v5556_v12, %v5552_v63  ;;  %v5634_v11 = vpack.c.bf16 %v5554_v44, %v5550_v29 }
 0x515   :  { %v5088_v31 = vpop.f32.mrb[216].mxu0  ;;  %v5434_v19 = vpop.f32.mrb[216].mxu1  ;;  %6142 = vmatprep.mubr.bf16.mxu0 %v5634_v11  ;;  %6824 = vmatprep.mubr.bf16.mxu1 %v5634_v11 }
 0x516   :  { %v5557_v25 = vmax.f32 %v23673_v15, %v5088_v31  ;;  %v5559_v16 = vmax.f32 %v23674_v52, %v5434_v19  ;;  %v5090_v14 = vpop.f32.mrb[217].mxu0  ;;  %v5436_v57 = vpop.f32.mrb[217].mxu1  ;;  %6143 = vmatmul.mubr.bf16.gmra.mrb[12].mxu0 %v5633_v47  ;;  %6825 = vmatmul.mubr.bf16.gmra.mrb[12].mxu1 %v5633_v47  ;;  %v23687_v31 = vld [vmem:[#allocation34_spill] sm:$0xff]  ;;  %v23688_v15 = vld [vmem:[#allocation31_spill] sm:$0xff] }
 0x517   :  { %v5558_v39 = vmax.f32 %v23675_v24, %v5090_v14  ;;  %v5560_v1 = vmax.f32 %v23676_v60, %v5436_v57  ;;  %v5092_v26 = vpop.f32.mrb[218].mxu0  ;;  %v5438_v30 = vpop.f32.mrb[218].mxu1  ;;  %v23689_v60 = vld [vmem:[#allocation32_spill] sm:$0xff] }
 0x518   :  { %v5561_v37 = vmax.f32 %v23677_v36, %v5092_v26  ;;  %v5563_v35 = vmax.f32 %v23678_v17, %v5438_v30  ;;  %v5094_v48 = vpop.f32.mrb[219].mxu0  ;;  %v5440_v46 = vpop.f32.mrb[219].mxu1  ;;  %v23690_v26 = vld [vmem:[#allocation37_spill] sm:$0xff]  ;;  %v23691_v17 = vld [vmem:[#allocation38_spill] sm:$0xff] }
 0x519   :  { %v5562_v56 = vmax.f32 %v23679_v50, %v5094_v48  ;;  %v5564_v0 = vmax.f32 %v23680_v27, %v5440_v46  ;;  %v23692_v48 = vld [vmem:[#allocation35_spill] sm:$0xff]  ;;  %v23693_v27 = vld [vmem:[#allocation36_spill] sm:$0xff] }
 0x51a   :  { %v5637_v28 = vpack.c.bf16 %v5561_v37, %v5557_v25  ;;  %v20548_v21 = vpack.c.bf16 %v5563_v35, %v5559_v16 }
 0x51b   :  { %v20550_v58 = vpack.c.bf16 %v5564_v0, %v5560_v1  ;;  %v5638_v34 = vpack.c.bf16 %v5562_v56, %v5558_v39 }
 0x51d   :  { %v5098_v7 = vpop.f32.mrb[220].mxu0  ;;  %v5444_v8 = vpop.f32.mrb[220].mxu1  ;;  %6152 = vmatprep.mubr.bf16.mxu0 %v5638_v34  ;;  %6834 = vmatprep.mubr.bf16.mxu1 %v5638_v34 }
 0x51e   :  { %v5565_v29 = vmax.f32 %v23681_v59, %v5098_v7  ;;  %v5567_v63 = vmax.f32 %v23682_v13, %v5444_v8  ;;  %v5100_v33 = vpop.f32.mrb[221].mxu0  ;;  %v5446_v6 = vpop.f32.mrb[221].mxu1  ;;  %6153 = vmatmul.mubr.bf16.gmra.mrb[16].mxu0 %v5637_v28  ;;  %6835 = vmatmul.mubr.bf16.gmra.mrb[16].mxu1 %v5637_v28  ;;  %v23694_v28 = vld [vmem:[#allocation41_spill] sm:$0xff]  ;;  %v23695_v59 = vld [vmem:[#allocation42_spill] sm:$0xff]  ;;  %v23696_v13 = vld [vmem:[#allocation39_spill] sm:$0xff] }
 0x51f   :  { %v5566_v4 = vmax.f32 %v23683_v20, %v5100_v33  ;;  %v5568_v38 = vmax.f32 %v23684_v3, %v5446_v6  ;;  %v5102_v62 = vpop.f32.mrb[222].mxu0  ;;  %v5448_v61 = vpop.f32.mrb[222].mxu1 }
 0x520   :  { %v5569_v44 = vmax.f32 %v23685_v10, %v5102_v62  ;;  %v5571_v12 = vmax.f32 %v23686_v45, %v5448_v61  ;;  %v5104_v47 = vpop.f32.mrb[223].mxu0  ;;  %v5450_v11 = vpop.f32.mrb[223].mxu1  ;;  %v23697_v62 = vld [vmem:[#allocation40_spill] sm:$0xff]  ;;  %v23698_v10 = vld [vmem:[#allocation45_spill] sm:$0xff] }
 0x521   :  { %v5570_v19 = vmax.f32 %v23687_v31, %v5104_v47  ;;  %v5572_v25 = vmax.f32 %v23688_v15, %v5450_v11  ;;  %v23699_v47 = vld [vmem:[#allocation46_spill] sm:$0xff]  ;;  %v23700_v31 = vld [vmem:[#allocation43_spill] sm:$0xff] }
 0x522   :  { %v5641_v52 = vpack.c.bf16 %v5569_v44, %v5565_v29  ;;  %v20560_v16 = vpack.c.bf16 %v5571_v12, %v5567_v63 }
 0x523   :  { %v5642_v14 = vpack.c.bf16 %v5570_v19, %v5566_v4  ;;  %v20562_v57 = vpack.c.bf16 %v5572_v25, %v5568_v38 }
 0x525   :  { %v5108_v24 = vpop.f32.mrb[224].mxu0  ;;  %v5454_v39 = vpop.f32.mrb[224].mxu1  ;;  %6162 = vmatprep.mubr.bf16.mxu0 %v5642_v14  ;;  %6844 = vmatprep.mubr.bf16.mxu1 %v5642_v14 }
 0x526   :  { %v5573_v1 = vmax.f32 %v23689_v60, %v5108_v24  ;;  %v5575_v30 = vmax.f32 %v23690_v26, %v5454_v39  ;;  %v5110_v36 = vpop.f32.mrb[225].mxu0  ;;  %v5456_v37 = vpop.f32.mrb[225].mxu1  ;;  %6163 = vmatmul.mubr.bf16.gmra.mrb[20].mxu0 %v5641_v52  ;;  %6845 = vmatmul.mubr.bf16.gmra.mrb[20].mxu1 %v5641_v52  ;;  %v23701_v52 = vld [vmem:[#allocation44_spill] sm:$0xff]  ;;  %v23702_v24 = vld [vmem:[#allocation49_spill] sm:$0xff]  ;;  %v23703_v26 = vld [vmem:[#allocation50_spill] sm:$0xff] }
 0x527   :  { %v5574_v35 = vmax.f32 %v23691_v17, %v5110_v36  ;;  %v5576_v46 = vmax.f32 %v23692_v48, %v5456_v37  ;;  %v5112_v50 = vpop.f32.mrb[226].mxu0  ;;  %v5458_v56 = vpop.f32.mrb[226].mxu1  ;;  %v23704_v36 = vld [vmem:[#allocation47_spill] sm:$0xff] }
 0x528   :  { %v5577_v0 = vmax.f32 %v23693_v27, %v5112_v50  ;;  %v5579_v34 = vmax.f32 %v23694_v28, %v5458_v56  ;;  %v5114_v7 = vpop.f32.mrb[227].mxu0  ;;  %v5460_v8 = vpop.f32.mrb[227].mxu1  ;;  %v23705_v27 = vld [vmem:[#allocation48_spill] sm:$0xff]  ;;  %v23706_v28 = vld [vmem:[#allocation53_spill] sm:$0xff] }
 0x529   :  { %v5578_v29 = vmax.f32 %v23695_v59, %v5114_v7  ;;  %v5580_v63 = vmax.f32 %v23696_v13, %v5460_v8  ;;  %v23707_v59 = vld [vmem:[#allocation54_spill] sm:$0xff]  ;;  %v23708_v13 = vld [vmem:[#allocation51_spill] sm:$0xff] }
 0x52a   :  { %v5645_v33 = vpack.c.bf16 %v5577_v0, %v5573_v1  ;;  %v20572_v6 = vpack.c.bf16 %v5579_v34, %v5575_v30 }
 0x52b   :  { %v5646_v20 = vpack.c.bf16 %v5578_v29, %v5574_v35  ;;  %v20574_v4 = vpack.c.bf16 %v5580_v63, %v5576_v46 }
 0x52d   :  { %v5118_v3 = vpop.f32.mrb[228].mxu0  ;;  %v5464_v38 = vpop.f32.mrb[228].mxu1  ;;  %6172 = vmatprep.mubr.bf16.mxu0 %v5646_v20  ;;  %6854 = vmatprep.mubr.bf16.mxu1 %v5646_v20 }
 0x52e   :  { %v5581_v61 = vmax.f32 %v23697_v62, %v5118_v3  ;;  %v5583_v44 = vmax.f32 %v23698_v10, %v5464_v38  ;;  %v5120_v45 = vpop.f32.mrb[229].mxu0  ;;  %v5466_v12 = vpop.f32.mrb[229].mxu1  ;;  %6173 = vmatmul.mubr.bf16.gmra.mrb[24].mxu0 %v5645_v33  ;;  %6855 = vmatmul.mubr.bf16.gmra.mrb[24].mxu1 %v5645_v33  ;;  %v23709_v3 = vld [vmem:[#allocation52_spill] sm:$0xff]  ;;  %v23710_v62 = vld [vmem:[#allocation57_spill] sm:$0xff] }
 0x52f   :  { %v5582_v11 = vmax.f32 %v23699_v47, %v5120_v45  ;;  %v5584_v19 = vmax.f32 %v23700_v31, %v5466_v12  ;;  %v5122_v15 = vpop.f32.mrb[230].mxu0  ;;  %v5468_v25 = vpop.f32.mrb[230].mxu1  ;;  %v23711_v45 = vld [vmem:[#allocation58_spill] sm:$0xff]  ;;  %v23712_v47 = vld [vmem:[#allocation55_spill] sm:$0xff] }
 0x530   :  { %v5585_v14 = vmax.f32 %v23701_v52, %v5122_v15  ;;  %v5587_v39 = vmax.f32 %v23702_v24, %v5468_v25  ;;  %v5124_v60 = vpop.f32.mrb[231].mxu0  ;;  %v5470_v1 = vpop.f32.mrb[231].mxu1  ;;  %v23713_v24 = vld [vmem:[#allocation56_spill] sm:$0xff] }
 0x531   :  { %v5586_v30 = vmax.f32 %v23703_v26, %v5124_v60  ;;  %v5588_v37 = vmax.f32 %v23704_v36, %v5470_v1  ;;  %v23714_v60 = vld [vmem:[#allocation61_spill] sm:$0xff]  ;;  %v23715_v36 = vld [vmem:[#allocation62_spill] sm:$0xff] }
 0x532   :  { %v5649_v17 = vpack.c.bf16 %v5585_v14, %v5581_v61  ;;  %v20584_v35 = vpack.c.bf16 %v5587_v39, %v5583_v44 }
 0x533   :  { %v5650_v48 = vpack.c.bf16 %v5586_v30, %v5582_v11  ;;  %v20586_v46 = vpack.c.bf16 %v5588_v37, %v5584_v19 }
 0x535   :  { %v5128_v50 = vpop.f32.mrb[232].mxu0  ;;  %v5474_v56 = vpop.f32.mrb[232].mxu1  ;;  %6182 = vmatprep.mubr.bf16.mxu0 %v5650_v48  ;;  %6864 = vmatprep.mubr.bf16.mxu1 %v5650_v48 }
 0x536   :  { %v5589_v0 = vmax.f32 %v23705_v27, %v5128_v50  ;;  %v5591_v34 = vmax.f32 %v23706_v28, %v5474_v56  ;;  %v5130_v7 = vpop.f32.mrb[233].mxu0  ;;  %v5476_v8 = vpop.f32.mrb[233].mxu1  ;;  %6183 = vmatmul.mubr.bf16.gmra.mrb[28].mxu0 %v5649_v17  ;;  %6865 = vmatmul.mubr.bf16.gmra.mrb[28].mxu1 %v5649_v17  ;;  %v23716_v17 = vld [vmem:[#allocation59_spill] sm:$0xff]  ;;  %v23717_v27 = vld [vmem:[#allocation60_spill] sm:$0xff]  ;;  %v23718_v28 = vld [vmem:[#allocation65_spill] sm:$0xff] }
 0x537   :  { %v5590_v29 = vmax.f32 %v23707_v59, %v5130_v7  ;;  %v5592_v63 = vmax.f32 %v23708_v13, %v5476_v8  ;;  %v5132_v33 = vpop.f32.mrb[234].mxu0  ;;  %v5478_v20 = vpop.f32.mrb[234].mxu1  ;;  %v23719_v59 = vld [vmem:[#allocation66_spill] sm:$0xff]  ;;  %v23720_v13 = vld [vmem:[#allocation63_spill] sm:$0xff] }
 0x538   :  { %v5593_v38 = vmax.f32 %v23709_v3, %v5132_v33  ;;  %v5595_v61 = vmax.f32 %v23710_v62, %v5478_v20  ;;  %v5134_v10 = vpop.f32.mrb[235].mxu0  ;;  %v5480_v44 = vpop.f32.mrb[235].mxu1 }
 0x539   :  { %v5594_v12 = vmax.f32 %v23711_v45, %v5134_v10  ;;  %v5596_v11 = vmax.f32 %v23712_v47, %v5480_v44 }
 0x53a   :  { %v5653_v31 = vpack.c.bf16 %v5593_v38, %v5589_v0  ;;  %v20596_v19 = vpack.c.bf16 %v5595_v61, %v5591_v34 }
 0x53b   :  { %v5654_v15 = vpack.c.bf16 %v5594_v12, %v5590_v29  ;;  %v20598_v25 = vpack.c.bf16 %v5596_v11, %v5592_v63 }
 0x53d   :  { %v5138_v52 = vpop.f32.mrb[236].mxu0  ;;  %v5484_v14 = vpop.f32.mrb[236].mxu1  ;;  %6192 = vmatprep.mubr.bf16.mxu0 %v5654_v15  ;;  %6874 = vmatprep.mubr.bf16.mxu1 %v5654_v15 }
 0x53e   :  { %v5597_v39 = vmax.f32 %v23713_v24, %v5138_v52  ;;  %v5599_v1 = vmax.f32 %v23714_v60, %v5484_v14  ;;  %v5140_v26 = vpop.f32.mrb[237].mxu0  ;;  %v5486_v30 = vpop.f32.mrb[237].mxu1  ;;  %6193 = vmatmul.mubr.bf16.gmra.mrb[32].mxu0 %v5653_v31  ;;  %6875 = vmatmul.mubr.bf16.gmra.mrb[32].mxu1 %v5653_v31 }
 0x53f   :  { %v5598_v37 = vmax.f32 %v23715_v36, %v5140_v26  ;;  %v5600_v48 = vmax.f32 %v23716_v17, %v5486_v30  ;;  %v5142_v50 = vpop.f32.mrb[238].mxu0  ;;  %v5488_v56 = vpop.f32.mrb[238].mxu1 }
 0x540   :  { %v5601_v0 = vmax.f32 %v23717_v27, %v5142_v50  ;;  %v5603_v34 = vmax.f32 %v23718_v28, %v5488_v56  ;;  %v5144_v7 = vpop.f32.mrb[239].mxu0  ;;  %v5490_v8 = vpop.f32.mrb[239].mxu1 }
 0x541   :  { %v5602_v29 = vmax.f32 %v23719_v59, %v5144_v7  ;;  %v5604_v63 = vmax.f32 %v23720_v13, %v5490_v8 }
 0x542   :  { %v5657_v33 = vpack.c.bf16 %v5601_v0, %v5597_v39  ;;  %v5659_v20 = vpack.c.bf16 %v5603_v34, %v5599_v1 }
 0x543   :  { %v5658_v3 = vpack.c.bf16 %v5602_v29, %v5598_v37  ;;  %v5660_v38 = vpack.c.bf16 %v5604_v63, %v5600_v48 }
 0x545   :  { %6202 = vmatprep.mubr.bf16.mxu0 %v5658_v3  ;;  %6884 = vmatprep.mubr.bf16.mxu1 %v5658_v3 }
 0x546   :  { %6203 = vmatmul.mubr.bf16.gmra.mrb[36].mxu0 %v5657_v33  ;;  %6885 = vmatmul.mubr.bf16.gmra.mrb[36].mxu1 %v5657_v33 }
 0x547   :  { %14326 = vmatprep.mubr.msk.bf16.mxu0 %vm5997_vm1, %v20316_v9  ;;  %14396 = vmatprep.mubr.msk.bf16.mxu1 %vm5997_vm1, %v20316_v9 }
 0x54e   :  { %6246 = vmatmul.mubr.bf16.vlgmr.msra.gmra.mrb[240].mxu0 %v20314_v53  ;;  %6928 = vmatmul.mubr.bf16.vlgmr.msra.gmra.mrb[240].mxu1 %v20314_v53  ;;  %v17197_v53 = vld [vmem:[%s23288_s7 + $0x4] ss:$8 sps:$4 sm:$0xff]  }
 0x54f   :  { %14327 = vmatprep.mubr.msk.bf16.mxu0 %vm5997_vm1, %v20352_v41  ;;  %14397 = vmatprep.mubr.msk.bf16.mxu1 %vm5997_vm1, %v20352_v41 }
 0x556   :  { %6256 = vmatmul.mubr.bf16.gmra.mrb[244].mxu0 %v20350_v40  ;;  %6938 = vmatmul.mubr.bf16.gmra.mrb[244].mxu1 %v20350_v40 }
 0x557   :  { %14328 = vmatprep.mubr.msk.bf16.mxu0 %vm5997_vm1, %v20388_v54  ;;  %14398 = vmatprep.mubr.msk.bf16.mxu1 %vm5997_vm1, %v20388_v54 }
 0x55e   :  { %6266 = vmatmul.mubr.bf16.gmra.mrb[248].mxu0 %v20386_v51  ;;  %6948 = vmatmul.mubr.bf16.gmra.mrb[248].mxu1 %v20386_v51 }
 0x55f   :  { %14329 = vmatprep.mubr.msk.bf16.mxu0 %vm5997_vm1, %v20424_v42  ;;  %14399 = vmatprep.mubr.msk.bf16.mxu1 %vm5997_vm1, %v20424_v42 }
 0x566   :  { %6276 = vmatmul.mubr.bf16.gmra.mrb[252].mxu0 %v20422_v49  ;;  %6958 = vmatmul.mubr.bf16.gmra.mrb[252].mxu1 %v20422_v49 }
 0x567   :  { %14330 = vmatprep.mubr.msk.bf16.mxu0 %vm5997_vm1, %v20460_v5  ;;  %14400 = vmatprep.mubr.msk.bf16.mxu1 %vm5997_vm1, %v20460_v5 }
 0x56e   :  { %6286 = vmatmul.mubr.bf16.gmra.mrb[0].mxu0 %v20458_v2  ;;  %6968 = vmatmul.mubr.bf16.gmra.mrb[0].mxu1 %v20458_v2 }
 0x56f   :  { %14331 = vmatprep.mubr.msk.bf16.mxu0 %vm5997_vm1, %v20496_v32  ;;  %14401 = vmatprep.mubr.msk.bf16.mxu1 %vm5997_vm1, %v20496_v32 }
 0x576   :  { %6296 = vmatmul.mubr.bf16.gmra.mrb[4].mxu0 %v20494_v55  ;;  %6978 = vmatmul.mubr.bf16.gmra.mrb[4].mxu1 %v20494_v55 }
 0x577   :  { %14332 = vmatprep.mubr.msk.bf16.mxu0 %vm5997_vm1, %v20526_v23  ;;  %14402 = vmatprep.mubr.msk.bf16.mxu1 %vm5997_vm1, %v20526_v23 }
 0x57e   :  { %6306 = vmatmul.mubr.bf16.gmra.mrb[8].mxu0 %v20524_v22  ;;  %6988 = vmatmul.mubr.bf16.gmra.mrb[8].mxu1 %v20524_v22 }
 0x57f   :  { %14333 = vmatprep.mubr.msk.bf16.mxu0 %vm5997_vm1, %v20538_v18  ;;  %14403 = vmatprep.mubr.msk.bf16.mxu1 %vm5997_vm1, %v20538_v18 }
 0x586   :  { %6316 = vmatmul.mubr.bf16.gmra.mrb[12].mxu0 %v20536_v43  ;;  %6998 = vmatmul.mubr.bf16.gmra.mrb[12].mxu1 %v20536_v43 }
 0x587   :  { %14334 = vmatprep.mubr.msk.bf16.mxu0 %vm5997_vm1, %v20550_v58  ;;  %14404 = vmatprep.mubr.msk.bf16.mxu1 %vm5997_vm1, %v20550_v58 }
 0x58e   :  { %6326 = vmatmul.mubr.bf16.gmra.mrb[16].mxu0 %v20548_v21  ;;  %7008 = vmatmul.mubr.bf16.gmra.mrb[16].mxu1 %v20548_v21 }
 0x58f   :  { %14335 = vmatprep.mubr.msk.bf16.mxu0 %vm5997_vm1, %v20562_v57  ;;  %14405 = vmatprep.mubr.msk.bf16.mxu1 %vm5997_vm1, %v20562_v57 }
 0x596   :  { %6336 = vmatmul.mubr.bf16.gmra.mrb[20].mxu0 %v20560_v16  ;;  %7018 = vmatmul.mubr.bf16.gmra.mrb[20].mxu1 %v20560_v16 }
 0x597   :  { %14336 = vmatprep.mubr.msk.bf16.mxu0 %vm5997_vm1, %v20574_v4  ;;  %14406 = vmatprep.mubr.msk.bf16.mxu1 %vm5997_vm1, %v20574_v4 }
 0x59e   :  { %6346 = vmatmul.mubr.bf16.gmra.mrb[24].mxu0 %v20572_v6  ;;  %7028 = vmatmul.mubr.bf16.gmra.mrb[24].mxu1 %v20572_v6 }
 0x59f   :  { %14337 = vmatprep.mubr.msk.bf16.mxu0 %vm5997_vm1, %v20586_v46  ;;  %14407 = vmatprep.mubr.msk.bf16.mxu1 %vm5997_vm1, %v20586_v46 }
 0x5a6   :  { %6356 = vmatmul.mubr.bf16.gmra.mrb[28].mxu0 %v20584_v35  ;;  %7038 = vmatmul.mubr.bf16.gmra.mrb[28].mxu1 %v20584_v35 }
 0x5a7   :  { %14338 = vmatprep.mubr.msk.bf16.mxu0 %vm5997_vm1, %v20598_v25  ;;  %14408 = vmatprep.mubr.msk.bf16.mxu1 %vm5997_vm1, %v20598_v25 }
 0x5ae   :  { %6366 = vmatmul.mubr.bf16.gmra.mrb[32].mxu0 %v20596_v19  ;;  %7048 = vmatmul.mubr.bf16.gmra.mrb[32].mxu1 %v20596_v19 }
 0x5af   :  { %14339 = vmatprep.mubr.msk.bf16.mxu0 %vm5997_vm1, %v5660_v38  ;;  %14409 = vmatprep.mubr.msk.bf16.mxu1 %vm5997_vm1, %v5660_v38 }
 0x5b6   :  { %6376 = vmatmul.mubr.bf16.gmra.mrb[36].mxu0 %v5659_v20  ;;  %7058 = vmatmul.mubr.bf16.gmra.mrb[36].mxu1 %v5659_v20 }
 0x5b7   :  { %14510 = vmatprep.mubr.msk.bf16.mxu0 %vm1544_vm0, %v17197_v53 }
 0x621   :  { %v6247_v9 = vpop.f32.mrb[240].mxu0  ;;  %v6929_v40 = vpop.f32.mrb[240].mxu1 }
 0x622   :  { %v7068_v41 = vmax.f32 %v6247_v9, %v6929_v40  ;;  %v6249_v51 = vpop.f32.mrb[241].mxu0  ;;  %v6931_v54 = vpop.f32.mrb[241].mxu1 }
 0x623   :  { %v7069_v49 = vmax.f32 %v6249_v51, %v6931_v54  ;;  %v6251_v42 = vpop.f32.mrb[242].mxu0  ;;  %v6933_v2 = vpop.f32.mrb[242].mxu1 }
 0x624   :  { %v7070_v5 = vmax.f32 %v6251_v42, %v6933_v2  ;;  %v6253_v55 = vpop.f32.mrb[243].mxu0  ;;  %v6935_v32 = vpop.f32.mrb[243].mxu1 }
 0x625   :  { %v7071_v22 = vmax.f32 %v6253_v55, %v6935_v32 }
 0x626   :  { %v7124_v23 = vpack.c.bf16 %v7070_v5, %v7068_v41 }
 0x627   :  { %v7125_v43 = vpack.c.bf16 %v7071_v22, %v7069_v49 }
 0x629   :  { %v6257_v18 = vpop.f32.mrb[244].mxu0  ;;  %v6939_v21 = vpop.f32.mrb[244].mxu1  ;;  %7852 = vmatprep.subr.bf16.mxu0 %v7125_v43 }
 0x62a   :  { %v7072_v58 = vmax.f32 %v6257_v18, %v6939_v21  ;;  %v6259_v16 = vpop.f32.mrb[245].mxu0  ;;  %v6941_v57 = vpop.f32.mrb[245].mxu1  ;;  %7853 = vmatpush1.bf16.msra.mxu0 %v7124_v23 }
 0x62b   :  { %v7073_v6 = vmax.f32 %v6259_v16, %v6941_v57  ;;  %v6261_v4 = vpop.f32.mrb[246].mxu0  ;;  %v6943_v35 = vpop.f32.mrb[246].mxu1 }
 0x62c   :  { %v7074_v46 = vmax.f32 %v6261_v4, %v6943_v35  ;;  %v6263_v62 = vpop.f32.mrb[247].mxu0  ;;  %v6945_v61 = vpop.f32.mrb[247].mxu1 }
 0x62d   :  { %v7075_v10 = vmax.f32 %v6263_v62, %v6945_v61 }
 0x62e   :  { %v7126_v44 = vpack.c.bf16 %v7074_v46, %v7072_v58 }
 0x62f   :  { %v7127_v45 = vpack.c.bf16 %v7075_v10, %v7073_v6 }
 0x631   :  { %v6267_v12 = vpop.f32.mrb[248].mxu0  ;;  %v6949_v47 = vpop.f32.mrb[248].mxu1  ;;  %7854 = vmatprep.subr.bf16.mxu0 %v7127_v45 }
 0x632   :  { %v7076_v11 = vmax.f32 %v6267_v12, %v6949_v47  ;;  %v6269_v31 = vpop.f32.mrb[249].mxu0  ;;  %v6951_v19 = vpop.f32.mrb[249].mxu1  ;;  %7855 = vmatpush1.bf16.msra.mxu0 %v7126_v44 }
 0x633   :  { %v7077_v15 = vmax.f32 %v6269_v31, %v6951_v19  ;;  %v6271_v25 = vpop.f32.mrb[250].mxu0  ;;  %v6953_v52 = vpop.f32.mrb[250].mxu1 }
 0x634   :  { %v7078_v14 = vmax.f32 %v6271_v25, %v6953_v52  ;;  %v6273_v24 = vpop.f32.mrb[251].mxu0  ;;  %v6955_v39 = vpop.f32.mrb[251].mxu1 }
 0x635   :  { %v7079_v60 = vmax.f32 %v6273_v24, %v6955_v39 }
 0x636   :  { %v7128_v1 = vpack.c.bf16 %v7078_v14, %v7076_v11 }
 0x637   :  { %v7129_v26 = vpack.c.bf16 %v7079_v60, %v7077_v15 }
 0x639   :  { %v6277_v30 = vpop.f32.mrb[252].mxu0  ;;  %v6959_v36 = vpop.f32.mrb[252].mxu1  ;;  %7856 = vmatprep.subr.bf16.mxu0 %v7129_v26 }
 0x63a   :  { %v7080_v37 = vmax.f32 %v6277_v30, %v6959_v36  ;;  %v6279_v17 = vpop.f32.mrb[253].mxu0  ;;  %v6961_v48 = vpop.f32.mrb[253].mxu1  ;;  %7857 = vmatpush1.bf16.msra.mxu0 %v7128_v1 }
 0x63b   :  { %v7081_v50 = vmax.f32 %v6279_v17, %v6961_v48  ;;  %v6281_v56 = vpop.f32.mrb[254].mxu0  ;;  %v6963_v27 = vpop.f32.mrb[254].mxu1 }
 0x63c   :  { %v7082_v0 = vmax.f32 %v6281_v56, %v6963_v27  ;;  %v6283_v28 = vpop.f32.mrb[255].mxu0  ;;  %v6965_v34 = vpop.f32.mrb[255].mxu1 }
 0x63d   :  { %v7083_v7 = vmax.f32 %v6283_v28, %v6965_v34 }
 0x63e   :  { %v7130_v8 = vpack.c.bf16 %v7082_v0, %v7080_v37 }
 0x63f   :  { %v7131_v59 = vpack.c.bf16 %v7083_v7, %v7081_v50 }
 0x641   :  { %v6287_v29 = vpop.f32.mrb[0].mxu0  ;;  %v6969_v13 = vpop.f32.mrb[0].mxu1  ;;  %7858 = vmatprep.subr.bf16.mxu0 %v7131_v59 }
 0x642   :  { %v7084_v63 = vmax.f32 %v6287_v29, %v6969_v13  ;;  %v6289_v33 = vpop.f32.mrb[1].mxu0  ;;  %v6971_v20 = vpop.f32.mrb[1].mxu1  ;;  %7859 = vmatpush1.bf16.msra.mxu0 %v7130_v8 }
 0x643   :  { %v7085_v3 = vmax.f32 %v6289_v33, %v6971_v20  ;;  %v6291_v38 = vpop.f32.mrb[2].mxu0  ;;  %v6973_v53 = vpop.f32.mrb[2].mxu1 }
 0x644   :  { %v7086_v9 = vmax.f32 %v6291_v38, %v6973_v53  ;;  %v6293_v40 = vpop.f32.mrb[3].mxu0  ;;  %v6975_v41 = vpop.f32.mrb[3].mxu1 }
 0x645   :  { %v7087_v51 = vmax.f32 %v6293_v40, %v6975_v41 }
 0x646   :  { %v7132_v54 = vpack.c.bf16 %v7086_v9, %v7084_v63 }
 0x647   :  { %v7133_v49 = vpack.c.bf16 %v7087_v51, %v7085_v3 }
 0x649   :  { %v6297_v42 = vpop.f32.mrb[4].mxu0  ;;  %v6979_v2 = vpop.f32.mrb[4].mxu1  ;;  %7860 = vmatprep.subr.bf16.mxu0 %v7133_v49 }
 0x64a   :  { %v7088_v5 = vmax.f32 %v6297_v42, %v6979_v2  ;;  %v6299_v55 = vpop.f32.mrb[5].mxu0  ;;  %v6981_v32 = vpop.f32.mrb[5].mxu1  ;;  %7861 = vmatpush1.bf16.msra.mxu0 %v7132_v54 }
 0x64b   :  { %v7089_v22 = vmax.f32 %v6299_v55, %v6981_v32  ;;  %v6301_v23 = vpop.f32.mrb[6].mxu0  ;;  %v6983_v43 = vpop.f32.mrb[6].mxu1 }
 0x64c   :  { %v7090_v18 = vmax.f32 %v6301_v23, %v6983_v43  ;;  %v6303_v21 = vpop.f32.mrb[7].mxu0  ;;  %v6985_v58 = vpop.f32.mrb[7].mxu1 }
 0x64d   :  { %v7091_v16 = vmax.f32 %v6303_v21, %v6985_v58 }
 0x64e   :  { %v7134_v57 = vpack.c.bf16 %v7090_v18, %v7088_v5 }
 0x64f   :  { %v7135_v6 = vpack.c.bf16 %v7091_v16, %v7089_v22 }
 0x651   :  { %v6307_v4 = vpop.f32.mrb[8].mxu0  ;;  %v6989_v35 = vpop.f32.mrb[8].mxu1  ;;  %7862 = vmatprep.subr.bf16.mxu0 %v7135_v6 }
 0x652   :  { %v7092_v46 = vmax.f32 %v6307_v4, %v6989_v35  ;;  %v6309_v62 = vpop.f32.mrb[9].mxu0  ;;  %v6991_v61 = vpop.f32.mrb[9].mxu1  ;;  %7863 = vmatpush1.bf16.msra.mxu0 %v7134_v57 }
 0x653   :  { %v7093_v10 = vmax.f32 %v6309_v62, %v6991_v61  ;;  %v6311_v44 = vpop.f32.mrb[10].mxu0  ;;  %v6993_v45 = vpop.f32.mrb[10].mxu1 }
 0x654   :  { %v7094_v12 = vmax.f32 %v6311_v44, %v6993_v45  ;;  %v6313_v47 = vpop.f32.mrb[11].mxu0  ;;  %v6995_v11 = vpop.f32.mrb[11].mxu1 }
 0x655   :  { %v7095_v31 = vmax.f32 %v6313_v47, %v6995_v11 }
 0x656   :  { %v7136_v19 = vpack.c.bf16 %v7094_v12, %v7092_v46 }
 0x657   :  { %v7137_v15 = vpack.c.bf16 %v7095_v31, %v7093_v10 }
 0x659   :  { %v6317_v25 = vpop.f32.mrb[12].mxu0  ;;  %v6999_v52 = vpop.f32.mrb[12].mxu1  ;;  %7864 = vmatprep.subr.bf16.mxu0 %v7137_v15 }
 0x65a   :  { %v7096_v14 = vmax.f32 %v6317_v25, %v6999_v52  ;;  %v6319_v24 = vpop.f32.mrb[13].mxu0  ;;  %v7001_v39 = vpop.f32.mrb[13].mxu1  ;;  %7865 = vmatpush1.bf16.msra.mxu0 %v7136_v19 }
 0x65b   :  { %v7097_v60 = vmax.f32 %v6319_v24, %v7001_v39  ;;  %v6321_v1 = vpop.f32.mrb[14].mxu0  ;;  %v7003_v26 = vpop.f32.mrb[14].mxu1 }
 0x65c   :  { %v7098_v30 = vmax.f32 %v6321_v1, %v7003_v26  ;;  %v6323_v36 = vpop.f32.mrb[15].mxu0  ;;  %v7005_v37 = vpop.f32.mrb[15].mxu1 }
 0x65d   :  { %v7099_v17 = vmax.f32 %v6323_v36, %v7005_v37 }
 0x65e   :  { %v7138_v48 = vpack.c.bf16 %v7098_v30, %v7096_v14 }
 0x65f   :  { %v7139_v50 = vpack.c.bf16 %v7099_v17, %v7097_v60 }
 0x661   :  { %v6327_v56 = vpop.f32.mrb[16].mxu0  ;;  %v7009_v27 = vpop.f32.mrb[16].mxu1  ;;  %7866 = vmatprep.subr.bf16.mxu0 %v7139_v50 }
 0x662   :  { %v7100_v0 = vmax.f32 %v6327_v56, %v7009_v27  ;;  %v6329_v28 = vpop.f32.mrb[17].mxu0  ;;  %v7011_v34 = vpop.f32.mrb[17].mxu1  ;;  %7867 = vmatpush1.bf16.msra.mxu0 %v7138_v48 }
 0x663   :  { %v7101_v7 = vmax.f32 %v6329_v28, %v7011_v34  ;;  %v6331_v8 = vpop.f32.mrb[18].mxu0  ;;  %v7013_v59 = vpop.f32.mrb[18].mxu1 }
 0x664   :  { %v7102_v29 = vmax.f32 %v6331_v8, %v7013_v59  ;;  %v6333_v13 = vpop.f32.mrb[19].mxu0  ;;  %v7015_v63 = vpop.f32.mrb[19].mxu1 }
 0x665   :  { %v7103_v33 = vmax.f32 %v6333_v13, %v7015_v63 }
 0x666   :  { %v7140_v20 = vpack.c.bf16 %v7102_v29, %v7100_v0 }
 0x667   :  { %v7141_v3 = vpack.c.bf16 %v7103_v33, %v7101_v7 }
 0x669   :  { %v6337_v38 = vpop.f32.mrb[20].mxu0  ;;  %v7019_v53 = vpop.f32.mrb[20].mxu1  ;;  %7868 = vmatprep.subr.bf16.mxu0 %v7141_v3 }
 0x66a   :  { %v7104_v9 = vmax.f32 %v6337_v38, %v7019_v53  ;;  %v6339_v40 = vpop.f32.mrb[21].mxu0  ;;  %v7021_v41 = vpop.f32.mrb[21].mxu1  ;;  %7869 = vmatpush1.bf16.msra.mxu0 %v7140_v20 }
 0x66b   :  { %v7105_v51 = vmax.f32 %v6339_v40, %v7021_v41  ;;  %v6341_v54 = vpop.f32.mrb[22].mxu0  ;;  %v7023_v49 = vpop.f32.mrb[22].mxu1 }
 0x66c   :  { %v7106_v42 = vmax.f32 %v6341_v54, %v7023_v49  ;;  %v6343_v2 = vpop.f32.mrb[23].mxu0  ;;  %v7025_v5 = vpop.f32.mrb[23].mxu1  ;;  %v17195_v54 = vld [vmem:[%s23288_s7] ss:$8 sps:$4 sm:$0xff]   ;;  %v17200_v49 = vld [vmem:[%s23288_s7 + $0x14] ss:$8 sps:$4 sm:$0xff]  }
 0x66d   :  { %v7107_v55 = vmax.f32 %v6343_v2, %v7025_v5  ;;  %v17203_v2 = vld [vmem:[%s23288_s7 + $0x24] ss:$8 sps:$4 sm:$0xff]   ;;  %v17201_v5 = vld [vmem:[%s23288_s7 + $0x20] ss:$8 sps:$4 sm:$0xff]  }
 0x66e   :  { %v7142_v32 = vpack.c.bf16 %v7106_v42, %v7104_v9  ;;  %v17198_v42 = vld [vmem:[%s23288_s7 + $0x10] ss:$8 sps:$4 sm:$0xff]  }
 0x66f   :  { %v7143_v22 = vpack.c.bf16 %v7107_v55, %v7105_v51  ;;  %v17206_v55 = vld [vmem:[%s23288_s7 + $0x34] ss:$8 sps:$4 sm:$0xff]  }
 0x671   :  { %v6347_v23 = vpop.f32.mrb[24].mxu0  ;;  %v7029_v43 = vpop.f32.mrb[24].mxu1  ;;  %7870 = vmatprep.subr.bf16.mxu0 %v7143_v22  ;;  %v17209_v22 = vld [vmem:[%s23288_s7 + $0x44] ss:$8 sps:$4 sm:$0xff]  }
 0x672   :  { %v7108_v18 = vmax.f32 %v6347_v23, %v7029_v43  ;;  %v6349_v21 = vpop.f32.mrb[25].mxu0  ;;  %v7031_v58 = vpop.f32.mrb[25].mxu1  ;;  %7871 = vmatpush1.bf16.msra.mxu0 %v7142_v32  ;;  %v17204_v32 = vld [vmem:[%s23288_s7 + $0x30] ss:$8 sps:$4 sm:$0xff]   ;;  %v17207_v23 = vld [vmem:[%s23288_s7 + $0x40] ss:$8 sps:$4 sm:$0xff]  }
 0x673   :  { %v7109_v16 = vmax.f32 %v6349_v21, %v7031_v58  ;;  %v6351_v57 = vpop.f32.mrb[26].mxu0  ;;  %v7033_v6 = vpop.f32.mrb[26].mxu1  ;;  %v17212_v43 = vld [vmem:[%s23288_s7 + $0x54] ss:$8 sps:$4 sm:$0xff]   ;;  %v17215_v21 = vld [vmem:[%s23288_s7 + $0x64] ss:$8 sps:$4 sm:$0xff]  }
 0x674   :  { %v7110_v4 = vmax.f32 %v6351_v57, %v7033_v6  ;;  %v6353_v35 = vpop.f32.mrb[27].mxu0  ;;  %v7035_v46 = vpop.f32.mrb[27].mxu1  ;;  %v17213_v58 = vld [vmem:[%s23288_s7 + $0x60] ss:$8 sps:$4 sm:$0xff]   ;;  %v17216_v57 = vld [vmem:[%s23288_s7 + $0x70] ss:$8 sps:$4 sm:$0xff]  }
 0x675   :  { %v7111_v62 = vmax.f32 %v6353_v35, %v7035_v46  ;;  %v17221_v6 = vld [vmem:[%s23288_s7 + $0x84] ss:$8 sps:$4 sm:$0xff]   ;;  %v17224_v35 = vld [vmem:[%s23288_s7 + $0x94] ss:$8 sps:$4 sm:$0xff]   ;;  %v17222_v46 = vld [vmem:[%s23288_s7 + $0x90] ss:$8 sps:$4 sm:$0xff]  }
 0x676   :  { %v7144_v61 = vpack.c.bf16 %v7110_v4, %v7108_v18  ;;  %v17210_v18 = vld [vmem:[%s23288_s7 + $0x50] ss:$8 sps:$4 sm:$0xff]   ;;  %v17219_v4 = vld [vmem:[%s23288_s7 + $0x80] ss:$8 sps:$4 sm:$0xff]  }
 0x677   :  { %v7145_v10 = vpack.c.bf16 %v7111_v62, %v7109_v16  ;;  %v17218_v16 = vld [vmem:[%s23288_s7 + $0x74] ss:$8 sps:$4 sm:$0xff]   ;;  %v17227_v62 = vld [vmem:[%s23288_s7 + $0xa4] ss:$8 sps:$4 sm:$0xff]  }
 0x679   :  { %v6357_v44 = vpop.f32.mrb[28].mxu0  ;;  %v7039_v45 = vpop.f32.mrb[28].mxu1  ;;  %7872 = vmatprep.subr.bf16.mxu0 %v7145_v10  ;;  %v17230_v10 = vld [vmem:[%s23288_s7 + $0xb4] ss:$8 sps:$4 sm:$0xff]  }
 0x67a   :  { %v7112_v12 = vmax.f32 %v6357_v44, %v7039_v45  ;;  %v6359_v47 = vpop.f32.mrb[29].mxu0  ;;  %v7041_v11 = vpop.f32.mrb[29].mxu1  ;;  %7873 = vmatpush1.bf16.msra.mxu0 %v7144_v61  ;;  %v17225_v61 = vld [vmem:[%s23288_s7 + $0xa0] ss:$8 sps:$4 sm:$0xff]   ;;  %v17228_v44 = vld [vmem:[%s23288_s7 + $0xb0] ss:$8 sps:$4 sm:$0xff]  }
 0x67b   :  { %v7113_v31 = vmax.f32 %v6359_v47, %v7041_v11  ;;  %v6361_v19 = vpop.f32.mrb[30].mxu0  ;;  %v7043_v15 = vpop.f32.mrb[30].mxu1  ;;  %v17233_v45 = vld [vmem:[%s23288_s7 + $0xc4] ss:$8 sps:$4 sm:$0xff]   ;;  %v17236_v47 = vld [vmem:[%s23288_s7 + $0xd4] ss:$8 sps:$4 sm:$0xff]  }
 0x67c   :  { %v7114_v25 = vmax.f32 %v6361_v19, %v7043_v15  ;;  %v6363_v52 = vpop.f32.mrb[31].mxu0  ;;  %v7045_v14 = vpop.f32.mrb[31].mxu1  ;;  %v17234_v11 = vld [vmem:[%s23288_s7 + $0xd0] ss:$8 sps:$4 sm:$0xff]   ;;  %v17237_v19 = vld [vmem:[%s23288_s7 + $0xe0] ss:$8 sps:$4 sm:$0xff]  }
 0x67d   :  { %v7115_v24 = vmax.f32 %v6363_v52, %v7045_v14  ;;  %v17242_v15 = vld [vmem:[%s23288_s7 + $0xf4] ss:$8 sps:$4 sm:$0xff]   ;;  %v17240_v52 = vld [vmem:[%s23288_s7 + $0xf0] ss:$8 sps:$4 sm:$0xff]  }
 0x67e   :  { %v7146_v39 = vpack.c.bf16 %v7114_v25, %v7112_v12  ;;  %v17231_v12 = vld [vmem:[%s23288_s7 + $0xc0] ss:$8 sps:$4 sm:$0xff]   ;;  %v17288_v25 = vld [vmem:[%s23289_s8 + $0x150] ss:$12 sps:$4 sm:$0xff]  }
 0x67f   :  { %v7147_v60 = vpack.c.bf16 %v7115_v24, %v7113_v31  ;;  %v17239_v31 = vld [vmem:[%s23288_s7 + $0xe4] ss:$8 sps:$4 sm:$0xff]   ;;  %v17290_v14 = vld [vmem:[%s23289_s8 + $0x154] ss:$12 sps:$4 sm:$0xff]  }
 0x680   :  { %v17245_v24 = vld [vmem:[%s23288_s7 + $0x104] ss:$8 sps:$4 sm:$0xff]   ;;  %8852 = vmatprep.subr.bf16.mxu1 %v17290_v14 }
 0x681   :  { %v6367_v1 = vpop.f32.mrb[32].mxu0  ;;  %v7049_v26 = vpop.f32.mrb[32].mxu1  ;;  %7874 = vmatprep.subr.bf16.mxu0 %v7147_v60  ;;  %v17293_v60 = vld [vmem:[%s23289_s8 + $0x16c] ss:$12 sps:$4 sm:$0xff]   ;;  %8853 = vmatpush1.bf16.msra.mxu1 %v17288_v25 }
 0x682   :  { %v7116_v30 = vmax.f32 %v6367_v1, %v7049_v26  ;;  %v6369_v36 = vpop.f32.mrb[33].mxu0  ;;  %v7051_v37 = vpop.f32.mrb[33].mxu1  ;;  %7875 = vmatpush1.bf16.msra.mxu0 %v7146_v39  ;;  %v17291_v39 = vld [vmem:[%s23289_s8 + $0x168] ss:$12 sps:$4 sm:$0xff]   ;;  %8854 = vmatprep.subr.bf16.mxu1 %v17293_v60  ;;  %v17299_v1 = vld [vmem:[%s23289_s8 + $0x184] ss:$12 sps:$4 sm:$0xff]  }
 0x683   :  { %v7117_v17 = vmax.f32 %v6369_v36, %v7051_v37  ;;  %v6371_v48 = vpop.f32.mrb[34].mxu0  ;;  %v7053_v50 = vpop.f32.mrb[34].mxu1  ;;  %v17297_v26 = vld [vmem:[%s23289_s8 + $0x180] ss:$12 sps:$4 sm:$0xff]   ;;  %v17248_v37 = vld [vmem:[%s23288_s7 + $0x114] ss:$8 sps:$4 sm:$0xff]  }
 0x684   :  { %v7118_v56 = vmax.f32 %v6371_v48, %v7053_v50  ;;  %v6373_v27 = vpop.f32.mrb[35].mxu0  ;;  %v7055_v0 = vpop.f32.mrb[35].mxu1  ;;  %v17243_v36 = vld [vmem:[%s23288_s7 + $0x100] ss:$8 sps:$4 sm:$0xff]   ;;  %v17306_v50 = vld [vmem:[%s23289_s8 + $0x1b0] ss:$12 sps:$4 sm:$0xff]  }
 0x685   :  { %v7119_v28 = vmax.f32 %v6373_v27, %v7055_v0  ;;  %8855 = vmatpush1.bf16.msra.mxu1 %v17291_v39  ;;  %v17308_v48 = vld [vmem:[%s23289_s8 + $0x1b4] ss:$12 sps:$4 sm:$0xff]   ;;  %v17246_v27 = vld [vmem:[%s23288_s7 + $0x110] ss:$8 sps:$4 sm:$0xff]   ;;  %v17251_v0 = vld [vmem:[%s23288_s7 + $0x124] ss:$8 sps:$4 sm:$0xff]  }
 0x686   :  { %v7148_v34 = vpack.c.bf16 %v7118_v56, %v7116_v30  ;;  %v17302_v30 = vld [vmem:[%s23289_s8 + $0x19c] ss:$12 sps:$4 sm:$0xff]   ;;  %8856 = vmatprep.subr.bf16.mxu1 %v17299_v1  ;;  %v17311_v56 = vld [vmem:[%s23289_s8 + $0x1cc] ss:$12 sps:$4 sm:$0xff]  }
 0x687   :  { %v7149_v7 = vpack.c.bf16 %v7119_v28, %v7117_v17  ;;  %v17300_v17 = vld [vmem:[%s23289_s8 + $0x198] ss:$12 sps:$4 sm:$0xff]   ;;  %v17309_v28 = vld [vmem:[%s23289_s8 + $0x1c8] ss:$12 sps:$4 sm:$0xff]   ;;  %v17377_v14 = vld [vmem:[%s23289_s8 + $0x2c0] ss:$12 sps:$4 sm:$0xff]  }
 0x689   :  { %v6377_v8 = vpop.f32.mrb[36].mxu0  ;;  %v7059_v59 = vpop.f32.mrb[36].mxu1  ;;  %7876 = vmatprep.subr.bf16.mxu0 %v7149_v7  ;;  %8857 = vmatpush1.bf16.msra.mxu1 %v17297_v26  ;;  %v17315_v7 = vld [vmem:[%s23289_s8 + $0x1e0] ss:$12 sps:$4 sm:$0xff]   ;;  %v17382_v26 = vld [vmem:[%s23289_s8 + $0x2d8] ss:$12 sps:$4 sm:$0xff]  }
 0x68a   :  { %v7120_v29 = vmax.f32 %v6377_v8, %v7059_v59  ;;  %v6379_v13 = vpop.f32.mrb[37].mxu0  ;;  %v7061_v63 = vpop.f32.mrb[37].mxu1  ;;  %7877 = vmatpush1.bf16.msra.mxu0 %v7148_v34  ;;  %8858 = vmatprep.subr.bf16.mxu1 %v17302_v30  ;;  %v17317_v34 = vld [vmem:[%s23289_s8 + $0x1e4] ss:$12 sps:$4 sm:$0xff]   ;;  %v17320_v8 = vld [vmem:[%s23289_s8 + $0x1fc] ss:$12 sps:$4 sm:$0xff]  }
 0x68b   :  { %v7121_v33 = vmax.f32 %v6379_v13, %v7061_v63  ;;  %v6381_v20 = vpop.f32.mrb[38].mxu0  ;;  %v7063_v3 = vpop.f32.mrb[38].mxu1  ;;  %v17249_v59 = vld [vmem:[%s23288_s7 + $0x120] ss:$8 sps:$4 sm:$0xff]   ;;  %v17318_v13 = vld [vmem:[%s23289_s8 + $0x1f8] ss:$12 sps:$4 sm:$0xff]  }
 0x68c   :  { %v7122_v38 = vmax.f32 %v6381_v20, %v7063_v3  ;;  %v6383_v53 = vpop.f32.mrb[39].mxu0  ;;  %v7065_v9 = vpop.f32.mrb[39].mxu1  ;;  %v17326_v63 = vld [vmem:[%s23289_s8 + $0x214] ss:$12 sps:$4 sm:$0xff]   ;;  %v17329_v20 = vld [vmem:[%s23289_s8 + $0x22c] ss:$12 sps:$4 sm:$0xff]  }
 0x68d   :  { %v7123_v40 = vmax.f32 %v6383_v53, %v7065_v9  ;;  %8859 = vmatpush1.bf16.msra.mxu1 %v17300_v17  ;;  %v17252_v3 = vld [vmem:[%s23288_s7 + $0x130] ss:$8 sps:$4 sm:$0xff]   ;;  %v17327_v53 = vld [vmem:[%s23289_s8 + $0x228] ss:$12 sps:$4 sm:$0xff]   ;;  %v17333_v9 = vld [vmem:[%s23289_s8 + $0x240] ss:$12 sps:$4 sm:$0xff]  }
 0x68e   :  { %v7150_v41 = vpack.c.bf16 %v7122_v38, %v7120_v29  ;;  %8860 = vmatprep.subr.bf16.mxu1 %v17308_v48  ;;  %v17254_v29 = vld [vmem:[%s23288_s7 + $0x134] ss:$8 sps:$4 sm:$0xff]   ;;  %v17257_v38 = vld [vmem:[%s23288_s7 + $0x144] ss:$8 sps:$4 sm:$0xff]  }
 0x68f   :  { %v7151_v51 = vpack.c.bf16 %v7123_v40, %v7121_v33  ;;  %v17324_v33 = vld [vmem:[%s23289_s8 + $0x210] ss:$12 sps:$4 sm:$0xff]   ;;  %v17287_v48 = vld [vmem:[%s23288_s7 + $0x1e4] ss:$8 sps:$4 sm:$0xff]  }
 0x690   :  { %v17335_v40 = vld [vmem:[%s23289_s8 + $0x244] ss:$12 sps:$4 sm:$0xff]  }
 0x691   :  { %7878 = vmatprep.subr.bf16.mxu0 %v7151_v51  ;;  %8861 = vmatpush1.bf16.msra.mxu1 %v17306_v50  ;;  %v17255_v51 = vld [vmem:[%s23288_s7 + $0x140] ss:$8 sps:$4 sm:$0xff]   ;;  %v17384_v17 = vld [vmem:[%s23289_s8 + $0x2f0] ss:$12 sps:$4 sm:$0xff]  }
 0x692   :  { %7879 = vmatpush1.bf16.msra.mxu0 %v7150_v41  ;;  %8862 = vmatprep.subr.bf16.mxu1 %v17311_v56  ;;  %v17338_v41 = vld [vmem:[%s23289_s8 + $0x25c] ss:$12 sps:$4 sm:$0xff]  }
 0x695   :  { %7885 = vmatmul.mubr.bf16.vlgmr.msra.gmra.mrb[40].mxu0 %v17195_v54  ;;  %8863 = vmatpush1.bf16.msra.mxu1 %v17309_v28  ;;  %v17260_v54 = vld [vmem:[%s23288_s7 + $0x154] ss:$8 sps:$4 sm:$0xff]  }
 0x696   :  { %14511 = vmatprep.mubr.msk.bf16.mxu0 %vm1544_vm0, %v17200_v49  ;;  %8864 = vmatprep.subr.bf16.mxu1 %v17317_v34  ;;  %v17336_v49 = vld [vmem:[%s23289_s8 + $0x258] ss:$12 sps:$4 sm:$0xff]   ;;  %v17389_v28 = vld [vmem:[%s23289_s8 + $0x308] ss:$12 sps:$4 sm:$0xff]  }
 0x699   :  { %8865 = vmatpush1.bf16.msra.mxu1 %v17315_v7  ;;  %v17285_v7 = vld [vmem:[%s23288_s7 + $0x1e0] ss:$8 sps:$4 sm:$0xff]  }
 0x69a   :  { %8866 = vmatprep.subr.bf16.mxu1 %v17320_v8 }
 0x69d   :  { %7895 = vmatmul.mubr.bf16.gmra.mrb[44].mxu0 %v17198_v42  ;;  %8867 = vmatpush1.bf16.msra.mxu1 %v17318_v13  ;;  %v17342_v42 = vld [vmem:[%s23289_s8 + $0x270] ss:$12 sps:$4 sm:$0xff]  }
 0x69e   :  { %14512 = vmatprep.mubr.msk.bf16.mxu0 %vm1544_vm0, %v17203_v2  ;;  %8868 = vmatprep.subr.bf16.mxu1 %v17326_v63  ;;  %v17344_v2 = vld [vmem:[%s23289_s8 + $0x274] ss:$12 sps:$4 sm:$0xff]  }
 0x6a1   :  { %8869 = vmatpush1.bf16.msra.mxu1 %v17324_v33 }
 0x6a2   :  { %8870 = vmatprep.subr.bf16.mxu1 %v17329_v20 }
 0x6a5   :  { %7905 = vmatmul.mubr.bf16.gmra.mrb[48].mxu0 %v17201_v5  ;;  %8871 = vmatpush1.bf16.msra.mxu1 %v17327_v53  ;;  %v17258_v5 = vld [vmem:[%s23288_s7 + $0x150] ss:$8 sps:$4 sm:$0xff]  }
 0x6a6   :  { %14513 = vmatprep.mubr.msk.bf16.mxu0 %vm1544_vm0, %v17206_v55  ;;  %8872 = vmatprep.subr.bf16.mxu1 %v17335_v40  ;;  %v17263_v55 = vld [vmem:[%s23288_s7 + $0x164] ss:$8 sps:$4 sm:$0xff]  }
 0x6a9   :  { %8873 = vmatpush1.bf16.msra.mxu1 %v17333_v9  ;;  %v17294_v9 = vld [vmem:[%s23288_s7 + $0x1f0] ss:$8 sps:$4 sm:$0xff]  }
 0x6aa   :  { %8874 = vmatprep.subr.bf16.mxu1 %v17338_v41  ;;  %v17305_v41 = vld [vmem:[%s23288_s7 + $0x204] ss:$8 sps:$4 sm:$0xff]  }
 0x6ad   :  { %7915 = vmatmul.mubr.bf16.gmra.mrb[52].mxu0 %v17204_v32  ;;  %8875 = vmatpush1.bf16.msra.mxu1 %v17336_v49  ;;  %v17347_v32 = vld [vmem:[%s23289_s8 + $0x28c] ss:$12 sps:$4 sm:$0xff]  }
 0x6ae   :  { %14514 = vmatprep.mubr.msk.bf16.mxu0 %vm1544_vm0, %v17209_v22  ;;  %8876 = vmatprep.subr.bf16.mxu1 %v17344_v2  ;;  %v17345_v22 = vld [vmem:[%s23289_s8 + $0x288] ss:$12 sps:$4 sm:$0xff]  }
 0x6af   :  { %v17403_v2 = vld [vmem:[%s23289_s8 + $0x368] ss:$12 sps:$4 sm:$0xff]  }
 0x6b1   :  { %8877 = vmatpush1.bf16.msra.mxu1 %v17342_v42 }
 0x6b2   :  { %8878 = vmatprep.subr.bf16.mxu1 %v17347_v32  ;;  %v17303_v32 = vld [vmem:[%s23288_s7 + $0x200] ss:$8 sps:$4 sm:$0xff]  }
 0x6b5   :  { %7925 = vmatmul.mubr.bf16.gmra.mrb[56].mxu0 %v17207_v23  ;;  %8879 = vmatpush1.bf16.msra.mxu1 %v17345_v22  ;;  %v17261_v23 = vld [vmem:[%s23288_s7 + $0x160] ss:$8 sps:$4 sm:$0xff]  }
 0x6b6   :  { %14515 = vmatprep.mubr.msk.bf16.mxu0 %vm1544_vm0, %v17212_v43  ;;  %v17266_v43 = vld [vmem:[%s23288_s7 + $0x174] ss:$8 sps:$4 sm:$0xff]  }
 0x6bd   :  { %7935 = vmatmul.mubr.bf16.gmra.mrb[60].mxu0 %v17210_v18  ;;  %v17264_v18 = vld [vmem:[%s23288_s7 + $0x170] ss:$8 sps:$4 sm:$0xff]  }
 0x6be   :  { %14516 = vmatprep.mubr.msk.bf16.mxu0 %vm1544_vm0, %v17215_v21  ;;  %v17269_v21 = vld [vmem:[%s23288_s7 + $0x184] ss:$8 sps:$4 sm:$0xff]  }
 0x6c5   :  { %7945 = vmatmul.mubr.bf16.gmra.mrb[64].mxu0 %v17213_v58  ;;  %v17267_v58 = vld [vmem:[%s23288_s7 + $0x180] ss:$8 sps:$4 sm:$0xff]  }
 0x6c6   :  { %14517 = vmatprep.mubr.msk.bf16.mxu0 %vm1544_vm0, %v17218_v16  ;;  %v17272_v16 = vld [vmem:[%s23288_s7 + $0x194] ss:$8 sps:$4 sm:$0xff]  }
 0x6cd   :  { %7955 = vmatmul.mubr.bf16.gmra.mrb[68].mxu0 %v17216_v57  ;;  %v17270_v57 = vld [vmem:[%s23288_s7 + $0x190] ss:$8 sps:$4 sm:$0xff]  }
 0x6ce   :  { %14518 = vmatprep.mubr.msk.bf16.mxu0 %vm1544_vm0, %v17221_v6  ;;  %v17275_v6 = vld [vmem:[%s23288_s7 + $0x1a4] ss:$8 sps:$4 sm:$0xff]  }
 0x6d5   :  { %7965 = vmatmul.mubr.bf16.gmra.mrb[72].mxu0 %v17219_v4  ;;  %v23400_v4 = vmov 0  }
 0x6d6   :  { %14519 = vmatprep.mubr.msk.bf16.mxu0 %vm1544_vm0, %v17224_v35  ;;  %8985 = vmatprep.subr.bf16.mxu1 %v23400_v4  ;;  %v17273_v35 = vld [vmem:[%s23288_s7 + $0x1a0] ss:$8 sps:$4 sm:$0xff]  }
 0x6d7   :  { %10042 = vmatprep.subr.bf16.mxu0 %v23400_v4 }
 0x6dd   :  { %7975 = vmatmul.mubr.bf16.gmra.mrb[76].mxu0 %v17222_v46  ;;  %v17278_v46 = vld [vmem:[%s23288_s7 + $0x1b4] ss:$8 sps:$4 sm:$0xff]  }
 0x6de   :  { %14520 = vmatprep.mubr.msk.bf16.mxu0 %vm1544_vm0, %v17227_v62  ;;  %v17276_v62 = vld [vmem:[%s23288_s7 + $0x1b0] ss:$8 sps:$4 sm:$0xff]  }
 0x6e5   :  { %7985 = vmatmul.mubr.bf16.gmra.mrb[80].mxu0 %v17225_v61  ;;  %v17281_v61 = vld [vmem:[%s23288_s7 + $0x1c4] ss:$8 sps:$4 sm:$0xff]  }
 0x6e6   :  { %14521 = vmatprep.mubr.msk.bf16.mxu0 %vm1544_vm0, %v17230_v10 }
 0x6ed   :  { %7995 = vmatmul.mubr.bf16.gmra.mrb[84].mxu0 %v17228_v44 }
 0x6ee   :  { %14522 = vmatprep.mubr.msk.bf16.mxu0 %vm1544_vm0, %v17233_v45 }
 0x6f5   :  { %8005 = vmatmul.mubr.bf16.gmra.mrb[88].mxu0 %v17231_v12 }
 0x6f6   :  { %14523 = vmatprep.mubr.msk.bf16.mxu0 %vm1544_vm0, %v17236_v47 }
 0x6fd   :  { %8015 = vmatmul.mubr.bf16.gmra.mrb[92].mxu0 %v17234_v11 }
 0x6fe   :  { %14524 = vmatprep.mubr.msk.bf16.mxu0 %vm1544_vm0, %v17239_v31  ;;  %v17375_v31 = vld [vmem:[%s23289_s8 + $0x2a8] ss:$12 sps:$4 sm:$0xff]  }
 0x6ff   :  { %10043 = vmatpush1.bf16.msra.mxu0 %v17375_v31  ;;  %v17414_v31 = vld [vmem:[%s23289_s8 + $0x3e0] ss:$12 sps:$4 sm:$0xff]  }
 0x700   :  { %10044 = vmatprep.subr.bf16.mxu0 %v23400_v4 }
 0x703   :  { %10045 = vmatpush1.bf16.msra.mxu0 %v17377_v14 }
 0x704   :  { %10046 = vmatprep.subr.bf16.mxu0 %v23400_v4 }
 0x705   :  { %8025 = vmatmul.mubr.bf16.gmra.mrb[96].mxu0 %v17237_v19  ;;  %v17279_v19 = vld [vmem:[%s23288_s7 + $0x1c0] ss:$8 sps:$4 sm:$0xff]  }
 0x706   :  { %14525 = vmatprep.mubr.msk.bf16.mxu0 %vm1544_vm0, %v17242_v15  ;;  %v17284_v15 = vld [vmem:[%s23288_s7 + $0x1d4] ss:$8 sps:$4 sm:$0xff]  }
 0x707   :  { %10047 = vmatpush1.bf16.msra.mxu0 %v17382_v26 }
 0x708   :  { %10048 = vmatprep.subr.bf16.mxu0 %v23400_v4 }
 0x70b   :  { %10049 = vmatpush1.bf16.msra.mxu0 %v17384_v17 }
 0x70c   :  { %10050 = vmatprep.subr.bf16.mxu0 %v23400_v4 }
 0x70d   :  { %8035 = vmatmul.mubr.bf16.gmra.mrb[100].mxu0 %v17240_v52 }
 0x70e   :  { %14526 = vmatprep.mubr.msk.bf16.mxu0 %vm1544_vm0, %v17245_v24 }
 0x70f   :  { %10051 = vmatpush1.bf16.msra.mxu0 %v17389_v28 }
 0x710   :  { %10052 = vmatprep.subr.bf16.mxu0 %v23400_v4 }
 0x715   :  { %8045 = vmatmul.mubr.bf16.gmra.mrb[104].mxu0 %v17243_v36  ;;  %v17282_v36 = vld [vmem:[%s23288_s7 + $0x1d0] ss:$8 sps:$4 sm:$0xff]  }
 0x716   :  { %14527 = vmatprep.mubr.msk.bf16.mxu0 %vm1544_vm0, %v17248_v37 }
 0x71d   :  { %8055 = vmatmul.mubr.bf16.gmra.mrb[108].mxu0 %v17246_v27 }
 0x71e   :  { %14528 = vmatprep.mubr.msk.bf16.mxu0 %vm1544_vm0, %v17251_v0 }
 0x725   :  { %8065 = vmatmul.mubr.bf16.gmra.mrb[112].mxu0 %v17249_v59  ;;  %v17391_v59 = vld [vmem:[%s23289_s8 + $0x320] ss:$12 sps:$4 sm:$0xff]  }
 0x726   :  { %14529 = vmatprep.mubr.msk.bf16.mxu0 %vm1544_vm0, %v17254_v29  ;;  %v17296_v29 = vld [vmem:[%s23288_s7 + $0x1f4] ss:$8 sps:$4 sm:$0xff]   ;;  %10053 = vmatpush1.bf16.msra.mxu0 %v17391_v59 }
 0x727   :  { %10054 = vmatprep.subr.bf16.mxu0 %v23400_v4 }
 0x72d   :  { %8075 = vmatmul.mubr.bf16.gmra.mrb[116].mxu0 %v17252_v3  ;;  %v17396_v3 = vld [vmem:[%s23289_s8 + $0x338] ss:$12 sps:$4 sm:$0xff]  }
 0x72e   :  { %14530 = vmatprep.mubr.msk.bf16.mxu0 %vm1544_vm0, %v17257_v38  ;;  %10055 = vmatpush1.bf16.msra.mxu0 %v17396_v3  ;;  %v17398_v38 = vld [vmem:[%s23289_s8 + $0x350] ss:$12 sps:$4 sm:$0xff]  }
 0x72f   :  { %10056 = vmatprep.subr.bf16.mxu0 %v23400_v4 }
 0x732   :  { %10057 = vmatpush1.bf16.msra.mxu0 %v17398_v38 }
 0x733   :  { %10058 = vmatprep.subr.bf16.mxu0 %v23400_v4 }
 0x735   :  { %8085 = vmatmul.mubr.bf16.gmra.mrb[120].mxu0 %v17255_v51 }
 0x736   :  { %14531 = vmatprep.mubr.msk.bf16.mxu0 %vm1544_vm0, %v17260_v54  ;;  %10059 = vmatpush1.bf16.msra.mxu0 %v17403_v2 }
 0x737   :  { %10060 = vmatprep.subr.bf16.mxu0 %v23400_v4 }
 0x73d   :  { %8095 = vmatmul.mubr.bf16.gmra.mrb[124].mxu0 %v17258_v5  ;;  %v17404_v5 = vld [vmem:[%s23289_s8 + $0x380] ss:$12 sps:$4 sm:$0xff]  }
 0x73e   :  { %14532 = vmatprep.mubr.msk.bf16.mxu0 %vm1544_vm0, %v17263_v55  ;;  %10061 = vmatpush1.bf16.msra.mxu0 %v17404_v5  ;;  %v17360_v5 = vld [vmem:[%s23289_s8 + $0x158] ss:$12 sps:$4 sm:$0xff]  }
 0x73f   :  { %10062 = vmatprep.subr.bf16.mxu0 %v23400_v4 }
 0x745   :  { %8105 = vmatmul.mubr.bf16.gmra.mrb[128].mxu0 %v17261_v23  ;;  %v17314_v23 = vld [vmem:[%s23288_s7 + $0x214] ss:$8 sps:$4 sm:$0xff]  }
 0x746   :  { %14533 = vmatprep.mubr.msk.bf16.mxu0 %vm1544_vm0, %v17266_v43 }
 0x74d   :  { %8115 = vmatmul.mubr.bf16.gmra.mrb[132].mxu0 %v17264_v18 }
 0x74e   :  { %14534 = vmatprep.mubr.msk.bf16.mxu0 %vm1544_vm0, %v17269_v21 }
 0x755   :  { %8125 = vmatmul.mubr.bf16.gmra.mrb[136].mxu0 %v17267_v58 }
 0x756   :  { %14535 = vmatprep.mubr.msk.bf16.mxu0 %vm1544_vm0, %v17272_v16  ;;  %v17408_v16 = vld [vmem:[%s23289_s8 + $0x398] ss:$12 sps:$4 sm:$0xff]  }
 0x757   :  { %10063 = vmatpush1.bf16.msra.mxu0 %v17408_v16 }
 0x758   :  { %10064 = vmatprep.subr.bf16.mxu0 %v23400_v4 }
 0x75d   :  { %8135 = vmatmul.mubr.bf16.gmra.mrb[140].mxu0 %v17270_v57  ;;  %v17409_v57 = vld [vmem:[%s23289_s8 + $0x3b0] ss:$12 sps:$4 sm:$0xff]  }
 0x75e   :  { %14536 = vmatprep.mubr.msk.bf16.mxu0 %vm1544_vm0, %v17275_v6  ;;  %10065 = vmatpush1.bf16.msra.mxu0 %v17409_v57 }
 0x75f   :  { %10066 = vmatprep.subr.bf16.mxu0 %v23400_v4 }
 0x765   :  { %8145 = vmatmul.mubr.bf16.gmra.mrb[144].mxu0 %v17273_v35  ;;  %v17312_v35 = vld [vmem:[%s23288_s7 + $0x210] ss:$8 sps:$4 sm:$0xff]  }
 0x766   :  { %14537 = vmatprep.mubr.msk.bf16.mxu0 %vm1544_vm0, %v17278_v46 }
 0x768   :  { %v7886_v10 = vpop.f32.mrb[40].mxu0 }
 0x769   :  { %v7888_v44 = vpop.f32.mrb[41].mxu0 }
 0x76a   :  { %v7890_v45 = vpop.f32.mrb[42].mxu0 }
 0x76b   :  { %v20973_v12 = vpack.c.bf16 %v7890_v45, %v7886_v10  ;;  %v7892_v47 = vpop.f32.mrb[43].mxu0 }
 0x76c   :  { %v20975_v11 = vpack.c.bf16 %v7892_v47, %v7888_v44  ;;  %v17413_v47 = vld [vmem:[%s23289_s8 + $0x3c8] ss:$12 sps:$4 sm:$0xff]  }
 0x76d   :  { %8155 = vmatmul.mubr.bf16.gmra.mrb[148].mxu0 %v17276_v62  ;;  %v17323_v62 = vld [vmem:[%s23288_s7 + $0x224] ss:$8 sps:$4 sm:$0xff]  }
 0x76e   :  { %14538 = vmatprep.mubr.msk.bf16.mxu0 %vm1544_vm0, %v17281_v61  ;;  %10067 = vmatpush1.bf16.msra.mxu0 %v17413_v47 }
 0x76f   :  { %10068 = vmatprep.subr.bf16.mxu0 %v23400_v4 }
 0x770   :  { %v7896_v25 = vpop.f32.mrb[44].mxu0 }
 0x771   :  { %v7898_v52 = vpop.f32.mrb[45].mxu0 }
 0x772   :  { %v7900_v24 = vpop.f32.mrb[46].mxu0  ;;  %10069 = vmatpush1.bf16.msra.mxu0 %v17414_v31  ;;  %v17359_v31 = vld [vmem:[%s23288_s7 + $0x284] ss:$8 sps:$4 sm:$0xff]  }
 0x773   :  { %v20991_v39 = vpack.c.bf16 %v7900_v24, %v7896_v25  ;;  %v7902_v60 = vpop.f32.mrb[47].mxu0  ;;  %10659 = vmatprep.subr.bf16.mxu0 %v23400_v4 }
 0x774   :  { %v20993_v1 = vpack.c.bf16 %v7902_v60, %v7898_v52  ;;  %v17332_v52 = vld [vmem:[%s23288_s7 + $0x234] ss:$8 sps:$4 sm:$0xff]  }
 0x775   :  { %8165 = vmatmul.mubr.bf16.gmra.mrb[152].mxu0 %v17279_v19 }
 0x776   :  { %14539 = vmatprep.mubr.msk.bf16.mxu0 %vm1544_vm0, %v17284_v15  ;;  %v17321_v15 = vld [vmem:[%s23288_s7 + $0x220] ss:$8 sps:$4 sm:$0xff]  }
 0x778   :  { %v7906_v30 = vpop.f32.mrb[48].mxu0 }
 0x779   :  { %v7908_v37 = vpop.f32.mrb[49].mxu0 }
 0x77a   :  { %v7910_v50 = vpop.f32.mrb[50].mxu0 }
 0x77b   :  { %v21010_v56 = vpack.c.bf16 %v7910_v50, %v7906_v30  ;;  %v7912_v27 = vpop.f32.mrb[51].mxu0 }
 0x77c   :  { %v21012_v0 = vpack.c.bf16 %v7912_v27, %v7908_v37 }
 0x77d   :  { %8175 = vmatmul.mubr.bf16.gmra.mrb[156].mxu0 %v17282_v36  ;;  %v17330_v36 = vld [vmem:[%s23288_s7 + $0x230] ss:$8 sps:$4 sm:$0xff]  }
 0x77e   :  { %14540 = vmatprep.mubr.msk.bf16.mxu0 %vm1544_vm0, %v17287_v48  ;;  %v17341_v48 = vld [vmem:[%s23288_s7 + $0x244] ss:$8 sps:$4 sm:$0xff]  }
 0x780   :  { %v7916_v34 = vpop.f32.mrb[52].mxu0 }
 0x781   :  { %v7918_v8 = vpop.f32.mrb[53].mxu0 }
 0x782   :  { %v7920_v13 = vpop.f32.mrb[54].mxu0 }
 0x783   :  { %v21029_v63 = vpack.c.bf16 %v7920_v13, %v7916_v34  ;;  %v7922_v33 = vpop.f32.mrb[55].mxu0 }
 0x784   :  { %v21031_v20 = vpack.c.bf16 %v7922_v33, %v7918_v8 }
 0x785   :  { %8185 = vmatmul.mubr.bf16.gmra.mrb[160].mxu0 %v17285_v7  ;;  %v17339_v7 = vld [vmem:[%s23288_s7 + $0x240] ss:$8 sps:$4 sm:$0xff]  }
 0x786   :  { %14541 = vmatprep.mubr.msk.bf16.mxu0 %vm1544_vm0, %v17296_v29  ;;  %v17350_v29 = vld [vmem:[%s23288_s7 + $0x254] ss:$8 sps:$4 sm:$0xff]  }
 0x788   :  { %v7926_v53 = vpop.f32.mrb[56].mxu0 }
 0x789   :  { %v7928_v40 = vpop.f32.mrb[57].mxu0 }
 0x78a   :  { %v7930_v51 = vpop.f32.mrb[58].mxu0 }
 0x78b   :  { %v21048_v54 = vpack.c.bf16 %v7930_v51, %v7926_v53  ;;  %v7932_v49 = vpop.f32.mrb[59].mxu0 }
 0x78c   :  { %v21050_v42 = vpack.c.bf16 %v7932_v49, %v7928_v40 }
 0x78d   :  { %8195 = vmatmul.mubr.bf16.gmra.mrb[164].mxu0 %v17294_v9  ;;  %v17348_v9 = vld [vmem:[%s23288_s7 + $0x250] ss:$8 sps:$4 sm:$0xff]  }
 0x78e   :  { %14542 = vmatprep.mubr.msk.bf16.mxu0 %vm1544_vm0, %v17305_v41  ;;  %v17353_v41 = vld [vmem:[%s23288_s7 + $0x264] ss:$8 sps:$4 sm:$0xff]  }
 0x790   :  { %v7936_v55 = vpop.f32.mrb[60].mxu0 }
 0x791   :  { %v7938_v22 = vpop.f32.mrb[61].mxu0 }
 0x792   :  { %v7940_v43 = vpop.f32.mrb[62].mxu0 }
 0x793   :  { %v21067_v18 = vpack.c.bf16 %v7940_v43, %v7936_v55  ;;  %v7942_v21 = vpop.f32.mrb[63].mxu0 }
 0x794   :  { %v21069_v58 = vpack.c.bf16 %v7942_v21, %v7938_v22  ;;  %v17356_v21 = vld [vmem:[%s23288_s7 + $0x274] ss:$8 sps:$4 sm:$0xff]  }
 0x795   :  { %8205 = vmatmul.mubr.bf16.gmra.mrb[168].mxu0 %v17303_v32  ;;  %v17364_v32 = vld [vmem:[%s23289_s8 + $0x170] ss:$12 sps:$4 sm:$0xff]  }
 0x796   :  { %14543 = vmatprep.mubr.msk.bf16.mxu0 %vm1544_vm0, %v17314_v23  ;;  %v17351_v23 = vld [vmem:[%s23288_s7 + $0x260] ss:$8 sps:$4 sm:$0xff]  }
 0x798   :  { %v7946_v6 = vpop.f32.mrb[64].mxu0 }
 0x799   :  { %v7948_v46 = vpop.f32.mrb[65].mxu0 }
 0x79a   :  { %v7950_v61 = vpop.f32.mrb[66].mxu0 }
 0x79b   :  { %v21086_v10 = vpack.c.bf16 %v7950_v61, %v7946_v6  ;;  %v7952_v44 = vpop.f32.mrb[67].mxu0 }
 0x79c   :  { %v21088_v45 = vpack.c.bf16 %v7952_v44, %v7948_v46  ;;  %v17354_v44 = vld [vmem:[%s23288_s7 + $0x270] ss:$8 sps:$4 sm:$0xff]  }
 0x79d   :  { %8215 = vmatmul.mubr.bf16.gmra.mrb[172].mxu0 %v17312_v35  ;;  %v17365_v35 = vld [vmem:[%s23289_s8 + $0x188] ss:$12 sps:$4 sm:$0xff]  }
 0x79e   :  { %14544 = vmatprep.mubr.msk.bf16.mxu0 %vm1544_vm0, %v17323_v62  ;;  %v17369_v62 = vld [vmem:[%s23289_s8 + $0x1a0] ss:$12 sps:$4 sm:$0xff]  }
 0x7a0   :  { %v7956_v19 = vpop.f32.mrb[68].mxu0 }
 0x7a1   :  { %v7958_v25 = vpop.f32.mrb[69].mxu0 }
 0x7a2   :  { %v7960_v14 = vpop.f32.mrb[70].mxu0 }
 0x7a3   :  { %v21105_v24 = vpack.c.bf16 %v7960_v14, %v7956_v19  ;;  %v7962_v60 = vpop.f32.mrb[71].mxu0 }
 0x7a4   :  { %v21107_v26 = vpack.c.bf16 %v7962_v60, %v7958_v25  ;;  %v17374_v60 = vld [vmem:[%s23289_s8 + $0x1d0] ss:$12 sps:$4 sm:$0xff]  }
 0x7a5   :  { %8225 = vmatmul.mubr.bf16.gmra.mrb[176].mxu0 %v17321_v15 }
 0x7a6   :  { %14545 = vmatprep.mubr.msk.bf16.mxu0 %vm1544_vm0, %v17332_v52  ;;  %v17370_v52 = vld [vmem:[%s23289_s8 + $0x1b8] ss:$12 sps:$4 sm:$0xff]  }
 0x7a8   :  { %v7966_v30 = vpop.f32.mrb[72].mxu0 }
 0x7a9   :  { %v7968_v37 = vpop.f32.mrb[73].mxu0 }
 0x7aa   :  { %v7970_v17 = vpop.f32.mrb[74].mxu0 }
 0x7ab   :  { %v21117_v50 = vpack.c.bf16 %v7970_v17, %v7966_v30  ;;  %v7972_v27 = vpop.f32.mrb[75].mxu0  ;;  %v17363_v17 = vld [vmem:[%s23288_s7 + $0x294] ss:$8 sps:$4 sm:$0xff]  }
 0x7ac   :  { %v21119_v28 = vpack.c.bf16 %v7972_v27, %v7968_v37 }
 0x7ad   :  { %8235 = vmatmul.mubr.bf16.gmra.mrb[180].mxu0 %v17330_v36  ;;  %v17357_v36 = vld [vmem:[%s23288_s7 + $0x280] ss:$8 sps:$4 sm:$0xff]  }
 0x7ae   :  { %14546 = vmatprep.mubr.msk.bf16.mxu0 %vm1544_vm0, %v17341_v48 }
 0x7b0   :  { %v7976_v34 = vpop.f32.mrb[76].mxu0 }
 0x7b1   :  { %v7978_v8 = vpop.f32.mrb[77].mxu0 }
 0x7b2   :  { %v7980_v59 = vpop.f32.mrb[78].mxu0 }
 0x7b3   :  { %v21128_v13 = vpack.c.bf16 %v7980_v59, %v7976_v34  ;;  %v7982_v33 = vpop.f32.mrb[79].mxu0  ;;  %v17381_v59 = vld [vmem:[%s23289_s8 + $0x200] ss:$12 sps:$4 sm:$0xff]  }
 0x7b4   :  { %v21130_v3 = vpack.c.bf16 %v7982_v33, %v7978_v8  ;;  %v17361_v33 = vld [vmem:[%s23288_s7 + $0x290] ss:$8 sps:$4 sm:$0xff]  }
 0x7b5   :  { %8245 = vmatmul.mubr.bf16.gmra.mrb[184].mxu0 %v17339_v7  ;;  %v17376_v7 = vld [vmem:[%s23289_s8 + $0x1e8] ss:$12 sps:$4 sm:$0xff]  }
 0x7b6   :  { %14547 = vmatprep.mubr.msk.bf16.mxu0 %vm1544_vm0, %v17350_v29 }
 0x7b8   :  { %v7986_v38 = vpop.f32.mrb[80].mxu0 }
 0x7b9   :  { %v7988_v53 = vpop.f32.mrb[81].mxu0 }
 0x7ba   :  { %v7990_v40 = vpop.f32.mrb[82].mxu0 }
 0x7bb   :  { %v21139_v51 = vpack.c.bf16 %v7990_v40, %v7986_v38  ;;  %v7992_v49 = vpop.f32.mrb[83].mxu0 }
 0x7bc   :  { %v21141_v2 = vpack.c.bf16 %v7992_v49, %v7988_v53  ;;  %v17368_v53 = vld [vmem:[%s23288_s7 + $0x2a4] ss:$8 sps:$4 sm:$0xff]  }
 0x7bd   :  { %8255 = vmatmul.mubr.bf16.gmra.mrb[188].mxu0 %v17348_v9  ;;  %v17383_v49 = vld [vmem:[%s23289_s8 + $0x218] ss:$12 sps:$4 sm:$0xff]  }
 0x7be   :  { %14658 = vmatprep.mubr.msk.bf16.mxu1 %vm1544_vm0, %v21141_v2  ;;  %14548 = vmatprep.mubr.msk.bf16.mxu0 %vm1544_vm0, %v17353_v41 }
 0x7bf   :  { %8885 = vmatmul.mubr.bf16.vlgmr.msra.gmra.mrb[40].mxu1 %v21139_v51 }
 0x7c0   :  { %v7996_v55 = vpop.f32.mrb[84].mxu0  ;;  %8986 = vmatpush1.bf16.msra.mxu1 %v17360_v5 }
 0x7c1   :  { %v7998_v22 = vpop.f32.mrb[85].mxu0  ;;  %8987 = vmatprep.subr.bf16.mxu1 %v23400_v4 }
 0x7c2   :  { %v8000_v43 = vpop.f32.mrb[86].mxu0 }
 0x7c3   :  { %v21160_v16 = vpack.c.bf16 %v8000_v43, %v7996_v55  ;;  %v8002_v57 = vpop.f32.mrb[87].mxu0  ;;  %v17388_v55 = vld [vmem:[%s23289_s8 + $0x230] ss:$12 sps:$4 sm:$0xff]  }
 0x7c4   :  { %v21162_v6 = vpack.c.bf16 %v8002_v57, %v7998_v22  ;;  %8988 = vmatpush1.bf16.msra.mxu1 %v17364_v32  ;;  %v17366_v22 = vld [vmem:[%s23288_s7 + $0x2a0] ss:$8 sps:$4 sm:$0xff]   ;;  %v17373_v43 = vld [vmem:[%s23288_s7 + $0x2b4] ss:$8 sps:$4 sm:$0xff]  }
 0x7c5   :  { %8265 = vmatmul.mubr.bf16.gmra.mrb[192].mxu0 %v17351_v23  ;;  %8989 = vmatprep.subr.bf16.mxu1 %v23400_v4 }
 0x7c6   :  { %14659 = vmatprep.mubr.msk.bf16.mxu1 %vm1544_vm0, %v21162_v6  ;;  %14549 = vmatprep.mubr.msk.bf16.mxu0 %vm1544_vm0, %v17356_v21 }
 0x7c7   :  { %8895 = vmatmul.mubr.bf16.gmra.mrb[44].mxu1 %v21160_v16 }
 0x7c8   :  { %v8006_v46 = vpop.f32.mrb[88].mxu0  ;;  %8990 = vmatpush1.bf16.msra.mxu1 %v17365_v35 }
 0x7c9   :  { %v8008_v61 = vpop.f32.mrb[89].mxu0  ;;  %8991 = vmatprep.subr.bf16.mxu1 %v23400_v4 }
 0x7ca   :  { %v8010_v47 = vpop.f32.mrb[90].mxu0 }
 0x7cb   :  { %v21182_v19 = vpack.c.bf16 %v8010_v47, %v8006_v46  ;;  %v8012_v15 = vpop.f32.mrb[91].mxu0  ;;  %v17390_v46 = vld [vmem:[%s23289_s8 + $0x248] ss:$12 sps:$4 sm:$0xff]   ;;  %v17371_v47 = vld [vmem:[%s23288_s7 + $0x2b0] ss:$8 sps:$4 sm:$0xff]  }
 0x7cc   :  { %v21184_v25 = vpack.c.bf16 %v8012_v15, %v8008_v61  ;;  %8992 = vmatpush1.bf16.msra.mxu1 %v17369_v62  ;;  %v17395_v61 = vld [vmem:[%s23289_s8 + $0x260] ss:$12 sps:$4 sm:$0xff]  }
 0x7cd   :  { %8275 = vmatmul.mubr.bf16.gmra.mrb[196].mxu0 %v17354_v44  ;;  %8993 = vmatprep.subr.bf16.mxu1 %v23400_v4  ;;  %v17380_v15 = vld [vmem:[%s23288_s7 + $0x2c4] ss:$8 sps:$4 sm:$0xff]  }
 0x7ce   :  { %14660 = vmatprep.mubr.msk.bf16.mxu1 %vm1544_vm0, %v21184_v25  ;;  %14550 = vmatprep.mubr.msk.bf16.mxu0 %vm1544_vm0, %v17359_v31 }
 0x7cf   :  { %8905 = vmatmul.mubr.bf16.gmra.mrb[48].mxu1 %v21182_v19 }
 0x7d0   :  { %v8016_v14 = vpop.f32.mrb[92].mxu0  ;;  %8994 = vmatpush1.bf16.msra.mxu1 %v17370_v52 }
 0x7d1   :  { %v8018_v30 = vpop.f32.mrb[93].mxu0  ;;  %8995 = vmatprep.subr.bf16.mxu1 %v23400_v4 }
 0x7d2   :  { %v8020_v37 = vpop.f32.mrb[94].mxu0 }
 0x7d3   :  { %v21204_v48 = vpack.c.bf16 %v8020_v37, %v8016_v14  ;;  %v8022_v27 = vpop.f32.mrb[95].mxu0  ;;  %v17402_v37 = vld [vmem:[%s23289_s8 + $0x290] ss:$12 sps:$4 sm:$0xff]  }
 0x7d4   :  { %v21206_v34 = vpack.c.bf16 %v8022_v27, %v8018_v30  ;;  %8996 = vmatpush1.bf16.msra.mxu1 %v17374_v60  ;;  %v17397_v30 = vld [vmem:[%s23289_s8 + $0x278] ss:$12 sps:$4 sm:$0xff]   ;;  %v17378_v27 = vld [vmem:[%s23288_s7 + $0x2c0] ss:$8 sps:$4 sm:$0xff]  }
 0x7d5   :  { %8285 = vmatmul.mubr.bf16.gmra.mrb[200].mxu0 %v17357_v36  ;;  %8997 = vmatprep.subr.bf16.mxu1 %v23400_v4 }
 0x7d6   :  { %14661 = vmatprep.mubr.msk.bf16.mxu1 %vm1544_vm0, %v21206_v34  ;;  %14551 = vmatprep.mubr.msk.bf16.mxu0 %vm1544_vm0, %v17363_v17 }
 0x7d7   :  { %8915 = vmatmul.mubr.bf16.gmra.mrb[52].mxu1 %v21204_v48 }
 0x7d8   :  { %v8026_v8 = vpop.f32.mrb[96].mxu0  ;;  %8998 = vmatpush1.bf16.msra.mxu1 %v17376_v7  ;;  %v17417_v7 = vld [vmem:[%s23289_s8 + $0x4] ss:$12 sps:$4 sm:$0xff]  }
 0x7d9   :  { %v8028_v29 = vpop.f32.mrb[97].mxu0  ;;  %8999 = vmatprep.subr.bf16.mxu1 %v23400_v4 }
 0x7da   :  { %v8030_v38 = vpop.f32.mrb[98].mxu0 }
 0x7db   :  { %v21226_v9 = vpack.c.bf16 %v8030_v38, %v8026_v8  ;;  %v8032_v40 = vpop.f32.mrb[99].mxu0 }
 0x7dc   :  { %v21228_v41 = vpack.c.bf16 %v8032_v40, %v8028_v29  ;;  %9000 = vmatpush1.bf16.msra.mxu1 %v17381_v59  ;;  %v17387_v59 = vld [vmem:[%s23288_s7 + $0x2d4] ss:$8 sps:$4 sm:$0xff]  }
 0x7dd   :  { %8295 = vmatmul.mubr.bf16.gmra.mrb[204].mxu0 %v17361_v33  ;;  %9001 = vmatprep.subr.bf16.mxu1 %v23400_v4 }
 0x7de   :  { %14662 = vmatprep.mubr.msk.bf16.mxu1 %vm1544_vm0, %v21228_v41  ;;  %14552 = vmatprep.mubr.msk.bf16.mxu0 %vm1544_vm0, %v17368_v53 }
 0x7df   :  { %8925 = vmatmul.mubr.bf16.gmra.mrb[56].mxu1 %v21226_v9 }
 0x7e0   :  { %v8036_v5 = vpop.f32.mrb[100].mxu0  ;;  %9002 = vmatpush1.bf16.msra.mxu1 %v17383_v49  ;;  %v17385_v49 = vld [vmem:[%s23288_s7 + $0x2d0] ss:$8 sps:$4 sm:$0xff]  }
 0x7e1   :  { %v8038_v32 = vpop.f32.mrb[101].mxu0  ;;  %9003 = vmatprep.subr.bf16.mxu1 %v23400_v4 }
 0x7e2   :  { %v8040_v23 = vpop.f32.mrb[102].mxu0 }
 0x7e3   :  { %v21248_v21 = vpack.c.bf16 %v8040_v23, %v8036_v5  ;;  %v8042_v57 = vpop.f32.mrb[103].mxu0 }
 0x7e4   :  { %v21250_v35 = vpack.c.bf16 %v8042_v57, %v8038_v32  ;;  %9004 = vmatpush1.bf16.msra.mxu1 %v17388_v55  ;;  %v17394_v55 = vld [vmem:[%s23288_s7 + $0x2e4] ss:$8 sps:$4 sm:$0xff]  }
 0x7e5   :  { %8305 = vmatmul.mubr.bf16.gmra.mrb[208].mxu0 %v17366_v22  ;;  %9005 = vmatprep.subr.bf16.mxu1 %v23400_v4 }
 0x7e6   :  { %14663 = vmatprep.mubr.msk.bf16.mxu1 %vm1544_vm0, %v21250_v35  ;;  %14553 = vmatprep.mubr.msk.bf16.mxu0 %vm1544_vm0, %v17373_v43 }
 0x7e7   :  { %8935 = vmatmul.mubr.bf16.gmra.mrb[60].mxu1 %v21248_v21 }
 0x7e8   :  { %v8046_v62 = vpop.f32.mrb[104].mxu0  ;;  %9006 = vmatpush1.bf16.msra.mxu1 %v17390_v46  ;;  %v17392_v46 = vld [vmem:[%s23288_s7 + $0x2e0] ss:$8 sps:$4 sm:$0xff]  }
 0x7e9   :  { %v8048_v44 = vpop.f32.mrb[105].mxu0  ;;  %9007 = vmatprep.subr.bf16.mxu1 %v23400_v4 }
 0x7ea   :  { %v8050_v31 = vpop.f32.mrb[106].mxu0 }
 0x7eb   :  { %v21270_v52 = vpack.c.bf16 %v8050_v31, %v8046_v62  ;;  %v8052_v14 = vpop.f32.mrb[107].mxu0 }
 0x7ec   :  { %v21272_v60 = vpack.c.bf16 %v8052_v14, %v8048_v44  ;;  %9008 = vmatpush1.bf16.msra.mxu1 %v17395_v61  ;;  %v17401_v61 = vld [vmem:[%s23288_s7 + $0x2f4] ss:$8 sps:$4 sm:$0xff]   ;;  %v17399_v14 = vld [vmem:[%s23288_s7 + $0x2f0] ss:$8 sps:$4 sm:$0xff]  }
 0x7ed   :  { %8315 = vmatmul.mubr.bf16.gmra.mrb[212].mxu0 %v17371_v47  ;;  %9009 = vmatprep.subr.bf16.mxu1 %v23400_v4 }
 0x7ee   :  { %14664 = vmatprep.mubr.msk.bf16.mxu1 %vm1544_vm0, %v21272_v60  ;;  %14554 = vmatprep.mubr.msk.bf16.mxu0 %vm1544_vm0, %v17380_v15 }
 0x7ef   :  { %8945 = vmatmul.mubr.bf16.gmra.mrb[64].mxu1 %v21270_v52 }
 0x7f0   :  { %v8056_v36 = vpop.f32.mrb[108].mxu0  ;;  %9010 = vmatpush1.bf16.msra.mxu1 %v17397_v30 }
 0x7f1   :  { %v8058_v17 = vpop.f32.mrb[109].mxu0  ;;  %9011 = vmatprep.subr.bf16.mxu1 %v23400_v4 }
 0x7f2   :  { %v8060_v8 = vpop.f32.mrb[110].mxu0 }
 0x7f3   :  { %v21295_v29 = vpack.c.bf16 %v8060_v8, %v8056_v36  ;;  %v8062_v33 = vpop.f32.mrb[111].mxu0  ;;  %v17407_v36 = vld [vmem:[%s23288_s7 + $0x304] ss:$8 sps:$4 sm:$0xff]   ;;  %v17420_v8 = vld [vmem:[%s23289_s8 + $0x1c] ss:$12 sps:$4 sm:$0xff]  }
 0x7f4   :  { %v21297_v38 = vpack.c.bf16 %v8062_v33, %v8058_v17  ;;  %9012 = vmatpush1.bf16.msra.mxu1 %v17402_v37  ;;  %v17418_v33 = vld [vmem:[%s23289_s8 + $0x18] ss:$12 sps:$4 sm:$0xff]  }
 0x7f5   :  { %8325 = vmatmul.mubr.bf16.gmra.mrb[216].mxu0 %v17378_v27  ;;  %9352 = vmatprep.subr.bf16.mxu1 %v17417_v7 }
 0x7f6   :  { %14665 = vmatprep.mubr.msk.bf16.mxu1 %vm1544_vm0, %v21297_v38  ;;  %14555 = vmatprep.mubr.msk.bf16.mxu0 %vm1544_vm0, %v17387_v59 }
 0x7f7   :  { %8955 = vmatmul.mubr.bf16.gmra.mrb[68].mxu1 %v21295_v29 }
 0x7f8   :  { %v8066_v53 = vpop.f32.mrb[112].mxu0 }
 0x7f9   :  { %v8068_v40 = vpop.f32.mrb[113].mxu0 }
 0x7fa   :  { %v8070_v5 = vpop.f32.mrb[114].mxu0 }
 0x7fb   :  { %v21309_v32 = vpack.c.bf16 %v8070_v5, %v8066_v53  ;;  %v8072_v22 = vpop.f32.mrb[115].mxu0  ;;  %v17405_v53 = vld [vmem:[%s23288_s7 + $0x300] ss:$8 sps:$4 sm:$0xff]  }
 0x7fc   :  { %v21311_v23 = vpack.c.bf16 %v8072_v22, %v8068_v40 }
 0x7fd   :  { %8335 = vmatmul.mubr.bf16.gmra.mrb[220].mxu0 %v17385_v49  ;;  %v17423_v49 = vld [vmem:[%s23289_s8 + $0x34] ss:$12 sps:$4 sm:$0xff]  }
 0x7fe   :  { %14666 = vmatprep.mubr.msk.bf16.mxu1 %vm1544_vm0, %v21311_v23  ;;  %14556 = vmatprep.mubr.msk.bf16.mxu0 %vm1544_vm0, %v17394_v55 }
 0x7ff   :  { %8965 = vmatmul.mubr.bf16.gmra.mrb[72].mxu1 %v21309_v32 }
 0x800   :  { %v8076_v43 = vpop.f32.mrb[116].mxu0 }
 0x801   :  { %v8078_v57 = vpop.f32.mrb[117].mxu0 }
 0x802   :  { %v8080_v62 = vpop.f32.mrb[118].mxu0 }
 0x803   :  { %v21323_v44 = vpack.c.bf16 %v8080_v62, %v8076_v43  ;;  %v8082_v47 = vpop.f32.mrb[119].mxu0  ;;  %v17421_v43 = vld [vmem:[%s23289_s8 + $0x30] ss:$12 sps:$4 sm:$0xff]   ;;  %v17424_v62 = vld [vmem:[%s23289_s8 + $0x48] ss:$12 sps:$4 sm:$0xff]  }
 0x804   :  { %v21325_v31 = vpack.c.bf16 %v8082_v47, %v8078_v57  ;;  %v17426_v57 = vld [vmem:[%s23289_s8 + $0x4c] ss:$12 sps:$4 sm:$0xff]  }
 0x805   :  { %8345 = vmatmul.mubr.bf16.gmra.mrb[224].mxu0 %v17392_v46 }
 0x806   :  { %14667 = vmatprep.mubr.msk.bf16.mxu1 %vm1544_vm0, %v21325_v31  ;;  %14557 = vmatprep.mubr.msk.bf16.mxu0 %vm1544_vm0, %v17401_v61  ;;  %v17410_v61 = vld [vmem:[%s23288_s7 + $0x310] ss:$8 sps:$4 sm:$0xff]  }
 0x807   :  { %8975 = vmatmul.mubr.bf16.gmra.mrb[76].mxu1 %v21323_v44 }
 0x808   :  { %14668 = vmatprep.mubr.msk.bf16.mxu1 %vm1544_vm0, %v21141_v2  ;;  %v8086_v15 = vpop.f32.mrb[120].mxu0  ;;  %v17415_v2 = vld [vmem:[%s23289_s8] ss:$12 sps:$4 sm:$0xff]  }
 0x809   :  { %v8088_v30 = vpop.f32.mrb[121].mxu0 }
 0x80a   :  { %v8090_v37 = vpop.f32.mrb[122].mxu0 }
 0x80b   :  { %v21339_v17 = vpack.c.bf16 %v8090_v37, %v8086_v15  ;;  %v8092_v27 = vpop.f32.mrb[123].mxu0  ;;  %v17429_v15 = vld [vmem:[%s23289_s8 + $0x64] ss:$12 sps:$4 sm:$0xff]   ;;  %v17432_v37 = vld [vmem:[%s23289_s8 + $0x7c] ss:$12 sps:$4 sm:$0xff]  }
 0x80c   :  { %v21341_v7 = vpack.c.bf16 %v8092_v27, %v8088_v30 }
 0x80d   :  { %8355 = vmatmul.mubr.bf16.gmra.mrb[228].mxu0 %v17399_v14 }
 0x80e   :  { %14558 = vmatprep.mubr.msk.bf16.mxu0 %vm1544_vm0, %v17407_v36  ;;  %v17427_v36 = vld [vmem:[%s23289_s8 + $0x60] ss:$12 sps:$4 sm:$0xff]  }
 0x80f   :  { %9018 = vmatmul.mubr.bf16.vlgmr.msra.gmra.mrb[80].mxu1 %v21139_v51  ;;  %v17412_v51 = vld [vmem:[%s23288_s7 + $0x314] ss:$8 sps:$4 sm:$0xff]  }
 0x810   :  { %14669 = vmatprep.mubr.msk.bf16.mxu1 %vm1544_vm0, %v21162_v6  ;;  %v8096_v59 = vpop.f32.mrb[124].mxu0  ;;  %9353 = vmatpush1.bf16.msra.mxu1 %v17415_v2  ;;  %v17430_v2 = vld [vmem:[%s23289_s8 + $0x78] ss:$12 sps:$4 sm:$0xff]  }
 0x811   :  { %v8098_v40 = vpop.f32.mrb[125].mxu0  ;;  %9354 = vmatprep.subr.bf16.mxu1 %v17420_v8 }
 0x812   :  { %v8100_v6 = vpop.f32.mrb[126].mxu0 }
 0x813   :  { %v21365_v5 = vpack.c.bf16 %v8100_v6, %v8096_v59  ;;  %v8102_v55 = vpop.f32.mrb[127].mxu0  ;;  %v17436_v59 = vld [vmem:[%s23289_s8 + $0x94] ss:$12 sps:$4 sm:$0xff]   ;;  %v17437_v6 = vld [vmem:[%s23289_s8 + $0x410] ss:$12 sps:$4 sm:$0xff]  }
 0x814   :  { %v21367_v22 = vpack.c.bf16 %v8102_v55, %v8098_v40  ;;  %9355 = vmatpush1.bf16.msra.mxu1 %v17418_v33 }
 0x815   :  { %8365 = vmatmul.mubr.bf16.gmra.mrb[232].mxu0 %v17405_v53  ;;  %9356 = vmatprep.subr.bf16.mxu1 %v17423_v49  ;;  %v17434_v49 = vld [vmem:[%s23289_s8 + $0x90] ss:$12 sps:$4 sm:$0xff]  }
 0x816   :  { %14559 = vmatprep.mubr.msk.bf16.mxu0 %vm1544_vm0, %v17412_v51  ;;  %v17440_v51 = vld [vmem:[%s23289_s8 + $0xac] ss:$12 sps:$4 sm:$0xff]  }
 0x817   :  { %9026 = vmatmul.mubr.bf16.gmra.mrb[84].mxu1 %v21160_v16 }
 0x818   :  { %14670 = vmatprep.mubr.msk.bf16.mxu1 %vm1544_vm0, %v21184_v25  ;;  %v8106_v46 = vpop.f32.mrb[128].mxu0  ;;  %9357 = vmatpush1.bf16.msra.mxu1 %v17421_v43  ;;  %v17438_v43 = vld [vmem:[%s23289_s8 + $0xa8] ss:$12 sps:$4 sm:$0xff]  }
 0x819   :  { %v8108_v47 = vpop.f32.mrb[129].mxu0  ;;  %9358 = vmatprep.subr.bf16.mxu1 %v17426_v57 }
 0x81a   :  { %v8110_v16 = vpop.f32.mrb[130].mxu0 }
 0x81b   :  { %v21388_v14 = vpack.c.bf16 %v8110_v16, %v8106_v46  ;;  %v8112_v25 = vpop.f32.mrb[131].mxu0  ;;  %v17444_v46 = vld [vmem:[%s23289_s8 + $0xc4] ss:$12 sps:$4 sm:$0xff]   ;;  %v17448_v16 = vld [vmem:[%s23289_s8 + $0xdc] ss:$12 sps:$4 sm:$0xff]  }
 0x81c   :  { %v21390_v30 = vpack.c.bf16 %v8112_v25, %v8108_v47  ;;  %9359 = vmatpush1.bf16.msra.mxu1 %v17424_v62  ;;  %v17445_v25 = vld [vmem:[%s23289_s8 + $0x440] ss:$12 sps:$4 sm:$0xff]  }
 0x81d   :  { %8375 = vmatmul.mubr.bf16.gmra.mrb[236].mxu0 %v17410_v61  ;;  %9360 = vmatprep.subr.bf16.mxu1 %v17429_v15  ;;  %v17442_v15 = vld [vmem:[%s23289_s8 + $0xc0] ss:$12 sps:$4 sm:$0xff]  }
 0x81e   :  { %14848 = vmatprep.mubr.msk.bf16.mxu0 %vm1544_vm0, %v21341_v7 }
 0x81f   :  { %9034 = vmatmul.mubr.bf16.gmra.mrb[88].mxu1 %v21182_v19  ;;  %v17433_v19 = vld [vmem:[%s23289_s8 + $0x3f8] ss:$12 sps:$4 sm:$0xff]  }
 0x820   :  { %14671 = vmatprep.mubr.msk.bf16.mxu1 %vm1544_vm0, %v21206_v34  ;;  %v8116_v27 = vpop.f32.mrb[132].mxu0  ;;  %9361 = vmatpush1.bf16.msra.mxu1 %v17427_v36 }
 0x821   :  { %v8118_v8 = vpop.f32.mrb[133].mxu0  ;;  %9362 = vmatprep.subr.bf16.mxu1 %v17432_v37  ;;  %v17446_v37 = vld [vmem:[%s23289_s8 + $0xd8] ss:$12 sps:$4 sm:$0xff]  }
 0x822   :  { %v8120_v33 = vpop.f32.mrb[134].mxu0 }
 0x823   :  { %v21412_v53 = vpack.c.bf16 %v8120_v33, %v8116_v27  ;;  %v8122_v34 = vpop.f32.mrb[135].mxu0 }
 0x824   :  { %v21414_v40 = vpack.c.bf16 %v8122_v34, %v8118_v8  ;;  %9363 = vmatpush1.bf16.msra.mxu1 %v17430_v2  ;;  %v17452_v2 = vld [vmem:[%s23289_s8 + $0xf4] ss:$12 sps:$4 sm:$0xff]   ;;  %v17456_v34 = vld [vmem:[%s23289_s8 + $0x10c] ss:$12 sps:$4 sm:$0xff]  }
 0x825   :  { %10075 = vmatmul.mubr.bf16.vlgmr.msra.gmra.mrb[240].mxu0 %v21339_v17  ;;  %9364 = vmatprep.subr.bf16.mxu1 %v17436_v59 }
 0x826   :  { %14849 = vmatprep.mubr.msk.bf16.mxu0 %vm1544_vm0, %v21367_v22  ;;  %10660 = vmatpush1.bf16.msra.mxu0 %v17433_v19  ;;  %v17450_v19 = vld [vmem:[%s23289_s8 + $0xf0] ss:$12 sps:$4 sm:$0xff]  }
 0x827   :  { %9042 = vmatmul.mubr.bf16.gmra.mrb[92].mxu1 %v21204_v48  ;;  %10661 = vmatprep.subr.bf16.mxu0 %v23400_v4  ;;  %v17441_v48 = vld [vmem:[%s23289_s8 + $0x428] ss:$12 sps:$4 sm:$0xff]  }
 0x828   :  { %14672 = vmatprep.mubr.msk.bf16.mxu1 %vm1544_vm0, %v21228_v41  ;;  %v8126_v55 = vpop.f32.mrb[136].mxu0  ;;  %9365 = vmatpush1.bf16.msra.mxu1 %v17434_v49  ;;  %v17453_v49 = vld [vmem:[%s23289_s8 + $0x470] ss:$12 sps:$4 sm:$0xff]  }
 0x829   :  { %v8128_v57 = vpop.f32.mrb[137].mxu0  ;;  %9366 = vmatprep.subr.bf16.mxu1 %v17440_v51 }
 0x82a   :  { %v8130_v62 = vpop.f32.mrb[138].mxu0  ;;  %10662 = vmatpush1.bf16.msra.mxu0 %v17437_v6  ;;  %v17454_v6 = vld [vmem:[%s23289_s8 + $0x108] ss:$12 sps:$4 sm:$0xff]  }
 0x82b   :  { %v21441_v61 = vpack.c.bf16 %v8130_v62, %v8126_v55  ;;  %v8132_v41 = vpop.f32.mrb[139].mxu0  ;;  %10663 = vmatprep.subr.bf16.mxu0 %v23400_v4 }
 0x82c   :  { %v21444_v47 = vpack.c.bf16 %v8132_v41, %v8128_v57  ;;  %9367 = vmatpush1.bf16.msra.mxu1 %v17438_v43  ;;  %v17460_v43 = vld [vmem:[%s23289_s8 + $0x124] ss:$12 sps:$4 sm:$0xff]   ;;  %v17464_v41 = vld [vmem:[%s23289_s8 + $0x13c] ss:$12 sps:$4 sm:$0xff]  }
 0x82d   :  { %10083 = vmatmul.mubr.bf16.gmra.mrb[244].mxu0 %v21365_v5  ;;  %9368 = vmatprep.subr.bf16.mxu1 %v17444_v46 }
 0x82e   :  { %14850 = vmatprep.mubr.msk.bf16.mxu0 %vm1544_vm0, %v21390_v30  ;;  %10664 = vmatpush1.bf16.msra.mxu0 %v17441_v48  ;;  %v17458_v48 = vld [vmem:[%s23289_s8 + $0x120] ss:$12 sps:$4 sm:$0xff]  }
 0x82f   :  { %9050 = vmatmul.mubr.bf16.gmra.mrb[96].mxu1 %v21226_v9  ;;  %10665 = vmatprep.subr.bf16.mxu0 %v23400_v4  ;;  %v17449_v9 = vld [vmem:[%s23289_s8 + $0x458] ss:$12 sps:$4 sm:$0xff]  }
 0x830   :  { %14673 = vmatprep.mubr.msk.bf16.mxu1 %vm1544_vm0, %v21250_v35  ;;  %v8136_v36 = vpop.f32.mrb[140].mxu0  ;;  %9369 = vmatpush1.bf16.msra.mxu1 %v17442_v15  ;;  %v17461_v15 = vld [vmem:[%s23289_s8 + $0x4a0] ss:$12 sps:$4 sm:$0xff]  }
 0x831   :  { %v8138_v27 = vpop.f32.mrb[141].mxu0  ;;  %9370 = vmatprep.subr.bf16.mxu1 %v17448_v16 }
 0x832   :  { %v8140_v8 = vpop.f32.mrb[142].mxu0  ;;  %10666 = vmatpush1.bf16.msra.mxu0 %v17445_v25  ;;  %v17462_v25 = vld [vmem:[%s23289_s8 + $0x138] ss:$12 sps:$4 sm:$0xff]  }
 0x833   :  { %v21471_v59 = vpack.c.bf16 %v8140_v8, %v8136_v36  ;;  %v8142_v35 = vpop.f32.mrb[143].mxu0  ;;  %10667 = vmatprep.subr.bf16.mxu0 %v23400_v4  ;;  %v17466_v8 = vld [vmem:[%s23289_s8 + $0x4d0] ss:$12 sps:$4 sm:$0xff]  }
 0x834   :  { %v21474_v33 = vpack.c.bf16 %v8142_v35, %v8138_v27  ;;  %9371 = vmatpush1.bf16.msra.mxu1 %v17446_v37  ;;  %v17465_v27 = vld [vmem:[%s23289_s8 + $0x4b8] ss:$12 sps:$4 sm:$0xff]  }
 0x835   :  { %10091 = vmatmul.mubr.bf16.gmra.mrb[248].mxu0 %v21388_v14  ;;  %9372 = vmatprep.subr.bf16.mxu1 %v17452_v2 }
 0x836   :  { %14851 = vmatprep.mubr.msk.bf16.mxu0 %vm1544_vm0, %v21414_v40  ;;  %10668 = vmatpush1.bf16.msra.mxu0 %v17449_v9 }
 0x837   :  { %9058 = vmatmul.mubr.bf16.gmra.mrb[100].mxu1 %v21248_v21  ;;  %10669 = vmatprep.subr.bf16.mxu0 %v23400_v4  ;;  %v17457_v21 = vld [vmem:[%s23289_s8 + $0x488] ss:$12 sps:$4 sm:$0xff]  }
 0x838   :  { %14674 = vmatprep.mubr.msk.bf16.mxu1 %vm1544_vm0, %v21272_v60  ;;  %v8146_v51 = vpop.f32.mrb[144].mxu0  ;;  %9373 = vmatpush1.bf16.msra.mxu1 %v17450_v19 }
 0x839   :  { %v8148_v55 = vpop.f32.mrb[145].mxu0  ;;  %9374 = vmatprep.subr.bf16.mxu1 %v17456_v34  ;;  %v17467_v34 = vld [vmem:[%s23289_s8 + $0x4e8] ss:$12 sps:$4 sm:$0xff]  }
 0x83a   :  { %v8150_v57 = vpop.f32.mrb[146].mxu0  ;;  %10670 = vmatpush1.bf16.msra.mxu0 %v17453_v49 }
 0x83b   :  { %v21501_v46 = vpack.c.bf16 %v8150_v57, %v8146_v51  ;;  %v8152_v60 = vpop.f32.mrb[147].mxu0  ;;  %10671 = vmatprep.subr.bf16.mxu0 %v23400_v4  ;;  %v17469_v57 = vld [vmem:[%s23289_s8 + $0x518] ss:$12 sps:$4 sm:$0xff]  }
 0x83c   :  { %v21504_v62 = vpack.c.bf16 %v8152_v60, %v8148_v55  ;;  %9375 = vmatpush1.bf16.msra.mxu1 %v17454_v6 }
 0x83d   :  { %10099 = vmatmul.mubr.bf16.gmra.mrb[252].mxu0 %v21412_v53  ;;  %9376 = vmatprep.subr.bf16.mxu1 %v17460_v43 }
 0x83e   :  { %14852 = vmatprep.mubr.msk.bf16.mxu0 %vm1544_vm0, %v21444_v47  ;;  %10672 = vmatpush1.bf16.msra.mxu0 %v17457_v21 }
 0x83f   :  { %9066 = vmatmul.mubr.bf16.gmra.mrb[104].mxu1 %v21270_v52  ;;  %10673 = vmatprep.subr.bf16.mxu0 %v23400_v4 }
 0x840   :  { %14675 = vmatprep.mubr.msk.bf16.mxu1 %vm1544_vm0, %v21297_v38  ;;  %v8156_v16 = vpop.f32.mrb[148].mxu0  ;;  %9377 = vmatpush1.bf16.msra.mxu1 %v17458_v48 }
 0x841   :  { %v8158_v36 = vpop.f32.mrb[149].mxu0  ;;  %9378 = vmatprep.subr.bf16.mxu1 %v17464_v41 }
 0x842   :  { %v8160_v37 = vpop.f32.mrb[150].mxu0  ;;  %10674 = vmatpush1.bf16.msra.mxu0 %v17461_v15 }
 0x843   :  { %v21528_v52 = vpack.c.bf16 %v8160_v37, %v8156_v16  ;;  %v8162_v2 = vpop.f32.mrb[151].mxu0  ;;  %10675 = vmatprep.subr.bf16.mxu0 %v23400_v4 }
 0x844   :  { %v21531_v38 = vpack.c.bf16 %v8162_v2, %v8158_v36  ;;  %9379 = vmatpush1.bf16.msra.mxu1 %v17462_v25 }
 0x845   :  { %10107 = vmatmul.mubr.bf16.gmra.mrb[0].mxu0 %v21441_v61  ;;  %9485 = vmatprep.subr.bf16.mxu1 %v23400_v4 }
 0x846   :  { %14853 = vmatprep.mubr.msk.bf16.mxu0 %vm1544_vm0, %v21474_v33  ;;  %10676 = vmatpush1.bf16.msra.mxu0 %v17465_v27  ;;  %v17472_v27 = vld [vmem:[%s23289_s8 + $0x20] ss:$12 sps:$4 sm:$0xff]  }
 0x847   :  { %9074 = vmatmul.mubr.bf16.gmra.mrb[108].mxu1 %v21295_v29  ;;  %10677 = vmatprep.subr.bf16.mxu0 %v23400_v4  ;;  %v17468_v29 = vld [vmem:[%s23289_s8 + $0x500] ss:$12 sps:$4 sm:$0xff]  }
 0x848   :  { %14676 = vmatprep.mubr.msk.bf16.mxu1 %vm1544_vm0, %v21311_v23  ;;  %v8166_v9 = vpop.f32.mrb[152].mxu0 }
 0x849   :  { %v8168_v35 = vpop.f32.mrb[153].mxu0 }
 0x84a   :  { %v8170_v19 = vpop.f32.mrb[154].mxu0  ;;  %10678 = vmatpush1.bf16.msra.mxu0 %v17466_v8 }
 0x84b   :  { %v21547_v49 = vpack.c.bf16 %v8170_v19, %v8166_v9  ;;  %v8172_v51 = vpop.f32.mrb[155].mxu0  ;;  %10679 = vmatprep.subr.bf16.mxu0 %v23400_v4 }
 0x84c   :  { %v21550_v6 = vpack.c.bf16 %v8172_v51, %v8168_v35 }
 0x84d   :  { %10115 = vmatmul.mubr.bf16.gmra.mrb[4].mxu0 %v21471_v59 }
 0x84e   :  { %14854 = vmatprep.mubr.msk.bf16.mxu0 %vm1544_vm0, %v21504_v62  ;;  %10680 = vmatpush1.bf16.msra.mxu0 %v17467_v34  ;;  %v17473_v34 = vld [vmem:[%s23289_s8 + $0x38] ss:$12 sps:$4 sm:$0xff]  }
 0x84f   :  { %9082 = vmatmul.mubr.bf16.gmra.mrb[112].mxu1 %v21309_v32  ;;  %10681 = vmatprep.subr.bf16.mxu0 %v23400_v4  ;;  %v17470_v32 = vld [vmem:[%s23289_s8 + $0x530] ss:$12 sps:$4 sm:$0xff]  }
 0x850   :  { %14677 = vmatprep.mubr.msk.bf16.mxu1 %vm1544_vm0, %v21325_v31  ;;  %v8176_v23 = vpop.f32.mrb[156].mxu0 }
 0x851   :  { %v8178_v55 = vpop.f32.mrb[157].mxu0 }
 0x852   :  { %v8180_v43 = vpop.f32.mrb[158].mxu0  ;;  %10682 = vmatpush1.bf16.msra.mxu0 %v17468_v29  ;;  %v17474_v29 = vld [vmem:[%s23289_s8 + $0x50] ss:$12 sps:$4 sm:$0xff]  }
 0x853   :  { %v21565_v21 = vpack.c.bf16 %v8180_v43, %v8176_v23  ;;  %v8182_v60 = vpop.f32.mrb[159].mxu0  ;;  %10683 = vmatprep.subr.bf16.mxu0 %v23400_v4 }
 0x854   :  { %v21568_v48 = vpack.c.bf16 %v8182_v60, %v8178_v55 }
 0x855   :  { %10123 = vmatmul.mubr.bf16.gmra.mrb[8].mxu0 %v21501_v46 }
 0x856   :  { %14855 = vmatprep.mubr.msk.bf16.mxu0 %vm1544_vm0, %v21531_v38  ;;  %10684 = vmatpush1.bf16.msra.mxu0 %v17469_v57 }
 0x857   :  { %9090 = vmatmul.mubr.bf16.gmra.mrb[116].mxu1 %v21323_v44  ;;  %10685 = vmatprep.subr.bf16.mxu0 %v23400_v4  ;;  %v17471_v44 = vld [vmem:[%s23289_s8 + $0x8] ss:$12 sps:$4 sm:$0xff]  }
 0x858   :  { %14720 = vmatprep.mubr.msk.bf16.mxu1 %vm1544_vm0, %v20975_v11  ;;  %v8186_v31 = vpop.f32.mrb[160].mxu0 }
 0x859   :  { %v8188_v41 = vpop.f32.mrb[161].mxu0 }
 0x85a   :  { %v8190_v15 = vpop.f32.mrb[162].mxu0  ;;  %10686 = vmatpush1.bf16.msra.mxu0 %v17470_v32  ;;  %v17475_v32 = vld [vmem:[%s23289_s8 + $0x68] ss:$12 sps:$4 sm:$0xff]  }
 0x85b   :  { %v21580_v16 = vpack.c.bf16 %v8190_v15, %v8186_v31  ;;  %v8192_v25 = vpop.f32.mrb[163].mxu0  ;;  %11276 = vmatprep.subr.bf16.mxu0 %v23400_v4 }
 0x85c   :  { %v21583_v36 = vpack.c.bf16 %v8192_v25, %v8188_v41  ;;  %v17476_v41 = vld [vmem:[%s23289_s8 + $0x80] ss:$12 sps:$4 sm:$0xff]  }
 0x85d   :  { %10131 = vmatmul.mubr.bf16.gmra.mrb[12].mxu0 %v21528_v52 }
 0x85e   :  { %14856 = vmatprep.mubr.msk.bf16.mxu0 %vm1544_vm0, %v21550_v6 }
 0x85f   :  { %9385 = vmatmul.mubr.bf16.vlgmr.msra.gmra.mrb[40].mxu1 %v20973_v12 }
 0x860   :  { %14721 = vmatprep.mubr.msk.bf16.mxu1 %vm1544_vm0, %v20993_v1  ;;  %v8196_v37 = vpop.f32.mrb[164].mxu0  ;;  %9486 = vmatpush1.bf16.msra.mxu1 %v17471_v44  ;;  %v17477_v44 = vld [vmem:[%s23289_s8 + $0x548] ss:$12 sps:$4 sm:$0xff]  }
 0x861   :  { %v8198_v2 = vpop.f32.mrb[165].mxu0  ;;  %9487 = vmatprep.subr.bf16.mxu1 %v23400_v4 }
 0x862   :  { %v8200_v8 = vpop.f32.mrb[166].mxu0 }
 0x863   :  { %v21598_v9 = vpack.c.bf16 %v8200_v8, %v8196_v37  ;;  %v8202_v35 = vpop.f32.mrb[167].mxu0  ;;  %v17478_v8 = vld [vmem:[%s23289_s8 + $0x98] ss:$12 sps:$4 sm:$0xff]  }
 0x864   :  { %v21600_v19 = vpack.c.bf16 %v8202_v35, %v8198_v2  ;;  %9488 = vmatpush1.bf16.msra.mxu1 %v17472_v27  ;;  %v17479_v35 = vld [vmem:[%s23289_s8 + $0x560] ss:$12 sps:$4 sm:$0xff]  }
 0x865   :  { %10139 = vmatmul.mubr.bf16.gmra.mrb[16].mxu0 %v21547_v49  ;;  %9489 = vmatprep.subr.bf16.mxu1 %v23400_v4 }
 0x866   :  { %14857 = vmatprep.mubr.msk.bf16.mxu0 %vm1544_vm0, %v21568_v48 }
 0x867   :  { %9395 = vmatmul.mubr.bf16.gmra.mrb[44].mxu1 %v20991_v39 }
 0x868   :  { %14722 = vmatprep.mubr.msk.bf16.mxu1 %vm1544_vm0, %v21012_v0  ;;  %v8206_v51 = vpop.f32.mrb[168].mxu0  ;;  %9490 = vmatpush1.bf16.msra.mxu1 %v17473_v34 }
 0x869   :  { %v8208_v23 = vpop.f32.mrb[169].mxu0  ;;  %9491 = vmatprep.subr.bf16.mxu1 %v23400_v4 }
 0x86a   :  { %v8210_v55 = vpop.f32.mrb[170].mxu0 }
 0x86b   :  { %v21616_v43 = vpack.c.bf16 %v8210_v55, %v8206_v51  ;;  %v8212_v57 = vpop.f32.mrb[171].mxu0  ;;  %v17480_v51 = vld [vmem:[%s23289_s8 + $0xb0] ss:$12 sps:$4 sm:$0xff]   ;;  %v17481_v55 = vld [vmem:[%s23289_s8 + $0x578] ss:$12 sps:$4 sm:$0xff]  }
 0x86c   :  { %v21618_v60 = vpack.c.bf16 %v8212_v57, %v8208_v23  ;;  %9492 = vmatpush1.bf16.msra.mxu1 %v17474_v29 }
 0x86d   :  { %10147 = vmatmul.mubr.bf16.gmra.mrb[20].mxu0 %v21565_v21  ;;  %9493 = vmatprep.subr.bf16.mxu1 %v23400_v4 }
 0x86e   :  { %14966 = vmatprep.mubr.msk.bf16.mxu0 %vm1544_vm0, %v21583_v36 }
 0x86f   :  { %9405 = vmatmul.mubr.bf16.gmra.mrb[48].mxu1 %v21010_v56 }
 0x870   :  { %14723 = vmatprep.mubr.msk.bf16.mxu1 %vm1544_vm0, %v21031_v20  ;;  %v8216_v31 = vpop.f32.mrb[172].mxu0  ;;  %9494 = vmatpush1.bf16.msra.mxu1 %v17475_v32 }
 0x871   :  { %v8218_v15 = vpop.f32.mrb[173].mxu0  ;;  %9495 = vmatprep.subr.bf16.mxu1 %v23400_v4 }
 0x872   :  { %v8220_v25 = vpop.f32.mrb[174].mxu0 }
 0x873   :  { %v21637_v37 = vpack.c.bf16 %v8220_v25, %v8216_v31  ;;  %v8222_v27 = vpop.f32.mrb[175].mxu0 }
 0x874   :  { %v21639_v2 = vpack.c.bf16 %v8222_v27, %v8218_v15  ;;  %9496 = vmatpush1.bf16.msra.mxu1 %v17476_v41  ;;  %v17482_v41 = vld [vmem:[%s23289_s8 + $0xc8] ss:$12 sps:$4 sm:$0xff]   ;;  %v17483_v15 = vld [vmem:[%s23289_s8 + $0x590] ss:$12 sps:$4 sm:$0xff]  }
 0x875   :  { %10692 = vmatmul.mubr.bf16.vlgmr.msra.gmra.mrb[24].mxu0 %v21580_v16  ;;  %9497 = vmatprep.subr.bf16.mxu1 %v23400_v4 }
 0x876   :  { %14967 = vmatprep.mubr.msk.bf16.mxu0 %vm1544_vm0, %v21600_v19  ;;  %11277 = vmatpush1.bf16.msra.mxu0 %v17477_v44  ;;  %v17484_v44 = vld [vmem:[%s23289_s8 + $0xe0] ss:$12 sps:$4 sm:$0xff]  }
 0x877   :  { %9415 = vmatmul.mubr.bf16.gmra.mrb[52].mxu1 %v21029_v63  ;;  %11278 = vmatprep.subr.bf16.mxu0 %v23400_v4 }
 0x878   :  { %14724 = vmatprep.mubr.msk.bf16.mxu1 %vm1544_vm0, %v21050_v42  ;;  %v8226_v34 = vpop.f32.mrb[176].mxu0  ;;  %9498 = vmatpush1.bf16.msra.mxu1 %v17478_v8 }
 0x879   :  { %v8228_v29 = vpop.f32.mrb[177].mxu0  ;;  %9499 = vmatprep.subr.bf16.mxu1 %v23400_v4 }
 0x87a   :  { %v8230_v23 = vpop.f32.mrb[178].mxu0  ;;  %11279 = vmatpush1.bf16.msra.mxu0 %v17479_v35  ;;  %v17485_v35 = vld [vmem:[%s23289_s8 + $0x5a8] ss:$12 sps:$4 sm:$0xff]  }
 0x87b   :  { %v21662_v57 = vpack.c.bf16 %v8230_v23, %v8226_v34  ;;  %v8232_v32 = vpop.f32.mrb[179].mxu0  ;;  %11280 = vmatprep.subr.bf16.mxu0 %v23400_v4  ;;  %v17486_v23 = vld [vmem:[%s23289_s8 + $0xf8] ss:$12 sps:$4 sm:$0xff]  }
 0x87c   :  { %v21665_v31 = vpack.c.bf16 %v8232_v32, %v8228_v29  ;;  %9500 = vmatpush1.bf16.msra.mxu1 %v17480_v51 }
 0x87d   :  { %10700 = vmatmul.mubr.bf16.gmra.mrb[28].mxu0 %v21598_v9  ;;  %9501 = vmatprep.subr.bf16.mxu1 %v23400_v4 }
 0x87e   :  { %23721 = vst [vmem:[#allocation64_spill] sm:$0xff] %v21665_v31  ;;  %14968 = vmatprep.mubr.msk.bf16.mxu0 %vm1544_vm0, %v21618_v60  ;;  %11281 = vmatpush1.bf16.msra.mxu0 %v17481_v55  ;;  %v17487_v55 = vld [vmem:[%s23289_s8 + $0x5c0] ss:$12 sps:$4 sm:$0xff]  }
 0x87f   :  { %9425 = vmatmul.mubr.bf16.gmra.mrb[56].mxu1 %v21048_v54  ;;  %11282 = vmatprep.subr.bf16.mxu0 %v23400_v4 }
 0x880   :  { %14725 = vmatprep.mubr.msk.bf16.mxu1 %vm1544_vm0, %v21069_v58  ;;  %v8236_v25 = vpop.f32.mrb[180].mxu0  ;;  %9502 = vmatpush1.bf16.msra.mxu1 %v17482_v41  ;;  %v17488_v41 = vld [vmem:[%s23289_s8 + $0x110] ss:$12 sps:$4 sm:$0xff]  }
 0x881   :  { %v8238_v27 = vpop.f32.mrb[181].mxu0  ;;  %9503 = vmatprep.subr.bf16.mxu1 %v23400_v4 }
 0x882   :  { %v8240_v8 = vpop.f32.mrb[182].mxu0  ;;  %11283 = vmatpush1.bf16.msra.mxu0 %v17483_v15 }
 0x883   :  { %v21688_v34 = vpack.c.bf16 %v8240_v8, %v8236_v25  ;;  %v8242_v51 = vpop.f32.mrb[183].mxu0  ;;  %11284 = vmatprep.subr.bf16.mxu0 %v23400_v4 }
 0x884   :  { %v21691_v29 = vpack.c.bf16 %v8242_v51, %v8238_v27  ;;  %9504 = vmatpush1.bf16.msra.mxu1 %v17484_v44  ;;  %v17489_v44 = vld [vmem:[%s23289_s8 + $0x5d8] ss:$12 sps:$4 sm:$0xff]   ;;  %v17490_v51 = vld [vmem:[%s23289_s8 + $0x128] ss:$12 sps:$4 sm:$0xff]  }
 0x885   :  { %23722 = vst [vmem:[#allocation69_spill] sm:$0xff] %v21688_v34  ;;  %10708 = vmatmul.mubr.bf16.gmra.mrb[32].mxu0 %v21616_v43  ;;  %9505 = vmatprep.subr.bf16.mxu1 %v23400_v4 }
 0x886   :  { %14969 = vmatprep.mubr.msk.bf16.mxu0 %vm1544_vm0, %v21639_v2  ;;  %11285 = vmatpush1.bf16.msra.mxu0 %v17485_v35 }
 0x887   :  { %9435 = vmatmul.mubr.bf16.gmra.mrb[60].mxu1 %v21067_v18  ;;  %11286 = vmatprep.subr.bf16.mxu0 %v23400_v4 }
 0x888   :  { %14726 = vmatprep.mubr.msk.bf16.mxu1 %vm1544_vm0, %v21088_v45  ;;  %v8246_v32 = vpop.f32.mrb[184].mxu0  ;;  %9506 = vmatpush1.bf16.msra.mxu1 %v17486_v23  ;;  %v17491_v23 = vld [vmem:[%s23289_s8 + $0x5f0] ss:$12 sps:$4 sm:$0xff]  }
 0x889   :  { %v8248_v15 = vpop.f32.mrb[185].mxu0  ;;  %9507 = vmatprep.subr.bf16.mxu1 %v23400_v4 }
 0x88a   :  { %v8250_v25 = vpop.f32.mrb[186].mxu0  ;;  %11287 = vmatpush1.bf16.msra.mxu0 %v17487_v55 }
 0x88b   :  { %v21714_v27 = vpack.c.bf16 %v8250_v25, %v8246_v32  ;;  %v8252_v8 = vpop.f32.mrb[187].mxu0  ;;  %11288 = vmatprep.subr.bf16.mxu0 %v23400_v4  ;;  %v17492_v32 = vld [vmem:[%s23289_s8 + $0x140] ss:$12 sps:$4 sm:$0xff]  }
 0x88c   :  { %v21717_v35 = vpack.c.bf16 %v8252_v8, %v8248_v15  ;;  %9508 = vmatpush1.bf16.msra.mxu1 %v17488_v41  ;;  %v17501_v15 = vld [vmem:[%s23289_s8 + $0x2a4] ss:$12 sps:$4 sm:$0xff]  }
 0x88d   :  { %23723 = vst [vmem:[#allocation70_spill] sm:$0xff] %v21714_v27  ;;  %10716 = vmatmul.mubr.bf16.gmra.mrb[36].mxu0 %v21637_v37  ;;  %9509 = vmatprep.subr.bf16.mxu1 %v23400_v4 }
 0x88e   :  { %23724 = vst [vmem:[#allocation67_spill] sm:$0xff] %v21717_v35  ;;  %14970 = vmatprep.mubr.msk.bf16.mxu0 %vm1544_vm0, %v21665_v31  ;;  %11289 = vmatpush1.bf16.msra.mxu0 %v17489_v44  ;;  %v17493_v44 = vld [vmem:[%s23289_s8 + $0x608] ss:$12 sps:$4 sm:$0xff]  }
 0x88f   :  { %9445 = vmatmul.mubr.bf16.gmra.mrb[64].mxu1 %v21086_v10  ;;  %11290 = vmatprep.subr.bf16.mxu0 %v23400_v4 }
 0x890   :  { %14727 = vmatprep.mubr.msk.bf16.mxu1 %vm1544_vm0, %v21107_v26  ;;  %v8256_v55 = vpop.f32.mrb[188].mxu0  ;;  %9510 = vmatpush1.bf16.msra.mxu1 %v17490_v51 }
 0x891   :  { %v8258_v41 = vpop.f32.mrb[189].mxu0  ;;  %9511 = vmatprep.subr.bf16.mxu1 %v23400_v4 }
 0x892   :  { %v8260_v25 = vpop.f32.mrb[190].mxu0  ;;  %11291 = vmatpush1.bf16.msra.mxu0 %v17491_v23  ;;  %v17494_v23 = vld [vmem:[%s23289_s8 + $0x620] ss:$12 sps:$4 sm:$0xff]  }
 0x893   :  { %v21743_v8 = vpack.c.bf16 %v8260_v25, %v8256_v55  ;;  %v8262_v51 = vpop.f32.mrb[191].mxu0  ;;  %11292 = vmatprep.subr.bf16.mxu0 %v23400_v4 }
 0x894   :  { %v21746_v31 = vpack.c.bf16 %v8262_v51, %v8258_v41  ;;  %9512 = vmatpush1.bf16.msra.mxu1 %v17492_v32 }
 0x895   :  { %10724 = vmatmul.mubr.bf16.gmra.mrb[40].mxu0 %v21662_v57  ;;  %9909 = vmatprep.subr.bf16.mxu1 %v17501_v15  ;;  %v17495_v15 = vld [vmem:[%s23289_s8 + $0x638] ss:$12 sps:$4 sm:$0xff]  }
 0x896   :  { %23725 = vst [vmem:[#allocation68_spill] sm:$0xff] %v21746_v31  ;;  %14971 = vmatprep.mubr.msk.bf16.mxu0 %vm1544_vm0, %v21691_v29  ;;  %11293 = vmatpush1.bf16.msra.mxu0 %v17493_v44 }
 0x897   :  { %9455 = vmatmul.mubr.bf16.gmra.mrb[68].mxu1 %v21105_v24  ;;  %11294 = vmatprep.subr.bf16.mxu0 %v23400_v4 }
 0x898   :  { %14728 = vmatprep.mubr.msk.bf16.mxu1 %vm1544_vm0, %v21119_v28  ;;  %v8266_v55 = vpop.f32.mrb[192].mxu0 }
 0x899   :  { %v8268_v32 = vpop.f32.mrb[193].mxu0 }
 0x89a   :  { %v8270_v41 = vpop.f32.mrb[194].mxu0  ;;  %11295 = vmatpush1.bf16.msra.mxu0 %v17494_v23  ;;  %v17496_v23 = vld [vmem:[%s23289_s8 + $0x650] ss:$12 sps:$4 sm:$0xff]  }
 0x89b   :  { %v21761_v25 = vpack.c.bf16 %v8270_v41, %v8266_v55  ;;  %v8272_v44 = vpop.f32.mrb[195].mxu0  ;;  %11296 = vmatprep.subr.bf16.mxu0 %v23400_v4 }
 0x89c   :  { %v21764_v51 = vpack.c.bf16 %v8272_v44, %v8268_v32  ;;  %v17497_v44 = vld [vmem:[%s23289_s8 + $0x668] ss:$12 sps:$4 sm:$0xff]  }
 0x89d   :  { %10732 = vmatmul.mubr.bf16.gmra.mrb[44].mxu0 %v21688_v34 }
 0x89e   :  { %23726 = vst [vmem:[#allocation73_spill] sm:$0xff] %v21764_v51  ;;  %14972 = vmatprep.mubr.msk.bf16.mxu0 %vm1544_vm0, %v21717_v35  ;;  %11297 = vmatpush1.bf16.msra.mxu0 %v17495_v15 }
 0x89f   :  { %9465 = vmatmul.mubr.bf16.gmra.mrb[72].mxu1 %v21117_v50  ;;  %11298 = vmatprep.subr.bf16.mxu0 %v23400_v4 }
 0x8a0   :  { %14729 = vmatprep.mubr.msk.bf16.mxu1 %vm1544_vm0, %v21130_v3  ;;  %v8276_v55 = vpop.f32.mrb[196].mxu0 }
 0x8a1   :  { %v8278_v32 = vpop.f32.mrb[197].mxu0 }
 0x8a2   :  { %v8280_v41 = vpop.f32.mrb[198].mxu0  ;;  %11299 = vmatpush1.bf16.msra.mxu0 %v17496_v23  ;;  %v17498_v23 = vld [vmem:[%s23289_s8 + $0x680] ss:$12 sps:$4 sm:$0xff]  }
 0x8a3   :  { %v21779_v15 = vpack.c.bf16 %v8280_v41, %v8276_v55  ;;  %v8282_v35 = vpop.f32.mrb[199].mxu0  ;;  %11300 = vmatprep.subr.bf16.mxu0 %v23400_v4 }
 0x8a4   :  { %v21782_v34 = vpack.c.bf16 %v8282_v35, %v8278_v32 }
 0x8a5   :  { %10740 = vmatmul.mubr.bf16.gmra.mrb[48].mxu0 %v21714_v27 }
 0x8a6   :  { %14973 = vmatprep.mubr.msk.bf16.mxu0 %vm1544_vm0, %v21746_v31  ;;  %11301 = vmatpush1.bf16.msra.mxu0 %v17497_v44  ;;  %v17499_v44 = vld [vmem:[%s23289_s8 + $0x2a0] ss:$12 sps:$4 sm:$0xff]  }
 0x8a7   :  { %9475 = vmatmul.mubr.bf16.gmra.mrb[76].mxu1 %v21128_v13  ;;  %11302 = vmatprep.subr.bf16.mxu0 %v23400_v4  ;;  %v17504_v4 = vld [vmem:[%s23289_s8 + $0x2bc] ss:$12 sps:$4 sm:$0xff]  }
 0x8a8   :  { %14730 = vmatprep.mubr.msk.bf16.mxu1 %vm1544_vm0, %v20975_v11  ;;  %v8286_v55 = vpop.f32.mrb[200].mxu0 }
 0x8a9   :  { %v8288_v35 = vpop.f32.mrb[201].mxu0 }
 0x8aa   :  { %v8290_v32 = vpop.f32.mrb[202].mxu0  ;;  %11303 = vmatpush1.bf16.msra.mxu0 %v17498_v23 }
 0x8ab   :  { %v21794_v41 = vpack.c.bf16 %v8290_v32, %v8286_v55  ;;  %v8292_v27 = vpop.f32.mrb[203].mxu0  ;;  %v17507_v55 = vld [vmem:[%s23289_s8 + $0x2d4] ss:$12 sps:$4 sm:$0xff]  }
 0x8ac   :  { %v21796_v31 = vpack.c.bf16 %v8292_v27, %v8288_v35  ;;  %v17502_v27 = vld [vmem:[%s23289_s8 + $0x2b8] ss:$12 sps:$4 sm:$0xff]  }
 0x8ad   :  { %10748 = vmatmul.mubr.bf16.gmra.mrb[52].mxu0 %v21743_v8 }
 0x8ae   :  { %14974 = vmatprep.mubr.msk.bf16.mxu0 %vm1544_vm0, %v21764_v51 }
 0x8af   :  { %9518 = vmatmul.mubr.bf16.vlgmr.msra.gmra.mrb[120].mxu1 %v20973_v12 }
 0x8b0   :  { %14731 = vmatprep.mubr.msk.bf16.mxu1 %vm1544_vm0, %v20993_v1  ;;  %v8296_v11 = vpop.f32.mrb[204].mxu0  ;;  %9910 = vmatpush1.bf16.msra.mxu1 %v17499_v44  ;;  %v17505_v1 = vld [vmem:[%s23289_s8 + $0x2d0] ss:$12 sps:$4 sm:$0xff]   ;;  %v17508_v44 = vld [vmem:[%s23289_s8 + $0x2e8] ss:$12 sps:$4 sm:$0xff]  }
 0x8b1   :  { %v8298_v23 = vpop.f32.mrb[205].mxu0  ;;  %9911 = vmatprep.subr.bf16.mxu1 %v17504_v4  ;;  %v17510_v4 = vld [vmem:[%s23289_s8 + $0x2ec] ss:$12 sps:$4 sm:$0xff]  }
 0x8b2   :  { %v8300_v35 = vpop.f32.mrb[206].mxu0 }
 0x8b3   :  { %v21816_v32 = vpack.c.bf16 %v8300_v35, %v8296_v11  ;;  %v8302_v51 = vpop.f32.mrb[207].mxu0 }
 0x8b4   :  { %v21818_v12 = vpack.c.bf16 %v8302_v51, %v8298_v23  ;;  %9912 = vmatpush1.bf16.msra.mxu1 %v17502_v27  ;;  %v17513_v27 = vld [vmem:[%s23289_s8 + $0x304] ss:$12 sps:$4 sm:$0xff]  }
 0x8b5   :  { %10756 = vmatmul.mubr.bf16.gmra.mrb[56].mxu0 %v21761_v25  ;;  %9913 = vmatprep.subr.bf16.mxu1 %v17507_v55 }
 0x8b6   :  { %14975 = vmatprep.mubr.msk.bf16.mxu0 %vm1544_vm0, %v21782_v34 }
 0x8b7   :  { %9526 = vmatmul.mubr.bf16.gmra.mrb[124].mxu1 %v20991_v39 }
 0x8b8   :  { %14732 = vmatprep.mubr.msk.bf16.mxu1 %vm1544_vm0, %v21012_v0  ;;  %v8306_v51 = vpop.f32.mrb[208].mxu0  ;;  %9914 = vmatpush1.bf16.msra.mxu1 %v17505_v1  ;;  %v17511_v0 = vld [vmem:[%s23289_s8 + $0x300] ss:$12 sps:$4 sm:$0xff]   ;;  %v17516_v1 = vld [vmem:[%s23289_s8 + $0x31c] ss:$12 sps:$4 sm:$0xff]  }
 0x8b9   :  { %v8308_v11 = vpop.f32.mrb[209].mxu0  ;;  %9915 = vmatprep.subr.bf16.mxu1 %v17510_v4 }
 0x8ba   :  { %v8310_v23 = vpop.f32.mrb[210].mxu0 }
 0x8bb   :  { %v21838_v55 = vpack.c.bf16 %v8310_v23, %v8306_v51  ;;  %v8312_v35 = vpop.f32.mrb[211].mxu0  ;;  %v17514_v51 = vld [vmem:[%s23289_s8 + $0x318] ss:$12 sps:$4 sm:$0xff]  }
 0x8bc   :  { %v21840_v39 = vpack.c.bf16 %v8312_v35, %v8308_v11  ;;  %9916 = vmatpush1.bf16.msra.mxu1 %v17508_v44  ;;  %v17519_v11 = vld [vmem:[%s23289_s8 + $0x334] ss:$12 sps:$4 sm:$0xff]  }
 0x8bd   :  { %10764 = vmatmul.mubr.bf16.gmra.mrb[60].mxu0 %v21779_v15  ;;  %9917 = vmatprep.subr.bf16.mxu1 %v17513_v27 }
 0x8be   :  { %15084 = vmatprep.mubr.msk.bf16.mxu0 %vm1544_vm0, %v21796_v31 }
 0x8bf   :  { %9534 = vmatmul.mubr.bf16.gmra.mrb[128].mxu1 %v21010_v56 }
 0x8c0   :  { %14733 = vmatprep.mubr.msk.bf16.mxu1 %vm1544_vm0, %v21031_v20  ;;  %v8316_v4 = vpop.f32.mrb[212].mxu0  ;;  %9918 = vmatpush1.bf16.msra.mxu1 %v17511_v0  ;;  %v17517_v20 = vld [vmem:[%s23289_s8 + $0x330] ss:$12 sps:$4 sm:$0xff]   ;;  %v17522_v0 = vld [vmem:[%s23289_s8 + $0x34c] ss:$12 sps:$4 sm:$0xff]  }
 0x8c1   :  { %v8318_v44 = vpop.f32.mrb[213].mxu0  ;;  %9919 = vmatprep.subr.bf16.mxu1 %v17516_v1 }
 0x8c2   :  { %v8320_v27 = vpop.f32.mrb[214].mxu0 }
 0x8c3   :  { %v21860_v23 = vpack.c.bf16 %v8320_v27, %v8316_v4  ;;  %v8322_v35 = vpop.f32.mrb[215].mxu0  ;;  %v17520_v4 = vld [vmem:[%s23289_s8 + $0x348] ss:$12 sps:$4 sm:$0xff]  }
 0x8c4   :  { %v21862_v56 = vpack.c.bf16 %v8322_v35, %v8318_v44  ;;  %9920 = vmatpush1.bf16.msra.mxu1 %v17514_v51  ;;  %v17525_v44 = vld [vmem:[%s23289_s8 + $0x364] ss:$12 sps:$4 sm:$0xff]  }
 0x8c5   :  { %23727 = vst [vmem:[#allocation74_spill] sm:$0xff] %v21860_v23  ;;  %11309 = vmatmul.mubr.bf16.vlgmr.msra.gmra.mrb[64].mxu0 %v21794_v41  ;;  %9921 = vmatprep.subr.bf16.mxu1 %v17519_v11 }
 0x8c6   :  { %15085 = vmatprep.mubr.msk.bf16.mxu0 %vm1544_vm0, %v21818_v12 }
 0x8c7   :  { %9542 = vmatmul.mubr.bf16.gmra.mrb[132].mxu1 %v21029_v63 }
 0x8c8   :  { %14734 = vmatprep.mubr.msk.bf16.mxu1 %vm1544_vm0, %v21050_v42  ;;  %v8326_v1 = vpop.f32.mrb[216].mxu0  ;;  %9922 = vmatpush1.bf16.msra.mxu1 %v17517_v20  ;;  %v17523_v42 = vld [vmem:[%s23289_s8 + $0x360] ss:$12 sps:$4 sm:$0xff]   ;;  %v17528_v20 = vld [vmem:[%s23289_s8 + $0x37c] ss:$12 sps:$4 sm:$0xff]  }
 0x8c9   :  { %v8328_v51 = vpop.f32.mrb[217].mxu0  ;;  %9923 = vmatprep.subr.bf16.mxu1 %v17522_v0 }
 0x8ca   :  { %v8330_v11 = vpop.f32.mrb[218].mxu0 }
 0x8cb   :  { %v21882_v27 = vpack.c.bf16 %v8330_v11, %v8326_v1  ;;  %v8332_v35 = vpop.f32.mrb[219].mxu0  ;;  %v17526_v1 = vld [vmem:[%s23289_s8 + $0x378] ss:$12 sps:$4 sm:$0xff]  }
 0x8cc   :  { %v21884_v63 = vpack.c.bf16 %v8332_v35, %v8328_v51  ;;  %9924 = vmatpush1.bf16.msra.mxu1 %v17520_v4  ;;  %v17531_v51 = vld [vmem:[%s23289_s8 + $0x394] ss:$12 sps:$4 sm:$0xff]  }
 0x8cd   :  { %23728 = vst [vmem:[#allocation71_spill] sm:$0xff] %v21882_v27  ;;  %11317 = vmatmul.mubr.bf16.gmra.mrb[68].mxu0 %v21816_v32  ;;  %9925 = vmatprep.subr.bf16.mxu1 %v17525_v44 }
 0x8ce   :  { %23729 = vst [vmem:[#allocation72_spill] sm:$0xff] %v21884_v63  ;;  %15086 = vmatprep.mubr.msk.bf16.mxu0 %vm1544_vm0, %v21840_v39 }
 0x8cf   :  { %9550 = vmatmul.mubr.bf16.gmra.mrb[136].mxu1 %v21048_v54 }
 0x8d0   :  { %14735 = vmatprep.mubr.msk.bf16.mxu1 %vm1544_vm0, %v21069_v58  ;;  %v8336_v0 = vpop.f32.mrb[220].mxu0  ;;  %9926 = vmatpush1.bf16.msra.mxu1 %v17523_v42  ;;  %v17529_v58 = vld [vmem:[%s23289_s8 + $0x390] ss:$12 sps:$4 sm:$0xff]   ;;  %v17534_v42 = vld [vmem:[%s23289_s8 + $0x3ac] ss:$12 sps:$4 sm:$0xff]  }
 0x8d1   :  { %v8338_v4 = vpop.f32.mrb[221].mxu0  ;;  %9927 = vmatprep.subr.bf16.mxu1 %v17528_v20 }
 0x8d2   :  { %v8340_v44 = vpop.f32.mrb[222].mxu0 }
 0x8d3   :  { %v21904_v11 = vpack.c.bf16 %v8340_v44, %v8336_v0  ;;  %v8342_v35 = vpop.f32.mrb[223].mxu0  ;;  %v17532_v0 = vld [vmem:[%s23289_s8 + $0x3a8] ss:$12 sps:$4 sm:$0xff]  }
 0x8d4   :  { %v21906_v54 = vpack.c.bf16 %v8342_v35, %v8338_v4  ;;  %9928 = vmatpush1.bf16.msra.mxu1 %v17526_v1  ;;  %v17537_v4 = vld [vmem:[%s23289_s8 + $0x3c4] ss:$12 sps:$4 sm:$0xff]  }
 0x8d5   :  { %23730 = vst [vmem:[#allocation77_spill] sm:$0xff] %v21904_v11  ;;  %11325 = vmatmul.mubr.bf16.gmra.mrb[72].mxu0 %v21838_v55  ;;  %9929 = vmatprep.subr.bf16.mxu1 %v17531_v51 }
 0x8d6   :  { %23731 = vst [vmem:[#allocation78_spill] sm:$0xff] %v21906_v54  ;;  %15087 = vmatprep.mubr.msk.bf16.mxu0 %vm1544_vm0, %v21862_v56 }
 0x8d7   :  { %9558 = vmatmul.mubr.bf16.gmra.mrb[140].mxu1 %v21067_v18 }
 0x8d8   :  { %14736 = vmatprep.mubr.msk.bf16.mxu1 %vm1544_vm0, %v21088_v45  ;;  %v8346_v20 = vpop.f32.mrb[224].mxu0  ;;  %9930 = vmatpush1.bf16.msra.mxu1 %v17529_v58  ;;  %v17535_v45 = vld [vmem:[%s23289_s8 + $0x3c0] ss:$12 sps:$4 sm:$0xff]   ;;  %v17540_v58 = vld [vmem:[%s23289_s8 + $0x3dc] ss:$12 sps:$4 sm:$0xff]  }
 0x8d9   :  { %v8348_v1 = vpop.f32.mrb[225].mxu0  ;;  %9931 = vmatprep.subr.bf16.mxu1 %v17534_v42 }
 0x8da   :  { %v8350_v51 = vpop.f32.mrb[226].mxu0 }
 0x8db   :  { %v21926_v44 = vpack.c.bf16 %v8350_v51, %v8346_v20  ;;  %v8352_v35 = vpop.f32.mrb[227].mxu0  ;;  %v17538_v20 = vld [vmem:[%s23289_s8 + $0x3d8] ss:$12 sps:$4 sm:$0xff]  }
 0x8dc   :  { %v21928_v18 = vpack.c.bf16 %v8352_v35, %v8348_v1  ;;  %9932 = vmatpush1.bf16.msra.mxu1 %v17532_v0  ;;  %v17543_v1 = vld [vmem:[%s23289_s8 + $0x3f4] ss:$12 sps:$4 sm:$0xff]  }
 0x8dd   :  { %23732 = vst [vmem:[#allocation75_spill] sm:$0xff] %v21926_v44  ;;  %11333 = vmatmul.mubr.bf16.gmra.mrb[76].mxu0 %v21860_v23  ;;  %9933 = vmatprep.subr.bf16.mxu1 %v17537_v4 }
 0x8de   :  { %23733 = vst [vmem:[#allocation76_spill] sm:$0xff] %v21928_v18  ;;  %15088 = vmatprep.mubr.msk.bf16.mxu0 %vm1544_vm0, %v21884_v63 }
 0x8df   :  { %9566 = vmatmul.mubr.bf16.gmra.mrb[144].mxu1 %v21086_v10 }
 0x8e0   :  { %14737 = vmatprep.mubr.msk.bf16.mxu1 %vm1544_vm0, %v21107_v26  ;;  %v8356_v42 = vpop.f32.mrb[228].mxu0  ;;  %9934 = vmatpush1.bf16.msra.mxu1 %v17535_v45 }
 0x8e1   :  { %v8358_v0 = vpop.f32.mrb[229].mxu0  ;;  %9935 = vmatprep.subr.bf16.mxu1 %v17540_v58 }
 0x8e2   :  { %v8360_v4 = vpop.f32.mrb[230].mxu0  ;;  %v21948_v51 = vpop.f32.mrb[80].mxu1 }
 0x8e3   :  { %v21950_v35 = vpack.c.bf16 %v8360_v4, %v8356_v42  ;;  %v8362_v10 = vpop.f32.mrb[231].mxu0  ;;  %v9021_v63 = vpop.f32.mrb[81].mxu1 }
 0x8e4   :  { %v21952_v26 = vpack.c.bf16 %v8362_v10, %v8358_v0  ;;  %9936 = vmatpush1.bf16.msra.mxu1 %v17538_v20  ;;  %v21954_v45 = vpop.f32.mrb[82].mxu1 }
 0x8e5   :  { %23734 = vst [vmem:[#allocation81_spill] sm:$0xff] %v21950_v35  ;;  %11341 = vmatmul.mubr.bf16.gmra.mrb[80].mxu0 %v21882_v27  ;;  %v9024_v23 = vpop.f32.mrb[83].mxu1  ;;  %10526 = vmatprep.subr.bf16.mxu1 %v17543_v1 }
 0x8e6   :  { %23735 = vst [vmem:[#allocation82_spill] sm:$0xff] %v21952_v26  ;;  %15089 = vmatprep.mubr.msk.bf16.mxu0 %vm1544_vm0, %v21906_v54 }
 0x8e7   :  { %9574 = vmatmul.mubr.bf16.gmra.mrb[148].mxu1 %v21105_v24 }
 0x8e8   :  { %14738 = vmatprep.mubr.msk.bf16.mxu1 %vm1544_vm0, %v21119_v28  ;;  %v8366_v58 = vpop.f32.mrb[232].mxu0 }
 0x8e9   :  { %v8368_v42 = vpop.f32.mrb[233].mxu0 }
 0x8ea   :  { %v8370_v63 = vpop.f32.mrb[234].mxu0  ;;  %v21962_v0 = vpop.f32.mrb[84].mxu1 }
 0x8eb   :  { %v21964_v20 = vpack.c.bf16 %v8370_v63, %v8366_v58  ;;  %v8372_v4 = vpop.f32.mrb[235].mxu0  ;;  %v9029_v10 = vpop.f32.mrb[85].mxu1 }
 0x8ec   :  { %v21966_v27 = vpack.c.bf16 %v8372_v4, %v8368_v42  ;;  %v21968_v23 = vpop.f32.mrb[86].mxu1 }
 0x8ed   :  { %23736 = vst [vmem:[#allocation79_spill] sm:$0xff] %v21964_v20  ;;  %11349 = vmatmul.mubr.bf16.gmra.mrb[84].mxu0 %v21904_v11  ;;  %v9032_v1 = vpop.f32.mrb[87].mxu1 }
 0x8ee   :  { %23737 = vst [vmem:[#allocation80_spill] sm:$0xff] %v21966_v27  ;;  %15090 = vmatprep.mubr.msk.bf16.mxu0 %vm1544_vm0, %v21928_v18 }
 0x8ef   :  { %9582 = vmatmul.mubr.bf16.gmra.mrb[152].mxu1 %v21117_v50 }
 0x8f0   :  { %14739 = vmatprep.mubr.msk.bf16.mxu1 %vm1544_vm0, %v21130_v3  ;;  %v8376_v24 = vpop.f32.mrb[236].mxu0 }
 0x8f1   :  { %v8378_v28 = vpop.f32.mrb[237].mxu0 }
 0x8f2   :  { %v8380_v58 = vpop.f32.mrb[238].mxu0  ;;  %v21976_v63 = vpop.f32.mrb[88].mxu1 }
 0x8f3   :  { %v21978_v42 = vpack.c.bf16 %v8380_v58, %v8376_v24  ;;  %v8382_v4 = vpop.f32.mrb[239].mxu0  ;;  %v9037_v10 = vpop.f32.mrb[89].mxu1 }
 0x8f4   :  { %v21980_v54 = vpack.c.bf16 %v8382_v4, %v8378_v28  ;;  %v21982_v1 = vpop.f32.mrb[90].mxu1 }
 0x8f5   :  { %23738 = vst [vmem:[#allocation84_spill] sm:$0xff] %v21978_v42  ;;  %11357 = vmatmul.mubr.bf16.gmra.mrb[88].mxu0 %v21926_v44  ;;  %v9040_v18 = vpop.f32.mrb[91].mxu1 }
 0x8f6   :  { %23739 = vst [vmem:[#allocation85_spill] sm:$0xff] %v21980_v54  ;;  %15091 = vmatprep.mubr.msk.bf16.mxu0 %vm1544_vm0, %v21952_v26  ;;  %v17541_v18 = vld [vmem:[%s23289_s8 + $0x3f0] ss:$12 sps:$4 sm:$0xff]  }
 0x8f7   :  { %9590 = vmatmul.mubr.bf16.gmra.mrb[156].mxu1 %v21128_v13 }
 0x8f8   :  { %14838 = vmatprep.mubr.msk.bf16.mxu1 %vm1544_vm0, %v21341_v7  ;;  %v21990_v50 = vpop.f32.mrb[240].mxu0  ;;  %v17546_v7 = vld [vmem:[%s23289_s8 + $0x40c] ss:$12 sps:$4 sm:$0xff]  }
 0x8f9   :  { %v10078_v3 = vpop.f32.mrb[241].mxu0 }
 0x8fa   :  { %v21992_v24 = vpop.f32.mrb[92].mxu1  ;;  %v21994_v28 = vpop.f32.mrb[242].mxu0  ;;  %v17544_v3 = vld [vmem:[%s23289_s8 + $0x408] ss:$12 sps:$4 sm:$0xff]  }
 0x8fb   :  { %v9045_v58 = vpop.f32.mrb[93].mxu1  ;;  %v10081_v4 = vpop.f32.mrb[243].mxu0 }
 0x8fc   :  { %v21996_v10 = vpop.f32.mrb[94].mxu1  ;;  %v17549_v4 = vld [vmem:[%s23289_s8 + $0x424] ss:$12 sps:$4 sm:$0xff]  }
 0x8fd   :  { %11365 = vmatmul.mubr.bf16.gmra.mrb[92].mxu0 %v21950_v35  ;;  %v9048_v13 = vpop.f32.mrb[95].mxu1 }
 0x8fe   :  { %15092 = vmatprep.mubr.msk.bf16.mxu0 %vm1544_vm0, %v21966_v27 }
 0x8ff   :  { %9942 = vmatmul.mubr.bf16.vlgmr.msra.gmra.mrb[40].mxu1 %v21339_v17 }
 0x900   :  { %14839 = vmatprep.mubr.msk.bf16.mxu1 %vm1544_vm0, %v21367_v22  ;;  %10527 = vmatpush1.bf16.msra.mxu1 %v17541_v18  ;;  %v22013_v58 = vpop.f32.mrb[244].mxu0  ;;  %v17547_v18 = vld [vmem:[%s23289_s8 + $0x420] ss:$12 sps:$4 sm:$0xff]  }
 0x901   :  { %10528 = vmatprep.subr.bf16.mxu1 %v17546_v7  ;;  %v10086_v13 = vpop.f32.mrb[245].mxu0 }
 0x902   :  { %v22018_v35 = vpop.f32.mrb[96].mxu1  ;;  %v22020_v27 = vpop.f32.mrb[246].mxu0  ;;  %v17552_v13 = vld [vmem:[%s23289_s8 + $0x43c] ss:$12 sps:$4 sm:$0xff]  }
 0x903   :  { %v9053_v17 = vpop.f32.mrb[97].mxu1  ;;  %v10089_v26 = vpop.f32.mrb[247].mxu0 }
 0x904   :  { %10529 = vmatpush1.bf16.msra.mxu1 %v17544_v3  ;;  %v22022_v22 = vpop.f32.mrb[98].mxu1  ;;  %v17550_v26 = vld [vmem:[%s23289_s8 + $0x438] ss:$12 sps:$4 sm:$0xff]  }
 0x905   :  { %11373 = vmatmul.mubr.bf16.gmra.mrb[96].mxu0 %v21964_v20  ;;  %v9056_v7 = vpop.f32.mrb[99].mxu1  ;;  %10530 = vmatprep.subr.bf16.mxu1 %v17549_v4  ;;  %v17555_v4 = vld [vmem:[%s23289_s8 + $0x454] ss:$12 sps:$4 sm:$0xff]  }
 0x906   :  { %15093 = vmatprep.mubr.msk.bf16.mxu0 %vm1544_vm0, %v21980_v54 }
 0x907   :  { %9952 = vmatmul.mubr.bf16.gmra.mrb[44].mxu1 %v21365_v5 }
 0x908   :  { %14840 = vmatprep.mubr.msk.bf16.mxu1 %vm1544_vm0, %v21390_v30  ;;  %10531 = vmatpush1.bf16.msra.mxu1 %v17547_v18  ;;  %v22039_v3 = vpop.f32.mrb[248].mxu0  ;;  %v17553_v18 = vld [vmem:[%s23289_s8 + $0x450] ss:$12 sps:$4 sm:$0xff]  }
 0x909   :  { %10532 = vmatprep.subr.bf16.mxu1 %v17552_v13  ;;  %v10094_v17 = vpop.f32.mrb[249].mxu0 }
 0x90a   :  { %v22044_v7 = vpop.f32.mrb[100].mxu1  ;;  %v22046_v54 = vpop.f32.mrb[250].mxu0  ;;  %v17558_v17 = vld [vmem:[%s23289_s8 + $0x46c] ss:$12 sps:$4 sm:$0xff]  }
 0x90b   :  { %v9061_v5 = vpop.f32.mrb[101].mxu1  ;;  %v10097_v20 = vpop.f32.mrb[251].mxu0 }
 0x90c   :  { %10533 = vmatpush1.bf16.msra.mxu1 %v17550_v26  ;;  %v22048_v30 = vpop.f32.mrb[102].mxu1  ;;  %v17556_v20 = vld [vmem:[%s23289_s8 + $0x468] ss:$12 sps:$4 sm:$0xff]  }
 0x90d   :  { %11381 = vmatmul.mubr.bf16.gmra.mrb[100].mxu0 %v21978_v42  ;;  %v9064_v13 = vpop.f32.mrb[103].mxu1  ;;  %10534 = vmatprep.subr.bf16.mxu1 %v17555_v4  ;;  %v17561_v4 = vld [vmem:[%s23289_s8 + $0x484] ss:$12 sps:$4 sm:$0xff]  }
 0x90f   :  { %9962 = vmatmul.mubr.bf16.gmra.mrb[48].mxu1 %v21388_v14 }
 0x910   :  { %14841 = vmatprep.mubr.msk.bf16.mxu1 %vm1544_vm0, %v21414_v40  ;;  %10535 = vmatpush1.bf16.msra.mxu1 %v17553_v18  ;;  %v22063_v26 = vpop.f32.mrb[252].mxu0  ;;  %v17559_v18 = vld [vmem:[%s23289_s8 + $0x480] ss:$12 sps:$4 sm:$0xff]  }
 0x911   :  { %10536 = vmatprep.subr.bf16.mxu1 %v17558_v17  ;;  %v10102_v5 = vpop.f32.mrb[253].mxu0  ;;  %v17564_v17 = vld [vmem:[%s23289_s8 + $0x49c] ss:$12 sps:$4 sm:$0xff]  }
 0x912   :  { %v22068_v13 = vpop.f32.mrb[104].mxu1  ;;  %v22070_v42 = vpop.f32.mrb[254].mxu0 }
 0x913   :  { %23740 = vst [vmem:[#allocation83_spill] sm:$0xff] %v22068_v13  ;;  %v9069_v14 = vpop.f32.mrb[105].mxu1  ;;  %v10105_v44 = vpop.f32.mrb[255].mxu0 }
 0x914   :  { %10537 = vmatpush1.bf16.msra.mxu1 %v17556_v20  ;;  %v22072_v40 = vpop.f32.mrb[106].mxu1  ;;  %v17562_v44 = vld [vmem:[%s23289_s8 + $0x498] ss:$12 sps:$4 sm:$0xff]  }
 0x915   :  { %23741 = vst [vmem:[#allocation86_spill] sm:$0xff] %v22072_v40  ;;  %v9072_v11 = vpop.f32.mrb[107].mxu1  ;;  %10538 = vmatprep.subr.bf16.mxu1 %v17561_v4 }
 0x916   :  { %v17567_v11 = vld [vmem:[%s23289_s8 + $0x4b4] ss:$12 sps:$4 sm:$0xff]  }
 0x917   :  { %9972 = vmatmul.mubr.bf16.gmra.mrb[52].mxu1 %v21412_v53 }
 0x918   :  { %14842 = vmatprep.mubr.msk.bf16.mxu1 %vm1544_vm0, %v21444_v47  ;;  %10539 = vmatpush1.bf16.msra.mxu1 %v17559_v18  ;;  %v22086_v20 = vpop.f32.mrb[0].mxu0  ;;  %v17565_v18 = vld [vmem:[%s23289_s8 + $0x4b0] ss:$12 sps:$4 sm:$0xff]  }
 0x919   :  { %10540 = vmatprep.subr.bf16.mxu1 %v17564_v17  ;;  %v10110_v4 = vpop.f32.mrb[1].mxu0  ;;  %v17570_v17 = vld [vmem:[%s23289_s8 + $0x4cc] ss:$12 sps:$4 sm:$0xff]  }
 0x91a   :  { %v22091_v5 = vpop.f32.mrb[108].mxu1  ;;  %v22093_v14 = vpop.f32.mrb[2].mxu0 }
 0x91b   :  { %23742 = vst [vmem:[#allocation5_spill] sm:$0xff] %v22091_v5  ;;  %v9077_v53 = vpop.f32.mrb[109].mxu1  ;;  %v10113_v40 = vpop.f32.mrb[3].mxu0 }
 0x91c   :  { %10541 = vmatpush1.bf16.msra.mxu1 %v17562_v44  ;;  %v22095_v47 = vpop.f32.mrb[110].mxu1  ;;  %v17568_v40 = vld [vmem:[%s23289_s8 + $0x4c8] ss:$12 sps:$4 sm:$0xff]  }
 0x91d   :  { %23743 = vst [vmem:[#allocation6_spill] sm:$0xff] %v22095_v47  ;;  %v9080_v13 = vpop.f32.mrb[111].mxu1  ;;  %10542 = vmatprep.subr.bf16.mxu1 %v17567_v11 }
 0x91e   :  { %v17573_v13 = vld [vmem:[%s23289_s8 + $0x4e4] ss:$12 sps:$4 sm:$0xff]  }
 0x91f   :  { %9982 = vmatmul.mubr.bf16.gmra.mrb[56].mxu1 %v21441_v61 }
 0x920   :  { %14843 = vmatprep.mubr.msk.bf16.mxu1 %vm1544_vm0, %v21474_v33  ;;  %10543 = vmatpush1.bf16.msra.mxu1 %v17565_v18  ;;  %v22109_v44 = vpop.f32.mrb[4].mxu0  ;;  %v17571_v18 = vld [vmem:[%s23289_s8 + $0x4e0] ss:$12 sps:$4 sm:$0xff]  }
 0x921   :  { %10544 = vmatprep.subr.bf16.mxu1 %v17570_v17  ;;  %v10118_v11 = vpop.f32.mrb[5].mxu0  ;;  %v17576_v17 = vld [vmem:[%s23289_s8 + $0x4fc] ss:$12 sps:$4 sm:$0xff]  }
 0x922   :  { %v22114_v4 = vpop.f32.mrb[112].mxu1  ;;  %v22116_v53 = vpop.f32.mrb[6].mxu0 }
 0x923   :  { %23744 = vst [vmem:[#allocation3_spill] sm:$0xff] %v22114_v4  ;;  %v9085_v61 = vpop.f32.mrb[113].mxu1  ;;  %v10121_v47 = vpop.f32.mrb[7].mxu0 }
 0x924   :  { %10545 = vmatpush1.bf16.msra.mxu1 %v17568_v40  ;;  %v22118_v33 = vpop.f32.mrb[114].mxu1  ;;  %v17574_v47 = vld [vmem:[%s23289_s8 + $0x4f8] ss:$12 sps:$4 sm:$0xff]  }
 0x925   :  { %23745 = vst [vmem:[#allocation4_spill] sm:$0xff] %v22118_v33  ;;  %v9088_v5 = vpop.f32.mrb[115].mxu1  ;;  %10546 = vmatprep.subr.bf16.mxu1 %v17573_v13 }
 0x926   :  { %v17579_v5 = vld [vmem:[%s23289_s8 + $0x514] ss:$12 sps:$4 sm:$0xff]  }
 0x927   :  { %9992 = vmatmul.mubr.bf16.gmra.mrb[60].mxu1 %v21471_v59 }
 0x928   :  { %14844 = vmatprep.mubr.msk.bf16.mxu1 %vm1544_vm0, %v21504_v62  ;;  %10547 = vmatpush1.bf16.msra.mxu1 %v17571_v18  ;;  %v22132_v40 = vpop.f32.mrb[8].mxu0  ;;  %v17577_v18 = vld [vmem:[%s23289_s8 + $0x510] ss:$12 sps:$4 sm:$0xff]  }
 0x929   :  { %10548 = vmatprep.subr.bf16.mxu1 %v17576_v17  ;;  %v10126_v13 = vpop.f32.mrb[9].mxu0  ;;  %v17582_v17 = vld [vmem:[%s23289_s8 + $0x52c] ss:$12 sps:$4 sm:$0xff]  }
 0x92a   :  { %v22137_v11 = vpop.f32.mrb[116].mxu1  ;;  %v22139_v61 = vpop.f32.mrb[10].mxu0 }
 0x92b   :  { %23746 = vst [vmem:[#allocation9_spill] sm:$0xff] %v22137_v11  ;;  %v9093_v59 = vpop.f32.mrb[117].mxu1  ;;  %v10129_v33 = vpop.f32.mrb[11].mxu0 }
 0x92c   :  { %10549 = vmatpush1.bf16.msra.mxu1 %v17574_v47  ;;  %v22141_v62 = vpop.f32.mrb[118].mxu1  ;;  %v17580_v33 = vld [vmem:[%s23289_s8 + $0x528] ss:$12 sps:$4 sm:$0xff]  }
 0x92d   :  { %23747 = vst [vmem:[#allocation10_spill] sm:$0xff] %v22141_v62  ;;  %v9096_v4 = vpop.f32.mrb[119].mxu1  ;;  %10550 = vmatprep.subr.bf16.mxu1 %v17579_v5 }
 0x92e   :  { %v17585_v4 = vld [vmem:[%s23289_s8 + $0x544] ss:$12 sps:$4 sm:$0xff]  }
 0x92f   :  { %10002 = vmatmul.mubr.bf16.gmra.mrb[64].mxu1 %v21501_v46 }
 0x930   :  { %14845 = vmatprep.mubr.msk.bf16.mxu1 %vm1544_vm0, %v21531_v38  ;;  %10551 = vmatpush1.bf16.msra.mxu1 %v17577_v18  ;;  %v22155_v47 = vpop.f32.mrb[12].mxu0 }
 0x931   :  { %23748 = vst [vmem:[#allocation7_spill] sm:$0xff] %v22155_v47  ;;  %10552 = vmatprep.subr.bf16.mxu1 %v17582_v17  ;;  %v10134_v13 = vpop.f32.mrb[13].mxu0 }
 0x932   :  { %v22160_v5 = vpop.f32.mrb[14].mxu0 }
 0x933   :  { %23749 = vst [vmem:[#allocation8_spill] sm:$0xff] %v22160_v5  ;;  %v10137_v59 = vpop.f32.mrb[15].mxu0 }
 0x934   :  { %10553 = vmatpush1.bf16.msra.mxu1 %v17580_v33 }
 0x935   :  { %11143 = vmatprep.subr.bf16.mxu1 %v17585_v4 }
 0x937   :  { %10012 = vmatmul.mubr.bf16.gmra.mrb[68].mxu1 %v21528_v52 }
 0x938   :  { %14846 = vmatprep.mubr.msk.bf16.mxu1 %vm1544_vm0, %v21550_v6  ;;  %v22165_v46 = vpop.f32.mrb[16].mxu0 }
 0x939   :  { %23750 = vst [vmem:[#allocation13_spill] sm:$0xff] %v22165_v46  ;;  %v10142_v38 = vpop.f32.mrb[17].mxu0 }
 0x93a   :  { %v22167_v18 = vpop.f32.mrb[18].mxu0 }
 0x93b   :  { %23751 = vst [vmem:[#allocation14_spill] sm:$0xff] %v22167_v18  ;;  %v10145_v17 = vpop.f32.mrb[19].mxu0 }
 0x93c   :  { %v17588_v17 = vld [vmem:[%s23289_s8 + $0x55c] ss:$12 sps:$4 sm:$0xff]  }
 0x93f   :  { %10022 = vmatmul.mubr.bf16.gmra.mrb[72].mxu1 %v21547_v49 }
 0x940   :  { %14847 = vmatprep.mubr.msk.bf16.mxu1 %vm1544_vm0, %v21568_v48  ;;  %v22172_v13 = vpop.f32.mrb[20].mxu0  ;;  %v17583_v48 = vld [vmem:[%s23289_s8 + $0x540] ss:$12 sps:$4 sm:$0xff]  }
 0x941   :  { %23752 = vst [vmem:[#allocation11_spill] sm:$0xff] %v22172_v13  ;;  %v10150_v33 = vpop.f32.mrb[21].mxu0 }
 0x942   :  { %v22174_v4 = vpop.f32.mrb[22].mxu0  ;;  %v17591_v33 = vld [vmem:[%s23289_s8 + $0x574] ss:$12 sps:$4 sm:$0xff]  }
 0x943   :  { %23753 = vst [vmem:[#allocation12_spill] sm:$0xff] %v22174_v4  ;;  %v10153_v52 = vpop.f32.mrb[23].mxu0 }
 0x947   :  { %10032 = vmatmul.mubr.bf16.gmra.mrb[76].mxu1 %v21565_v21  ;;  %v17586_v21 = vld [vmem:[%s23289_s8 + $0x558] ss:$12 sps:$4 sm:$0xff]  }
 0x948   :  { %14956 = vmatprep.mubr.msk.bf16.mxu1 %vm1544_vm0, %v21583_v36  ;;  %v22179_v6 = vpop.f32.mrb[24].mxu0 }
 0x949   :  { %v10695_v59 = vpop.f32.mrb[25].mxu0 }
 0x94a   :  { %v22181_v38 = vpop.f32.mrb[26].mxu0 }
 0x94b   :  { %v10698_v49 = vpop.f32.mrb[27].mxu0 }
 0x94f   :  { %10559 = vmatmul.mubr.bf16.vlgmr.msra.gmra.mrb[40].mxu1 %v21580_v16  ;;  %v17589_v16 = vld [vmem:[%s23289_s8 + $0x570] ss:$12 sps:$4 sm:$0xff]  }
 0x950   :  { %14957 = vmatprep.mubr.msk.bf16.mxu1 %vm1544_vm0, %v21600_v19  ;;  %11144 = vmatpush1.bf16.msra.mxu1 %v17583_v48  ;;  %v22195_v36 = vpop.f32.mrb[28].mxu0  ;;  %v17594_v19 = vld [vmem:[%s23289_s8 + $0x58c] ss:$12 sps:$4 sm:$0xff]   ;;  %v17592_v48 = vld [vmem:[%s23289_s8 + $0x588] ss:$12 sps:$4 sm:$0xff]  }
 0x951   :  { %11145 = vmatprep.subr.bf16.mxu1 %v17588_v17  ;;  %v10703_v52 = vpop.f32.mrb[29].mxu0 }
 0x952   :  { %v22200_v59 = vpop.f32.mrb[30].mxu0 }
 0x953   :  { %v10706_v49 = vpop.f32.mrb[31].mxu0 }
 0x954   :  { %11146 = vmatpush1.bf16.msra.mxu1 %v17586_v21  ;;  %v17597_v21 = vld [vmem:[%s23289_s8 + $0x5a4] ss:$12 sps:$4 sm:$0xff]  }
 0x955   :  { %11147 = vmatprep.subr.bf16.mxu1 %v17591_v33 }
 0x957   :  { %10569 = vmatmul.mubr.bf16.gmra.mrb[44].mxu1 %v21598_v9  ;;  %v17595_v9 = vld [vmem:[%s23289_s8 + $0x5a0] ss:$12 sps:$4 sm:$0xff]  }
 0x958   :  { %14958 = vmatprep.mubr.msk.bf16.mxu1 %vm1544_vm0, %v21618_v60  ;;  %11148 = vmatpush1.bf16.msra.mxu1 %v17589_v16  ;;  %v22214_v17 = vpop.f32.mrb[32].mxu0  ;;  %v17600_v60 = vld [vmem:[%s23289_s8 + $0x5bc] ss:$12 sps:$4 sm:$0xff]   ;;  %v17598_v16 = vld [vmem:[%s23289_s8 + $0x5b8] ss:$12 sps:$4 sm:$0xff]  }
 0x959   :  { %11149 = vmatprep.subr.bf16.mxu1 %v17594_v19  ;;  %v10711_v33 = vpop.f32.mrb[33].mxu0 }
 0x95a   :  { %v22219_v52 = vpop.f32.mrb[34].mxu0 }
 0x95b   :  { %v10714_v49 = vpop.f32.mrb[35].mxu0 }
 0x95c   :  { %11150 = vmatpush1.bf16.msra.mxu1 %v17592_v48 }
 0x95d   :  { %11151 = vmatprep.subr.bf16.mxu1 %v17597_v21  ;;  %v17603_v21 = vld [vmem:[%s23289_s8 + $0x5d4] ss:$12 sps:$4 sm:$0xff]  }
 0x95f   :  { %10579 = vmatmul.mubr.bf16.gmra.mrb[48].mxu1 %v21616_v43  ;;  %v17601_v43 = vld [vmem:[%s23289_s8 + $0x5d0] ss:$12 sps:$4 sm:$0xff]  }
 0x960   :  { %14959 = vmatprep.mubr.msk.bf16.mxu1 %vm1544_vm0, %v21639_v2  ;;  %11152 = vmatpush1.bf16.msra.mxu1 %v17595_v9  ;;  %v22233_v19 = vpop.f32.mrb[36].mxu0  ;;  %v17606_v2 = vld [vmem:[%s23289_s8 + $0x5ec] ss:$12 sps:$4 sm:$0xff]   ;;  %v23754_v9 = vld [vmem:[#allocation64_spill] sm:$0xff] }
 0x961   :  { %11153 = vmatprep.subr.bf16.mxu1 %v17600_v60  ;;  %v10719_v48 = vpop.f32.mrb[37].mxu0 }
 0x962   :  { %v22238_v33 = vpop.f32.mrb[38].mxu0 }
 0x963   :  { %v10722_v49 = vpop.f32.mrb[39].mxu0 }
 0x964   :  { %11154 = vmatpush1.bf16.msra.mxu1 %v17598_v16  ;;  %v17604_v16 = vld [vmem:[%s23289_s8 + $0x5e8] ss:$12 sps:$4 sm:$0xff]  }
 0x965   :  { %11155 = vmatprep.subr.bf16.mxu1 %v17603_v21  ;;  %v17609_v21 = vld [vmem:[%s23289_s8 + $0x604] ss:$12 sps:$4 sm:$0xff]  }
 0x967   :  { %10589 = vmatmul.mubr.bf16.gmra.mrb[52].mxu1 %v21637_v37  ;;  %v17607_v37 = vld [vmem:[%s23289_s8 + $0x600] ss:$12 sps:$4 sm:$0xff]  }
 0x968   :  { %14960 = vmatprep.mubr.msk.bf16.mxu1 %vm1544_vm0, %v23754_v9  ;;  %v22249_v60 = vpop.f32.mrb[40].mxu0  ;;  %11156 = vmatpush1.bf16.msra.mxu1 %v17601_v43  ;;  %v17612_v43 = vld [vmem:[%s23289_s8 + $0x61c] ss:$12 sps:$4 sm:$0xff]  }
 0x969   :  { %v10727_v48 = vpop.f32.mrb[41].mxu0  ;;  %11157 = vmatprep.subr.bf16.mxu1 %v17606_v2 }
 0x96a   :  { %v22257_v49 = vpop.f32.mrb[42].mxu0 }
 0x96b   :  { %v10730_v4 = vpop.f32.mrb[43].mxu0 }
 0x96c   :  { %11158 = vmatpush1.bf16.msra.mxu1 %v17604_v16  ;;  %v17610_v4 = vld [vmem:[%s23289_s8 + $0x618] ss:$12 sps:$4 sm:$0xff]   ;;  %v17615_v16 = vld [vmem:[%s23289_s8 + $0x634] ss:$12 sps:$4 sm:$0xff]  }
 0x96d   :  { %11159 = vmatprep.subr.bf16.mxu1 %v17609_v21 }
 0x96f   :  { %10599 = vmatmul.mubr.bf16.gmra.mrb[56].mxu1 %v21662_v57  ;;  %v17613_v57 = vld [vmem:[%s23289_s8 + $0x630] ss:$12 sps:$4 sm:$0xff]  }
 0x970   :  { %14961 = vmatprep.mubr.msk.bf16.mxu1 %vm1544_vm0, %v21691_v29  ;;  %v22268_v2 = vpop.f32.mrb[44].mxu0  ;;  %11160 = vmatpush1.bf16.msra.mxu1 %v17607_v37  ;;  %v17618_v29 = vld [vmem:[%s23289_s8 + $0x64c] ss:$12 sps:$4 sm:$0xff]  }
 0x971   :  { %v10735_v9 = vpop.f32.mrb[45].mxu0  ;;  %11161 = vmatprep.subr.bf16.mxu1 %v17612_v43  ;;  %v23755_v37 = vld [vmem:[#allocation69_spill] sm:$0xff]  ;;  %v23756_v43 = vld [vmem:[#allocation67_spill] sm:$0xff] }
 0x972   :  { %v22276_v48 = vpop.f32.mrb[46].mxu0 }
 0x973   :  { %v10738_v21 = vpop.f32.mrb[47].mxu0 }
 0x974   :  { %11162 = vmatpush1.bf16.msra.mxu1 %v17610_v4  ;;  %v17616_v4 = vld [vmem:[%s23289_s8 + $0x648] ss:$12 sps:$4 sm:$0xff]  }
 0x975   :  { %11163 = vmatprep.subr.bf16.mxu1 %v17615_v16  ;;  %v17621_v16 = vld [vmem:[%s23289_s8 + $0x664] ss:$12 sps:$4 sm:$0xff]  }
 0x977   :  { %10609 = vmatmul.mubr.bf16.gmra.mrb[60].mxu1 %v23755_v37  ;;  %v17619_v37 = vld [vmem:[%s23289_s8 + $0x660] ss:$12 sps:$4 sm:$0xff]  }
 0x978   :  { %14962 = vmatprep.mubr.msk.bf16.mxu1 %vm1544_vm0, %v23756_v43  ;;  %v22287_v9 = vpop.f32.mrb[48].mxu0  ;;  %11164 = vmatpush1.bf16.msra.mxu1 %v17613_v57  ;;  %v17624_v57 = vld [vmem:[%s23289_s8 + $0x67c] ss:$12 sps:$4 sm:$0xff]   ;;  %v23757_v43 = vld [vmem:[#allocation70_spill] sm:$0xff] }
 0x979   :  { %v10743_v21 = vpop.f32.mrb[49].mxu0  ;;  %11165 = vmatprep.subr.bf16.mxu1 %v17618_v29  ;;  %v23758_v29 = vld [vmem:[#allocation68_spill] sm:$0xff] }
 0x97a   :  { %v22295_v62 = vpop.f32.mrb[50].mxu0 }
 0x97b   :  { %v10746_v13 = vpop.f32.mrb[51].mxu0 }
 0x97c   :  { %11166 = vmatpush1.bf16.msra.mxu1 %v17616_v4  ;;  %v17622_v13 = vld [vmem:[%s23289_s8 + $0x678] ss:$12 sps:$4 sm:$0xff]  }
 0x97d   :  { %11167 = vmatprep.subr.bf16.mxu1 %v17621_v16 }
 0x97f   :  { %10619 = vmatmul.mubr.bf16.gmra.mrb[64].mxu1 %v23757_v43 }
 0x980   :  { %14963 = vmatprep.mubr.msk.bf16.mxu1 %vm1544_vm0, %v23758_v29  ;;  %v22306_v21 = vpop.f32.mrb[52].mxu0  ;;  %11168 = vmatpush1.bf16.msra.mxu1 %v17619_v37 }
 0x981   :  { %23759 = vst [vmem:[#allocation17_spill] sm:$0xff] %v22306_v21  ;;  %v10751_v4 = vpop.f32.mrb[53].mxu0  ;;  %11169 = vmatprep.subr.bf16.mxu1 %v17624_v57 }
 0x982   :  { %v9519_v11 = vpop.f32.mrb[120].mxu1  ;;  %v22311_v16 = vpop.f32.mrb[54].mxu0  ;;  %v23761_v4 = vld [vmem:[#allocation73_spill] sm:$0xff] }
 0x983   :  { %23760 = vst [vmem:[#allocation18_spill] sm:$0xff] %v22311_v16  ;;  %v9520_v18 = vadd.f32 %v9519_v11, %v21948_v51  ;;  %v9521_v46 = vpop.f32.mrb[121].mxu1  ;;  %v10754_v5 = vpop.f32.mrb[55].mxu0 }
 0x984   :  { %v9522_v43 = vpop.f32.mrb[122].mxu1  ;;  %11170 = vmatpush1.bf16.msra.mxu1 %v17622_v13 }
 0x985   :  { %v10157_v29 = vadd.f32 %v21990_v50, %v9520_v18  ;;  %v9523_v21 = vadd.f32 %v9522_v43, %v21954_v45  ;;  %v9524_v37 = vpop.f32.mrb[123].mxu1 }
 0x987   :  { %v10160_v47 = vadd.f32 %v21994_v28, %v9523_v21  ;;  %10629 = vmatmul.mubr.bf16.gmra.mrb[68].mxu1 %v21743_v8  ;;  %v10774_v57 = vadd.f32 %v22179_v6, %v10157_v29 }
 0x988   :  { %14964 = vmatprep.mubr.msk.bf16.mxu1 %vm1544_vm0, %v23761_v4  ;;  %v22321_v16 = vpop.f32.mrb[56].mxu0 }
 0x989   :  { %v10759_v51 = vpop.f32.mrb[57].mxu0  ;;  %v10777_v11 = vadd.f32 %v22181_v38, %v10160_v47 }
 0x98a   :  { %v9527_v5 = vpop.f32.mrb[124].mxu1  ;;  %v22324_v46 = vpop.f32.mrb[58].mxu0 }
 0x98b   :  { %v9528_v45 = vadd.f32 %v9527_v5, %v21962_v0  ;;  %v9529_v50 = vpop.f32.mrb[125].mxu1  ;;  %v10762_v18 = vpop.f32.mrb[59].mxu0  ;;  %v23762_v5 = vld [vmem:[#allocation2_spill] sm:$0xff] }
 0x98c   :  { %v9530_v28 = vpop.f32.mrb[126].mxu1 }
 0x98d   :  { %v10163_v8 = vadd.f32 %v22013_v58, %v9528_v45  ;;  %v9531_v6 = vadd.f32 %v9530_v28, %v21968_v23  ;;  %v9532_v21 = vpop.f32.mrb[127].mxu1  ;;  %v23763_v45 = vsub.s32 2, %v23762_v5 }
 0x98f   :  { %v10166_v13 = vadd.f32 %v22020_v27, %v9531_v6  ;;  %10639 = vmatmul.mubr.bf16.gmra.mrb[72].mxu1 %v21761_v25  ;;  %v10780_v43 = vadd.f32 %v22195_v36, %v10163_v8  ;;  %v22343_v25 = vld [vmem:[%s23290_s9] sm:$0x7] }
 0x990   :  { %v22332_v47 = vpop.f32.mrb[60].mxu0  ;;  %14965 = vmatprep.mubr.msk.bf16.mxu1 %vm1544_vm0, %v21782_v34 }
 0x991   :  { %v10767_v0 = vpop.f32.mrb[61].mxu0  ;;  %v10783_v38 = vadd.f32 %v22200_v59, %v10166_v13 }
 0x992   :  { %v9535_v29 = vpop.f32.mrb[128].mxu1  ;;  %v22337_v37 = vpop.f32.mrb[62].mxu0 }
 0x993   :  { %v9536_v23 = vadd.f32 %v9535_v29, %v21976_v63  ;;  %v9537_v58 = vpop.f32.mrb[129].mxu1  ;;  %v10770_v4 = vpop.f32.mrb[63].mxu0  ;;  %v22352_v63 = vrot.slane %v22343_v25, %v23763_v45 }
 0x994   :  { %v9538_v27 = vpop.f32.mrb[130].mxu1 }
 0x995   :  { %v10169_v36 = vadd.f32 %v22039_v3, %v9536_v23  ;;  %v9539_v34 = vadd.f32 %v9538_v27, %v21982_v1  ;;  %v9540_v51 = vpop.f32.mrb[131].mxu1 }
 0x997   :  { %v10172_v59 = vadd.f32 %v22046_v54, %v9539_v34  ;;  %10649 = vmatmul.mubr.bf16.gmra.mrb[76].mxu1 %v21779_v15  ;;  %v10786_v50 = vadd.f32 %v22214_v17, %v10169_v36 }
 0x998   :  { %v11310_v18 = vpop.f32.mrb[64].mxu0  ;;  %15074 = vmatprep.mubr.msk.bf16.mxu1 %vm1544_vm0, %v21796_v31 }
 0x999   :  { %v11391_v28 = vadd.f32 %v11310_v18, %v10774_v57  ;;  %v11312_v3 = vpop.f32.mrb[65].mxu0  ;;  %v10789_v1 = vadd.f32 %v22219_v52, %v10172_v59 }
 0x99a   :  { %v9543_v8 = vpop.f32.mrb[132].mxu1  ;;  %v11313_v6 = vpop.f32.mrb[66].mxu0 }
 0x99b   :  { %v11468_v54 = vadd.f32 %v22352_v63, %v11391_v28  ;;  %v9544_v15 = vadd.f32 %v9543_v8, %v21992_v24  ;;  %v11394_v21 = vadd.f32 %v11313_v6, %v10777_v11  ;;  %v9545_v13 = vpop.f32.mrb[133].mxu1  ;;  %v11315_v0 = vpop.f32.mrb[67].mxu0 }
 0x99c   :  { %v9546_v29 = vpop.f32.mrb[134].mxu1 }
 0x99d   :  { %v10175_v17 = vadd.f32 %v22063_v26, %v9544_v15  ;;  %v11471_v23 = vadd.f32 %v22352_v63, %v11394_v21  ;;  %v9547_v31 = vadd.f32 %v9546_v29, %v21996_v10  ;;  %v9548_v57 = vpop.f32.mrb[135].mxu1  ;;  %v11528_v58 = vmax.f32 %v11468_v54, 0.0 }
 0x99f   :  { %v11531_v4 = vmax.f32 %v11471_v23, 0.0  ;;  %v10178_v52 = vadd.f32 %v22070_v42, %v9547_v31  ;;  %11176 = vmatmul.mubr.bf16.vlgmr.msra.gmra.mrb[40].mxu1 %v21794_v41  ;;  %v10792_v27 = vadd.f32 %v22233_v19, %v10175_v17 }
 0x9a0   :  { %v11318_v24 = vpop.f32.mrb[68].mxu0  ;;  %15075 = vmatprep.mubr.msk.bf16.mxu1 %vm1544_vm0, %v21818_v12 }
 0x9a1   :  { %v22368_v11 = vpack.c.bf16 %v11531_v4, %v11528_v58  ;;  %v11397_v26 = vadd.f32 %v11318_v24, %v10780_v43  ;;  %v11320_v36 = vpop.f32.mrb[69].mxu0  ;;  %v10795_v34 = vadd.f32 %v22238_v33, %v10178_v52 }
 0x9a2   :  { %v9551_v10 = vpop.f32.mrb[136].mxu1  ;;  %v11321_v51 = vpop.f32.mrb[70].mxu0 }
 0x9a3   :  { %v11474_v59 = vadd.f32 %v22352_v63, %v11397_v26  ;;  %v9552_v42 = vadd.f32 %v9551_v10, %v22018_v35  ;;  %v11400_v45 = vadd.f32 %v11321_v51, %v10783_v38  ;;  %v9553_v41 = vpop.f32.mrb[137].mxu1  ;;  %v11323_v18 = vpop.f32.mrb[71].mxu0  ;;  %v23764_v10 = vld [vmem:[#allocation83_spill] sm:$0xff] }
 0x9a4   :  { %v9554_v19 = vpop.f32.mrb[138].mxu1 }
 0x9a5   :  { %v10181_v28 = vadd.f32 %v22086_v20, %v9552_v42  ;;  %v11477_v12 = vadd.f32 %v22352_v63, %v11400_v45  ;;  %v9555_v3 = vadd.f32 %v9554_v19, %v22022_v22  ;;  %v9556_v43 = vpop.f32.mrb[139].mxu1  ;;  %v11534_v8 = vmax.f32 %v11474_v59, 0.0  ;;  %v23765_v45 = vld [vmem:[#allocation86_spill] sm:$0xff] }
 0x9a7   :  { %v11537_v6 = vmax.f32 %v11477_v12, 0.0  ;;  %v10184_v33 = vadd.f32 %v22093_v14, %v9555_v3  ;;  %11186 = vmatmul.mubr.bf16.gmra.mrb[44].mxu1 %v21816_v32  ;;  %v10798_v54 = vadd.f32 %v22249_v60, %v10181_v28  ;;  %v23766_v28 = vld [vmem:[#allocation74_spill] sm:$0xff] }
 0x9a8   :  { %v11326_v35 = vpop.f32.mrb[72].mxu0  ;;  %15076 = vmatprep.mubr.msk.bf16.mxu1 %vm1544_vm0, %v21840_v39 }
 0x9a9   :  { %v22381_v38 = vpack.c.bf16 %v11537_v6, %v11534_v8  ;;  %v11403_v20 = vadd.f32 %v11326_v35, %v10786_v50  ;;  %v11328_v15 = vpop.f32.mrb[73].mxu0  ;;  %v10801_v21 = vadd.f32 %v22257_v49, %v10184_v33 }
 0x9aa   :  { %v9559_v22 = vpop.f32.mrb[140].mxu1  ;;  %v11329_v13 = vpop.f32.mrb[74].mxu0  ;;  %v23768_v15 = vld [vmem:[#allocation5_spill] sm:$0xff] }
 0x9ab   :  { %v11480_v0 = vadd.f32 %v22352_v63, %v11403_v20  ;;  %v9560_v14 = vadd.f32 %v9559_v22, %v22044_v7  ;;  %v11406_v29 = vadd.f32 %v11329_v13, %v10789_v1  ;;  %v9561_v32 = vpop.f32.mrb[141].mxu1  ;;  %v11331_v17 = vpop.f32.mrb[75].mxu0 }
 0x9ac   :  { %v9562_v60 = vpop.f32.mrb[142].mxu1  ;;  %v23770_v17 = vld [vmem:[#allocation6_spill] sm:$0xff] }
 0x9ad   :  { %v10187_v23 = vadd.f32 %v22109_v44, %v9560_v14  ;;  %v11483_v39 = vadd.f32 %v22352_v63, %v11406_v29  ;;  %v9563_v31 = vadd.f32 %v9562_v60, %v22048_v30  ;;  %v9564_v50 = vpop.f32.mrb[143].mxu1  ;;  %v11540_v57 = vmax.f32 %v11480_v0, 0.0  ;;  %v23769_v14 = vld [vmem:[#allocation7_spill] sm:$0xff] }
 0x9ae   :  { %v23772_v50 = vld [vmem:[#allocation71_spill] sm:$0xff] }
 0x9af   :  { %v11543_v58 = vmax.f32 %v11483_v39, 0.0  ;;  %v10190_v49 = vadd.f32 %v22116_v53, %v9563_v31  ;;  %11196 = vmatmul.mubr.bf16.gmra.mrb[48].mxu1 %v21838_v55  ;;  %v10804_v4 = vadd.f32 %v22268_v2, %v10187_v23 }
 0x9b0   :  { %v11334_v7 = vpop.f32.mrb[76].mxu0  ;;  %15077 = vmatprep.mubr.msk.bf16.mxu1 %vm1544_vm0, %v21862_v56 }
 0x9b1   :  { %v22394_v1 = vpack.c.bf16 %v11543_v58, %v11540_v57  ;;  %v11409_v44 = vadd.f32 %v11334_v7, %v10792_v27  ;;  %v11336_v52 = vpop.f32.mrb[77].mxu0  ;;  %v10807_v24 = vadd.f32 %v22276_v48, %v10190_v49  ;;  %v23773_v57 = vld [vmem:[#allocation17_spill] sm:$0xff] }
 0x9b2   :  { %v9567_v30 = vpop.f32.mrb[144].mxu1  ;;  %v11337_v26 = vpop.f32.mrb[78].mxu0 }
 0x9b3   :  { %v11486_v36 = vadd.f32 %v22352_v63, %v11409_v44  ;;  %v9568_v53 = vadd.f32 %v9567_v30, %v23764_v10  ;;  %v11412_v51 = vadd.f32 %v11337_v26, %v10795_v34  ;;  %v9569_v55 = vpop.f32.mrb[145].mxu1  ;;  %v11339_v59 = vpop.f32.mrb[79].mxu0  ;;  %v23767_v34 = vld [vmem:[#allocation72_spill] sm:$0xff]  ;;  %v23775_v30 = vld [vmem:[#allocation18_spill] sm:$0xff] }
 0x9b4   :  { %v9570_v2 = vpop.f32.mrb[146].mxu1 }
 0x9b5   :  { %v10193_v42 = vadd.f32 %v22132_v40, %v9568_v53  ;;  %v11489_v56 = vadd.f32 %v22352_v63, %v11412_v51  ;;  %v9571_v41 = vadd.f32 %v9570_v2, %v23765_v45  ;;  %v9572_v27 = vpop.f32.mrb[147].mxu1  ;;  %v11546_v18 = vmax.f32 %v11486_v36, 0.0  ;;  %v23776_v51 = vld [vmem:[#allocation3_spill] sm:$0xff]  ;;  %v23777_v45 = vld [vmem:[#allocation13_spill] sm:$0xff] }
 0x9b7   :  { %v11549_v19 = vmax.f32 %v11489_v56, 0.0  ;;  %v10196_v48 = vadd.f32 %v22139_v61, %v9571_v41  ;;  %11206 = vmatmul.mubr.bf16.gmra.mrb[52].mxu1 %v23766_v28  ;;  %v10810_v12 = vadd.f32 %v22287_v9, %v10193_v42 }
 0x9b8   :  { %v11342_v3 = vpop.f32.mrb[80].mxu0  ;;  %15078 = vmatprep.mubr.msk.bf16.mxu1 %vm1544_vm0, %v23767_v34 }
 0x9b9   :  { %v22407_v43 = vpack.c.bf16 %v11549_v19, %v11546_v18  ;;  %v11415_v40 = vadd.f32 %v11342_v3, %v10798_v54  ;;  %v11344_v8 = vpop.f32.mrb[81].mxu0  ;;  %v10813_v6 = vadd.f32 %v22295_v62, %v10196_v48  ;;  %v23771_v62 = vld [vmem:[#allocation8_spill] sm:$0xff]  ;;  %v23779_v3 = vld [vmem:[#allocation14_spill] sm:$0xff] }
 0x9ba   :  { %v9575_v33 = vpop.f32.mrb[148].mxu1  ;;  %v11345_v35 = vpop.f32.mrb[82].mxu0  ;;  %v23778_v18 = vld [vmem:[#allocation4_spill] sm:$0xff] }
 0x9bb   :  { %v11492_v20 = vadd.f32 %v22352_v63, %v11415_v40  ;;  %v9576_v61 = vadd.f32 %v9575_v33, %v23768_v15  ;;  %v11418_v22 = vadd.f32 %v11345_v35, %v10801_v21  ;;  %v9577_v13 = vpop.f32.mrb[149].mxu1  ;;  %v11347_v0 = vpop.f32.mrb[83].mxu0  ;;  %v23774_v21 = vld [vmem:[#allocation78_spill] sm:$0xff]  ;;  %v23780_v40 = vld [vmem:[#allocation77_spill] sm:$0xff] }
 0x9bc   :  { %v9578_v9 = vpop.f32.mrb[150].mxu1 }
 0x9bd   :  { %v10199_v29 = vadd.f32 %v23769_v14, %v9576_v61  ;;  %v11495_v32 = vadd.f32 %v22352_v63, %v11418_v22  ;;  %v9579_v60 = vadd.f32 %v9578_v9, %v23770_v17  ;;  %v9580_v54 = vpop.f32.mrb[151].mxu1  ;;  %v11552_v23 = vmax.f32 %v11492_v20, 0.0  ;;  %v23782_v9 = vld [vmem:[#allocation9_spill] sm:$0xff] }
 0x9bf   :  { %v11555_v39 = vmax.f32 %v11495_v32, 0.0  ;;  %v10202_v31 = vadd.f32 %v23771_v62, %v9579_v60  ;;  %11216 = vmatmul.mubr.bf16.gmra.mrb[56].mxu1 %v23772_v50  ;;  %v10816_v58 = vadd.f32 %v23773_v57, %v10199_v29  ;;  %v23783_v60 = vld [vmem:[#allocation11_spill] sm:$0xff] }
 0x9c0   :  { %v11350_v49 = vpop.f32.mrb[84].mxu0  ;;  %15079 = vmatprep.mubr.msk.bf16.mxu1 %vm1544_vm0, %v23774_v21 }
 0x9c1   :  { %v22420_v7 = vpack.c.bf16 %v11555_v39, %v11552_v23  ;;  %v11421_v44 = vadd.f32 %v11350_v49, %v10804_v4  ;;  %v11352_v52 = vpop.f32.mrb[85].mxu0  ;;  %v10819_v26 = vadd.f32 %v23775_v30, %v10202_v31  ;;  %v23784_v39 = vld [vmem:[#allocation10_spill] sm:$0xff]  ;;  %v23786_v49 = vld [vmem:[#allocation75_spill] sm:$0xff] }
 0x9c2   :  { %v9583_v36 = vpop.f32.mrb[152].mxu1  ;;  %v11353_v10 = vpop.f32.mrb[86].mxu0 }
 0x9c3   :  { %v11498_v53 = vadd.f32 %v22352_v63, %v11421_v44  ;;  %v9584_v55 = vadd.f32 %v9583_v36, %v23776_v51  ;;  %v11424_v59 = vadd.f32 %v11353_v10, %v10807_v24  ;;  %v9585_v2 = vpop.f32.mrb[153].mxu1  ;;  %v11355_v42 = vpop.f32.mrb[87].mxu0  ;;  %v23781_v24 = vld [vmem:[#allocation76_spill] sm:$0xff] }
 0x9c4   :  { %v9586_v56 = vpop.f32.mrb[154].mxu1 }
 0x9c5   :  { %v10205_v41 = vadd.f32 %v23777_v45, %v9584_v55  ;;  %v11501_v27 = vadd.f32 %v22352_v63, %v11424_v59  ;;  %v9587_v19 = vadd.f32 %v9586_v56, %v23778_v18  ;;  %v9588_v4 = vpop.f32.mrb[155].mxu1  ;;  %v11558_v48 = vmax.f32 %v11498_v53, 0.0 }
 0x9c7   :  { %v11561_v28 = vmax.f32 %v11501_v27, 0.0  ;;  %v10208_v34 = vadd.f32 %v23779_v3, %v9587_v19  ;;  %11226 = vmatmul.mubr.bf16.gmra.mrb[60].mxu1 %v23780_v40  ;;  %v10822_v8 = vadd.f32 %v22321_v16, %v10205_v41  ;;  %v23789_v41 = vld [vmem:[#allocation80_spill] sm:$0xff] }
 0x9c8   :  { %v11358_v33 = vpop.f32.mrb[88].mxu0  ;;  %15080 = vmatprep.mubr.msk.bf16.mxu1 %vm1544_vm0, %v23781_v24 }
 0x9c9   :  { %v22433_v35 = vpack.c.bf16 %v11561_v28, %v11558_v48  ;;  %v11427_v20 = vadd.f32 %v11358_v33, %v10810_v12  ;;  %v11360_v15 = vpop.f32.mrb[89].mxu0  ;;  %v10825_v61 = vadd.f32 %v22324_v46, %v10208_v34  ;;  %v23785_v46 = vld [vmem:[#allocation12_spill] sm:$0xff]  ;;  %v23790_v34 = vld [vmem:[#allocation79_spill] sm:$0xff]  ;;  %v23791_v33 = vld [vmem:[#allocation85_spill] sm:$0xff] }
 0x9ca   :  { %v9591_v22 = vpop.f32.mrb[156].mxu1  ;;  %v11361_v13 = vpop.f32.mrb[90].mxu0 }
 0x9cb   :  { %v11504_v0 = vadd.f32 %v22352_v63, %v11427_v20  ;;  %v9592_v14 = vadd.f32 %v9591_v22, %v23782_v9  ;;  %v11430_v29 = vadd.f32 %v11361_v13, %v10813_v6  ;;  %v9593_v32 = vpop.f32.mrb[157].mxu1  ;;  %v11363_v17 = vpop.f32.mrb[91].mxu0  ;;  %v23787_v6 = vld [vmem:[#allocation82_spill] sm:$0xff] }
 0x9cc   :  { %v9594_v16 = vpop.f32.mrb[158].mxu1  ;;  %v22471_v17 = vld [vmem:[%s23291_s10 + $0x4] ss:$8 sps:$4 sm:$0xff]  }
 0x9cd   :  { %v10211_v54 = vadd.f32 %v23783_v60, %v9592_v14  ;;  %v11507_v23 = vadd.f32 %v22352_v63, %v11430_v29  ;;  %v9595_v62 = vadd.f32 %v9594_v16, %v23784_v39  ;;  %v9596_v12 = vpop.f32.mrb[159].mxu1  ;;  %v11564_v31 = vmax.f32 %v11504_v0, 0.0  ;;  %v23792_v29 = vld [vmem:[#allocation84_spill] sm:$0xff]  ;;  %v22478_v16 = vld [vmem:[%s23292_s11 + $0x4] ss:$8 sps:$4 sm:$0xff]  }
 0x9ce   :  { %15124 = vmatprep.mubr.msk.bf16.mxu0 %vm11671_vm2, %v22478_v16 }
 0x9cf   :  { %v11567_v50 = vmax.f32 %v11507_v23, 0.0  ;;  %v10214_v57 = vadd.f32 %v23785_v46, %v9595_v62  ;;  %11236 = vmatmul.mubr.bf16.gmra.mrb[64].mxu1 %v23786_v49  ;;  %v10828_v21 = vadd.f32 %v22332_v47, %v10211_v54  ;;  %v23788_v47 = vld [vmem:[#allocation81_spill] sm:$0xff]  ;;  %v23794_v54 = vsub.s32 1, %v23762_v5 }
 0x9d0   :  { %v11366_v44 = vpop.f32.mrb[92].mxu0  ;;  %15081 = vmatprep.mubr.msk.bf16.mxu1 %vm1544_vm0, %v23787_v6 }
 0x9d1   :  { %v22446_v52 = vpack.c.bf16 %v11567_v50, %v11564_v31  ;;  %v11433_v30 = vadd.f32 %v11366_v44, %v10816_v58  ;;  %v11368_v36 = vpop.f32.mrb[93].mxu0  ;;  %v10831_v10 = vadd.f32 %v22337_v37, %v10214_v57  ;;  %v22490_v23 = vrot.slane %v22343_v25, %v23794_v54 }
 0x9d2   :  { %v11369_v53 = vpop.f32.mrb[94].mxu0 }
 0x9d3   :  { %v11510_v51 = vadd.f32 %v22352_v63, %v11433_v30  ;;  %v11436_v55 = vadd.f32 %v11369_v53, %v10819_v26  ;;  %v11371_v59 = vpop.f32.mrb[95].mxu0 }
 0x9d5   :  { %v11513_v2 = vadd.f32 %v22352_v63, %v11436_v55  ;;  %v11570_v42 = vmax.f32 %v11510_v51, 0.0 }
 0x9d7   :  { %v11573_v56 = vmax.f32 %v11513_v2, 0.0  ;;  %11246 = vmatmul.mubr.bf16.gmra.mrb[68].mxu1 %v23788_v47 }
 0x9d8   :  { %v11374_v45 = vpop.f32.mrb[96].mxu0  ;;  %15082 = vmatprep.mubr.msk.bf16.mxu1 %vm1544_vm0, %v23789_v41 }
 0x9d9   :  { %v22454_v27 = vpack.c.bf16 %v11573_v56, %v11570_v42  ;;  %v11439_v58 = vadd.f32 %v11374_v45, %v10822_v8  ;;  %v11376_v18 = vpop.f32.mrb[97].mxu0 }
 0x9da   :  { %v11377_v37 = vpop.f32.mrb[98].mxu0 }
 0x9db   :  { %v11516_v19 = vadd.f32 %v22352_v63, %v11439_v58  ;;  %v11442_v4 = vadd.f32 %v11377_v37, %v10825_v61  ;;  %v11379_v26 = vpop.f32.mrb[99].mxu0 }
 0x9dd   :  { %v11519_v48 = vadd.f32 %v22352_v63, %v11442_v4  ;;  %v11576_v28 = vmax.f32 %v11516_v19, 0.0 }
 0x9df   :  { %v11579_v3 = vmax.f32 %v11519_v48, 0.0  ;;  %11256 = vmatmul.mubr.bf16.gmra.mrb[72].mxu1 %v23790_v34 }
 0x9e0   :  { %v11382_v40 = vpop.f32.mrb[100].mxu0  ;;  %15083 = vmatprep.mubr.msk.bf16.mxu1 %vm1544_vm0, %v23791_v33 }
 0x9e1   :  { %v22461_v24 = vpack.c.bf16 %v11579_v3, %v11576_v28  ;;  %v11445_v20 = vadd.f32 %v11382_v40, %v10828_v21  ;;  %v11384_v8 = vpop.f32.mrb[101].mxu0 }
 0x9e2   :  { %v11385_v15 = vpop.f32.mrb[102].mxu0 }
 0x9e3   :  { %v11522_v22 = vadd.f32 %v22352_v63, %v11445_v20  ;;  %v11448_v13 = vadd.f32 %v11385_v15, %v10831_v10  ;;  %v11387_v61 = vpop.f32.mrb[103].mxu0 }
 0x9e5   :  { %v11525_v0 = vadd.f32 %v22352_v63, %v11448_v13  ;;  %v11582_v9 = vmax.f32 %v11522_v22, 0.0  ;;  %v23793_v63 = vsub.s32 0, %v23762_v5 }
 0x9e7   :  { %v11585_v14 = vmax.f32 %v11525_v0, 0.0  ;;  %11266 = vmatmul.mubr.bf16.gmra.mrb[76].mxu1 %v23792_v29  ;;  %v22485_v60 = vrot.slane %v22343_v25, %v23793_v63 }
 0x9e8   :  { %15104 = vmatprep.mubr.msk.bf16.mxu1 %vm11671_vm2, %v22471_v17 }
 0x9e9   :  { %v22466_v32 = vpack.c.bf16 %v11585_v14, %v11582_v9 }
 0xa72   :  { %v11177_v39 = vpop.f32.mrb[40].mxu1 }
 0xa73   :  { %v11466_v62 = vadd.f32 %v22485_v60, %v11177_v39  ;;  %v11179_v12 = vpop.f32.mrb[41].mxu1 }
 0xa74   :  { %v11467_v31 = vadd.f32 %v22490_v23, %v11179_v12  ;;  %v11181_v50 = vpop.f32.mrb[42].mxu1 }
 0xa75   :  { %v11469_v46 = vadd.f32 %v22485_v60, %v11181_v50  ;;  %v11183_v57 = vpop.f32.mrb[43].mxu1  ;;  %v11526_v21 = vmax.f32 %v11466_v62, 0.0 }
 0xa76   :  { %v11470_v49 = vadd.f32 %v22490_v23, %v11183_v57  ;;  %v11527_v6 = vmax.f32 %v11467_v31, 0.0 }
 0xa77   :  { %v11529_v44 = vmax.f32 %v11469_v46, 0.0 }
 0xa78   :  { %v11530_v30 = vmax.f32 %v11470_v49, 0.0 }
 0xa79   :  { %v11586_v5 = vpack.c.bf16 %v11529_v44, %v11526_v21 }
 0xa7a   :  { %v11587_v36 = vpack.c.bf16 %v11530_v30, %v11527_v6  ;;  %v11187_v25 = vpop.f32.mrb[44].mxu1 }
 0xa7b   :  { %v11472_v10 = vadd.f32 %v22485_v60, %v11187_v25  ;;  %v11189_v53 = vpop.f32.mrb[45].mxu1 }
 0xa7c   :  { %v11473_v51 = vadd.f32 %v22490_v23, %v11189_v53  ;;  %v11191_v55 = vpop.f32.mrb[46].mxu1  ;;  %11687 = vmatprep.subr.bf16.mxu1 %v11587_v36  ;;  %11913 = vmatprep.subr.bf16.mxu0 %v11587_v36 }
 0xa7d   :  { %v11475_v59 = vadd.f32 %v22485_v60, %v11191_v55  ;;  %v11193_v2 = vpop.f32.mrb[47].mxu1  ;;  %11688 = vmatpush1.bf16.msra.mxu1 %v11586_v5  ;;  %11914 = vmatpush1.bf16.msra.mxu0 %v11586_v5  ;;  %v11532_v56 = vmax.f32 %v11472_v10, 0.0 }
 0xa7e   :  { %v11476_v42 = vadd.f32 %v22490_v23, %v11193_v2  ;;  %v11533_v45 = vmax.f32 %v11473_v51, 0.0 }
 0xa7f   :  { %v11535_v47 = vmax.f32 %v11475_v59, 0.0 }
 0xa80   :  { %v11536_v41 = vmax.f32 %v11476_v42, 0.0 }
 0xa81   :  { %v11589_v58 = vpack.c.bf16 %v11535_v47, %v11532_v56 }
 0xa82   :  { %v11590_v18 = vpack.c.bf16 %v11536_v41, %v11533_v45  ;;  %v11197_v37 = vpop.f32.mrb[48].mxu1 }
 0xa83   :  { %v11478_v19 = vadd.f32 %v22485_v60, %v11197_v37  ;;  %v11199_v4 = vpop.f32.mrb[49].mxu1 }
 0xa84   :  { %v11479_v26 = vadd.f32 %v22490_v23, %v11199_v4  ;;  %v11201_v48 = vpop.f32.mrb[50].mxu1  ;;  %11689 = vmatprep.subr.bf16.mxu1 %v11590_v18  ;;  %11915 = vmatprep.subr.bf16.mxu0 %v11590_v18 }
 0xa85   :  { %v11481_v28 = vadd.f32 %v22485_v60, %v11201_v48  ;;  %v11203_v3 = vpop.f32.mrb[51].mxu1  ;;  %11690 = vmatpush1.bf16.msra.mxu1 %v11589_v58  ;;  %11916 = vmatpush1.bf16.msra.mxu0 %v11589_v58  ;;  %v11538_v40 = vmax.f32 %v11478_v19, 0.0 }
 0xa86   :  { %v11482_v34 = vadd.f32 %v22490_v23, %v11203_v3  ;;  %v11539_v20 = vmax.f32 %v11479_v26, 0.0 }
 0xa87   :  { %v11541_v33 = vmax.f32 %v11481_v28, 0.0 }
 0xa88   :  { %v11542_v8 = vmax.f32 %v11482_v34, 0.0 }
 0xa89   :  { %v11592_v15 = vpack.c.bf16 %v11541_v33, %v11538_v40 }
 0xa8a   :  { %v11593_v22 = vpack.c.bf16 %v11542_v8, %v11539_v20  ;;  %v11207_v13 = vpop.f32.mrb[52].mxu1 }
 0xa8b   :  { %v11484_v61 = vadd.f32 %v22485_v60, %v11207_v13  ;;  %v11209_v0 = vpop.f32.mrb[53].mxu1 }
 0xa8c   :  { %v11485_v9 = vadd.f32 %v22490_v23, %v11209_v0  ;;  %v11211_v14 = vpop.f32.mrb[54].mxu1  ;;  %11691 = vmatprep.subr.bf16.mxu1 %v11593_v22  ;;  %11917 = vmatprep.subr.bf16.mxu0 %v11593_v22 }
 0xa8d   :  { %v11487_v29 = vadd.f32 %v22485_v60, %v11211_v14  ;;  %v11213_v63 = vpop.f32.mrb[55].mxu1  ;;  %11692 = vmatpush1.bf16.msra.mxu1 %v11592_v15  ;;  %11918 = vmatpush1.bf16.msra.mxu0 %v11592_v15  ;;  %v11544_v39 = vmax.f32 %v11484_v61, 0.0 }
 0xa8e   :  { %v11488_v54 = vadd.f32 %v22490_v23, %v11213_v63  ;;  %v11545_v12 = vmax.f32 %v11485_v9, 0.0 }
 0xa8f   :  { %v11547_v62 = vmax.f32 %v11487_v29, 0.0 }
 0xa90   :  { %v11548_v31 = vmax.f32 %v11488_v54, 0.0 }
 0xa91   :  { %v11595_v50 = vpack.c.bf16 %v11547_v62, %v11544_v39 }
 0xa92   :  { %v11596_v46 = vpack.c.bf16 %v11548_v31, %v11545_v12  ;;  %v11217_v57 = vpop.f32.mrb[56].mxu1 }
 0xa93   :  { %v11490_v49 = vadd.f32 %v22485_v60, %v11217_v57  ;;  %v11219_v21 = vpop.f32.mrb[57].mxu1 }
 0xa94   :  { %v11491_v44 = vadd.f32 %v22490_v23, %v11219_v21  ;;  %v11221_v6 = vpop.f32.mrb[58].mxu1  ;;  %11693 = vmatprep.subr.bf16.mxu1 %v11596_v46  ;;  %11919 = vmatprep.subr.bf16.mxu0 %v11596_v46 }
 0xa95   :  { %v11493_v30 = vadd.f32 %v22485_v60, %v11221_v6  ;;  %v11223_v5 = vpop.f32.mrb[59].mxu1  ;;  %11694 = vmatpush1.bf16.msra.mxu1 %v11595_v50  ;;  %11920 = vmatpush1.bf16.msra.mxu0 %v11595_v50  ;;  %v11550_v25 = vmax.f32 %v11490_v49, 0.0 }
 0xa96   :  { %v11494_v36 = vadd.f32 %v22490_v23, %v11223_v5  ;;  %v11551_v53 = vmax.f32 %v11491_v44, 0.0 }
 0xa97   :  { %v11553_v10 = vmax.f32 %v11493_v30, 0.0 }
 0xa98   :  { %v11554_v51 = vmax.f32 %v11494_v36, 0.0 }
 0xa99   :  { %v11598_v55 = vpack.c.bf16 %v11553_v10, %v11550_v25 }
 0xa9a   :  { %v11599_v59 = vpack.c.bf16 %v11554_v51, %v11551_v53  ;;  %v11227_v2 = vpop.f32.mrb[60].mxu1 }
 0xa9b   :  { %v11496_v42 = vadd.f32 %v22485_v60, %v11227_v2  ;;  %v11229_v56 = vpop.f32.mrb[61].mxu1 }
 0xa9c   :  { %v11497_v47 = vadd.f32 %v22490_v23, %v11229_v56  ;;  %v11231_v45 = vpop.f32.mrb[62].mxu1  ;;  %11695 = vmatprep.subr.bf16.mxu1 %v11599_v59  ;;  %11921 = vmatprep.subr.bf16.mxu0 %v11599_v59 }
 0xa9d   :  { %v11499_v41 = vadd.f32 %v22485_v60, %v11231_v45  ;;  %v11233_v58 = vpop.f32.mrb[63].mxu1  ;;  %11696 = vmatpush1.bf16.msra.mxu1 %v11598_v55  ;;  %11922 = vmatpush1.bf16.msra.mxu0 %v11598_v55  ;;  %v11556_v37 = vmax.f32 %v11496_v42, 0.0 }
 0xa9e   :  { %v11500_v18 = vadd.f32 %v22490_v23, %v11233_v58  ;;  %v11557_v4 = vmax.f32 %v11497_v47, 0.0 }
 0xa9f   :  { %v11559_v19 = vmax.f32 %v11499_v41, 0.0 }
 0xaa0   :  { %v11560_v26 = vmax.f32 %v11500_v18, 0.0 }
 0xaa1   :  { %v11601_v48 = vpack.c.bf16 %v11559_v19, %v11556_v37 }
 0xaa2   :  { %v11602_v28 = vpack.c.bf16 %v11560_v26, %v11557_v4  ;;  %v11237_v3 = vpop.f32.mrb[64].mxu1 }
 0xaa3   :  { %v11502_v34 = vadd.f32 %v22485_v60, %v11237_v3  ;;  %v11239_v40 = vpop.f32.mrb[65].mxu1 }
 0xaa4   :  { %v11503_v33 = vadd.f32 %v22490_v23, %v11239_v40  ;;  %v11241_v20 = vpop.f32.mrb[66].mxu1  ;;  %11697 = vmatprep.subr.bf16.mxu1 %v11602_v28  ;;  %11923 = vmatprep.subr.bf16.mxu0 %v11602_v28 }
 0xaa5   :  { %v11505_v8 = vadd.f32 %v22485_v60, %v11241_v20  ;;  %v11243_v15 = vpop.f32.mrb[67].mxu1  ;;  %11698 = vmatpush1.bf16.msra.mxu1 %v11601_v48  ;;  %11924 = vmatpush1.bf16.msra.mxu0 %v11601_v48  ;;  %v11562_v13 = vmax.f32 %v11502_v34, 0.0 }
 0xaa6   :  { %v11506_v22 = vadd.f32 %v22490_v23, %v11243_v15  ;;  %v11563_v0 = vmax.f32 %v11503_v33, 0.0  ;;  %v17657_v15 = vld [vmem:[%s23293_s12 + $0x4] ss:$8 sps:$4 sm:$0xff]  }
 0xaa7   :  { %v11565_v61 = vmax.f32 %v11505_v8, 0.0 }
 0xaa8   :  { %v11566_v9 = vmax.f32 %v11506_v22, 0.0  ;;  %v22548_v22 = vld [vmem:[%s23291_s10 + $0x14] ss:$8 sps:$4 sm:$0xff]  }
 0xaa9   :  { %v11604_v14 = vpack.c.bf16 %v11565_v61, %v11562_v13  ;;  %v23795_v13 = vmov 0   ;;  %v22554_v61 = vld [vmem:[%s23292_s11 + $0x14] ss:$8 sps:$4 sm:$0xff]  }
 0xaaa   :  { %v11605_v29 = vpack.c.bf16 %v11566_v9, %v11563_v0  ;;  %v11247_v63 = vpop.f32.mrb[68].mxu1  ;;  %v17655_v0 = vld [vmem:[%s23293_s12] ss:$8 sps:$4 sm:$0xff]   ;;  %v17663_v9 = vld [vmem:[%s23293_s12 + $0x14] ss:$8 sps:$4 sm:$0xff]  }
 0xaab   :  { %v11508_v54 = vadd.f32 %v22485_v60, %v11247_v63  ;;  %v11249_v39 = vpop.f32.mrb[69].mxu1  ;;  %v22581_v63 = vld [vmem:[%s23292_s11 + $0x10] ss:$8 sps:$4 sm:$0xff]  }
 0xaac   :  { %v11509_v62 = vadd.f32 %v22490_v23, %v11249_v39  ;;  %v11251_v12 = vpop.f32.mrb[70].mxu1  ;;  %11699 = vmatprep.subr.bf16.mxu1 %v11605_v29  ;;  %11925 = vmatprep.subr.bf16.mxu0 %v11605_v29  ;;  %v22576_v29 = vld [vmem:[%s23291_s10 + $0x10] ss:$8 sps:$4 sm:$0xff]   ;;  %v22593_v39 = vld [vmem:[%s23292_s11 + $0x24] ss:$8 sps:$4 sm:$0xff]  }
 0xaad   :  { %v11511_v31 = vadd.f32 %v22485_v60, %v11251_v12  ;;  %v11253_v50 = vpop.f32.mrb[71].mxu1  ;;  %11700 = vmatpush1.bf16.msra.mxu1 %v11604_v14  ;;  %11926 = vmatpush1.bf16.msra.mxu0 %v11604_v14  ;;  %v11568_v57 = vmax.f32 %v11508_v54, 0.0  ;;  %v17661_v14 = vld [vmem:[%s23293_s12 + $0x10] ss:$8 sps:$4 sm:$0xff]   ;;  %v22587_v54 = vld [vmem:[%s23291_s10 + $0x24] ss:$8 sps:$4 sm:$0xff]  }
 0xaae   :  { %v11512_v46 = vadd.f32 %v22490_v23, %v11253_v50  ;;  %v11569_v21 = vmax.f32 %v11509_v62, 0.0  ;;  %v17669_v62 = vld [vmem:[%s23293_s12 + $0x24] ss:$8 sps:$4 sm:$0xff]   ;;  %v17667_v12 = vld [vmem:[%s23293_s12 + $0x20] ss:$8 sps:$4 sm:$0xff]  }
 0xaaf   :  { %v11571_v49 = vmax.f32 %v11511_v31, 0.0  ;;  %v17675_v31 = vld [vmem:[%s23293_s12 + $0x34] ss:$8 sps:$4 sm:$0xff]   ;;  %v22615_v50 = vld [vmem:[%s23291_s10 + $0x20] ss:$8 sps:$4 sm:$0xff]  }
 0xab0   :  { %v11572_v44 = vmax.f32 %v11512_v46, 0.0  ;;  %v22620_v46 = vld [vmem:[%s23292_s11 + $0x20] ss:$8 sps:$4 sm:$0xff]  }
 0xab1   :  { %v11607_v6 = vpack.c.bf16 %v11571_v49, %v11568_v57  ;;  %v22626_v57 = vld [vmem:[%s23291_s10 + $0x34] ss:$8 sps:$4 sm:$0xff]  }
 0xab2   :  { %v11608_v30 = vpack.c.bf16 %v11572_v44, %v11569_v21  ;;  %v11257_v5 = vpop.f32.mrb[72].mxu1  ;;  %v22632_v49 = vld [vmem:[%s23292_s11 + $0x34] ss:$8 sps:$4 sm:$0xff]   ;;  %v17673_v21 = vld [vmem:[%s23293_s12 + $0x30] ss:$8 sps:$4 sm:$0xff]  }
 0xab3   :  { %v11514_v36 = vadd.f32 %v22485_v60, %v11257_v5  ;;  %v11259_v25 = vpop.f32.mrb[73].mxu1  ;;  %v17681_v44 = vld [vmem:[%s23293_s12 + $0x44] ss:$8 sps:$4 sm:$0xff]  }
 0xab4   :  { %v11515_v10 = vadd.f32 %v22490_v23, %v11259_v25  ;;  %v11261_v53 = vpop.f32.mrb[74].mxu1  ;;  %11701 = vmatprep.subr.bf16.mxu1 %v11608_v30  ;;  %11927 = vmatprep.subr.bf16.mxu0 %v11608_v30  ;;  %v17679_v30 = vld [vmem:[%s23293_s12 + $0x40] ss:$8 sps:$4 sm:$0xff]   ;;  %v22659_v5 = vld [vmem:[%s23291_s10 + $0x44] ss:$8 sps:$4 sm:$0xff]  }
 0xab5   :  { %v11517_v51 = vadd.f32 %v22485_v60, %v11261_v53  ;;  %v11263_v55 = vpop.f32.mrb[75].mxu1  ;;  %11702 = vmatpush1.bf16.msra.mxu1 %v11607_v6  ;;  %11928 = vmatpush1.bf16.msra.mxu0 %v11607_v6  ;;  %v11574_v2 = vmax.f32 %v11514_v36, 0.0  ;;  %v22651_v6 = vld [vmem:[%s23291_s10 + $0x30] ss:$8 sps:$4 sm:$0xff]   ;;  %v22670_v25 = vld [vmem:[%s23292_s11 + $0x44] ss:$8 sps:$4 sm:$0xff]  }
 0xab6   :  { %v11518_v59 = vadd.f32 %v22490_v23, %v11263_v55  ;;  %v11575_v56 = vmax.f32 %v11515_v10, 0.0  ;;  %v22664_v36 = vld [vmem:[%s23292_s11 + $0x30] ss:$8 sps:$4 sm:$0xff]   ;;  %v17687_v53 = vld [vmem:[%s23293_s12 + $0x54] ss:$8 sps:$4 sm:$0xff]  }
 0xab7   :  { %v11577_v42 = vmax.f32 %v11517_v51, 0.0  ;;  %v17685_v10 = vld [vmem:[%s23293_s12 + $0x50] ss:$8 sps:$4 sm:$0xff]   ;;  %v17693_v51 = vld [vmem:[%s23293_s12 + $0x64] ss:$8 sps:$4 sm:$0xff]  }
 0xab8   :  { %v11578_v47 = vmax.f32 %v11518_v59, 0.0  ;;  %v22691_v55 = vld [vmem:[%s23291_s10 + $0x40] ss:$8 sps:$4 sm:$0xff]  }
 0xab9   :  { %v11610_v45 = vpack.c.bf16 %v11577_v42, %v11574_v2  ;;  %v22696_v59 = vld [vmem:[%s23292_s11 + $0x40] ss:$8 sps:$4 sm:$0xff]   ;;  %v17699_v42 = vld [vmem:[%s23293_s12 + $0x74] ss:$8 sps:$4 sm:$0xff]  }
 0xaba   :  { %v11611_v41 = vpack.c.bf16 %v11578_v47, %v11575_v56  ;;  %v11267_v58 = vpop.f32.mrb[76].mxu1  ;;  %v17691_v2 = vld [vmem:[%s23293_s12 + $0x60] ss:$8 sps:$4 sm:$0xff]   ;;  %v17697_v56 = vld [vmem:[%s23293_s12 + $0x70] ss:$8 sps:$4 sm:$0xff]  }
 0xabb   :  { %v11520_v18 = vadd.f32 %v22485_v60, %v11267_v58  ;;  %v11269_v37 = vpop.f32.mrb[77].mxu1  ;;  %v17705_v47 = vld [vmem:[%s23293_s12 + $0x84] ss:$8 sps:$4 sm:$0xff]  }
 0xabc   :  { %v11521_v19 = vadd.f32 %v22490_v23, %v11269_v37  ;;  %v11271_v4 = vpop.f32.mrb[78].mxu1  ;;  %11703 = vmatprep.subr.bf16.mxu1 %v11611_v41  ;;  %11929 = vmatprep.subr.bf16.mxu0 %v11611_v41  ;;  %v17709_v41 = vld [vmem:[%s23293_s12 + $0x90] ss:$8 sps:$4 sm:$0xff]   ;;  %v17717_v58 = vld [vmem:[%s23293_s12 + $0xa4] ss:$8 sps:$4 sm:$0xff]  }
 0xabd   :  { %v11523_v26 = vadd.f32 %v22485_v60, %v11271_v4  ;;  %v11273_v48 = vpop.f32.mrb[79].mxu1  ;;  %11704 = vmatpush1.bf16.msra.mxu1 %v11610_v45  ;;  %11930 = vmatpush1.bf16.msra.mxu0 %v11610_v45  ;;  %v11580_v3 = vmax.f32 %v11520_v18, 0.0  ;;  %v22538_v60 = vld [vmem:[%s23291_s10] ss:$8 sps:$4 sm:$0xff]   ;;  %v17711_v45 = vld [vmem:[%s23293_s12 + $0x94] ss:$8 sps:$4 sm:$0xff]  }
 0xabe   :  { %v11524_v28 = vadd.f32 %v22490_v23, %v11273_v48  ;;  %v11581_v40 = vmax.f32 %v11521_v19, 0.0  ;;  %v22543_v23 = vld [vmem:[%s23292_s11] ss:$8 sps:$4 sm:$0xff]   ;;  %v17723_v18 = vld [vmem:[%s23293_s12 + $0xb4] ss:$8 sps:$4 sm:$0xff]  }
 0xabf   :  { %v11583_v34 = vmax.f32 %v11523_v26, 0.0  ;;  %v17729_v37 = vld [vmem:[%s23293_s12 + $0xc4] ss:$8 sps:$4 sm:$0xff]   ;;  %v17735_v19 = vld [vmem:[%s23293_s12 + $0xd4] ss:$8 sps:$4 sm:$0xff]  }
 0xac0   :  { %v11584_v33 = vmax.f32 %v11524_v28, 0.0  ;;  %v17670_v4 = vld [vmem:[%s23294_s13 + $0x20] ss:$8 sps:$4 sm:$0xff]   ;;  %v17678_v26 = vld [vmem:[%s23294_s13 + $0x34] ss:$8 sps:$4 sm:$0xff]  }
 0xac1   :  { %v11613_v20 = vpack.c.bf16 %v11583_v34, %v11580_v3  ;;  %v17747_v48 = vld [vmem:[%s23293_s12 + $0xf4] ss:$8 sps:$4 sm:$0xff]   ;;  %v17745_v28 = vld [vmem:[%s23293_s12 + $0xf0] ss:$8 sps:$4 sm:$0xff]   ;;  %v17684_v34 = vld [vmem:[%s23294_s13 + $0x44] ss:$8 sps:$4 sm:$0xff]  }
 0xac2   :  { %v11614_v8 = vpack.c.bf16 %v11584_v33, %v11581_v40  ;;  %v17676_v3 = vld [vmem:[%s23294_s13 + $0x30] ss:$8 sps:$4 sm:$0xff]   ;;  %v17682_v40 = vld [vmem:[%s23294_s13 + $0x40] ss:$8 sps:$4 sm:$0xff]   ;;  %v17690_v33 = vld [vmem:[%s23294_s13 + $0x54] ss:$8 sps:$4 sm:$0xff]  }
 0xac4   :  { %11705 = vmatprep.subr.bf16.mxu1 %v11614_v8  ;;  %11931 = vmatprep.subr.bf16.mxu0 %v11614_v8  ;;  %v17696_v8 = vld [vmem:[%s23294_s13 + $0x64] ss:$8 sps:$4 sm:$0xff]  }
 0xac5   :  { %11706 = vmatpush1.bf16.msra.mxu1 %v11613_v20  ;;  %11932 = vmatpush1.bf16.msra.mxu0 %v11613_v20  ;;  %v17688_v20 = vld [vmem:[%s23294_s13 + $0x50] ss:$8 sps:$4 sm:$0xff]  }
 0xac6   :  { %11770 = vmatprep.subr.bf16.mxu1 %v23795_v13  ;;  %12369 = vmatprep.subr.bf16.mxu0 %v17657_v15  ;;  %v17694_v15 = vld [vmem:[%s23294_s13 + $0x60] ss:$8 sps:$4 sm:$0xff]  }
 0xac8   :  { %11720 = vmatmul.mubr.bf16.vlgmr.msra.gmra.mrb[160].mxu1 %v22538_v60  ;;  %11946 = vmatmul.mubr.bf16.vlgmr.msra.gmra.mrb[104].mxu0 %v22543_v23 }
 0xac9   :  { %11771 = vmatpush1.bf16.msra.mxu1 %v22368_v11  ;;  %15105 = vmatprep.mubr.msk.bf16.mxu1 %vm11671_vm2, %v22548_v22 }
 0xaca   :  { %11772 = vmatprep.subr.bf16.mxu1 %v23795_v13  ;;  %15125 = vmatprep.mubr.msk.bf16.mxu0 %vm11671_vm2, %v22554_v61 }
 0xacb   :  { %12370 = vmatpush1.bf16.msra.mxu0 %v17655_v0  ;;  %v17714_v0 = vld [vmem:[%s23294_s13 + $0x94] ss:$8 sps:$4 sm:$0xff]  }
 0xacc   :  { %12371 = vmatprep.subr.bf16.mxu0 %v17663_v9  ;;  %v17712_v9 = vld [vmem:[%s23294_s13 + $0x90] ss:$8 sps:$4 sm:$0xff]  }
 0xacd   :  { %11773 = vmatpush1.bf16.msra.mxu1 %v22381_v38 }
 0xace   :  { %11774 = vmatprep.subr.bf16.mxu1 %v23795_v13 }
 0xacf   :  { %12372 = vmatpush1.bf16.msra.mxu0 %v17661_v14  ;;  %v17720_v14 = vld [vmem:[%s23294_s13 + $0xa4] ss:$8 sps:$4 sm:$0xff]  }
 0xad0   :  { %11730 = vmatmul.mubr.bf16.gmra.mrb[164].mxu1 %v22576_v29  ;;  %11956 = vmatmul.mubr.bf16.gmra.mrb[108].mxu0 %v22581_v63 }
 0xad1   :  { %11775 = vmatpush1.bf16.msra.mxu1 %v22394_v1  ;;  %15106 = vmatprep.mubr.msk.bf16.mxu1 %vm11671_vm2, %v22587_v54 }
 0xad2   :  { %11776 = vmatprep.subr.bf16.mxu1 %v23795_v13  ;;  %15126 = vmatprep.mubr.msk.bf16.mxu0 %vm11671_vm2, %v22593_v39 }
 0xad3   :  { %12373 = vmatprep.subr.bf16.mxu0 %v17669_v62  ;;  %v17730_v62 = vld [vmem:[%s23294_s13 + $0xc0] ss:$8 sps:$4 sm:$0xff]  }
 0xad4   :  { %12374 = vmatpush1.bf16.msra.mxu0 %v17667_v12  ;;  %v17738_v12 = vld [vmem:[%s23294_s13 + $0xd4] ss:$8 sps:$4 sm:$0xff]  }
 0xad5   :  { %11777 = vmatpush1.bf16.msra.mxu1 %v22407_v43  ;;  %12375 = vmatprep.subr.bf16.mxu0 %v17675_v31  ;;  %v17736_v31 = vld [vmem:[%s23294_s13 + $0xd0] ss:$8 sps:$4 sm:$0xff]  }
 0xad6   :  { %11778 = vmatprep.subr.bf16.mxu1 %v23795_v13 }
 0xad8   :  { %11740 = vmatmul.mubr.bf16.gmra.mrb[168].mxu1 %v22615_v50  ;;  %11966 = vmatmul.mubr.bf16.gmra.mrb[112].mxu0 %v22620_v46 }
 0xad9   :  { %11779 = vmatpush1.bf16.msra.mxu1 %v22420_v7  ;;  %15107 = vmatprep.mubr.msk.bf16.mxu1 %vm11671_vm2, %v22626_v57 }
 0xada   :  { %11780 = vmatprep.subr.bf16.mxu1 %v23795_v13  ;;  %15127 = vmatprep.mubr.msk.bf16.mxu0 %vm11671_vm2, %v22632_v49 }
 0xadb   :  { %12376 = vmatpush1.bf16.msra.mxu0 %v17673_v21  ;;  %v17753_v21 = vld [vmem:[%s23293_s12 + $0x104] ss:$8 sps:$4 sm:$0xff]  }
 0xadc   :  { %12377 = vmatprep.subr.bf16.mxu0 %v17681_v44  ;;  %v17756_v44 = vld [vmem:[%s23294_s13 + $0x104] ss:$8 sps:$4 sm:$0xff]  }
 0xadd   :  { %11781 = vmatpush1.bf16.msra.mxu1 %v22433_v35 }
 0xade   :  { %11782 = vmatprep.subr.bf16.mxu1 %v23795_v13 }
 0xadf   :  { %12378 = vmatpush1.bf16.msra.mxu0 %v17679_v30 }
 0xae0   :  { %11750 = vmatmul.mubr.bf16.gmra.mrb[172].mxu1 %v22651_v6  ;;  %11976 = vmatmul.mubr.bf16.gmra.mrb[116].mxu0 %v22664_v36 }
 0xae1   :  { %11783 = vmatpush1.bf16.msra.mxu1 %v22446_v52  ;;  %15108 = vmatprep.mubr.msk.bf16.mxu1 %vm11671_vm2, %v22659_v5 }
 0xae2   :  { %11784 = vmatprep.subr.bf16.mxu1 %v23795_v13  ;;  %15128 = vmatprep.mubr.msk.bf16.mxu0 %vm11671_vm2, %v22670_v25 }
 0xae3   :  { %12379 = vmatprep.subr.bf16.mxu0 %v17687_v53 }
 0xae4   :  { %12380 = vmatpush1.bf16.msra.mxu0 %v17685_v10 }
 0xae5   :  { %11785 = vmatpush1.bf16.msra.mxu1 %v22454_v27  ;;  %12381 = vmatprep.subr.bf16.mxu0 %v17693_v51 }
 0xae6   :  { %11786 = vmatprep.subr.bf16.mxu1 %v23795_v13 }
 0xae8   :  { %11760 = vmatmul.mubr.bf16.gmra.mrb[176].mxu1 %v22691_v55  ;;  %11986 = vmatmul.mubr.bf16.gmra.mrb[120].mxu0 %v22696_v59 }
 0xae9   :  { %11787 = vmatpush1.bf16.msra.mxu1 %v22461_v24  ;;  %15109 = vmatprep.mubr.msk.bf16.mxu1 %vm11671_vm2, %v22471_v17  ;;  %v17703_v17 = vld [vmem:[%s23293_s12 + $0x80] ss:$8 sps:$4 sm:$0xff]  }
 0xaea   :  { %11788 = vmatprep.subr.bf16.mxu1 %v23795_v13  ;;  %12382 = vmatpush1.bf16.msra.mxu0 %v17691_v2 }
 0xaeb   :  { %12383 = vmatprep.subr.bf16.mxu0 %v17699_v42 }
 0xaed   :  { %11789 = vmatpush1.bf16.msra.mxu1 %v22466_v32 }
 0xaee   :  { %11996 = vmatprep.subr.bf16.mxu1 %v23795_v13  ;;  %12384 = vmatpush1.bf16.msra.mxu0 %v17697_v56  ;;  %v17751_v56 = vld [vmem:[%s23293_s12 + $0x100] ss:$8 sps:$4 sm:$0xff]  }
 0xaef   :  { %12385 = vmatprep.subr.bf16.mxu0 %v17705_v47  ;;  %v17754_v47 = vld [vmem:[%s23294_s13 + $0x100] ss:$8 sps:$4 sm:$0xff]  }
 0xaf0   :  { %11803 = vmatmul.mubr.bf16.vlgmr.msra.gmra.mrb[180].mxu1 %v22538_v60  ;;  %v17702_v60 = vld [vmem:[%s23294_s13 + $0x74] ss:$8 sps:$4 sm:$0xff]  }
 0xaf1   :  { %11997 = vmatpush1.bf16.msra.mxu1 %v22368_v11  ;;  %15110 = vmatprep.mubr.msk.bf16.mxu1 %vm11671_vm2, %v22548_v22  ;;  %v17715_v11 = vld [vmem:[%s23293_s12 + $0xa0] ss:$8 sps:$4 sm:$0xff]   ;;  %v17708_v22 = vld [vmem:[%s23294_s13 + $0x84] ss:$8 sps:$4 sm:$0xff]  }
 0xaf2   :  { %11998 = vmatprep.subr.bf16.mxu1 %v23795_v13  ;;  %12386 = vmatpush1.bf16.msra.mxu0 %v17703_v17 }
 0xaf3   :  { %12387 = vmatprep.subr.bf16.mxu0 %v17711_v45  ;;  %v17759_v45 = vld [vmem:[%s23293_s12 + $0x114] ss:$8 sps:$4 sm:$0xff]  }
 0xaf5   :  { %11999 = vmatpush1.bf16.msra.mxu1 %v22381_v38  ;;  %v17721_v38 = vld [vmem:[%s23293_s12 + $0xb0] ss:$8 sps:$4 sm:$0xff]  }
 0xaf6   :  { %12000 = vmatprep.subr.bf16.mxu1 %v23795_v13  ;;  %12388 = vmatpush1.bf16.msra.mxu0 %v17709_v41 }
 0xaf7   :  { %12389 = vmatprep.subr.bf16.mxu0 %v17717_v58  ;;  %v17762_v58 = vld [vmem:[%s23294_s13 + $0x114] ss:$8 sps:$4 sm:$0xff]  }
 0xaf8   :  { %11811 = vmatmul.mubr.bf16.gmra.mrb[184].mxu1 %v22576_v29  ;;  %v17718_v29 = vld [vmem:[%s23294_s13 + $0xa0] ss:$8 sps:$4 sm:$0xff]  }
 0xaf9   :  { %12001 = vmatpush1.bf16.msra.mxu1 %v22394_v1  ;;  %15111 = vmatprep.mubr.msk.bf16.mxu1 %vm11671_vm2, %v22587_v54  ;;  %v17727_v1 = vld [vmem:[%s23293_s12 + $0xc0] ss:$8 sps:$4 sm:$0xff]   ;;  %v17724_v54 = vld [vmem:[%s23294_s13 + $0xb0] ss:$8 sps:$4 sm:$0xff]  }
 0xafa   :  { %12002 = vmatprep.subr.bf16.mxu1 %v23795_v13  ;;  %12390 = vmatpush1.bf16.msra.mxu0 %v17715_v11 }
 0xafb   :  { %12391 = vmatprep.subr.bf16.mxu0 %v17723_v18 }
 0xafd   :  { %12003 = vmatpush1.bf16.msra.mxu1 %v22407_v43  ;;  %v17733_v43 = vld [vmem:[%s23293_s12 + $0xd0] ss:$8 sps:$4 sm:$0xff]  }
 0xafe   :  { %12004 = vmatprep.subr.bf16.mxu1 %v23795_v13  ;;  %12392 = vmatpush1.bf16.msra.mxu0 %v17721_v38  ;;  %v17757_v38 = vld [vmem:[%s23293_s12 + $0x110] ss:$8 sps:$4 sm:$0xff]  }
 0xaff   :  { %12393 = vmatprep.subr.bf16.mxu0 %v17729_v37  ;;  %v17760_v37 = vld [vmem:[%s23294_s13 + $0x110] ss:$8 sps:$4 sm:$0xff]  }
 0xb00   :  { %11819 = vmatmul.mubr.bf16.gmra.mrb[188].mxu1 %v22615_v50  ;;  %v17744_v50 = vld [vmem:[%s23294_s13 + $0xe4] ss:$8 sps:$4 sm:$0xff]  }
 0xb01   :  { %12005 = vmatpush1.bf16.msra.mxu1 %v22420_v7  ;;  %15112 = vmatprep.mubr.msk.bf16.mxu1 %vm11671_vm2, %v22626_v57  ;;  %v17660_v7 = vld [vmem:[%s23294_s13 + $0x4] ss:$8 sps:$4 sm:$0xff]   ;;  %v17750_v57 = vld [vmem:[%s23294_s13 + $0xf4] ss:$8 sps:$4 sm:$0xff]  }
 0xb02   :  { %12006 = vmatprep.subr.bf16.mxu1 %v23795_v13  ;;  %12394 = vmatpush1.bf16.msra.mxu0 %v17727_v1 }
 0xb03   :  { %12395 = vmatprep.subr.bf16.mxu0 %v17735_v19 }
 0xb05   :  { %12007 = vmatpush1.bf16.msra.mxu1 %v22433_v35  ;;  %v17658_v35 = vld [vmem:[%s23294_s13] ss:$8 sps:$4 sm:$0xff]  }
 0xb06   :  { %12008 = vmatprep.subr.bf16.mxu1 %v23795_v13  ;;  %12396 = vmatpush1.bf16.msra.mxu0 %v17733_v43 }
 0xb08   :  { %11827 = vmatmul.mubr.bf16.gmra.mrb[192].mxu1 %v22651_v6 }
 0xb09   :  { %12009 = vmatpush1.bf16.msra.mxu1 %v22446_v52  ;;  %15113 = vmatprep.mubr.msk.bf16.mxu1 %vm11671_vm2, %v22659_v5  ;;  %v17666_v52 = vld [vmem:[%s23294_s13 + $0x14] ss:$8 sps:$4 sm:$0xff]  }
 0xb0a   :  { %12010 = vmatprep.subr.bf16.mxu1 %v23795_v13 }
 0xb0d   :  { %12011 = vmatpush1.bf16.msra.mxu1 %v22454_v27  ;;  %v17664_v27 = vld [vmem:[%s23294_s13 + $0x10] ss:$8 sps:$4 sm:$0xff]  }
 0xb0e   :  { %12012 = vmatprep.subr.bf16.mxu1 %v23795_v13 }
 0xb10   :  { %11835 = vmatmul.mubr.bf16.gmra.mrb[196].mxu1 %v22691_v55 }
 0xb11   :  { %12013 = vmatpush1.bf16.msra.mxu1 %v22461_v24  ;;  %15129 = vmatprep.mubr.msk.bf16.mxu1 %vm11671_vm2, %v22478_v16  ;;  %v17672_v24 = vld [vmem:[%s23294_s13 + $0x24] ss:$8 sps:$4 sm:$0xff]   ;;  %v17739_v16 = vld [vmem:[%s23293_s12 + $0xe0] ss:$8 sps:$4 sm:$0xff]  }
 0xb12   :  { %12014 = vmatprep.subr.bf16.mxu1 %v23795_v13 }
 0xb15   :  { %12015 = vmatpush1.bf16.msra.mxu1 %v22466_v32  ;;  %v17741_v32 = vld [vmem:[%s23293_s12 + $0xe4] ss:$8 sps:$4 sm:$0xff]  }
 0xb16   :  { %12775 = vmatprep.subr.bf16.mxu1 %v17660_v7  ;;  %12397 = vmatprep.subr.bf16.mxu0 %v17741_v32  ;;  %v17765_v7 = vld [vmem:[%s23293_s12 + $0x124] ss:$8 sps:$4 sm:$0xff]  }
 0xb17   :  { %12398 = vmatpush1.bf16.msra.mxu0 %v17739_v16 }
 0xb18   :  { %12029 = vmatmul.mubr.bf16.vlgmr.msra.gmra.mrb[200].mxu1 %v22543_v23  ;;  %12399 = vmatprep.subr.bf16.mxu0 %v17747_v48  ;;  %v17700_v23 = vld [vmem:[%s23294_s13 + $0x70] ss:$8 sps:$4 sm:$0xff]   ;;  %v17763_v48 = vld [vmem:[%s23293_s12 + $0x120] ss:$8 sps:$4 sm:$0xff]  }
 0xb19   :  { %15130 = vmatprep.mubr.msk.bf16.mxu1 %vm11671_vm2, %v22554_v61  ;;  %12776 = vmatpush1.bf16.msra.mxu1 %v17658_v35  ;;  %v17706_v61 = vld [vmem:[%s23294_s13 + $0x80] ss:$8 sps:$4 sm:$0xff]   ;;  %v17768_v35 = vld [vmem:[%s23294_s13 + $0x124] ss:$8 sps:$4 sm:$0xff]  }
 0xb1a   :  { %12777 = vmatprep.subr.bf16.mxu1 %v17666_v52 }
 0xb1b   :  { %12400 = vmatpush1.bf16.msra.mxu0 %v17745_v28  ;;  %v17766_v28 = vld [vmem:[%s23294_s13 + $0x120] ss:$8 sps:$4 sm:$0xff]  }
 0xb1c   :  { %12452 = vmatprep.subr.bf16.mxu0 %v17753_v21 }
 0xb1d   :  { %12778 = vmatpush1.bf16.msra.mxu1 %v17664_v27 }
 0xb1e   :  { %12779 = vmatprep.subr.bf16.mxu1 %v17672_v24 }
 0xb20   :  { %12037 = vmatmul.mubr.bf16.gmra.mrb[204].mxu1 %v22581_v63  ;;  %v17726_v63 = vld [vmem:[%s23294_s13 + $0xb4] ss:$8 sps:$4 sm:$0xff]  }
 0xb21   :  { %15131 = vmatprep.mubr.msk.bf16.mxu1 %vm11671_vm2, %v22593_v39  ;;  %12780 = vmatpush1.bf16.msra.mxu1 %v17670_v4  ;;  %v17732_v39 = vld [vmem:[%s23294_s13 + $0xc4] ss:$8 sps:$4 sm:$0xff]  }
 0xb22   :  { %12781 = vmatprep.subr.bf16.mxu1 %v17678_v26 }
 0xb25   :  { %12782 = vmatpush1.bf16.msra.mxu1 %v17676_v3 }
 0xb26   :  { %12783 = vmatprep.subr.bf16.mxu1 %v17684_v34  ;;  %v17771_v34 = vld [vmem:[%s23293_s12 + $0x134] ss:$8 sps:$4 sm:$0xff]  }
 0xb28   :  { %12045 = vmatmul.mubr.bf16.gmra.mrb[208].mxu1 %v22620_v46  ;;  %v17742_v46 = vld [vmem:[%s23294_s13 + $0xe0] ss:$8 sps:$4 sm:$0xff]  }
 0xb29   :  { %15132 = vmatprep.mubr.msk.bf16.mxu1 %vm11671_vm2, %v22632_v49  ;;  %12784 = vmatpush1.bf16.msra.mxu1 %v17682_v40  ;;  %v17748_v49 = vld [vmem:[%s23294_s13 + $0xf0] ss:$8 sps:$4 sm:$0xff]   ;;  %v17774_v40 = vld [vmem:[%s23294_s13 + $0x134] ss:$8 sps:$4 sm:$0xff]  }
 0xb2a   :  { %12785 = vmatprep.subr.bf16.mxu1 %v17690_v33 }
 0xb2d   :  { %12786 = vmatpush1.bf16.msra.mxu1 %v17688_v20 }
 0xb2e   :  { %12787 = vmatprep.subr.bf16.mxu1 %v17696_v8 }
 0xb30   :  { %12053 = vmatmul.mubr.bf16.gmra.mrb[212].mxu1 %v22664_v36 }
 0xb31   :  { %15133 = vmatprep.mubr.msk.bf16.mxu1 %vm11671_vm2, %v22670_v25  ;;  %12788 = vmatpush1.bf16.msra.mxu1 %v17694_v15  ;;  %v17769_v15 = vld [vmem:[%s23293_s12 + $0x130] ss:$8 sps:$4 sm:$0xff]  }
 0xb32   :  { %12789 = vmatprep.subr.bf16.mxu1 %v17702_v60  ;;  %v17772_v60 = vld [vmem:[%s23294_s13 + $0x130] ss:$8 sps:$4 sm:$0xff]  }
 0xb35   :  { %12790 = vmatpush1.bf16.msra.mxu1 %v17700_v23 }
 0xb36   :  { %12791 = vmatprep.subr.bf16.mxu1 %v17708_v22 }
 0xb38   :  { %12061 = vmatmul.mubr.bf16.gmra.mrb[216].mxu1 %v22696_v59 }
 0xb39   :  { %12792 = vmatpush1.bf16.msra.mxu1 %v17706_v61 }
 0xb3a   :  { %12793 = vmatprep.subr.bf16.mxu1 %v17714_v0 }
 0xb3d   :  { %12794 = vmatpush1.bf16.msra.mxu1 %v17712_v9 }
 0xb3e   :  { %12795 = vmatprep.subr.bf16.mxu1 %v17720_v14 }
 0xb41   :  { %12796 = vmatpush1.bf16.msra.mxu1 %v17718_v29 }
 0xb42   :  { %12797 = vmatprep.subr.bf16.mxu1 %v17726_v63 }
 0xb45   :  { %12798 = vmatpush1.bf16.msra.mxu1 %v17724_v54 }
 0xb46   :  { %12799 = vmatprep.subr.bf16.mxu1 %v17732_v39 }
 0xb49   :  { %12800 = vmatpush1.bf16.msra.mxu1 %v17730_v62 }
 0xb4a   :  { %12801 = vmatprep.subr.bf16.mxu1 %v17738_v12 }
 0xb4d   :  { %12802 = vmatpush1.bf16.msra.mxu1 %v17736_v31 }
 0xb4e   :  { %12803 = vmatprep.subr.bf16.mxu1 %v17744_v50 }
 0xb51   :  { %12804 = vmatpush1.bf16.msra.mxu1 %v17742_v46 }
 0xb52   :  { %12805 = vmatprep.subr.bf16.mxu1 %v17750_v57 }
 0xb55   :  { %12806 = vmatpush1.bf16.msra.mxu1 %v17748_v49 }
 0xb56   :  { %12858 = vmatprep.subr.bf16.mxu1 %v17756_v44 }
 0xb9b   :  { %v11721_v6 = vpop.f32.mrb[160].mxu1  ;;  %v11947_v30 = vpop.f32.mrb[104].mxu0 }
 0xb9c   :  { %v12069_v5 = vmax.f32 %v11721_v6, %v11947_v30  ;;  %v11723_v36 = vpop.f32.mrb[161].mxu1  ;;  %v11949_v25 = vpop.f32.mrb[105].mxu0 }
 0xb9d   :  { %v12070_v10 = vmax.f32 %v11723_v36, %v11949_v25  ;;  %v11725_v53 = vpop.f32.mrb[162].mxu1  ;;  %v11951_v51 = vpop.f32.mrb[106].mxu0 }
 0xb9e   :  { %v12072_v55 = vmax.f32 %v11725_v53, %v11951_v51  ;;  %v11727_v59 = vpop.f32.mrb[163].mxu1  ;;  %v11953_v2 = vpop.f32.mrb[107].mxu0 }
 0xb9f   :  { %v12073_v42 = vmax.f32 %v11727_v59, %v11953_v2 }
 0xba0   :  { %v12099_v17 = vpack.c.bf16 %v12072_v55, %v12069_v5 }
 0xba1   :  { %v12100_v41 = vpack.c.bf16 %v12073_v42, %v12070_v10 }
 0xba3   :  { %v11731_v11 = vpop.f32.mrb[164].mxu1  ;;  %v11957_v18 = vpop.f32.mrb[108].mxu0  ;;  %12401 = vmatprep.mubr.bf16.mxu0 %v12100_v41  ;;  %12807 = vmatprep.mubr.bf16.mxu1 %v12100_v41 }
 0xba4   :  { %v11733_v1 = vpop.f32.mrb[165].mxu1  ;;  %v12075_v19 = vmax.f32 %v11731_v11, %v11957_v18  ;;  %v11959_v43 = vpop.f32.mrb[109].mxu0  ;;  %12402 = vmatmul.mubr.bf16.vlgmr.msra.gmra.mrb[124].mxu0 %v12099_v17  ;;  %12808 = vmatmul.mubr.bf16.vlgmr.msra.gmra.mrb[220].mxu1 %v12099_v17 }
 0xba5   :  { %v11735_v52 = vpop.f32.mrb[166].mxu1  ;;  %v12076_v27 = vmax.f32 %v11733_v1, %v11959_v43  ;;  %v11961_v24 = vpop.f32.mrb[110].mxu0  ;;  %12453 = vmatpush1.bf16.msra.mxu0 %v17751_v56  ;;  %12859 = vmatpush1.bf16.msra.mxu1 %v17754_v47 }
 0xba6   :  { %v11737_v32 = vpop.f32.mrb[167].mxu1  ;;  %v12078_v16 = vmax.f32 %v11735_v52, %v11961_v24  ;;  %v11963_v4 = vpop.f32.mrb[111].mxu0  ;;  %12454 = vmatprep.subr.bf16.mxu0 %v17759_v45  ;;  %12860 = vmatprep.subr.bf16.mxu1 %v17762_v58 }
 0xba7   :  { %v12079_v26 = vmax.f32 %v11737_v32, %v11963_v4 }
 0xba8   :  { %v12102_v3 = vpack.c.bf16 %v12078_v16, %v12075_v19 }
 0xba9   :  { %v12103_v33 = vpack.c.bf16 %v12079_v26, %v12076_v27  ;;  %12455 = vmatpush1.bf16.msra.mxu0 %v17757_v38  ;;  %12861 = vmatpush1.bf16.msra.mxu1 %v17760_v37 }
 0xbaa   :  { %12456 = vmatprep.subr.bf16.mxu0 %v17765_v7  ;;  %12862 = vmatprep.subr.bf16.mxu1 %v17768_v35 }
 0xbab   :  { %v11741_v20 = vpop.f32.mrb[168].mxu1  ;;  %v11967_v8 = vpop.f32.mrb[112].mxu0  ;;  %12411 = vmatprep.mubr.bf16.mxu0 %v12103_v33  ;;  %12817 = vmatprep.mubr.bf16.mxu1 %v12103_v33 }
 0xbac   :  { %v11743_v23 = vpop.f32.mrb[169].mxu1  ;;  %v12081_v22 = vmax.f32 %v11741_v20, %v11967_v8  ;;  %v11969_v61 = vpop.f32.mrb[113].mxu0  ;;  %12412 = vmatmul.mubr.bf16.gmra.mrb[128].mxu0 %v12102_v3  ;;  %12818 = vmatmul.mubr.bf16.gmra.mrb[224].mxu1 %v12102_v3 }
 0xbad   :  { %v11745_v0 = vpop.f32.mrb[170].mxu1  ;;  %v12082_v9 = vmax.f32 %v11743_v23, %v11969_v61  ;;  %v11971_v14 = vpop.f32.mrb[114].mxu0  ;;  %12457 = vmatpush1.bf16.msra.mxu0 %v17763_v48  ;;  %12863 = vmatpush1.bf16.msra.mxu1 %v17766_v28 }
 0xbae   :  { %v11747_v29 = vpop.f32.mrb[171].mxu1  ;;  %v12084_v63 = vmax.f32 %v11745_v0, %v11971_v14  ;;  %v11973_v54 = vpop.f32.mrb[115].mxu0  ;;  %12458 = vmatprep.subr.bf16.mxu0 %v17771_v34  ;;  %12864 = vmatprep.subr.bf16.mxu1 %v17774_v40  ;;  %v17776_v14 = vld [vmem:[%s23295_s14] sm:$0xff]  }
 0xbaf   :  { %v12085_v39 = vmax.f32 %v11747_v29, %v11973_v54 }
 0xbb0   :  { %v12105_v62 = vpack.c.bf16 %v12084_v63, %v12081_v22 }
 0xbb1   :  { %v12106_v12 = vpack.c.bf16 %v12085_v39, %v12082_v9  ;;  %12459 = vmatpush1.bf16.msra.mxu0 %v17769_v15  ;;  %12865 = vmatpush1.bf16.msra.mxu1 %v17772_v60  ;;  %v17775_v9 = vld [vmem:[%s23295_s14 + $0x50] sm:$0xff]   ;;  %v17777_v39 = vld [vmem:[%s23295_s14 + $0x58] sm:$0xff]  }
 0xbb2   :  { %13075 = vmatprep.subr.bf16.mxu0 %v23795_v13  ;;  %13179 = vmatprep.subr.bf16.mxu1 %v23795_v13 }
 0xbb3   :  { %v11751_v31 = vpop.f32.mrb[172].mxu1  ;;  %v11977_v50 = vpop.f32.mrb[116].mxu0  ;;  %12421 = vmatprep.mubr.bf16.mxu0 %v12106_v12  ;;  %12827 = vmatprep.mubr.bf16.mxu1 %v12106_v12 }
 0xbb4   :  { %v11753_v46 = vpop.f32.mrb[173].mxu1  ;;  %v12087_v57 = vmax.f32 %v11751_v31, %v11977_v50  ;;  %v11979_v49 = vpop.f32.mrb[117].mxu0  ;;  %12422 = vmatmul.mubr.bf16.gmra.mrb[132].mxu0 %v12105_v62  ;;  %12828 = vmatmul.mubr.bf16.gmra.mrb[228].mxu1 %v12105_v62  ;;  %v17778_v62 = vld [vmem:[%s23295_s14 + $0x8] sm:$0xff]  }
 0xbb5   :  { %v11755_v21 = vpop.f32.mrb[174].mxu1  ;;  %v12088_v44 = vmax.f32 %v11753_v46, %v11979_v49  ;;  %v11981_v6 = vpop.f32.mrb[118].mxu0  ;;  %v17780_v49 = vld [vmem:[%s23295_s14 + $0x10] sm:$0xff]  }
 0xbb6   :  { %v11757_v30 = vpop.f32.mrb[175].mxu1  ;;  %v12090_v5 = vmax.f32 %v11755_v21, %v11981_v6  ;;  %v11983_v36 = vpop.f32.mrb[119].mxu0 }
 0xbb7   :  { %v12091_v25 = vmax.f32 %v11757_v30, %v11983_v36  ;;  %v17781_v30 = vld [vmem:[%s23295_s14 + $0x68] sm:$0xff]  }
 0xbb8   :  { %v12108_v10 = vpack.c.bf16 %v12090_v5, %v12087_v57  ;;  %v17779_v57 = vld [vmem:[%s23295_s14 + $0x60] sm:$0xff]   ;;  %v17782_v5 = vld [vmem:[%s23295_s14 + $0x18] sm:$0xff]  }
 0xbb9   :  { %v12109_v53 = vpack.c.bf16 %v12091_v25, %v12088_v44 }
 0xbbb   :  { %v11761_v51 = vpop.f32.mrb[176].mxu1  ;;  %v11987_v55 = vpop.f32.mrb[120].mxu0  ;;  %12431 = vmatprep.mubr.bf16.mxu0 %v12109_v53  ;;  %12837 = vmatprep.mubr.bf16.mxu1 %v12109_v53 }
 0xbbc   :  { %v11763_v59 = vpop.f32.mrb[177].mxu1  ;;  %v12093_v2 = vmax.f32 %v11761_v51, %v11987_v55  ;;  %v11989_v42 = vpop.f32.mrb[121].mxu0  ;;  %12432 = vmatmul.mubr.bf16.gmra.mrb[136].mxu0 %v12108_v10  ;;  %12838 = vmatmul.mubr.bf16.gmra.mrb[232].mxu1 %v12108_v10  ;;  %v17783_v51 = vld [vmem:[%s23295_s14 + $0x70] sm:$0xff]   ;;  %v17784_v55 = vld [vmem:[%s23295_s14 + $0x20] sm:$0xff]  }
 0xbbd   :  { %v11765_v56 = vpop.f32.mrb[178].mxu1  ;;  %v12094_v47 = vmax.f32 %v11763_v59, %v11989_v42  ;;  %v11991_v17 = vpop.f32.mrb[122].mxu0 }
 0xbbe   :  { %v11767_v45 = vpop.f32.mrb[179].mxu1  ;;  %v12096_v41 = vmax.f32 %v11765_v56, %v11991_v17  ;;  %v11993_v58 = vpop.f32.mrb[123].mxu0  ;;  %v17785_v56 = vld [vmem:[%s23295_s14 + $0x78] sm:$0xff]  }
 0xbbf   :  { %v12097_v11 = vmax.f32 %v11767_v45, %v11993_v58 }
 0xbc0   :  { %v12111_v18 = vpack.c.bf16 %v12096_v41, %v12093_v2 }
 0xbc1   :  { %v12112_v38 = vpack.c.bf16 %v12097_v11, %v12094_v47  ;;  %v17786_v47 = vld [vmem:[%s23295_s14 + $0x28] sm:$0xff]   ;;  %v17787_v11 = vld [vmem:[%s23295_s14 + $0x80] sm:$0xff]  }
 0xbc3   :  { %v11804_v37 = vpop.f32.mrb[180].mxu1  ;;  %12441 = vmatprep.mubr.bf16.mxu0 %v12112_v38  ;;  %12847 = vmatprep.mubr.bf16.mxu1 %v12112_v38 }
 0xbc4   :  { %v11806_v1 = vpop.f32.mrb[181].mxu1  ;;  %12442 = vmatmul.mubr.bf16.gmra.mrb[140].mxu0 %v12111_v18  ;;  %12848 = vmatmul.mubr.bf16.gmra.mrb[236].mxu1 %v12111_v18  ;;  %v17788_v18 = vld [vmem:[%s23295_s14 + $0x30] sm:$0xff]  }
 0xbc5   :  { %v11807_v19 = vpop.f32.mrb[182].mxu1  ;;  %12484 = vmatprep.mubr.bf16.mxu0 %v23795_v13  ;;  %12890 = vmatprep.mubr.bf16.mxu1 %v23795_v13 }
 0xbc6   :  { %v11809_v43 = vpop.f32.mrb[183].mxu1 }
 0xbcb   :  { %v11812_v7 = vpop.f32.mrb[184].mxu1 }
 0xbcc   :  { %v11814_v35 = vpop.f32.mrb[185].mxu1 }
 0xbcd   :  { %v11815_v52 = vpop.f32.mrb[186].mxu1 }
 0xbce   :  { %v11817_v27 = vpop.f32.mrb[187].mxu1 }
 0xbcf   :  { %v17792_v27 = vld [vmem:[%s23295_s14 + $0x40] sm:$0xff]  }
 0xbd3   :  { %v11820_v24 = vpop.f32.mrb[188].mxu1 }
 0xbd4   :  { %v11822_v32 = vpop.f32.mrb[189].mxu1 }
 0xbd5   :  { %v11823_v16 = vpop.f32.mrb[190].mxu1  ;;  %v17794_v32 = vld [vmem:[%s23295_s14 + $0x48] sm:$0xff]  }
 0xbd6   :  { %v11825_v4 = vpop.f32.mrb[191].mxu1 }
 0xbd7   :  { %v17793_v4 = vld [vmem:[%s23295_s14 + $0x98] sm:$0xff]  }
 0xbdb   :  { %v22962_v26 = vpop.f32.mrb[192].mxu1 }
 0xbdc   :  { %v11830_v48 = vpop.f32.mrb[193].mxu1 }
 0xbdd   :  { %v22964_v28 = vpop.f32.mrb[194].mxu1 }
 0xbde   :  { %v11833_v3 = vpop.f32.mrb[195].mxu1 }
 0xbe3   :  { %v22966_v34 = vpop.f32.mrb[196].mxu1 }
 0xbe4   :  { %v11838_v40 = vpop.f32.mrb[197].mxu1 }
 0xbe5   :  { %v22968_v33 = vpop.f32.mrb[198].mxu1 }
 0xbe6   :  { %v11841_v20 = vpop.f32.mrb[199].mxu1 }
 0xbeb   :  { %v12030_v8 = vpop.f32.mrb[200].mxu1 }
 0xbec   :  { %v12071_v15 = vmax.f32 %v11804_v37, %v12030_v8  ;;  %v12032_v60 = vpop.f32.mrb[201].mxu1 }
 0xbed   :  { %v12033_v23 = vpop.f32.mrb[202].mxu1 }
 0xbee   :  { %v12074_v22 = vmax.f32 %v11807_v19, %v12033_v23  ;;  %v12035_v61 = vpop.f32.mrb[203].mxu1 }
 0xbf0   :  { %v12101_v0 = vpack.c.bf16 %v12074_v22, %v12071_v15 }
 0xbf2   :  { %15174 = vmatmul.mubr.msk.bf16.vlgmr.msra.gmra.mrb[124].mxu0 %vm5997_vm1, %v12101_v0  ;;  %15219 = vmatmul.mubr.msk.bf16.vlgmr.msra.gmra.mrb[220].mxu1 %vm5997_vm1, %v12101_v0  ;;  %v17796_v0 = vld [vmem:[%s23295_s14 + $0xf0] sm:$0xff]  }
 0xbf3   :  { %v12038_v29 = vpop.f32.mrb[204].mxu1  ;;  %12494 = vmatprep.mubr.bf16.mxu0 %v23795_v13  ;;  %12900 = vmatprep.mubr.bf16.mxu1 %v23795_v13 }
 0xbf4   :  { %v12077_v63 = vmax.f32 %v11812_v7, %v12038_v29  ;;  %v12040_v54 = vpop.f32.mrb[205].mxu1  ;;  %13076 = vmatpush1.bf16.msra.mxu0 %v17775_v9  ;;  %13180 = vmatpush1.bf16.msra.mxu1 %v17776_v14 }
 0xbf5   :  { %v12041_v12 = vpop.f32.mrb[206].mxu1  ;;  %13077 = vmatprep.subr.bf16.mxu0 %v23795_v13  ;;  %13181 = vmatprep.subr.bf16.mxu1 %v23795_v13 }
 0xbf6   :  { %v12080_v31 = vmax.f32 %v11815_v52, %v12041_v12  ;;  %v12043_v50 = vpop.f32.mrb[207].mxu1  ;;  %v17790_v52 = vld [vmem:[%s23295_s14 + $0x38] sm:$0xff]  }
 0xbf8   :  { %v12104_v46 = vpack.c.bf16 %v12080_v31, %v12077_v63  ;;  %13078 = vmatpush1.bf16.msra.mxu0 %v17777_v39  ;;  %13182 = vmatpush1.bf16.msra.mxu1 %v17778_v62  ;;  %v17798_v31 = vld [vmem:[%s23295_s14 + $0xf8] sm:$0xff]  }
 0xbf9   :  { %13079 = vmatprep.subr.bf16.mxu0 %v23795_v13  ;;  %13183 = vmatprep.subr.bf16.mxu1 %v23795_v13 }
 0xbfa   :  { %15175 = vmatmul.mubr.msk.bf16.gmra.mrb[128].mxu0 %vm5997_vm1, %v12104_v46  ;;  %15220 = vmatmul.mubr.msk.bf16.gmra.mrb[224].mxu1 %vm5997_vm1, %v12104_v46 }
 0xbfb   :  { %v12046_v21 = vpop.f32.mrb[208].mxu1  ;;  %12504 = vmatprep.mubr.bf16.mxu0 %v23795_v13  ;;  %12910 = vmatprep.mubr.bf16.mxu1 %v23795_v13 }
 0xbfc   :  { %v12083_v44 = vmax.f32 %v11820_v24, %v12046_v21  ;;  %v12048_v6 = vpop.f32.mrb[209].mxu1  ;;  %13080 = vmatpush1.bf16.msra.mxu0 %v17779_v57  ;;  %13184 = vmatpush1.bf16.msra.mxu1 %v17780_v49  ;;  %v17789_v24 = vld [vmem:[%s23295_s14 + $0x88] sm:$0xff]  }
 0xbfd   :  { %v12049_v36 = vpop.f32.mrb[210].mxu1  ;;  %13081 = vmatprep.subr.bf16.mxu0 %v23795_v13  ;;  %13185 = vmatprep.subr.bf16.mxu1 %v23795_v13  ;;  %v17795_v6 = vld [vmem:[%s23295_s14 + $0xa0] sm:$0xff]  }
 0xbfe   :  { %v12086_v25 = vmax.f32 %v11823_v16, %v12049_v36  ;;  %v12051_v10 = vpop.f32.mrb[211].mxu1  ;;  %v17791_v16 = vld [vmem:[%s23295_s14 + $0x90] sm:$0xff]  }
 0xc00   :  { %v12107_v53 = vpack.c.bf16 %v12086_v25, %v12083_v44  ;;  %13082 = vmatpush1.bf16.msra.mxu0 %v17781_v30  ;;  %13186 = vmatpush1.bf16.msra.mxu1 %v17782_v5  ;;  %v17800_v30 = vld [vmem:[%s23295_s14 + $0x100] sm:$0xff]  }
 0xc01   :  { %13083 = vmatprep.subr.bf16.mxu0 %v23795_v13  ;;  %13187 = vmatprep.subr.bf16.mxu1 %v23795_v13 }
 0xc02   :  { %15176 = vmatmul.mubr.msk.bf16.gmra.mrb[132].mxu0 %vm5997_vm1, %v12107_v53  ;;  %15221 = vmatmul.mubr.msk.bf16.gmra.mrb[228].mxu1 %vm5997_vm1, %v12107_v53 }
 0xc03   :  { %v12054_v59 = vpop.f32.mrb[212].mxu1  ;;  %12514 = vmatprep.mubr.bf16.mxu0 %v23795_v13  ;;  %12920 = vmatprep.mubr.bf16.mxu1 %v23795_v13 }
 0xc04   :  { %v12089_v2 = vmax.f32 %v22962_v26, %v12054_v59  ;;  %v12056_v42 = vpop.f32.mrb[213].mxu1  ;;  %13084 = vmatpush1.bf16.msra.mxu0 %v17783_v51  ;;  %13188 = vmatpush1.bf16.msra.mxu1 %v17784_v55  ;;  %v17797_v51 = vld [vmem:[%s23295_s14 + $0xa8] sm:$0xff]  }
 0xc05   :  { %v12057_v17 = vpop.f32.mrb[214].mxu1  ;;  %13085 = vmatprep.subr.bf16.mxu0 %v23795_v13  ;;  %13189 = vmatprep.subr.bf16.mxu1 %v23795_v13  ;;  %v17802_v55 = vld [vmem:[%s23295_s14 + $0x108] sm:$0xff]  }
 0xc06   :  { %v12092_v45 = vmax.f32 %v22964_v28, %v12057_v17  ;;  %v12059_v41 = vpop.f32.mrb[215].mxu1 }
 0xc08   :  { %v12110_v58 = vpack.c.bf16 %v12092_v45, %v12089_v2  ;;  %13086 = vmatpush1.bf16.msra.mxu0 %v17785_v56  ;;  %13190 = vmatpush1.bf16.msra.mxu1 %v17786_v47 }
 0xc09   :  { %13087 = vmatprep.subr.bf16.mxu0 %v23795_v13  ;;  %13191 = vmatprep.subr.bf16.mxu1 %v23795_v13 }
 0xc0a   :  { %15177 = vmatmul.mubr.msk.bf16.gmra.mrb[136].mxu0 %vm5997_vm1, %v12110_v58  ;;  %15222 = vmatmul.mubr.msk.bf16.gmra.mrb[232].mxu1 %vm5997_vm1, %v12110_v58  ;;  %v17799_v58 = vld [vmem:[%s23295_s14 + $0xb0] sm:$0xff]  }
 0xc0b   :  { %v12062_v38 = vpop.f32.mrb[216].mxu1  ;;  %12524 = vmatprep.mubr.bf16.mxu0 %v23795_v13  ;;  %12930 = vmatprep.mubr.bf16.mxu1 %v23795_v13 }
 0xc0c   :  { %v12095_v37 = vmax.f32 %v22966_v34, %v12062_v38  ;;  %v12064_v1 = vpop.f32.mrb[217].mxu1  ;;  %13088 = vmatpush1.bf16.msra.mxu0 %v17787_v11  ;;  %13192 = vmatpush1.bf16.msra.mxu1 %v17788_v18  ;;  %v17804_v11 = vld [vmem:[%s23295_s14 + $0x110] sm:$0xff]  }
 0xc0d   :  { %v12065_v19 = vpop.f32.mrb[218].mxu1  ;;  %13089 = vmatprep.subr.bf16.mxu0 %v23795_v13  ;;  %13193 = vmatprep.subr.bf16.mxu1 %v23795_v13 }
 0xc0e   :  { %v12098_v43 = vmax.f32 %v22968_v33, %v12065_v19  ;;  %v12067_v7 = vpop.f32.mrb[219].mxu1 }
 0xc0f   :  { %v17801_v7 = vld [vmem:[%s23295_s14 + $0xb8] sm:$0xff]  }
 0xc10   :  { %v12113_v35 = vpack.c.bf16 %v12098_v43, %v12095_v37  ;;  %13194 = vmatpush1.bf16.msra.mxu1 %v17790_v52  ;;  %13090 = vmatpush1.bf16.msra.mxu0 %v17789_v24 }
 0xc11   :  { %13195 = vmatprep.subr.bf16.mxu1 %v23795_v13  ;;  %13091 = vmatprep.subr.bf16.mxu0 %v23795_v13 }
 0xc12   :  { %15178 = vmatmul.mubr.msk.bf16.gmra.mrb[140].mxu0 %vm5997_vm1, %v12113_v35  ;;  %15223 = vmatmul.mubr.msk.bf16.gmra.mrb[236].mxu1 %vm5997_vm1, %v12113_v35  ;;  %v17806_v35 = vld [vmem:[%s23295_s14 + $0x118] sm:$0xff]  }
 0xc14   :  { %13196 = vmatpush1.bf16.msra.mxu1 %v17792_v27  ;;  %13092 = vmatpush1.bf16.msra.mxu0 %v17791_v16 }
 0xc15   :  { %13197 = vmatprep.subr.bf16.mxu1 %v23795_v13  ;;  %13093 = vmatprep.subr.bf16.mxu0 %v23795_v13 }
 0xc18   :  { %13198 = vmatpush1.bf16.msra.mxu1 %v17794_v32  ;;  %13094 = vmatpush1.bf16.msra.mxu0 %v17793_v4 }
 0xc19   :  { %13431 = vmatprep.subr.bf16.mxu1 %v23795_v13  ;;  %13304 = vmatprep.subr.bf16.mxu0 %v23795_v13 }
 0xcc5   :  { %v12486_v26 = vpop.f32.mrb[124].mxu0  ;;  %v12892_v48 = vpop.f32.mrb[220].mxu1 }
 0xcc6   :  { %v12941_v28 = vmax.f32 %v12486_v26, %v12892_v48  ;;  %v12488_v3 = vpop.f32.mrb[125].mxu0  ;;  %v12894_v34 = vpop.f32.mrb[221].mxu1 }
 0xcc7   :  { %v12942_v40 = vmax.f32 %v12488_v3, %v12894_v34  ;;  %v12490_v33 = vpop.f32.mrb[126].mxu0  ;;  %v12896_v20 = vpop.f32.mrb[222].mxu1  ;;  %v17808_v3 = vld [vmem:[%s23295_s14 + $0x120] sm:$0xff]  }
 0xcc8   :  { %v12943_v8 = vmax.f32 %v12490_v33, %v12896_v20  ;;  %v12492_v15 = vpop.f32.mrb[127].mxu0  ;;  %v12898_v60 = vpop.f32.mrb[223].mxu1 }
 0xcc9   :  { %v12944_v23 = vmax.f32 %v12492_v15, %v12898_v60  ;;  %v17805_v60 = vld [vmem:[%s23295_s14 + $0xc8] sm:$0xff]  }
 0xcca   :  { %v12961_v22 = vpack.c.bf16 %v12943_v8, %v12941_v28  ;;  %v17803_v28 = vld [vmem:[%s23295_s14 + $0xc0] sm:$0xff]  }
 0xccb   :  { %v12962_v61 = vpack.c.bf16 %v12944_v23, %v12942_v40  ;;  %v17810_v23 = vld [vmem:[%s23295_s14 + $0x128] sm:$0xff]  }
 0xccd   :  { %v12496_v9 = vpop.f32.mrb[128].mxu0  ;;  %v12902_v14 = vpop.f32.mrb[224].mxu1  ;;  %15265 = vmatprep.mubr.msk.bf16.mxu1 %vm11671_vm2, %v12962_v61 }
 0xcce   :  { %v12945_v29 = vmax.f32 %v12496_v9, %v12902_v14  ;;  %v12498_v63 = vpop.f32.mrb[129].mxu0  ;;  %v12904_v54 = vpop.f32.mrb[225].mxu1  ;;  %13212 = vmatmul.mubr.bf16.vlgmr.msra.gmra.mrb[240].mxu1 %v12961_v22 }
 0xccf   :  { %v12946_v39 = vmax.f32 %v12498_v63, %v12904_v54  ;;  %v12500_v62 = vpop.f32.mrb[130].mxu0  ;;  %v12906_v12 = vpop.f32.mrb[226].mxu1  ;;  %13432 = vmatpush1.bf16.msra.mxu1 %v17796_v0 }
 0xcd0   :  { %v12947_v50 = vmax.f32 %v12500_v62, %v12906_v12  ;;  %v12502_v46 = vpop.f32.mrb[131].mxu0  ;;  %v12908_v57 = vpop.f32.mrb[227].mxu1  ;;  %13433 = vmatprep.subr.bf16.mxu1 %v23795_v13  ;;  %v17812_v62 = vld [vmem:[%s23295_s14 + $0x130] sm:$0xff]  }
 0xcd1   :  { %v12948_v49 = vmax.f32 %v12502_v46, %v12908_v57  ;;  %v17811_v46 = vld [vmem:[%s23295_s14 + $0xe0] sm:$0xff]   ;;  %v17813_v57 = vld [vmem:[%s23295_s14 + $0xe8] sm:$0xff]  }
 0xcd2   :  { %v12963_v21 = vpack.c.bf16 %v12947_v50, %v12945_v29  ;;  %v17814_v50 = vld [vmem:[%s23295_s14 + $0x138] sm:$0xff]  }
 0xcd3   :  { %v12964_v44 = vpack.c.bf16 %v12948_v49, %v12946_v39  ;;  %13434 = vmatpush1.bf16.msra.mxu1 %v17798_v31  ;;  %v17807_v39 = vld [vmem:[%s23295_s14 + $0xd0] sm:$0xff]   ;;  %v17809_v31 = vld [vmem:[%s23295_s14 + $0xd8] sm:$0xff]   ;;  %v17815_v49 = vld [vmem:[%s23295_s14 + $0x140] sm:$0xff]  }
 0xcd4   :  { %13435 = vmatprep.subr.bf16.mxu1 %v23795_v13 }
 0xcd5   :  { %15254 = vmatprep.mubr.msk.bf16.mxu0 %vm11671_vm2, %v12964_v44  ;;  %v12506_v5 = vpop.f32.mrb[132].mxu0  ;;  %v12912_v36 = vpop.f32.mrb[228].mxu1  ;;  %v17817_v44 = vld [vmem:[%s23295_s14 + $0x150] sm:$0xff]  }
 0xcd6   :  { %13108 = vmatmul.mubr.bf16.vlgmr.msra.gmra.mrb[144].mxu0 %v12963_v21  ;;  %v12949_v25 = vmax.f32 %v12506_v5, %v12912_v36  ;;  %v12508_v10 = vpop.f32.mrb[133].mxu0  ;;  %v12914_v53 = vpop.f32.mrb[229].mxu1  ;;  %v17816_v21 = vld [vmem:[%s23295_s14 + $0x148] sm:$0xff]   ;;  %v17821_v36 = vld [vmem:[%s23295_s14 + $0x170] sm:$0xff]  }
 0xcd7   :  { %13305 = vmatpush1.bf16.msra.mxu0 %v17795_v6  ;;  %13436 = vmatpush1.bf16.msra.mxu1 %v17800_v30  ;;  %v12950_v59 = vmax.f32 %v12508_v10, %v12914_v53  ;;  %v12510_v2 = vpop.f32.mrb[134].mxu0  ;;  %v12916_v42 = vpop.f32.mrb[230].mxu1  ;;  %v17818_v6 = vld [vmem:[%s23295_s14 + $0x158] sm:$0xff]   ;;  %v17819_v30 = vld [vmem:[%s23295_s14 + $0x160] sm:$0xff]   ;;  %v17820_v5 = vld [vmem:[%s23295_s14 + $0x168] sm:$0xff]  }
 0xcd8   :  { %13306 = vmatprep.subr.bf16.mxu0 %v23795_v13  ;;  %13437 = vmatprep.subr.bf16.mxu1 %v23795_v13  ;;  %v12951_v56 = vmax.f32 %v12510_v2, %v12916_v42  ;;  %v12512_v47 = vpop.f32.mrb[135].mxu0  ;;  %v12918_v17 = vpop.f32.mrb[231].mxu1  ;;  %v17823_v10 = vld [vmem:[%s23295_s14 + $0x180] sm:$0xff]   ;;  %v17824_v53 = vld [vmem:[%s23295_s14 + $0x188] sm:$0xff]   ;;  %v17828_v2 = vld [vmem:[%s23296_s16 + $0x18] sm:$0xff]  }
 0xcd9   :  { %v12952_v45 = vmax.f32 %v12512_v47, %v12918_v17  ;;  %v17829_v42 = vld [vmem:[%s23296_s16 + $0x20] sm:$0xff]   ;;  %v17831_v47 = vld [vmem:[%s23296_s16 + $0x30] sm:$0xff]   ;;  %v17832_v17 = vld [vmem:[%s23296_s16 + $0x38] sm:$0xff]  }
 0xcda   :  { %v23096_v41 = vpack.c.bf16 %v12951_v56, %v12949_v25  ;;  %v17822_v25 = vld [vmem:[%s23295_s14 + $0x178] sm:$0xff]   ;;  %v17830_v56 = vld [vmem:[%s23296_s16 + $0x28] sm:$0xff]  }
 0xcdb   :  { %13307 = vmatpush1.bf16.msra.mxu0 %v17797_v51  ;;  %13438 = vmatpush1.bf16.msra.mxu1 %v17802_v55  ;;  %v12966_v18 = vpack.c.bf16 %v12952_v45, %v12950_v59  ;;  %v17842_v51 = vmov 0.0   ;;  %v17825_v55 = vld [vmem:[%s23296_s16] sm:$0xff]   ;;  %v17826_v59 = vld [vmem:[%s23296_s16 + $0x8] sm:$0xff]  }
 0xcdc   :  { %13308 = vmatprep.subr.bf16.mxu0 %v23795_v13  ;;  %13439 = vmatprep.subr.bf16.mxu1 %v23795_v13 }
 0xcdd   :  { %v12516_v38 = vpop.f32.mrb[136].mxu0  ;;  %v12922_v37 = vpop.f32.mrb[232].mxu1  ;;  %15296 = vmatprep.mubr.msk.bf16.mxu0 %vm11671_vm2, %v12966_v18 }
 0xcde   :  { %v12953_v1 = vmax.f32 %v12516_v38, %v12922_v37  ;;  %v12518_v19 = vpop.f32.mrb[137].mxu0  ;;  %v12924_v43 = vpop.f32.mrb[233].mxu1 }
 0xcdf   :  { %13309 = vmatpush1.bf16.msra.mxu0 %v17799_v58  ;;  %13440 = vmatpush1.bf16.msra.mxu1 %v17804_v11  ;;  %v12954_v52 = vmax.f32 %v12518_v19, %v12924_v43  ;;  %v12520_v27 = vpop.f32.mrb[138].mxu0  ;;  %v12926_v24 = vpop.f32.mrb[234].mxu1 }
 0xce0   :  { %13310 = vmatprep.subr.bf16.mxu0 %v23795_v13  ;;  %13441 = vmatprep.subr.bf16.mxu1 %v23795_v13  ;;  %v12955_v32 = vmax.f32 %v12520_v27, %v12926_v24  ;;  %v12522_v16 = vpop.f32.mrb[139].mxu0  ;;  %v12928_v4 = vpop.f32.mrb[235].mxu1 }
 0xce1   :  { %v12956_v26 = vmax.f32 %v12522_v16, %v12928_v4 }
 0xce2   :  { %v12967_v48 = vpack.c.bf16 %v12955_v32, %v12953_v1 }
 0xce3   :  { %13311 = vmatpush1.bf16.msra.mxu0 %v17801_v7  ;;  %13442 = vmatpush1.bf16.msra.mxu1 %v17806_v35  ;;  %v12968_v34 = vpack.c.bf16 %v12956_v26, %v12954_v52 }
 0xce4   :  { %13312 = vmatprep.subr.bf16.mxu0 %v23795_v13  ;;  %13443 = vmatprep.subr.bf16.mxu1 %v23795_v13 }
 0xce5   :  { %15327 = vmatprep.mubr.msk.bf16.mxu1 %vm11671_vm2, %v12968_v34  ;;  %v12526_v40 = vpop.f32.mrb[140].mxu0  ;;  %v12932_v33 = vpop.f32.mrb[236].mxu1 }
 0xce6   :  { %v12957_v20 = vmax.f32 %v12526_v40, %v12932_v33  ;;  %v12528_v8 = vpop.f32.mrb[141].mxu0  ;;  %v12934_v15 = vpop.f32.mrb[237].mxu1  ;;  %v15359_v40 = vld [vmem:[%s23298_s15] ss:$0 sm:$0xff] }
 0xce7   :  { %13313 = vmatpush1.bf16.msra.mxu0 %v17803_v28  ;;  %13444 = vmatpush1.bf16.msra.mxu1 %v17808_v3  ;;  %v12958_v22 = vmax.f32 %v12528_v8, %v12934_v15  ;;  %v12530_v61 = vpop.f32.mrb[142].mxu0  ;;  %v12936_v0 = vpop.f32.mrb[238].mxu1 }
 0xce8   :  { %13314 = vmatprep.subr.bf16.mxu0 %v23795_v13  ;;  %13445 = vmatprep.subr.bf16.mxu1 %v23795_v13  ;;  %v12959_v9 = vmax.f32 %v12530_v61, %v12936_v0  ;;  %v12532_v14 = vpop.f32.mrb[143].mxu0  ;;  %v12938_v29 = vpop.f32.mrb[239].mxu1 }
 0xce9   :  { %v12960_v63 = vmax.f32 %v12532_v14, %v12938_v29  ;;  %v17834_v29 = vld [vmem:[%s23297_s18 + $0x8] sm:$0xff]  }
 0xcea   :  { %v12969_v54 = vpack.c.bf16 %v12959_v9, %v12957_v20  ;;  %v17833_v9 = vld [vmem:[%s23297_s18] sm:$0xff]  }
 0xceb   :  { %13315 = vmatpush1.bf16.msra.mxu0 %v17805_v60  ;;  %13446 = vmatpush1.bf16.msra.mxu1 %v17810_v23  ;;  %v12970_v12 = vpack.c.bf16 %v12960_v63, %v12958_v22  ;;  %v17835_v63 = vld [vmem:[%s23297_s18 + $0x10] sm:$0xff]  }
 0xcec   :  { %13316 = vmatprep.subr.bf16.mxu0 %v23795_v13  ;;  %13447 = vmatprep.subr.bf16.mxu1 %v23795_v13 }
 0xcef   :  { %13317 = vmatpush1.bf16.msra.mxu0 %v17807_v39  ;;  %13448 = vmatpush1.bf16.msra.mxu1 %v17812_v62  ;;  %v17837_v39 = vld [vmem:[%s23297_s18 + $0x20] sm:$0xff]   ;;  %v17838_v62 = vld [vmem:[%s23297_s18 + $0x28] sm:$0xff]  }
 0xcf0   :  { %13318 = vmatprep.subr.bf16.mxu0 %v23795_v13  ;;  %13449 = vmatprep.subr.bf16.mxu1 %v23795_v13 }
 0xcf3   :  { %13319 = vmatpush1.bf16.msra.mxu0 %v17809_v31  ;;  %13450 = vmatpush1.bf16.msra.mxu1 %v17814_v50  ;;  %v17840_v31 = vld [vmem:[%s23297_s18 + $0x38] sm:$0xff]   ;;  %v15360_v50 = vld [vmem:[%s23299_s17] ss:$0 sm:$0xff] }
 0xcf4   :  { %13320 = vmatprep.subr.bf16.mxu0 %v23795_v13  ;;  %15396 = vmatprep.subr.bf16.mxu1 %v17842_v51 }
 0xcf6   :  { %13464 = vmatmul.mubr.bf16.vlgmr.msra.gmra.mrb[244].mxu1 %v12967_v48 }
 0xcf7   :  { %13321 = vmatpush1.bf16.msra.mxu0 %v17811_v46  ;;  %15397 = vmatpush3.bf16.msra.mxu1 %v17825_v55 }
 0xcf8   :  { %13322 = vmatprep.subr.bf16.mxu0 %v23795_v13  ;;  %15398 = vmatprep.subr.bf16.mxu1 %v17842_v51 }
 0xcf9   :  { %15412 = vmatprep.mubr.msk.bf16.mxu1 %vm17843_vm3, %v17842_v51 }
 0xcfb   :  { %13323 = vmatpush1.bf16.msra.mxu0 %v17813_v57  ;;  %15399 = vmatpush3.bf16.msra.mxu1 %v17826_v59 }
 0xcfc   :  { %13558 = vmatprep.subr.bf16.mxu0 %v23795_v13  ;;  %15400 = vmatprep.subr.bf16.mxu1 %v17842_v51 }
 0xcfe   :  { %13337 = vmatmul.mubr.bf16.vlgmr.msra.gmra.mrb[148].mxu0 %v23096_v41 }
 0xcff   :  { %13559 = vmatpush1.bf16.msra.mxu0 %v17815_v49  ;;  %15358 = vmatprep.mubr.msk.bf16.mxu0 %vm11671_vm2, %v12970_v12  ;;  %v17839_v12 = vld [vmem:[%s23297_s18 + $0x30] sm:$0xff]  }
 0xd00   :  { %13560 = vmatprep.subr.bf16.mxu0 %v23795_v13 }
 0xd03   :  { %13561 = vmatpush1.bf16.msra.mxu0 %v17816_v21 }
 0xd04   :  { %13562 = vmatprep.subr.bf16.mxu0 %v23795_v13 }
 0xd07   :  { %13563 = vmatpush1.bf16.msra.mxu0 %v17817_v44 }
 0xd08   :  { %13564 = vmatprep.subr.bf16.mxu0 %v23795_v13 }
 0xd0b   :  { %13565 = vmatpush1.bf16.msra.mxu0 %v17818_v6 }
 0xd0c   :  { %13566 = vmatprep.subr.bf16.mxu0 %v23795_v13 }
 0xd0f   :  { %13567 = vmatpush1.bf16.msra.mxu0 %v17819_v30 }
 0xd10   :  { %13568 = vmatprep.subr.bf16.mxu0 %v23795_v13 }
 0xd13   :  { %13569 = vmatpush1.bf16.msra.mxu0 %v17820_v5 }
 0xd14   :  { %13570 = vmatprep.subr.bf16.mxu0 %v23795_v13 }
 0xd17   :  { %13571 = vmatpush1.bf16.msra.mxu0 %v17821_v36 }
 0xd18   :  { %13572 = vmatprep.subr.bf16.mxu0 %v23795_v13 }
 0xd1b   :  { %13573 = vmatpush1.bf16.msra.mxu0 %v17822_v25  ;;  %v15369_v25 = vld [vmem:[%s23300_s19] ss:$0 sm:$0xff] }
 0xd1c   :  { %13574 = vmatprep.subr.bf16.mxu0 %v23795_v13 }
 0xd1f   :  { %13575 = vmatpush1.bf16.msra.mxu0 %v17823_v10 }
 0xd20   :  { %13576 = vmatprep.subr.bf16.mxu0 %v23795_v13  ;;  %v17827_v13 = vld [vmem:[%s23296_s16 + $0x10] sm:$0xff]  }
 0xd21   :  { %15401 = vmatpush3.bf16.msra.mxu1 %v17827_v13 }
 0xd22   :  { %15402 = vmatprep.subr.bf16.mxu1 %v17842_v51 }
 0xd23   :  { %13577 = vmatpush1.bf16.msra.mxu0 %v17824_v53 }
 0xd25   :  { %15403 = vmatpush3.bf16.msra.mxu1 %v17828_v2 }
 0xd26   :  { %13591 = vmatmul.mubr.bf16.vlgmr.msra.gmra.mrb[152].mxu0 %v12969_v54  ;;  %15404 = vmatprep.subr.bf16.mxu1 %v17842_v51  ;;  %v17836_v54 = vld [vmem:[%s23297_s18 + $0x18] sm:$0xff]  }
 0xd29   :  { %15405 = vmatpush3.bf16.msra.mxu1 %v17829_v42 }
 0xd2a   :  { %15406 = vmatprep.subr.bf16.mxu1 %v17842_v51 }
 0xd2d   :  { %15407 = vmatpush3.bf16.msra.mxu1 %v17830_v56 }
 0xd2e   :  { %15408 = vmatprep.subr.bf16.mxu1 %v17842_v51 }
 0xd31   :  { %15409 = vmatpush3.bf16.msra.mxu1 %v17831_v47 }
 0xd32   :  { %15410 = vmatprep.subr.bf16.mxu1 %v17842_v51 }
 0xd35   :  { %15411 = vmatpush3.bf16.msra.mxu1 %v17832_v17 }
 0xd36   :  { %15416 = vmatprep.subr.bf16.mxu1 %v17842_v51 }
 0xda1   :  { %v13213_v45 = vpop.f32.mrb[240].mxu1 }
 0xda2   :  { %v13215_v41 = vpop.f32.mrb[241].mxu1 }
 0xda3   :  { %v13216_v58 = vpop.f32.mrb[242].mxu1 }
 0xda4   :  { %v13218_v11 = vpop.f32.mrb[243].mxu1 }
 0xda9   :  { %v13109_v18 = vpop.f32.mrb[144].mxu0 }
 0xdaa   :  { %v13214_v38 = vadd.f32 %v13213_v45, %v13109_v18  ;;  %v13111_v37 = vpop.f32.mrb[145].mxu0 }
 0xdab   :  { %v13112_v1 = vpop.f32.mrb[146].mxu0 }
 0xdac   :  { %v13217_v19 = vadd.f32 %v13216_v58, %v13112_v1  ;;  %v13114_v43 = vpop.f32.mrb[147].mxu0 }
 0xdc9   :  { %v13465_v7 = vpop.f32.mrb[244].mxu1 }
 0xdca   :  { %v13467_v35 = vpop.f32.mrb[245].mxu1 }
 0xdcb   :  { %v13468_v52 = vpop.f32.mrb[246].mxu1 }
 0xdcc   :  { %v13470_v27 = vpop.f32.mrb[247].mxu1 }
 0xdd1   :  { %v13338_v24 = vpop.f32.mrb[148].mxu0 }
 0xdd2   :  { %v13345_v32 = vadd.f32 %v13338_v24, %v13214_v38  ;;  %v13340_v16 = vpop.f32.mrb[149].mxu0 }
 0xdd3   :  { %v13341_v4 = vpop.f32.mrb[150].mxu0 }
 0xdd4   :  { %v13346_v26 = vadd.f32 %v13341_v4, %v13217_v19  ;;  %v13472_v48 = vadd.f32 %v13465_v7, %v13345_v32  ;;  %v13343_v28 = vpop.f32.mrb[151].mxu0 }
 0xdd6   :  { %v13473_v3 = vadd.f32 %v13468_v52, %v13346_v26 }
 0xdf9   :  { %v13592_v34 = vpop.f32.mrb[152].mxu0 }
 0xdfa   :  { %v13599_v33 = vadd.f32 %v13592_v34, %v13472_v48  ;;  %v13594_v20 = vpop.f32.mrb[153].mxu0 }
 0xdfb   :  { %v13595_v8 = vpop.f32.mrb[154].mxu0 }
 0xdfc   :  { %v13608_v15 = vadd.f32 %v15359_v40, %v13599_v33  ;;  %v13600_v60 = vadd.f32 %v13595_v8, %v13473_v3  ;;  %v13597_v23 = vpop.f32.mrb[155].mxu0 }
 0xdfe   :  { %v13609_v22 = vadd.f32 %v15359_v40, %v13600_v60  ;;  %v13610_v61 = vmax.f32 %v13608_v15, 0.0 }
 0xe00   :  { %v13611_v0 = vmax.f32 %v13609_v22, 0.0 }
 0xe02   :  { %v13612_v14 = vpack.c.bf16 %v13611_v0, %v13610_v61 }
 0xe04   :  { %15413 = vmatmul.mubr.bf16.vlgmr.msra.gmra.mrb[248].mxu1 %v13612_v14 }
 0xe05   :  { %15417 = vmatpush3.bf16.msra.mxu1 %v17833_v9  ;;  %15432 = vmatprep.mubr.msk.bf16.mxu1 %vm17843_vm3, %v17842_v51 }
 0xe06   :  { %15418 = vmatprep.subr.bf16.mxu1 %v17842_v51 }
 0xe09   :  { %15419 = vmatpush3.bf16.msra.mxu1 %v17834_v29 }
 0xe0a   :  { %15420 = vmatprep.subr.bf16.mxu1 %v17842_v51 }
 0xe0d   :  { %15421 = vmatpush3.bf16.msra.mxu1 %v17835_v63 }
 0xe0e   :  { %15422 = vmatprep.subr.bf16.mxu1 %v17842_v51 }
 0xe11   :  { %15423 = vmatpush3.bf16.msra.mxu1 %v17836_v54 }
 0xe12   :  { %15424 = vmatprep.subr.bf16.mxu1 %v17842_v51 }
 0xe15   :  { %15425 = vmatpush3.bf16.msra.mxu1 %v17837_v39 }
 0xe16   :  { %15426 = vmatprep.subr.bf16.mxu1 %v17842_v51 }
 0xe19   :  { %15427 = vmatpush3.bf16.msra.mxu1 %v17838_v62 }
 0xe1a   :  { %15428 = vmatprep.subr.bf16.mxu1 %v17842_v51 }
 0xe1d   :  { %15429 = vmatpush3.bf16.msra.mxu1 %v17839_v12 }
 0xe1e   :  { %15430 = vmatprep.subr.bf16.mxu1 %v17842_v51 }
 0xe21   :  { %15431 = vmatpush3.bf16.msra.mxu1 %v17840_v31 }
 0xed7   :  { %v13718_v46 = vpop.f32.mrb[248].mxu1 }
 0xed8   :  { %v13719_v57 = vadd.f32 %v15360_v50, %v13718_v46  ;;  %v15414_v49 = vpop.f32.mrb[249].mxu1 }
 0xed9   :  { %v13721_v21 = vpop.f32.mrb[250].mxu1 }
 0xeda   :  { %v13722_v44 = vadd.f32 %v15360_v50, %v13721_v21  ;;  %v15415_v6 = vpop.f32.mrb[251].mxu1  ;;  %v13725_v30 = vmax.f32 %v13719_v57, 0.0 }
 0xedc   :  { %v13726_v5 = vmax.f32 %v13722_v44, 0.0 }
 0xede   :  { %v13727_v36 = vpack.c.bf16 %v13726_v5, %v13725_v30 }
 0xee0   :  { %15433 = vmatmul.mubr.bf16.vlgmr.msra.gmra.mrb[252].mxu1 %v13727_v36 }
 0xfb3   :  { %v13833_v10 = vpop.f32.mrb[252].mxu1 }
 0xfb4   :  { %v13834_v53 = vadd.f32 %v15369_v25, %v13833_v10  ;;  %v15434_v51 = vpop.f32.mrb[253].mxu1 }
 0xfb5   :  { %v13836_v55 = vpop.f32.mrb[254].mxu1 }
 0xfb6   :  { %13840 = vst [vmem:[%s23301_s20] sm:$0xff] %v13834_v53  ;;  %v13837_v59 = vadd.f32 %v15369_v25, %v13836_v55  ;;  %v15435_v13 = vpop.f32.mrb[255].mxu1 }
 0xfb8   :  { %13841 = vst [vmem:[%s23301_s20 + $0x8] sm:$0xff] %v13837_v59 }

</bundles_post_ra>
